<compile_context>
chip_gen: v7x
topology: tpu7x:2x2x1
jax: 0.10.0
libtpu: 0.0.40
codegen_flags: <defaults>
</compile_context>

<pallas_src>
import math

import jax
import jax.numpy as jnp
from jax import lax
from jax.experimental import pallas as pl
from jax.experimental.pallas import tpu as pltpu

NEG_SLOPE = 0.01  # PyTorch nn.LeakyReLU default negative_slope


def _leaky_relu(x):
    return jnp.where(x > 0, x, NEG_SLOPE * x)


def double_conv_kernel(x_ref, w1_ref, b1_ref, w2_ref, b2_ref, o_ref,
                       xp_ref, mp_ref, patch_ref):
    # x_ref    : (1, H, W, Cin)        bf16  input tile (one image per step)
    # w1_ref   : (9*Cin,  Cmid)        bf16  im2col weights, conv1
    # b1_ref   : (1, Cmid)             f32
    # w2_ref   : (9*Cmid, CoutP)       bf16  im2col weights, conv2 (Cout padded to 128x)
    # b2_ref   : (1, CoutP)            f32
    # o_ref    : (H*W, CoutP)          f32   lane-dense output slab for this image
    # xp_ref   : (H+2, W+2, Cin)       bf16  zero-halo scratch, conv1 input
    # mp_ref   : (H+2, W+2, Cmid)      bf16  zero-halo scratch, conv1 activation
    # patch_ref: (H*W, 9*max(Cin,Cmid)) bf16 shared im2col patch scratch
    _, H, W, Cin = x_ref.shape
    Cmid = w1_ref.shape[1]
    M = H * W

    def zero_halo(ref):
        # Per-step border zeroing: the interior is fully overwritten every
        # step, so only the 1-pixel perimeter needs (re)initialization.  This
        # keeps the scratches step-local, which is what makes the "parallel"
        # grid axis safe.
        hp, wp, c = ref.shape
        zrow = jnp.zeros((1, wp, c), ref.dtype)
        zcol = jnp.zeros((hp, 1, c), ref.dtype)
        ref[0:1, :, :] = zrow
        ref[hp - 1:hp, :, :] = zrow
        ref[:, 0:1, :] = zcol
        ref[:, wp - 1:wp, :] = zcol

    zero_halo(xp_ref)
    zero_halo(mp_ref)

    def conv3x3(pad_ref, w_ref, b_ref):
        # im2col: pack the nine 3x3 taps into one (M, 9*C) bf16 slab so the
        # whole convolution is a single MXU matmul with contraction depth 9*C.
        # Patches are written in bf16 directly (no full-slab cast needed).
        C = pad_ref.shape[-1]
        for dy in range(3):
            for dx in range(3):
                k = dy * 3 + dx
                patch_ref[:, k * C:(k + 1) * C] = (
                    pad_ref[dy:dy + H, dx:dx + W, :].reshape(M, C))
        acc = jnp.dot(patch_ref[:, :9 * C], w_ref[...],
                      preferred_element_type=jnp.float32)
        return _leaky_relu(acc + b_ref[...])          # bias + act in f32

    # ---- conv1 + LeakyReLU ----
    xp_ref[1:1 + H, 1:1 + W, :] = x_ref[...].reshape(H, W, Cin)
    h1 = conv3x3(xp_ref, w1_ref, b1_ref)              # (M, Cmid) f32

    # ---- conv2 + LeakyReLU ----  (intermediate stored as bf16)
    mp_ref[1:1 + H, 1:1 + W, :] = h1.astype(jnp.bfloat16).reshape(H, W, Cmid)
    h2 = conv3x3(mp_ref, w2_ref, b2_ref)              # (M, CoutP) f32

    # Lane-dense store (last dim is Cout padded to a multiple of 128).
    o_ref[...] = h2.astype(o_ref.dtype)


def _nbytes(shape, dtype):
    return math.prod(shape) * jnp.dtype(dtype).itemsize


def double_conv(x_nchw, w1, b1, w2, b2):
    """Forward of DoubleConv.  x: (N,Cin,H,W); w1: (Cmid,Cin,3,3); w2: (Cout,Cmid,3,3)."""
    N, Cin, H, W = x_nchw.shape
    Cmid = w1.shape[0]
    Cout = w2.shape[0]
    cout_p = ((Cout + 127) // 128) * 128              # lane-dense output width
    cmax = max(Cin, Cmid)
    M = H * W

    # NHWC (channels on the lane axis), bf16 on the way in (fused with the
    # transpose by XLA; halves input DMA and matches the matmul input dtype).
    x_nhwc = jnp.transpose(x_nchw, (0, 2, 3, 1)).astype(jnp.bfloat16)

    # PyTorch OIHW -> HWIO -> im2col weight matrices, bf16 for the MXU.
    w1_mat = (jnp.transpose(w1, (2, 3, 1, 0))
              .reshape(9 * Cin, Cmid).astype(jnp.bfloat16))
    w2_mat = (jnp.pad(jnp.transpose(w2, (2, 3, 1, 0)),
                      ((0, 0), (0, 0), (0, 0), (0, cout_p - Cout)))
              .reshape(9 * Cmid, cout_p).astype(jnp.bfloat16))
    b1_2d = b1.reshape(1, Cmid).astype(jnp.float32)
    b2_2d = jnp.pad(b2, (0, cout_p - Cout)).reshape(1, cout_p).astype(jnp.float32)

    # VMEM budget: scratches + 2x double-buffered input/weight/output tiles.
    scratch_bytes = (_nbytes((H + 2, W + 2, Cin), jnp.bfloat16)
                     + _nbytes((H + 2, W + 2, Cmid), jnp.bfloat16)
                     + _nbytes((M, 9 * cmax), jnp.bfloat16))
    tile_bytes = 2 * (_nbytes((1, H, W, Cin), jnp.bfloat16)
                      + _nbytes((9 * Cin, Cmid), jnp.bfloat16)
                      + _nbytes((1, Cmid), jnp.float32)
                      + _nbytes((9 * Cmid, cout_p), jnp.bfloat16)
                      + _nbytes((1, cout_p), jnp.float32)
                      + _nbytes((M, cout_p), jnp.float32))
    vmem_limit = min(64 << 20, max(32 << 20, 2 * (scratch_bytes + tile_bytes)))

    flops = N * (2 * M * (9 * Cin) * Cmid + 2 * M * (9 * Cmid) * cout_p)
    bytes_accessed = (x_nhwc.size * 2 + w1_mat.size * 2 + w2_mat.size * 2
                      + b1_2d.size * 4 + b2_2d.size * 4 + N * M * cout_p * 4)

    out2d = pl.pallas_call(
        double_conv_kernel,
        out_shape=jax.ShapeDtypeStruct((N * M, cout_p), jnp.float32),
        grid_spec=pltpu.PrefetchScalarGridSpec(
            num_scalar_prefetch=0,
            grid=(N,),
            in_specs=[
                pl.BlockSpec((1, H, W, Cin), lambda b: (b, 0, 0, 0)),
                pl.BlockSpec((9 * Cin, Cmid), lambda b: (0, 0)),
                pl.BlockSpec((1, Cmid), lambda b: (0, 0)),
                pl.BlockSpec((9 * Cmid, cout_p), lambda b: (0, 0)),
                pl.BlockSpec((1, cout_p), lambda b: (0, 0)),
            ],
            out_specs=pl.BlockSpec((M, cout_p), lambda b: (b, 0)),
            scratch_shapes=[
                pltpu.VMEM((H + 2, W + 2, Cin), jnp.bfloat16),
                pltpu.VMEM((H + 2, W + 2, Cmid), jnp.bfloat16),
                pltpu.VMEM((M, 9 * cmax), jnp.bfloat16),
            ],
        ),
        compiler_params=pltpu.CompilerParams(
            # Batch images are independent and the scratches carry no state
            # across steps (halo re-zeroed per step) -> safe to shard across
            # TensorCores on megacore parts.
            dimension_semantics=("parallel",),
            vmem_limit_bytes=int(vmem_limit),
        ),
        cost_estimate=pl.CostEstimate(flops=flops, transcendentals=0,
                                      bytes_accessed=int(bytes_accessed)),
    )(x_nhwc, w1_mat, b1_2d, w2_mat, b2_2d)

    out = out2d[:, :Cout].reshape(N, H, W, Cout)
    return jnp.transpose(out, (0, 3, 1, 2))           # back to NCHW


def _reference(x, w1, b1, w2, b2):
    # Matches the kernel's numerics: bf16 conv inputs, f32 accumulation,
    # bias + LeakyReLU in f32.
    def conv(h, w, b):
        y = lax.conv_general_dilated(
            h.astype(jnp.bfloat16), w.astype(jnp.bfloat16),
            window_strides=(1, 1), padding=((1, 1), (1, 1)),
            dimension_numbers=("NCHW", "OIHW", "NCHW"),
            preferred_element_type=jnp.float32)
        return y + b[None, :, None, None].astype(jnp.float32)

    h = _leaky_relu(conv(x, w1, b1))
    return _leaky_relu(conv(h, w2, b2))


if __name__ == "__main__":
    key = jax.random.PRNGKey(0)
    k = jax.random.split(key, 5)

    N, Cin, H, W = 2, 4, 16, 16
    Cmid, Cout = 8, 8   # mid_channels defaults to out_channels

    x = jax.random.normal(k[0], (N, Cin, H, W), jnp.float32)
    w1 = jax.random.normal(k[1], (Cmid, Cin, 3, 3), jnp.float32) * 0.1
    b1 = jax.random.normal(k[2], (Cmid,), jnp.float32) * 0.1
    w2 = jax.random.normal(k[3], (Cout, Cmid, 3, 3), jnp.float32) * 0.1
    b2 = jax.random.normal(k[4], (Cout,), jnp.float32) * 0.1

    out = double_conv(x, w1, b1, w2, b2)
    jax.block_until_ready(out)

    ref = _reference(x, w1, b1, w2, b2)
    assert out.shape == (N, Cout, H, W)
    err = float(jnp.max(jnp.abs(out - ref)))
    assert err < 5e-2, err
    print("KERNEL_OK")
</pallas_src>

<mosaic_0001>
module attributes {stable_mosaic.version = 11 : i64} {
  func.func @double_conv_kernel(%arg0: i32, %arg1: memref<1x16x16x4xbf16, #tpu.memory_space<vmem>>, %arg2: memref<36x8xbf16, #tpu.memory_space<vmem>>, %arg3: memref<1x8xf32, #tpu.memory_space<vmem>>, %arg4: memref<72x128xbf16, #tpu.memory_space<vmem>>, %arg5: memref<1x128xf32, #tpu.memory_space<vmem>>, %arg6: memref<256x128xf32, #tpu.memory_space<vmem>>, %arg7: memref<18x18x4xbf16, #tpu.memory_space<vmem>>, %arg8: memref<18x18x8xbf16, #tpu.memory_space<vmem>>, %arg9: memref<256x72xbf16, #tpu.memory_space<vmem>>) attributes {dimension_semantics = [#tpu.dimension_semantics<parallel>], iteration_bounds = array<i64: 2>, scalar_prefetch = 0 : i64, scratch_operands = 3 : i64, tpu.core_type = #tpu.core_type<tc>, window_params = [{transform_indices = @transform_0, window_bounds = array<i64: 1, 16, 16, 4>}, {pipeline_mode = #tpu.pipeline_mode<synchronous>, transform_indices = @transform_1, window_bounds = array<i64: 36, 8>}, {pipeline_mode = #tpu.pipeline_mode<synchronous>, transform_indices = @transform_2, window_bounds = array<i64: 1, 8>}, {pipeline_mode = #tpu.pipeline_mode<synchronous>, transform_indices = @transform_3, window_bounds = array<i64: 72, 128>}, {pipeline_mode = #tpu.pipeline_mode<synchronous>, transform_indices = @transform_4, window_bounds = array<i64: 1, 128>}, {transform_indices = @transform_5, window_bounds = array<i64: 256, 128>}]} {
    %cst = arith.constant 0.000000e+00 : bf16
    %0 = vector.broadcast %cst : bf16 to vector<1x18x4xbf16>
    %cst_0 = arith.constant 0.000000e+00 : bf16
    %1 = vector.broadcast %cst_0 : bf16 to vector<18x1x4xbf16>
    %c0 = arith.constant 0 : index
    %c0_1 = arith.constant 0 : index
    %c0_2 = arith.constant 0 : index
    %2 = vector.load %arg7[%c0, %c0_1, %c0_2] : memref<18x18x4xbf16, #tpu.memory_space<vmem>>, vector<1x18x4xbf16>
    tpu.vector_store %arg7[%c0, %c0_1, %c0_2], %0 {strides = array<i32>} : memref<18x18x4xbf16, #tpu.memory_space<vmem>>, vector<1x18x4xbf16>,
    %c17 = arith.constant 17 : index
    %c0_3 = arith.constant 0 : index
    %c0_4 = arith.constant 0 : index
    %3 = vector.load %arg7[%c17, %c0_3, %c0_4] : memref<18x18x4xbf16, #tpu.memory_space<vmem>>, vector<1x18x4xbf16>
    tpu.vector_store %arg7[%c17, %c0_3, %c0_4], %0 {strides = array<i32>} : memref<18x18x4xbf16, #tpu.memory_space<vmem>>, vector<1x18x4xbf16>,
    %c0_5 = arith.constant 0 : index
    %c0_6 = arith.constant 0 : index
    %c0_7 = arith.constant 0 : index
    %4 = vector.load %arg7[%c0_5, %c0_6, %c0_7] : memref<18x18x4xbf16, #tpu.memory_space<vmem>>, vector<18x1x4xbf16>
    tpu.vector_store %arg7[%c0_5, %c0_6, %c0_7], %1 {strides = array<i32>} : memref<18x18x4xbf16, #tpu.memory_space<vmem>>, vector<18x1x4xbf16>,
    %c0_8 = arith.constant 0 : index
    %c17_9 = arith.constant 17 : index
    %c0_10 = arith.constant 0 : index
    %5 = vector.load %arg7[%c0_8, %c17_9, %c0_10] : memref<18x18x4xbf16, #tpu.memory_space<vmem>>, vector<18x1x4xbf16>
    tpu.vector_store %arg7[%c0_8, %c17_9, %c0_10], %1 {strides = array<i32>} : memref<18x18x4xbf16, #tpu.memory_space<vmem>>, vector<18x1x4xbf16>,
    %cst_11 = arith.constant 0.000000e+00 : bf16
    %6 = vector.broadcast %cst_11 : bf16 to vector<1x18x8xbf16>
    %cst_12 = arith.constant 0.000000e+00 : bf16
    %7 = vector.broadcast %cst_12 : bf16 to vector<18x1x8xbf16>
    %c0_13 = arith.constant 0 : index
    %c0_14 = arith.constant 0 : index
    %c0_15 = arith.constant 0 : index
    %8 = vector.load %arg8[%c0_13, %c0_14, %c0_15] : memref<18x18x8xbf16, #tpu.memory_space<vmem>>, vector<1x18x8xbf16>
    tpu.vector_store %arg8[%c0_13, %c0_14, %c0_15], %6 {strides = array<i32>} : memref<18x18x8xbf16, #tpu.memory_space<vmem>>, vector<1x18x8xbf16>,
    %c17_16 = arith.constant 17 : index
    %c0_17 = arith.constant 0 : index
    %c0_18 = arith.constant 0 : index
    %9 = vector.load %arg8[%c17_16, %c0_17, %c0_18] : memref<18x18x8xbf16, #tpu.memory_space<vmem>>, vector<1x18x8xbf16>
    tpu.vector_store %arg8[%c17_16, %c0_17, %c0_18], %6 {strides = array<i32>} : memref<18x18x8xbf16, #tpu.memory_space<vmem>>, vector<1x18x8xbf16>,
    %c0_19 = arith.constant 0 : index
    %c0_20 = arith.constant 0 : index
    %c0_21 = arith.constant 0 : index
    %10 = vector.load %arg8[%c0_19, %c0_20, %c0_21] : memref<18x18x8xbf16, #tpu.memory_space<vmem>>, vector<18x1x8xbf16>
    tpu.vector_store %arg8[%c0_19, %c0_20, %c0_21], %7 {strides = array<i32>} : memref<18x18x8xbf16, #tpu.memory_space<vmem>>, vector<18x1x8xbf16>,
    %c0_22 = arith.constant 0 : index
    %c17_23 = arith.constant 17 : index
    %c0_24 = arith.constant 0 : index
    %11 = vector.load %arg8[%c0_22, %c17_23, %c0_24] : memref<18x18x8xbf16, #tpu.memory_space<vmem>>, vector<18x1x8xbf16>
    tpu.vector_store %arg8[%c0_22, %c17_23, %c0_24], %7 {strides = array<i32>} : memref<18x18x8xbf16, #tpu.memory_space<vmem>>, vector<18x1x8xbf16>,
    %c0_25 = arith.constant 0 : index
    %c0_26 = arith.constant 0 : index
    %c0_27 = arith.constant 0 : index
    %c0_28 = arith.constant 0 : index
    %12 = vector.load %arg1[%c0_25, %c0_26, %c0_27, %c0_28] : memref<1x16x16x4xbf16, #tpu.memory_space<vmem>>, vector<1x16x16x4xbf16>
    %13 = vector.shape_cast %12 : vector<1x16x16x4xbf16> to vector<16x16x4xbf16>
    %c1 = arith.constant 1 : index
    %c1_29 = arith.constant 1 : index
    %c0_30 = arith.constant 0 : index
    %14 = vector.load %arg7[%c1, %c1_29, %c0_30] : memref<18x18x4xbf16, #tpu.memory_space<vmem>>, vector<16x16x4xbf16>
    tpu.vector_store %arg7[%c1, %c1_29, %c0_30], %13 {strides = array<i32>} : memref<18x18x4xbf16, #tpu.memory_space<vmem>>, vector<16x16x4xbf16>,
    %c0_31 = arith.constant 0 : index
    %c0_32 = arith.constant 0 : index
    %c0_33 = arith.constant 0 : index
    %15 = vector.load %arg7[%c0_31, %c0_32, %c0_33] : memref<18x18x4xbf16, #tpu.memory_space<vmem>>, vector<16x16x4xbf16>
    %16 = vector.shape_cast %15 : vector<16x16x4xbf16> to vector<256x4xbf16>
    %c0_34 = arith.constant 0 : index
    %c0_35 = arith.constant 0 : index
    %17 = vector.load %arg9[%c0_34, %c0_35] : memref<256x72xbf16, #tpu.memory_space<vmem>>, vector<256x4xbf16>
    tpu.vector_store %arg9[%c0_34, %c0_35], %16 {strides = array<i32>} : memref<256x72xbf16, #tpu.memory_space<vmem>>, vector<256x4xbf16>,
    %c0_36 = arith.constant 0 : index
    %c1_37 = arith.constant 1 : index
    %c0_38 = arith.constant 0 : index
    %18 = vector.load %arg7[%c0_36, %c1_37, %c0_38] : memref<18x18x4xbf16, #tpu.memory_space<vmem>>, vector<16x16x4xbf16>
    %19 = vector.shape_cast %18 : vector<16x16x4xbf16> to vector<256x4xbf16>
    %c0_39 = arith.constant 0 : index
    %c4 = arith.constant 4 : index
    %20 = vector.load %arg9[%c0_39, %c4] : memref<256x72xbf16, #tpu.memory_space<vmem>>, vector<256x4xbf16>
    tpu.vector_store %arg9[%c0_39, %c4], %19 {strides = array<i32>} : memref<256x72xbf16, #tpu.memory_space<vmem>>, vector<256x4xbf16>,
    %c0_40 = arith.constant 0 : index
    %c2 = arith.constant 2 : index
    %c0_41 = arith.constant 0 : index
    %21 = vector.load %arg7[%c0_40, %c2, %c0_41] : memref<18x18x4xbf16, #tpu.memory_space<vmem>>, vector<16x16x4xbf16>
    %22 = vector.shape_cast %21 : vector<16x16x4xbf16> to vector<256x4xbf16>
    %c0_42 = arith.constant 0 : index
    %c8 = arith.constant 8 : index
    %23 = vector.load %arg9[%c0_42, %c8] : memref<256x72xbf16, #tpu.memory_space<vmem>>, vector<256x4xbf16>
    tpu.vector_store %arg9[%c0_42, %c8], %22 {strides = array<i32>} : memref<256x72xbf16, #tpu.memory_space<vmem>>, vector<256x4xbf16>,
    %c1_43 = arith.constant 1 : index
    %c0_44 = arith.constant 0 : index
    %c0_45 = arith.constant 0 : index
    %24 = vector.load %arg7[%c1_43, %c0_44, %c0_45] : memref<18x18x4xbf16, #tpu.memory_space<vmem>>, vector<16x16x4xbf16>
    %25 = vector.shape_cast %24 : vector<16x16x4xbf16> to vector<256x4xbf16>
    %c0_46 = arith.constant 0 : index
    %c12 = arith.constant 12 : index
    %26 = vector.load %arg9[%c0_46, %c12] : memref<256x72xbf16, #tpu.memory_space<vmem>>, vector<256x4xbf16>
    tpu.vector_store %arg9[%c0_46, %c12], %25 {strides = array<i32>} : memref<256x72xbf16, #tpu.memory_space<vmem>>, vector<256x4xbf16>,
    %c1_47 = arith.constant 1 : index
    %c1_48 = arith.constant 1 : index
    %c0_49 = arith.constant 0 : index
    %27 = vector.load %arg7[%c1_47, %c1_48, %c0_49] : memref<18x18x4xbf16, #tpu.memory_space<vmem>>, vector<16x16x4xbf16>
    %28 = vector.shape_cast %27 : vector<16x16x4xbf16> to vector<256x4xbf16>
    %c0_50 = arith.constant 0 : index
    %c16 = arith.constant 16 : index
    %29 = vector.load %arg9[%c0_50, %c16] : memref<256x72xbf16, #tpu.memory_space<vmem>>, vector<256x4xbf16>
    tpu.vector_store %arg9[%c0_50, %c16], %28 {strides = array<i32>} : memref<256x72xbf16, #tpu.memory_space<vmem>>, vector<256x4xbf16>,
    %c1_51 = arith.constant 1 : index
    %c2_52 = arith.constant 2 : index
    %c0_53 = arith.constant 0 : index
    %30 = vector.load %arg7[%c1_51, %c2_52, %c0_53] : memref<18x18x4xbf16, #tpu.memory_space<vmem>>, vector<16x16x4xbf16>
    %31 = vector.shape_cast %30 : vector<16x16x4xbf16> to vector<256x4xbf16>
    %c0_54 = arith.constant 0 : index
    %c20 = arith.constant 20 : index
    %32 = vector.load %arg9[%c0_54, %c20] : memref<256x72xbf16, #tpu.memory_space<vmem>>, vector<256x4xbf16>
    tpu.vector_store %arg9[%c0_54, %c20], %31 {strides = array<i32>} : memref<256x72xbf16, #tpu.memory_space<vmem>>, vector<256x4xbf16>,
    %c2_55 = arith.constant 2 : index
    %c0_56 = arith.constant 0 : index
    %c0_57 = arith.constant 0 : index
    %33 = vector.load %arg7[%c2_55, %c0_56, %c0_57] : memref<18x18x4xbf16, #tpu.memory_space<vmem>>, vector<16x16x4xbf16>
    %34 = vector.shape_cast %33 : vector<16x16x4xbf16> to vector<256x4xbf16>
    %c0_58 = arith.constant 0 : index
    %c24 = arith.constant 24 : index
    %35 = vector.load %arg9[%c0_58, %c24] : memref<256x72xbf16, #tpu.memory_space<vmem>>, vector<256x4xbf16>
    tpu.vector_store %arg9[%c0_58, %c24], %34 {strides = array<i32>} : memref<256x72xbf16, #tpu.memory_space<vmem>>, vector<256x4xbf16>,
    %c2_59 = arith.constant 2 : index
    %c1_60 = arith.constant 1 : index
    %c0_61 = arith.constant 0 : index
    %36 = vector.load %arg7[%c2_59, %c1_60, %c0_61] : memref<18x18x4xbf16, #tpu.memory_space<vmem>>, vector<16x16x4xbf16>
    %37 = vector.shape_cast %36 : vector<16x16x4xbf16> to vector<256x4xbf16>
    %c0_62 = arith.constant 0 : index
    %c28 = arith.constant 28 : index
    %38 = vector.load %arg9[%c0_62, %c28] : memref<256x72xbf16, #tpu.memory_space<vmem>>, vector<256x4xbf16>
    tpu.vector_store %arg9[%c0_62, %c28], %37 {strides = array<i32>} : memref<256x72xbf16, #tpu.memory_space<vmem>>, vector<256x4xbf16>,
    %c2_63 = arith.constant 2 : index
    %c2_64 = arith.constant 2 : index
    %c0_65 = arith.constant 0 : index
    %39 = vector.load %arg7[%c2_63, %c2_64, %c0_65] : memref<18x18x4xbf16, #tpu.memory_space<vmem>>, vector<16x16x4xbf16>
    %40 = vector.shape_cast %39 : vector<16x16x4xbf16> to vector<256x4xbf16>
    %c0_66 = arith.constant 0 : index
    %c32 = arith.constant 32 : index
    %41 = vector.load %arg9[%c0_66, %c32] : memref<256x72xbf16, #tpu.memory_space<vmem>>, vector<256x4xbf16>
    tpu.vector_store %arg9[%c0_66, %c32], %40 {strides = array<i32>} : memref<256x72xbf16, #tpu.memory_space<vmem>>, vector<256x4xbf16>,
    %c0_67 = arith.constant 0 : index
    %c0_68 = arith.constant 0 : index
    %42 = vector.load %arg9[%c0_67, %c0_68] : memref<256x72xbf16, #tpu.memory_space<vmem>>, vector<256x36xbf16>
    %c0_69 = arith.constant 0 : index
    %c0_70 = arith.constant 0 : index
    %43 = vector.load %arg2[%c0_69, %c0_70] : memref<36x8xbf16, #tpu.memory_space<vmem>>, vector<36x8xbf16>
    %cst_71 = arith.constant dense<0.000000e+00> : vector<256x8xf32>
    %44 = tpu.matmul %42, %43, %cst_71 {dimension_numbers = #tpu.dot_dimension_numbers<[1], [0], [0], [1], [0, 0, 1, 1], [], []>} : vector<256x36xbf16>, vector<36x8xbf16>, vector<256x8xf32> -> vector<256x8xf32>
    %c0_72 = arith.constant 0 : index
    %c0_73 = arith.constant 0 : index
    %45 = vector.load %arg3[%c0_72, %c0_73] : memref<1x8xf32, #tpu.memory_space<vmem>>, vector<1x8xf32>
    %46 = vector.broadcast %45 : vector<1x8xf32> to vector<256x8xf32>
    %47 = arith.addf %44, %46 : vector<256x8xf32>
    %cst_74 = arith.constant 0.000000e+00 : f32
    %48 = vector.broadcast %cst_74 : f32 to vector<256x8xf32>
    %49 = arith.cmpf ogt, %47, %48 : vector<256x8xf32>
    %cst_75 = arith.constant 0.00999999977 : f32
    %50 = vector.broadcast %cst_75 : f32 to vector<256x8xf32>
    %51 = arith.mulf %50, %47 : vector<256x8xf32>
    %52 = arith.select %49, %47, %51 : vector<256x8xi1>, vector<256x8xf32>
    %53 = arith.truncf %52 : vector<256x8xf32> to vector<256x8xbf16>
    %54 = vector.shape_cast %53 : vector<256x8xbf16> to vector<16x16x8xbf16>
    %c1_76 = arith.constant 1 : index
    %c1_77 = arith.constant 1 : index
    %c0_78 = arith.constant 0 : index
    %55 = vector.load %arg8[%c1_76, %c1_77, %c0_78] : memref<18x18x8xbf16, #tpu.memory_space<vmem>>, vector<16x16x8xbf16>
    tpu.vector_store %arg8[%c1_76, %c1_77, %c0_78], %54 {strides = array<i32>} : memref<18x18x8xbf16, #tpu.memory_space<vmem>>, vector<16x16x8xbf16>,
    %c0_79 = arith.constant 0 : index
    %c0_80 = arith.constant 0 : index
    %c0_81 = arith.constant 0 : index
    %56 = vector.load %arg8[%c0_79, %c0_80, %c0_81] : memref<18x18x8xbf16, #tpu.memory_space<vmem>>, vector<16x16x8xbf16>
    %57 = vector.shape_cast %56 : vector<16x16x8xbf16> to vector<256x8xbf16>
    %c0_82 = arith.constant 0 : index
    %c0_83 = arith.constant 0 : index
    %58 = vector.load %arg9[%c0_82, %c0_83] : memref<256x72xbf16, #tpu.memory_space<vmem>>, vector<256x8xbf16>
    tpu.vector_store %arg9[%c0_82, %c0_83], %57 {strides = array<i32>} : memref<256x72xbf16, #tpu.memory_space<vmem>>, vector<256x8xbf16>,
    %c0_84 = arith.constant 0 : index
    %c1_85 = arith.constant 1 : index
    %c0_86 = arith.constant 0 : index
    %59 = vector.load %arg8[%c0_84, %c1_85, %c0_86] : memref<18x18x8xbf16, #tpu.memory_space<vmem>>, vector<16x16x8xbf16>
    %60 = vector.shape_cast %59 : vector<16x16x8xbf16> to vector<256x8xbf16>
    %c0_87 = arith.constant 0 : index
    %c8_88 = arith.constant 8 : index
    %61 = vector.load %arg9[%c0_87, %c8_88] : memref<256x72xbf16, #tpu.memory_space<vmem>>, vector<256x8xbf16>
    tpu.vector_store %arg9[%c0_87, %c8_88], %60 {strides = array<i32>} : memref<256x72xbf16, #tpu.memory_space<vmem>>, vector<256x8xbf16>,
    %c0_89 = arith.constant 0 : index
    %c2_90 = arith.constant 2 : index
    %c0_91 = arith.constant 0 : index
    %62 = vector.load %arg8[%c0_89, %c2_90, %c0_91] : memref<18x18x8xbf16, #tpu.memory_space<vmem>>, vector<16x16x8xbf16>
    %63 = vector.shape_cast %62 : vector<16x16x8xbf16> to vector<256x8xbf16>
    %c0_92 = arith.constant 0 : index
    %c16_93 = arith.constant 16 : index
    %64 = vector.load %arg9[%c0_92, %c16_93] : memref<256x72xbf16, #tpu.memory_space<vmem>>, vector<256x8xbf16>
    tpu.vector_store %arg9[%c0_92, %c16_93], %63 {strides = array<i32>} : memref<256x72xbf16, #tpu.memory_space<vmem>>, vector<256x8xbf16>,
    %c1_94 = arith.constant 1 : index
    %c0_95 = arith.constant 0 : index
    %c0_96 = arith.constant 0 : index
    %65 = vector.load %arg8[%c1_94, %c0_95, %c0_96] : memref<18x18x8xbf16, #tpu.memory_space<vmem>>, vector<16x16x8xbf16>
    %66 = vector.shape_cast %65 : vector<16x16x8xbf16> to vector<256x8xbf16>
    %c0_97 = arith.constant 0 : index
    %c24_98 = arith.constant 24 : index
    %67 = vector.load %arg9[%c0_97, %c24_98] : memref<256x72xbf16, #tpu.memory_space<vmem>>, vector<256x8xbf16>
    tpu.vector_store %arg9[%c0_97, %c24_98], %66 {strides = array<i32>} : memref<256x72xbf16, #tpu.memory_space<vmem>>, vector<256x8xbf16>,
    %c1_99 = arith.constant 1 : index
    %c1_100 = arith.constant 1 : index
    %c0_101 = arith.constant 0 : index
    %68 = vector.load %arg8[%c1_99, %c1_100, %c0_101] : memref<18x18x8xbf16, #tpu.memory_space<vmem>>, vector<16x16x8xbf16>
    %69 = vector.shape_cast %68 : vector<16x16x8xbf16> to vector<256x8xbf16>
    %c0_102 = arith.constant 0 : index
    %c32_103 = arith.constant 32 : index
    %70 = vector.load %arg9[%c0_102, %c32_103] : memref<256x72xbf16, #tpu.memory_space<vmem>>, vector<256x8xbf16>
    tpu.vector_store %arg9[%c0_102, %c32_103], %69 {strides = array<i32>} : memref<256x72xbf16, #tpu.memory_space<vmem>>, vector<256x8xbf16>,
    %c1_104 = arith.constant 1 : index
    %c2_105 = arith.constant 2 : index
    %c0_106 = arith.constant 0 : index
    %71 = vector.load %arg8[%c1_104, %c2_105, %c0_106] : memref<18x18x8xbf16, #tpu.memory_space<vmem>>, vector<16x16x8xbf16>
    %72 = vector.shape_cast %71 : vector<16x16x8xbf16> to vector<256x8xbf16>
    %c0_107 = arith.constant 0 : index
    %c40 = arith.constant 40 : index
    %73 = vector.load %arg9[%c0_107, %c40] : memref<256x72xbf16, #tpu.memory_space<vmem>>, vector<256x8xbf16>
    tpu.vector_store %arg9[%c0_107, %c40], %72 {strides = array<i32>} : memref<256x72xbf16, #tpu.memory_space<vmem>>, vector<256x8xbf16>,
    %c2_108 = arith.constant 2 : index
    %c0_109 = arith.constant 0 : index
    %c0_110 = arith.constant 0 : index
    %74 = vector.load %arg8[%c2_108, %c0_109, %c0_110] : memref<18x18x8xbf16, #tpu.memory_space<vmem>>, vector<16x16x8xbf16>
    %75 = vector.shape_cast %74 : vector<16x16x8xbf16> to vector<256x8xbf16>
    %c0_111 = arith.constant 0 : index
    %c48 = arith.constant 48 : index
    %76 = vector.load %arg9[%c0_111, %c48] : memref<256x72xbf16, #tpu.memory_space<vmem>>, vector<256x8xbf16>
    tpu.vector_store %arg9[%c0_111, %c48], %75 {strides = array<i32>} : memref<256x72xbf16, #tpu.memory_space<vmem>>, vector<256x8xbf16>,
    %c2_112 = arith.constant 2 : index
    %c1_113 = arith.constant 1 : index
    %c0_114 = arith.constant 0 : index
    %77 = vector.load %arg8[%c2_112, %c1_113, %c0_114] : memref<18x18x8xbf16, #tpu.memory_space<vmem>>, vector<16x16x8xbf16>
    %78 = vector.shape_cast %77 : vector<16x16x8xbf16> to vector<256x8xbf16>
    %c0_115 = arith.constant 0 : index
    %c56 = arith.constant 56 : index
    %79 = vector.load %arg9[%c0_115, %c56] : memref<256x72xbf16, #tpu.memory_space<vmem>>, vector<256x8xbf16>
    tpu.vector_store %arg9[%c0_115, %c56], %78 {strides = array<i32>} : memref<256x72xbf16, #tpu.memory_space<vmem>>, vector<256x8xbf16>,
    %c2_116 = arith.constant 2 : index
    %c2_117 = arith.constant 2 : index
    %c0_118 = arith.constant 0 : index
    %80 = vector.load %arg8[%c2_116, %c2_117, %c0_118] : memref<18x18x8xbf16, #tpu.memory_space<vmem>>, vector<16x16x8xbf16>
    %81 = vector.shape_cast %80 : vector<16x16x8xbf16> to vector<256x8xbf16>
    %c0_119 = arith.constant 0 : index
    %c64 = arith.constant 64 : index
    %82 = vector.load %arg9[%c0_119, %c64] : memref<256x72xbf16, #tpu.memory_space<vmem>>, vector<256x8xbf16>
    tpu.vector_store %arg9[%c0_119, %c64], %81 {strides = array<i32>} : memref<256x72xbf16, #tpu.memory_space<vmem>>, vector<256x8xbf16>,
    %c0_120 = arith.constant 0 : index
    %c0_121 = arith.constant 0 : index
    %83 = vector.load %arg9[%c0_120, %c0_121] : memref<256x72xbf16, #tpu.memory_space<vmem>>, vector<256x72xbf16>
    %c0_122 = arith.constant 0 : index
    %c0_123 = arith.constant 0 : index
    %84 = vector.load %arg4[%c0_122, %c0_123] : memref<72x128xbf16, #tpu.memory_space<vmem>>, vector<72x128xbf16>
    %cst_124 = arith.constant dense<0.000000e+00> : vector<256x128xf32>
    %85 = tpu.matmul %83, %84, %cst_124 {dimension_numbers = #tpu.dot_dimension_numbers<[1], [0], [0], [1], [0, 0, 1, 1], [], []>} : vector<256x72xbf16>, vector<72x128xbf16>, vector<256x128xf32> -> vector<256x128xf32>
    %c0_125 = arith.constant 0 : index
    %c0_126 = arith.constant 0 : index
    %86 = vector.load %arg5[%c0_125, %c0_126] : memref<1x128xf32, #tpu.memory_space<vmem>>, vector<1x128xf32>
    %87 = vector.broadcast %86 : vector<1x128xf32> to vector<256x128xf32>
    %88 = arith.addf %85, %87 : vector<256x128xf32>
    %cst_127 = arith.constant 0.000000e+00 : f32
    %89 = vector.broadcast %cst_127 : f32 to vector<256x128xf32>
    %90 = arith.cmpf ogt, %88, %89 : vector<256x128xf32>
    %cst_128 = arith.constant 0.00999999977 : f32
    %91 = vector.broadcast %cst_128 : f32 to vector<256x128xf32>
    %92 = arith.mulf %91, %88 : vector<256x128xf32>
    %93 = arith.select %90, %88, %92 : vector<256x128xi1>, vector<256x128xf32>
    %c0_129 = arith.constant 0 : index
    %c0_130 = arith.constant 0 : index
    %94 = vector.load %arg6[%c0_129, %c0_130] : memref<256x128xf32, #tpu.memory_space<vmem>>, vector<256x128xf32>
    tpu.vector_store %arg6[%c0_129, %c0_130], %93 {strides = array<i32>} : memref<256x128xf32, #tpu.memory_space<vmem>>, vector<256x128xf32>,
    return
  }
  func.func @transform_0(%arg0: i32) -> (i32, i32, i32, i32) {
    %c0_i32 = arith.constant 0 : i32
    %c0_i32_0 = arith.constant 0 : i32
    %c0_i32_1 = arith.constant 0 : i32
    %c0_i32_2 = arith.constant 0 : i32
    return %arg0, %c0_i32, %c0_i32_0, %c0_i32_1 : i32, i32, i32, i32
  }
  func.func @transform_1(%arg0: i32) -> (i32, i32) {
    %c0_i32 = arith.constant 0 : i32
    %c0_i32_0 = arith.constant 0 : i32
    %c0_i32_1 = arith.constant 0 : i32
    return %c0_i32, %c0_i32_0 : i32, i32
  }
  func.func @transform_2(%arg0: i32) -> (i32, i32) {
    %c0_i32 = arith.constant 0 : i32
    %c0_i32_0 = arith.constant 0 : i32
    %c0_i32_1 = arith.constant 0 : i32
    return %c0_i32, %c0_i32_0 : i32, i32
  }
  func.func @transform_3(%arg0: i32) -> (i32, i32) {
    %c0_i32 = arith.constant 0 : i32
    %c0_i32_0 = arith.constant 0 : i32
    %c0_i32_1 = arith.constant 0 : i32
    return %c0_i32, %c0_i32_0 : i32, i32
  }
  func.func @transform_4(%arg0: i32) -> (i32, i32) {
    %c0_i32 = arith.constant 0 : i32
    %c0_i32_0 = arith.constant 0 : i32
    %c0_i32_1 = arith.constant 0 : i32
    return %c0_i32, %c0_i32_0 : i32, i32
  }
  func.func @transform_5(%arg0: i32) -> (i32, i32) {
    %c0_i32 = arith.constant 0 : i32
    %c0_i32_0 = arith.constant 0 : i32
    return %arg0, %c0_i32 : i32, i32
  }
}

</mosaic_0001>

<bundles_post_ra>
// kernel: tpu_custom_call.1
= control target key start
LH: loop header
LB: loop body
LE: loop exit
PB: predicated region body
PF: predicated region fallthrough
CT: control target
= control target key end

     0   :  { %10 = vsyncpa [#allocation6], 0  ;;  %s12022_s0 = inlined_call_operand.vmem [shape: bf16[2,16,16,4], index: 0, kind: input, shape index: {}]   ;;  %s12023_s1 = inlined_call_operand.vmem [shape: bf16[36,8], index: 1, kind: input, shape index: {}]   ;;  %s12024_s2 = inlined_call_operand.vmem [shape: f32[1,8], index: 2, kind: input, shape index: {}]   ;;  %s12025_s3 = inlined_call_operand.vmem [shape: bf16[72,128], index: 3, kind: input, shape index: {}]   ;;  %s12026_s4 = inlined_call_operand.vmem [shape: f32[1,128], index: 4, kind: input, shape index: {}]   ;;  %s12027_s5 = inlined_call_operand.hbm [shape: f32[512,128], index: 5, kind: output, shape index: {}]  }
   0x1   :  { %12 = vsyncpa [#allocation6 + $0x1], 0  ;;  %s9394_s18 = smov 0   ;;  %s9396_s19 = smov 0  }
   0x2   :  { %s9398_s20 = smov 0   ;;  %s9400_s21 = smov 0  }
   0x3 LB: > { %s9415_s22 = sadd.s32 4294967295, %s9347_s21   ;;  %s8499_s23 = sadd.s32 4294967294, %s9347_s21   ;;  %s9347_s21 = sphi %s9400_s21, %s12119_s21   ;;  %s9343_s20 = sphi %s9398_s20, %s12118_s20   ;;  %s9339_s19 = sphi %s9396_s19, %s12117_s19   ;;  %s9335_s18 = sphi %s9394_s18, %s12116_s18  }
   0x4   : > { %s9419_s24 = sadd.s32 1, %s9347_s21   ;;  %s135_s25 = sadd.s32 1, %s9343_s20 }
   0x5   : > { %s132_s26 = ssub.s32 %s9347_s21, %s9419_s24  ;;  %p145_p0 = scmp.ne.s32.totalorder %s9343_s20, %s9339_s19 }
   0x6   : > { %p133_p1 = scmp.eq.s32.totalorder %s132_s26, 0  ;;  %p146_p2 = scmp.eq.s32.totalorder %s9415_s22, 1 }
   0x7   : > { %p151_p3 = scmp.ne.s32.totalorder %s9339_s19, %s9335_s18  ;;  %p152_p4 = scmp.eq.s32.totalorder %s8499_s23, 1 }
   0x8   : > { %s9430_s27 = scalar_select %p133_p1, %s9343_s20, %s135_s25  }
   0x9   : > { %p9432_p5 = por %p146_p2, %p145_p0  ;;  %p9436_p6 = por %p152_p4, %p151_p3 }
   0xa   : > { %p8502_p7 = scmp.ge.s32.totalorder %s9347_s21, 1  ;;  %p190_p8 = scmp.lt.s32.totalorder %s9347_s21, 3 }
   0xc   : > { %p191_p9 = pnand %p8502_p7, %p190_p8 }
   0xd   : > { %p218_p10 = scmp.lt.s32.totalorder (!%p191_p9), %s9415_s22, 1  ;;  %vm225_vm0 = vcmask (!%p191_p9), 27648   ;;  %vm228_vm1 = vcmask (!%p191_p9), 24576   ;;  %vm12029_vm2 = vsmask.f32 (!%p191_p9), 256  ;;  %v9349_v3 = vmov (!%p191_p9), 0  }
   0xe   : > { %194 = sbr.rel (%p191_p9) target bundleno = 1238 (0x4d6), region = 40  ;;  %vm9445_vm3 = vmand (!%p191_p9), %vm228_vm1, %vm12029_vm2  ;;  %v240_v1 = vld [vmem:[#allocation2 + $0xc] sm:$0x1] (!%p191_p9)  ;;  %226 = vst.msk [vmem:[#allocation2] sm:$0xf] (!%p191_p9), %vm225_vm0, %v9349_v3  ;;  %vm1725_vm8 = vcmask (!%p191_p9), 1042432  }
   0xf   : > { %v241_v2 = vsel (!%p191_p9), %vm9445_vm3, 0, %v240_v1  ;;  %227 = vst.msk [vmem:[#allocation2 + $0x4] sm:$0xf] (!%p191_p9), %vm225_vm0, %v9349_v3  ;;  %231 = vst.msk [vmem:[#allocation2 + $0xcc] sm:$0xf] (!%p191_p9), %vm225_vm0, %v9349_v3  ;;  %vm1726_vm9 = vcmask (!%p191_p9), 1046532  }
  0x10   : > { %242 = vst [vmem:[#allocation2 + $0xc] sm:$0x1] (!%p191_p9), %v241_v2  ;;  %229 = vst.msk [vmem:[#allocation2 + $0x8] sm:$0x1] (!%p191_p9), %vm228_vm1, %v9349_v3  ;;  %v243_v4 = vld [vmem:[#allocation2 + $0x18] sm:$0x1] (!%p191_p9) }
  0x11   : > { %232 = vst.msk [vmem:[#allocation2 + $0xd0] sm:$0xf] (!%p191_p9), %vm225_vm0, %v9349_v3  ;;  %vm12028_vm4 = vsmask.f32 (!%p191_p9), 7938  ;;  %v244_v5 = vsel (!%p191_p9), %vm9445_vm3, 0, %v243_v4  ;;  %vm9526_vm13 = vmor (!%p191_p9), %vm1725_vm8, %vm1726_vm9  ;;  %s9350_s10 = smov (!%p191_p9), 12  }
  0x12   : > { %233 = vst.msk [vmem:[#allocation2 + $0xd4] sm:$0x1] (!%p191_p9), %vm228_vm1, %v9349_v3  ;;  %vm499_vm5 = vsmask.f32 (!%p191_p9), 4368  ;;  %245 = vst [vmem:[#allocation2 + $0x18] sm:$0x1] (!%p191_p9), %v244_v5 }
  0x13   : > { %v246_v6 = vld [vmem:[#allocation2 + $0x24] sm:$0x1] (!%p191_p9)  ;;  %vm9476_vm6 = vmand (!%p191_p9), %vm228_vm1, %vm12028_vm4  ;;  %v296_v45 = vld [vmem:[#allocation2 + $0x14] sm:$0x1] (!%p191_p9)  ;;  %vm1129_vm11 = vsmask.f32 (!%p191_p9), 3328 }
  0x14   : > { %vm9482_vm7 = vmor (!%p191_p9), %vm12029_vm2, %vm499_vm5  ;;  %v247_v23 = vsel (!%p191_p9), %vm9445_vm3, 0, %v246_v6  ;;  %v299_v50 = vld [vmem:[#allocation2 + $0x20] sm:$0x1] (!%p191_p9)  ;;  %vm1130_vm12 = vsmask.f32 (!%p191_p9), 7440  ;;  %s9351_s11 = smov (!%p191_p9), 8  }
  0x15   : > { %s219_s30 = scalar_select %p218_p10, %s9415_s22, 1  ;;  %vm9490_vm10 = vmand %vm225_vm0, %vm12028_vm4  ;;  %v9497_v27 = vld [vmem:[#allocation2] sm:$0xe]  ;;  %248 = vst [vmem:[#allocation2 + $0x24] sm:$0x1] %v247_v23  ;;  %vm12030_vm15 = vcmask 31744  }
  0x16   : > { %v9500_v31 = vld [vmem:[#allocation2 + $0x4] sm:$0xf]  ;;  %v237_v33 = vld [vmem:[#allocation2] sm:$0x1]  ;;  %v8538_v47 = vrot.slane %v9497_v27, 9  ;;  %vm9562_vm14 = vmor %vm1129_vm11, %vm1130_vm12  ;;  %s9352_s12 = smov 24  }
  0x17   : > { %s8969_s6 = sshll.u32 %s219_s30, 7  ;;  %v824_v25 = vld [vmem:[#allocation2 + $0xc] sm:$0xf]  ;;  %v293_v26 = vld [vmem:[#allocation2 + $0x8] sm:$0x1]  ;;  %v1730_v35 = vrot.slane %v9500_v31, 5 }
  0x18   : > { %s9469_s9 = scalar_lea.vmem %s12022_s0, %s8969_s6  ;;  %v294_v34 = vsel %vm9476_vm6, 0, %v293_v26  ;;  %v238_v43 = vsel %vm9445_vm3, 0, %v237_v33  ;;  %v1082_v44 = vld [vmem:[#allocation2 + $0x4] sm:$0xf]  ;;  %v302_v55 = vld [vmem:[#allocation2 + $0x2c] sm:$0x1] }
  0x19   : > { %v467_v7 = vld [vmem:[%s9469_s9] sm:$0xf]  ;;  %v468_v8 = vld [vmem:[%s9469_s9 + $0x4] sm:$0xf]  ;;  %v469_v9 = vld [vmem:[%s9469_s9 + $0x8] sm:$0xf]  ;;  %v1731_v23 = vsel %vm9526_vm13, %v8538_v47, %v1730_v35 }
  0x1a   : > { %v502_v11 = vshrl.u32 %v467_v7, 16  ;;  %v505_v12 = vshll.u32 %v467_v7, 16  ;;  %v510_v13 = vshrl.u32 %v468_v8, 16  ;;  %v513_v14 = vshll.u32 %v468_v8, 16  ;;  %v470_v15 = vld [vmem:[%s9469_s9 + $0xc] sm:$0xf] }
  0x1b   : > { %v519_v17 = vshrl.u32 %v469_v9, 16  ;;  %v522_v18 = vshll.u32 %v469_v9, 16  ;;  %v527_v22 = vshrl.u32 %v470_v15, 16  ;;  %v471_v24 = vld [vmem:[%s9469_s9 + $0x10] sm:$0xf]  ;;  %v530_v32 = vshll.u32 %v470_v15, 16 }
  0x1c   : > { %v504_v19 = vrot.slane %v502_v11, 7  ;;  %v9486_v20 = vrot.slane %v510_v13, 7  ;;  %v472_v37 = vld [vmem:[%s9469_s9 + $0x14] sm:$0xf]  ;;  %v536_v38 = vshrl.u32 %v471_v24, 16  ;;  %v1732_v51 = vrot.slane %v1730_v35, 4 }
  0x1d   : > { %v521_v36 = vrot.slane %v519_v17, 7  ;;  %295 = vst [vmem:[#allocation2 + $0x8] sm:$0x1] %v294_v34  ;;  %v9510_v41 = vrot.slane %v527_v22, 7  ;;  %v831_v42 = vld [vmem:[#allocation2 + $0x18] sm:$0xf] }
  0x1e   : > { %v507_v28 = vor.u32 %v505_v12, %v504_v19  ;;  %v508_v29 = vrot.slane %v504_v19, 4  ;;  %v515_v30 = vor.u32 %v513_v14, %v9486_v20  ;;  %v517_v46 = vrot.slane %v9486_v20, 4  ;;  %239 = vst [vmem:[#allocation2] sm:$0x1] %v238_v43  ;;  %v249_v60 = vld [vmem:[#allocation2 + $0x30] sm:$0x1] }
  0x1f   : > { %v524_v48 = vor.u32 %v522_v18, %v521_v36  ;;  %v525_v49 = vrot.slane %v521_v36, 4  ;;  %v532_v52 = vor.u32 %v530_v32, %v9510_v41  ;;  %v1142_v53 = vshll.u32 %v1082_v44, 16  ;;  %v838_v2 = vld [vmem:[#allocation2 + $0x24] sm:$0xf]  ;;  %v9546_v19 = vld [vmem:[%s9469_s9 + $0x18] sm:$0xf] }
  0x20   : > { %v516_v39 = vsel %vm9482_vm7, %v508_v29, %v515_v30  ;;  %v825_v40 = vsel %vm9490_vm10, %v507_v28, %v824_v25  ;;  %v1146_v54 = vshrl.u32 %v1082_v44, 16  ;;  %v538_v57 = vrot.slane %v536_v38, 7  ;;  %s9353_s13 = smov 4   ;;  %s9354_s14 = smov 20  }
  0x21   : > { %826 = vst [vmem:[#allocation2 + $0xc] sm:$0xf] %v825_v40  ;;  %827 = vst.msk [vmem:[#allocation2 + $0x10] sm:$0xf] %vm225_vm0, %v516_v39  ;;  %v832_v56 = vsel %vm9490_vm10, %v524_v48, %v831_v42  ;;  %v539_v58 = vshll.u32 %v471_v24, 16  ;;  %v544_v59 = vshrl.u32 %v472_v37, 16  ;;  %v533_v61 = vsel %vm9482_vm7, %v525_v49, %v532_v52 }
  0x22   : > { %833 = vst [vmem:[#allocation2 + $0x18] sm:$0xf] %v832_v56  ;;  %v9522_v62 = vrot.slane %v1142_v53, 5  ;;  %v1148_v63 = vrot.slane %v1146_v54, 4  ;;  %v547_v1 = vshll.u32 %v472_v37, 16  ;;  %v542_v6 = vrot.slane %v538_v57, 4 }
  0x23   : > { %834 = vst.msk [vmem:[#allocation2 + $0x1c] sm:$0xf] %vm225_vm0, %v533_v61  ;;  %v541_v5 = vor.u32 %v539_v58, %v538_v57  ;;  %v9531_v7 = vrot.slane %v544_v59, 7  ;;  %v297_v8 = vsel %vm9476_vm6, 0, %v296_v45  ;;  %v534_v9 = vrot.slane %v9510_v41, 4  ;;  %s9355_s15 = smov 32  }
  0x24   : > { %298 = vst [vmem:[#allocation2 + $0x14] sm:$0x1] %v297_v8  ;;  %v300_v11 = vsel %vm9476_vm6, 0, %v299_v50  ;;  %v303_v12 = vsel %vm9476_vm6, 0, %v302_v55  ;;  %v250_v13 = vsel %vm9445_vm3, 0, %v249_v60  ;;  %v1149_v26 = vor.u32 %v1148_v63, %v9522_v62  ;;  %s9356_s16 = smov 16  }
  0x25   : > { %v1631_v14 = vld [vmem:[#allocation2 + $0x8] sm:$0x1]  ;;  %v549_v17 = vor.u32 %v547_v1, %v9531_v7  ;;  %v839_v18 = vsel %vm9490_vm10, %v541_v5, %v838_v2  ;;  %301 = vst [vmem:[#allocation2 + $0x20] sm:$0x1] %v300_v11  ;;  %304 = vst [vmem:[#allocation2 + $0x2c] sm:$0x1] %v303_v12 }
  0x26   : > { %v1083_v15 = vld [vmem:[#allocation2 + $0x8] sm:$0x1]  ;;  %251 = vst [vmem:[#allocation2 + $0x30] sm:$0x1] %v250_v13  ;;  %v1733_v24 = vrot.slane %v1631_v14, 5  ;;  %v551_v29 = vrot.slane %v9531_v7, 4 }
  0x27   : > { %840 = vst [vmem:[#allocation2 + $0x24] sm:$0xf] %v839_v18  ;;  %v1081_v25 = vld [vmem:[#allocation2] sm:$0xf]  ;;  %v1152_v27 = vshll.u32 %v1083_v15, 16  ;;  %v550_v28 = vsel %vm9482_vm7, %v542_v6, %v549_v17  ;;  %v553_v37 = vshrl.u32 %v9546_v19, 16 }
  0x28   : > { %v9178_v22 = vld [vmem:[#allocation2 + $0xc] sm:$0xff]   ;;  %v1734_v30 = vsel %vm9526_vm13, %v1732_v51, %v1733_v24  ;;  %v1133_v31 = vshrl.u32 %v1081_v25, 16  ;;  %v1136_v32 = vshll.u32 %v1081_v25, 16  ;;  %841 = vst.msk [vmem:[#allocation2 + $0x28] sm:$0xf] %vm225_vm0, %v550_v28  ;;  %v1150_v43 = vrot.slane %v1149_v26, 4 }
  0x29   : > { %2065 = vrot.lane.b32.xlu0 %v9178_v22, %s9350_s10  ;;  %v2675_v33 = vld [vmem:[#allocation2 + $0xc] sm:$0xe]  ;;  %v2676_v34 = vld [vmem:[#allocation2 + $0x10] sm:$0xf]  ;;  %v8554_v35 = vcombine.low %v1731_v23, %v1734_v30  ;;  %v1154_v44 = vrot.slane %v1152_v27, 5  ;;  %v9576_v6 = vrot.slane %v553_v37, 7 }
  0x2a   : > { %v2773_v36 = vrot.slane %v2676_v34, 5  ;;  %v9179_v38 = vld [vmem:[#allocation2 + $0x18] sm:$0xff]   ;;  %v1135_v39 = vrot.slane %v1133_v31, 4  ;;  %v1138_v42 = vrot.slane %v1136_v32, 5  ;;  %v1632_v48 = vld [vmem:[#allocation2 + $0xc] sm:$0xe] }
  0x2b   : > { %1888 = vrot.lane.b32.xlu1 %v8554_v35, %s9351_s11  ;;  %v9180_v40 = vld [vmem:[#allocation2 + $0x18] sm:$0xff]   ;;  %v828_v45 = vld [vmem:[#allocation2 + $0x14] sm:$0x1]  ;;  %v1633_v49 = vld [vmem:[#allocation2 + $0x10] sm:$0xf]  ;;  %v8602_v52 = vrot.slane %v2675_v33, 9 }
  0x2c   : > { %v829_v47 = vsel %vm9445_vm3, %v517_v46, %v828_v45  ;;  %v835_v50 = vld [vmem:[#allocation2 + $0x20] sm:$0x1]  ;;  %v1139_v51 = vor.u32 %v1138_v42, %v1135_v39  ;;  %v1737_v53 = vrot.slane %v1633_v49, 5  ;;  %v3719_v55 = vld [vmem:[#allocation2 + $0x18] sm:$0xe]  ;;  %v2775_v56 = vrot.slane %v2773_v36, 4 }
  0x2d   : > { %3109 = vrot.lane.b32.xlu0 %v9179_v38, %s9352_s12  ;;  %830 = vst [vmem:[#allocation2 + $0x14] sm:$0x1] %v829_v47  ;;  %v836_v54 = vsel %vm9445_vm3, %v534_v9, %v835_v50  ;;  %v8539_v57 = vrot.slane %v1632_v48, 9  ;;  %v3720_v58 = vld [vmem:[#allocation2 + $0x1c] sm:$0xf]  ;;  %v1155_v46 = vsel %vm9562_vm14, %v1150_v43, %v1154_v44  ;;  %v8666_v61 = vrot.slane %v3719_v55, 9 }
  0x2e   : > { %837 = vst [vmem:[#allocation2 + $0x20] sm:$0x1] %v836_v54  ;;  %v2678_v59 = vld [vmem:[#allocation2 + $0x18] sm:$0xe]  ;;  %v1140_v20 = vrot.slane %v1139_v51, 4  ;;  %v3817_v63 = vrot.slane %v3720_v58, 5  ;;  %v2774_v8 = vsel %vm9526_vm13, %v8602_v52, %v2773_v36 }
  0x2f   : > { %2067 = vrot.lane.b32.xlu1 %v9180_v40, %s9350_s10  ;;  %v9181_v60 = vld [vmem:[#allocation2 + $0x24] sm:$0xff]   ;;  %v1739_v1 = vrot.slane %v1737_v53, 4  ;;  %v2679_v2 = vld [vmem:[#allocation2 + $0x1c] sm:$0xf]  ;;  %v842_v5 = vld [vmem:[#allocation2 + $0x2c] sm:$0x1]  ;;  %v1738_v30 = vsel %vm9526_vm13, %v8539_v57, %v1737_v53 }
  0x30   : > { %v1145_v7 = vsel %vm9562_vm14, %v1140_v20, %v9522_v62  ;;  %v8603_v9 = vrot.slane %v2678_v59, 9  ;;  %v2780_v11 = vrot.slane %v2679_v2, 5  ;;  %v3722_v12 = vld [vmem:[#allocation2 + $0x24] sm:$0xe]  ;;  %v3723_v13 = vld [vmem:[#allocation2 + $0x28] sm:$0xf]  ;;  %v843_v15 = vsel %vm9445_vm3, %v551_v29, %v842_v5 }
  0x31   : > { %v8522_v14 = vcombine.low %v1145_v7, %v1155_v46  ;;  %v8667_v17 = vrot.slane %v3722_v12, 9  ;;  %v3824_v18 = vrot.slane %v3723_v13, 5  ;;  %v2133_v22 = vld [vmem:[#allocation2 + $0x18] sm:$0xf]  ;;  %v2134_v23 = vld [vmem:[#allocation2 + $0x1c] sm:$0xf]  ;;  %v3818_v29 = vsel %vm9526_vm13, %v8666_v61, %v3817_v63 }
  0x32   : > { %v3819_v24 = vrot.slane %v3817_v63, 4  ;;  %v2782_v25 = vrot.slane %v2780_v11, 4  ;;  %844 = vst [vmem:[#allocation2 + $0x2c] sm:$0x1] %v843_v15  ;;  %v2203_v62 = vshrl.u32 %v2133_v22, 16  ;;  %v2206_v26 = vshll.u32 %v2133_v22, 16 }
  0x33   : > { %3111 = vrot.lane.b32.xlu1 %v9181_v60, %s9352_s12  ;;  %1564 = vrot.lane.b32.xlu0 %v8522_v14, %s9353_s13  ;;  %v3826_v31 = vrot.slane %v3824_v18, 4  ;;  %v2212_v32 = vshll.u32 %v2134_v23, 16  ;;  %v2781_v37 = vsel %vm9526_vm13, %v8603_v9, %v2780_v11  ;;  %v9595_v38 = vsel %vm9526_vm13, %v8667_v17, %v3824_v18  ;;  %v1084_v44 = vld [vmem:[#allocation2 + $0xc] sm:$0xf]  ;;  %v1085_v51 = vld [vmem:[#allocation2 + $0x10] sm:$0xf] }
  0x34   : > { %v2677_v27 = vld [vmem:[#allocation2 + $0x14] sm:$0x1]  ;;  %v2205_v42 = vrot.slane %v2203_v62, 4  ;;  %v2208_v43 = vrot.slane %v2206_v26, 5  ;;  %v2216_v50 = vshrl.u32 %v2134_v23, 16  ;;  %v1157_v61 = vshrl.u32 %v1084_v44, 16 }
  0x35   : > { %v1634_v28 = vld [vmem:[#allocation2 + $0x14] sm:$0x1]  ;;  %v2776_v33 = vrot.slane %v2677_v27, 5  ;;  %v3721_v35 = vld [vmem:[#allocation2 + $0x20] sm:$0x1]  ;;  %v2214_v49 = vrot.slane %v2212_v32, 5 }
  0x36   : > { %v1740_v34 = vrot.slane %v1634_v28, 5  ;;  %v2680_v36 = vld [vmem:[#allocation2 + $0x20] sm:$0x1]  ;;  %v3820_v39 = vrot.slane %v3721_v35, 5  ;;  %v2209_v59 = vor.u32 %v2208_v43, %v2205_v42  ;;  %v2218_v20 = vrot.slane %v2216_v50, 4  ;;  %s9357_s17 = smov 28  }
  0x37   : > { %v2783_v40 = vrot.slane %v2680_v36, 5  ;;  %v2777_v45 = vsel %vm9526_vm13, %v2775_v56, %v2776_v33  ;;  %v2135_v48 = vld [vmem:[#allocation2 + $0x20] sm:$0x1]  ;;  %v1086_v56 = vld [vmem:[#allocation2 + $0x14] sm:$0x1]  ;;  %v1160_v63 = vshll.u32 %v1084_v44, 16 }
  0x38   : > { %v1741_v47 = vsel %vm9526_vm13, %v1739_v1, %v1740_v34  ;;  %v8618_v52 = vcombine.low %v2774_v8, %v2777_v45  ;;  %v3821_v54 = vsel %vm9526_vm13, %v3819_v24, %v3820_v39  ;;  %v2222_v60 = vshll.u32 %v2135_v48, 16  ;;  %v3177_v9 = vld [vmem:[#allocation2 + $0x24] sm:$0xf]  ;;  %v3178_v15 = vld [vmem:[#allocation2 + $0x28] sm:$0xf]  ;;  %s9362_s6 = smov [#allocation5]  }
  0x39   : > { %v8555_v53 = vcombine.low %v1738_v30, %v1741_v47  ;;  %v2784_v55 = vsel %vm9526_vm13, %v2782_v25, %v2783_v40  ;;  %v8682_v57 = vcombine.low %v3818_v29, %v3821_v54  ;;  %v3724_v46 = vld [vmem:[#allocation2 + $0x2c] sm:$0x1]  ;;  %v1166_v1 = vshll.u32 %v1085_v51, 16  ;;  %s9289_s7 = sshll.u32 %s9362_s6, 4  ;;  %s9290_s7 = int_to_ptr.vmem [resolvable:$false] %s9289_s7 }
  0x3a   : > { %v8619_v58 = vcombine.low %v2781_v37, %v2784_v55  ;;  %2931 = vrot.lane.b32.xlu0 %v8618_v52, %s9354_s14  ;;  %v3827_v2 = vrot.slane %v3724_v46, 5  ;;  %v2210_v5 = vrot.slane %v2209_v59, 4  ;;  %v2219_v7 = vor.u32 %v2218_v20, %v2214_v49  ;;  %v3179_v30 = vld [vmem:[#allocation2 + $0x2c] sm:$0x1]  ;;  %v2131_v37 = vld [vmem:[#allocation2 + $0x10] sm:$0xf] }
  0x3b   : > { %1890 = vrot.lane.b32.xlu1 %v8555_v53, %s9351_s11  ;;  %v1170_v8 = vshrl.u32 %v1085_v51, 16  ;;  %v2224_v11 = vrot.slane %v2222_v60, 5  ;;  %v1159_v12 = vrot.slane %v1157_v61, 4  ;;  %v1162_v13 = vrot.slane %v1160_v63, 5  ;;  %v2130_v32 = vld [vmem:[#allocation2 + $0xc] sm:$0xf] }
  0x3c   : > { %v1168_v14 = vrot.slane %v1166_v1, 5  ;;  %v3828_v17 = vsel %vm9526_vm13, %v3826_v31, %v3827_v2  ;;  %v2215_v18 = vsel %vm9562_vm14, %v2210_v5, %v2214_v49  ;;  %v2220_v22 = vrot.slane %v2219_v7, 4  ;;  %v2132_v51 = vld [vmem:[#allocation2 + $0x14] sm:$0x1]  ;;  %v1087_v53 = vld [vmem:[#allocation2 + $0x18] sm:$0xf] }
  0x3d   : > { %v1172_v23 = vrot.slane %v1170_v8, 4  ;;  %v8683_v24 = vcombine.low %v9595_v38, %v3828_v17  ;;  %v1163_v25 = vor.u32 %v1162_v13, %v1159_v12  ;;  %v1176_v62 = vshll.u32 %v1086_v56, 16  ;;  %v1088_v59 = vld [vmem:[#allocation2 + $0x1c] sm:$0xf]  ;;  %v1089_v61 = vld [vmem:[#allocation2 + $0x20] sm:$0x1] }
  0x3e   : > { %3975 = vrot.lane.b32.xlu0 %v8682_v57, %s9355_s15  ;;  %v3247_v26 = vshrl.u32 %v3177_v9, 16  ;;  %v2225_v27 = vsel %vm9562_vm14, %v2220_v22, %v2224_v11  ;;  %v3250_v29 = vshll.u32 %v3177_v9, 16  ;;  %v3256_v31 = vshll.u32 %v3178_v15, 16  ;;  %v3174_v7 = vld [vmem:[#allocation2 + $0x18] sm:$0xf]  ;;  %s9291_s8 = scalar_lea.vmem %s9290_s7, 8192 }
  0x3f   : > { %2933 = vrot.lane.b32.xlu1 %v8619_v58, %s9354_s14  ;;  %v1173_v28 = vor.u32 %v1172_v23, %v1168_v14  ;;  %v8587_v33 = vcombine.low %v2215_v18, %v2225_v27  ;;  %v1164_v34 = vrot.slane %v1163_v25, 4  ;;  %v1178_v35 = vrot.slane %v1176_v62, 5  ;;  %v3175_v25 = vld [vmem:[#allocation2 + $0x1c] sm:$0xf] }
  0x40   : > { %v3249_v36 = vrot.slane %v3247_v26, 4  ;;  %v3252_v40 = vrot.slane %v3250_v29, 5  ;;  %v3258_v42 = vrot.slane %v3256_v31, 5  ;;  %v3260_v38 = vshrl.u32 %v3178_v15, 16  ;;  %v3176_v31 = vld [vmem:[#allocation2 + $0x20] sm:$0x1] }
  0x41   : > { %v1174_v39 = vrot.slane %v1173_v28, 4  ;;  %v1169_v43 = vsel %vm9562_vm14, %v1164_v34, %v1168_v14  ;;  %v3266_v44 = vshll.u32 %v3179_v30, 16  ;;  %v2179_v45 = vshrl.u32 %v2130_v32, 16 }
  0x42   : > { %3977 = vrot.lane.b32.xlu0 %v8683_v24, %s9355_s15  ;;  %v2182_v47 = vshll.u32 %v2130_v32, 16  ;;  %v3253_v49 = vor.u32 %v3252_v40, %v3249_v36  ;;  %v3262_v50 = vrot.slane %v3260_v38, 4  ;;  %v2188_v52 = vshll.u32 %v2131_v37, 16 }
  0x43   : > { %2612 = vrot.lane.b32.xlu1 %v8587_v33, %s9356_s16  ;;  %v1179_v48 = vsel %vm9562_vm14, %v1174_v39, %v1178_v35  ;;  %v3268_v55 = vrot.slane %v3266_v44, 5  ;;  %v2181_v57 = vrot.slane %v2179_v45, 4  ;;  %v2192_v60 = vshrl.u32 %v2131_v37, 16  ;;  %v1090_v39 = vld [vmem:[#allocation2 + $0x24] sm:$0xf] }
  0x44   : > { %v8523_v54 = vcombine.low %v1169_v43, %v1179_v48  ;;  %v2184_v58 = vrot.slane %v2182_v47, 5  ;;  %v3254_v20 = vrot.slane %v3253_v49, 4  ;;  %v3263_v56 = vor.u32 %v3262_v50, %v3258_v42  ;;  %v1091_v44 = vld [vmem:[#allocation2 + $0x28] sm:$0xf]  ;;  %v1092_v50 = vld [vmem:[#allocation2 + $0x2c] sm:$0x1] }
  0x45   : > { %v2190_v46 = vrot.slane %v2188_v52, 5  ;;  %v2198_v1 = vshll.u32 %v2132_v51, 16  ;;  %v1181_v2 = vshrl.u32 %v1087_v53, 16  ;;  %v1184_v5 = vshll.u32 %v1087_v53, 16 }
  0x46   : > { %1566 = vrot.lane.b32.xlu0 %v8523_v54, %s9353_s13  ;;  %v2185_v63 = vor.u32 %v2184_v58, %v2181_v57  ;;  %v3259_v8 = vsel %vm9562_vm14, %v3254_v20, %v3258_v42  ;;  %v3264_v9 = vrot.slane %v3263_v56, 4  ;;  %v2194_v11 = vrot.slane %v2192_v60, 4  ;;  %v1636_v56 = vld [vmem:[#allocation2 + $0x1c] sm:$0xf] }
  0x47   : > { %v1190_v12 = vshll.u32 %v1088_v59, 16  ;;  %v2200_v14 = vrot.slane %v2198_v1, 5  ;;  %v1183_v15 = vrot.slane %v1181_v2, 4  ;;  %v1186_v17 = vrot.slane %v1184_v5, 5  ;;  %v1637_v1 = vld [vmem:[#allocation2 + $0x20] sm:$0x1] }
  0x48   : > { %v2186_v13 = vrot.slane %v2185_v63, 4  ;;  %v3269_v18 = vsel %vm9562_vm14, %v3264_v9, %v3268_v55  ;;  %v2195_v22 = vor.u32 %v2194_v11, %v2190_v46  ;;  %v1194_v24 = vshrl.u32 %v1088_v59, 16  ;;  %v1635_v55 = vld [vmem:[#allocation2 + $0x18] sm:$0xe]  ;;  %v1638_v9 = vld [vmem:[#allocation2 + $0x24] sm:$0xe] }
  0x49   : > { %v1192_v23 = vrot.slane %v1190_v12, 5  ;;  %v8651_v62 = vcombine.low %v3259_v8, %v3269_v18  ;;  %v1187_v27 = vor.u32 %v1186_v17, %v1183_v15  ;;  %v1200_v28 = vshll.u32 %v1089_v61, 16  ;;  %v1639_v15 = vld [vmem:[#allocation2 + $0x28] sm:$0xf] }
  0x4a   : > { %v2191_v26 = vsel %vm9562_vm14, %v2186_v13, %v2190_v46  ;;  %v2196_v30 = vrot.slane %v2195_v22, 4  ;;  %v1196_v29 = vrot.slane %v1194_v24, 4  ;;  %v3223_v32 = vshrl.u32 %v3174_v7, 16  ;;  %v1640_v24 = vld [vmem:[#allocation2 + $0x2c] sm:$0x1] }
  0x4b   : > { %v3226_v33 = vshll.u32 %v3174_v7, 16  ;;  %3656 = vrot.lane.b32.xlu1 %v8651_v62, %s9357_s17  ;;  %v1188_v34 = vrot.slane %v1187_v27, 4  ;;  %v1202_v35 = vrot.slane %v1200_v28, 5  ;;  %v3232_v36 = vshll.u32 %v3175_v25, 16 }
  0x4c   : > { %v3236_v37 = vshrl.u32 %v3175_v25, 16  ;;  %v2201_v40 = vsel %vm9562_vm14, %v2196_v30, %v2200_v14  ;;  %v1197_v42 = vor.u32 %v1196_v29, %v1192_v23  ;;  %v3225_v38 = vrot.slane %v3223_v32, 4  ;;  %v474_v32 = vld [vmem:[%s9469_s9 + $0x1c] sm:$0xf] }
  0x4d   : > { %v3228_v43 = vrot.slane %v3226_v33, 5  ;;  %v8586_v45 = vcombine.low %v2191_v26, %v2201_v40  ;;  %v1193_v47 = vsel %vm9562_vm14, %v1188_v34, %v1192_v23  ;;  %v3234_v48 = vrot.slane %v3232_v36, 5 }
  0x4e   : > { %v3238_v49 = vrot.slane %v3236_v37, 4  ;;  %v1198_v51 = vrot.slane %v1197_v42, 4  ;;  %v3242_v53 = vshll.u32 %v3176_v31, 16  ;;  %v1205_v54 = vshrl.u32 %v1090_v39, 16  ;;  %v2136_v37 = vld [vmem:[#allocation2 + $0x24] sm:$0xf] }
  0x4f   : > { %v3229_v52 = vor.u32 %v3228_v43, %v3225_v38  ;;  %2610 = vrot.lane.b32.xlu0 %v8586_v45, %s9356_s16  ;;  %v1208_v58 = vshll.u32 %v1090_v39, 16  ;;  %v1214_v59 = vshll.u32 %v1091_v44, 16  ;;  %v1218_v20 = vshrl.u32 %v1091_v44, 16  ;;  %v845_v43 = vld [vmem:[#allocation2 + $0x30] sm:$0xf] }
  0x50   : > { %v3239_v57 = vor.u32 %v3238_v49, %v3234_v48  ;;  %v1203_v46 = vsel %vm9562_vm14, %v1198_v51, %v1202_v35  ;;  %v3244_v61 = vrot.slane %v3242_v53, 5  ;;  %v1207_v63 = vrot.slane %v1205_v54, 4  ;;  %v305_v44 = vld [vmem:[#allocation2 + $0x38] sm:$0x1]  ;;  %v2138_v51 = vld [vmem:[#allocation2 + $0x2c] sm:$0x1] }
  0x51   : > { %v3230_v60 = vrot.slane %v3229_v52, 4  ;;  %v8524_v2 = vcombine.low %v1193_v47, %v1203_v46  ;;  %v1210_v7 = vrot.slane %v1208_v58, 5  ;;  %v1216_v8 = vrot.slane %v1214_v59, 5  ;;  %v2682_v58 = vld [vmem:[#allocation2 + $0x28] sm:$0xf] }
  0x52   : > { %v3240_v5 = vrot.slane %v3239_v57, 4  ;;  %v1220_v12 = vrot.slane %v1218_v20, 4  ;;  %v1224_v13 = vshll.u32 %v1092_v50, 16  ;;  %v8540_v14 = vrot.slane %v1635_v55, 9  ;;  %v2137_v50 = vld [vmem:[#allocation2 + $0x28] sm:$0xf] }
  0x53   : > { %v3235_v11 = vsel %vm9562_vm14, %v3230_v60, %v3234_v48  ;;  %1568 = vrot.lane.b32.xlu1 %v8524_v2, %s9353_s13  ;;  %v1211_v18 = vor.u32 %v1210_v7, %v1207_v63  ;;  %v1744_v22 = vrot.slane %v1636_v56, 5  ;;  %v1747_v23 = vrot.slane %v1637_v1, 5  ;;  %v2681_v57 = vld [vmem:[#allocation2 + $0x24] sm:$0xe]  ;;  %v2683_v46 = vld [vmem:[#allocation2 + $0x2c] sm:$0x1] }
  0x54   : > { %v3245_v17 = vsel %vm9562_vm14, %v3240_v5, %v3244_v61  ;;  %v1221_v62 = vor.u32 %v1220_v12, %v1216_v8  ;;  %v1226_v26 = vrot.slane %v1224_v13, 5  ;;  %v8541_v27 = vrot.slane %v1638_v9, 9  ;;  %v252_v60 = vld [vmem:[#allocation2 + $0x3c] sm:$0x1]  ;;  %v475_v61 = vld [vmem:[%s9469_s9 + $0x20] sm:$0xf] }
  0x55   : > { %v8650_v25 = vcombine.low %v3235_v11, %v3245_v17  ;;  %v1212_v28 = vrot.slane %v1211_v18, 4  ;;  %v1745_v30 = vsel %vm9526_vm13, %v8540_v14, %v1744_v22  ;;  %v1746_v29 = vrot.slane %v1744_v22, 4  ;;  %v476_v7 = vld [vmem:[%s9469_s9 + $0x24] sm:$0xf] }
  0x56   : > { %v1751_v31 = vrot.slane %v1639_v15, 5  ;;  %v1222_v33 = vrot.slane %v1221_v62, 4  ;;  %v1754_v34 = vrot.slane %v1640_v24, 5  ;;  %v556_v35 = vshll.u32 %v9546_v19, 16  ;;  %v9182_v19 = vld [vmem:[#allocation2 + $0x24] sm:$0xff]  }
  0x57   : > { %3654 = vrot.lane.b32.xlu0 %v8650_v25, %s9357_s17  ;;  %v559_v36 = vrot.slane %v9576_v6, 4  ;;  %v1217_v39 = vsel %vm9562_vm14, %v1212_v28, %v1216_v8  ;;  %v1748_v40 = vsel %vm9526_vm13, %v1746_v29, %v1747_v23  ;;  %v561_v49 = vshrl.u32 %v474_v32, 16  ;;  %v308_v12 = vld [vmem:[#allocation2 + $0x44] sm:$0x1] }
  0x58   : > { %v1752_v42 = vsel %vm9526_vm13, %v8541_v27, %v1751_v31  ;;  %v1753_v38 = vrot.slane %v1751_v31, 4  ;;  %v1227_v45 = vsel %vm9562_vm14, %v1222_v33, %v1226_v26  ;;  %v8556_v47 = vcombine.low %v1745_v30, %v1748_v40 }
  0x59   : > { %v558_v48 = vor.u32 %v556_v35, %v9576_v6  ;;  %v8525_v52 = vcombine.low %v1217_v39, %v1227_v45  ;;  %v564_v54 = vshll.u32 %v474_v32, 16  ;;  %v2227_v55 = vshrl.u32 %v2136_v37, 16 }
  0x5a   : > { %v1755_v53 = vsel %vm9526_vm13, %v1753_v38, %v1754_v34  ;;  %v563_v20 = vrot.slane %v561_v49, 7  ;;  %v2230_v56 = vshll.u32 %v2136_v37, 16  ;;  %v2236_v1 = vshll.u32 %v2137_v50, 16 }
  0x5b   : > { %1892 = vrot.lane.b32.xlu0 %v8556_v47, %s9351_s11  ;;  %v8557_v59 = vcombine.low %v1752_v42, %v1755_v53  ;;  %v846_v6 = vsel %vm9490_vm10, %v558_v48, %v845_v43  ;;  %1570 = vrot.lane.b32.xlu1 %v8525_v52, %s9353_s13  ;;  %v2229_v63 = vrot.slane %v2227_v55, 4  ;;  %v2240_v2 = vshrl.u32 %v2137_v50, 16 }
  0x5c   : > { %847 = vst [vmem:[#allocation2 + $0x30] sm:$0xf] %v846_v6  ;;  %v2246_v5 = vshll.u32 %v2138_v51, 16  ;;  %v566_v8 = vor.u32 %v564_v54, %v563_v20  ;;  %v2232_v9 = vrot.slane %v2230_v56, 5  ;;  %v306_v11 = vsel %vm9476_vm6, 0, %v305_v44 }
  0x5d   : > { %v568_v13 = vrot.slane %v563_v20, 4  ;;  %v2238_v14 = vrot.slane %v2236_v1, 5  ;;  %v2242_v15 = vrot.slane %v2240_v2, 4  ;;  %307 = vst [vmem:[#allocation2 + $0x38] sm:$0x1] %v306_v11  ;;  %v8604_v23 = vrot.slane %v2681_v57, 9 }
  0x5e   : > { %v2248_v17 = vrot.slane %v2246_v5, 5  ;;  %v567_v18 = vsel %vm9482_vm7, %v559_v36, %v566_v8  ;;  %v2233_v22 = vor.u32 %v2232_v9, %v2229_v63  ;;  %v2787_v24 = vrot.slane %v2682_v58, 5 }
  0x5f   : > { %2069 = vrot.lane.b32.xlu0 %v9182_v19, %s9350_s10  ;;  %1894 = vrot.lane.b32.xlu1 %v8557_v59, %s9351_s11  ;;  %848 = vst.msk [vmem:[#allocation2 + $0x34] sm:$0xf] %vm225_vm0, %v567_v18  ;;  %v2243_v25 = vor.u32 %v2242_v15, %v2238_v14  ;;  %v2790_v62 = vrot.slane %v2683_v46, 5  ;;  %v253_v26 = vsel %vm9445_vm3, 0, %v252_v60  ;;  %v570_v27 = vshrl.u32 %v475_v61, 16 }
  0x60   : > { %v2234_v28 = vrot.slane %v2233_v22, 4  ;;  %v2789_v30 = vrot.slane %v2787_v24, 4  ;;  %254 = vst [vmem:[#allocation2 + $0x3c] sm:$0x1] %v253_v26  ;;  %v573_v29 = vshll.u32 %v475_v61, 16  ;;  %v578_v31 = vshrl.u32 %v476_v7, 16 }
  0x61   : > { %v2244_v32 = vrot.slane %v2243_v25, 4  ;;  %v572_v33 = vrot.slane %v570_v27, 7  ;;  %v581_v34 = vshll.u32 %v476_v7, 16  ;;  %v309_v35 = vsel %vm9476_vm6, 0, %v308_v12 }
  0x62   : > { %v2239_v36 = vsel %vm9562_vm14, %v2234_v28, %v2238_v14  ;;  %v2788_v39 = vsel %vm9526_vm13, %v8604_v23, %v2787_v24  ;;  %310 = vst [vmem:[#allocation2 + $0x44] sm:$0x1] %v309_v35  ;;  %v2791_v44 = vsel %vm9526_vm13, %v2789_v30, %v2790_v62  ;;  %v580_v53 = vrot.slane %v578_v31, 7 }
  0x63   : > { %v2139_v37 = vld [vmem:[#allocation2 + $0x30] sm:$0xf]  ;;  %v2249_v42 = vsel %vm9562_vm14, %v2244_v32, %v2248_v17  ;;  %v576_v49 = vrot.slane %v572_v33, 4  ;;  %v8620_v57 = vcombine.low %v2788_v39, %v2791_v44  ;;  %v575_v58 = vor.u32 %v573_v29, %v572_v33 }
  0x64   : > { %v9680_v40 = vld [vmem:[#allocation2 + $0x30] sm:$0xe]  ;;  %v2251_v38 = vshrl.u32 %v2139_v37, 16  ;;  %v2254_v43 = vshll.u32 %v2139_v37, 16  ;;  %v8588_v47 = vcombine.low %v2239_v36, %v2249_v42  ;;  %v849_v19 = vld [vmem:[#allocation2 + $0x38] sm:$0x1]  ;;  %v583_v60 = vor.u32 %v581_v34, %v580_v53 }
  0x65   : > { %v3180_v45 = vld [vmem:[#allocation2 + $0x30] sm:$0xf]  ;;  %v8605_v48 = vrot.slane %v9680_v40, 9  ;;  %v850_v50 = vsel %vm9445_vm3, %v568_v13, %v849_v19  ;;  %v585_v63 = vrot.slane %v580_v53, 4  ;;  %vm1612_vm1 = vcmask 64544  }
  0x66   : > { %v2253_v51 = vrot.slane %v2251_v38, 4  ;;  %v2256_v52 = vrot.slane %v2254_v43, 5  ;;  %v9183_v54 = vld [vmem:[#allocation2 + $0x30] sm:$0xff]   ;;  %2614 = vrot.lane.b32.xlu0 %v8588_v47, %s9356_s16  ;;  %851 = vst [vmem:[#allocation2 + $0x38] sm:$0x1] %v850_v50  ;;  %v3271_v59 = vshrl.u32 %v3180_v45, 16  ;;  %v584_v9 = vsel %vm9482_vm7, %v576_v49, %v583_v60 }
  0x67   : > { %v2140_v55 = vld [vmem:[#allocation2 + $0x34] sm:$0xf]  ;;  %2071 = vrot.lane.b32.xlu1 %v9183_v54, %s9350_s10  ;;  %v852_v1 = vld [vmem:[#allocation2 + $0x3c] sm:$0xf]  ;;  %v3725_v2 = vld [vmem:[#allocation2 + $0x30] sm:$0xe] }
  0x68   : > { %v2257_v20 = vor.u32 %v2256_v52, %v2253_v51  ;;  %v2260_v6 = vshll.u32 %v2140_v55, 16  ;;  %v2264_v56 = vshrl.u32 %v2140_v55, 16  ;;  %v2685_v46 = vld [vmem:[#allocation2 + $0x34] sm:$0xf]  ;;  %v3273_v12 = vrot.slane %v3271_v59, 4 }
  0x69   : > { %v2794_v61 = vrot.slane %v2685_v46, 5  ;;  %v9184_v8 = vld [vmem:[#allocation2 + $0x30] sm:$0xff]   ;;  %v853_v14 = vsel %vm9490_vm10, %v575_v58, %v852_v1  ;;  %855 = vst.msk [vmem:[#allocation2 + $0x40] sm:$0xf] %vm225_vm0, %v584_v9  ;;  %v3274_v15 = vshll.u32 %v3180_v45, 16  ;;  %v8668_v27 = vrot.slane %v3725_v2, 9 }
  0x6a   : > { %v2262_v5 = vrot.slane %v2260_v6, 5  ;;  %v2266_v7 = vrot.slane %v2264_v56, 4  ;;  %v3181_v11 = vld [vmem:[#allocation2 + $0x34] sm:$0xf]  ;;  %v2258_v13 = vrot.slane %v2257_v20, 4  ;;  %2935 = vrot.lane.b32.xlu0 %v8620_v57, %s9354_s14  ;;  %vm1936_vm5 = vcmask 97344  }
  0x6b   : > { %v856_v17 = vld [vmem:[#allocation2 + $0x44] sm:$0x1]  ;;  %v3726_v18 = vld [vmem:[#allocation2 + $0x34] sm:$0xf]  ;;  %v2796_v23 = vrot.slane %v2794_v61, 4  ;;  %v3280_v24 = vshll.u32 %v3181_v11, 16  ;;  %v2795_v40 = vsel %vm9526_vm13, %v8605_v48, %v2794_v61 }
  0x6c   : > { %v2267_v22 = vor.u32 %v2266_v7, %v2262_v5  ;;  %854 = vst [vmem:[#allocation2 + $0x3c] sm:$0xf] %v853_v14  ;;  %v3284_v25 = vshrl.u32 %v3181_v11, 16  ;;  %v3276_v62 = vrot.slane %v3274_v15, 5  ;;  %v857_v26 = vsel %vm9445_vm3, %v585_v63, %v856_v17  ;;  %v1093_v49 = vld [vmem:[#allocation2 + $0x30] sm:$0xf] }
  0x6d   : > { %v3831_v28 = vrot.slane %v3726_v18, 5  ;;  %v2141_v30 = vld [vmem:[#allocation2 + $0x38] sm:$0x1]  ;;  %v3282_v32 = vrot.slane %v3280_v24, 5  ;;  %858 = vst [vmem:[#allocation2 + $0x44] sm:$0x1] %v857_v26  ;;  %v2263_v39 = vsel %vm9562_vm14, %v2258_v13, %v2262_v5 }
  0x6e   : > { %v2268_v29 = vrot.slane %v2267_v22, 4  ;;  %v2686_v31 = vld [vmem:[#allocation2 + $0x38] sm:$0x1]  ;;  %v2270_v33 = vshll.u32 %v2141_v30, 16  ;;  %3113 = vrot.lane.b32.xlu0 %v9184_v8, %s9352_s12  ;;  %v3277_v36 = vor.u32 %v3276_v62, %v3273_v12  ;;  %v3286_v37 = vrot.slane %v3284_v25, 4 }
  0x6f   : > { %v2797_v34 = vrot.slane %v2686_v31, 5  ;;  %v3182_v35 = vld [vmem:[#allocation2 + $0x38] sm:$0x1]  ;;  %v3833_v43 = vrot.slane %v3831_v28, 4  ;;  %v3832_v52 = vsel %vm9526_vm13, %v8668_v27, %v3831_v28  ;;  %v1094_v46 = vld [vmem:[#allocation2 + $0x34] sm:$0xf] }
  0x70   : > { %v3290_v42 = vshll.u32 %v3182_v35, 16  ;;  %v3727_v38 = vld [vmem:[#allocation2 + $0x38] sm:$0x1]  ;;  %v2272_v44 = vrot.slane %v2270_v33, 5  ;;  %v3278_v47 = vrot.slane %v3277_v36, 4  ;;  %v3287_v19 = vor.u32 %v3286_v37, %v3282_v32 }
  0x71   : > { %v2798_v45 = vsel %vm9526_vm13, %v2796_v23, %v2797_v34  ;;  %v3184_v51 = vld [vmem:[#allocation2 + $0x40] sm:$0xf]  ;;  %v3834_v53 = vrot.slane %v3727_v38, 5  ;;  %v1095_v2 = vld [vmem:[#allocation2 + $0x38] sm:$0x1]  ;;  %v1229_v5 = vshrl.u32 %v1093_v49, 16 }
  0x72   : > { %v3292_v50 = vrot.slane %v3290_v42, 5  ;;  %v2273_v54 = vsel %vm9562_vm14, %v2268_v29, %v2272_v44  ;;  %v8621_v48 = vcombine.low %v2795_v40, %v2798_v45  ;;  %v3283_v55 = vsel %vm9562_vm14, %v3278_v47, %v3282_v32  ;;  %v3729_v18 = vld [vmem:[#allocation2 + $0x40] sm:$0xf] }
  0x73   : > { %v3288_v57 = vrot.slane %v3287_v19, 4  ;;  %v3183_v58 = vld [vmem:[#allocation2 + $0x3c] sm:$0xf]  ;;  %v8589_v59 = vcombine.low %v2263_v39, %v2273_v54  ;;  %v3304_v56 = vshll.u32 %v3184_v51, 16  ;;  %v3308_v63 = vshrl.u32 %v3184_v51, 16 }
  0x74   : > { %v3295_v20 = vshrl.u32 %v3183_v58, 16  ;;  %v3298_v6 = vshll.u32 %v3183_v58, 16  ;;  %v3185_v61 = vld [vmem:[#allocation2 + $0x44] sm:$0x1]  ;;  %v3835_v1 = vsel %vm9526_vm13, %v3833_v43, %v3834_v53  ;;  %v3728_v12 = vld [vmem:[#allocation2 + $0x3c] sm:$0xe] }
  0x75   : > { %v3293_v60 = vsel %vm9562_vm14, %v3288_v57, %v3292_v50  ;;  %2616 = vrot.lane.b32.xlu1 %v8589_v59, %s9356_s16  ;;  %v3306_v11 = vrot.slane %v3304_v56, 5  ;;  %v3310_v13 = vrot.slane %v3308_v63, 4  ;;  %v3314_v14 = vshll.u32 %v3185_v61, 16  ;;  %v3730_v62 = vld [vmem:[#allocation2 + $0x44] sm:$0x1]  ;;  %v9185_v31 = vld [vmem:[#allocation2 + $0x3c] sm:$0xff]  }
  0x76   : > { %v8652_v7 = vcombine.low %v3283_v55, %v3293_v60  ;;  %v3297_v8 = vrot.slane %v3295_v20, 4  ;;  %v3300_v9 = vrot.slane %v3298_v6, 5  ;;  %v8684_v15 = vcombine.low %v3832_v52, %v3835_v1  ;;  %v1096_v29 = vld [vmem:[#allocation2 + $0x3c] sm:$0xf]  ;;  %v1097_v44 = vld [vmem:[#allocation2 + $0x40] sm:$0xf] }
  0x77   : > { %v1231_v17 = vrot.slane %v1229_v5, 4  ;;  %v1232_v23 = vshll.u32 %v1093_v49, 16  ;;  %v1238_v24 = vshll.u32 %v1094_v46, 16  ;;  %v1242_v25 = vshrl.u32 %v1094_v46, 16  ;;  %v1098_v50 = vld [vmem:[#allocation2 + $0x44] sm:$0x1] }
  0x78   : > { %3658 = vrot.lane.b32.xlu0 %v8652_v7, %s9357_s17  ;;  %v3301_v22 = vor.u32 %v3300_v9, %v3297_v8  ;;  %v3311_v26 = vor.u32 %v3310_v13, %v3306_v11  ;;  %v3316_v27 = vrot.slane %v3314_v14, 5  ;;  %v1248_v28 = vshll.u32 %v1095_v2, 16  ;;  %v1641_v52 = vld [vmem:[#allocation2 + $0x30] sm:$0xe]  ;;  %v1642_v57 = vld [vmem:[#allocation2 + $0x34] sm:$0xf] }
  0x79   : > { %v8669_v30 = vrot.slane %v3728_v12, 9  ;;  %2937 = vrot.lane.b32.xlu1 %v8621_v48, %s9354_s14  ;;  %v1234_v33 = vrot.slane %v1232_v23, 5  ;;  %v1240_v34 = vrot.slane %v1238_v24, 5  ;;  %v1244_v35 = vrot.slane %v1242_v25, 4  ;;  %v1643_v56 = vld [vmem:[#allocation2 + $0x38] sm:$0x1] }
  0x7a   : > { %v3302_v32 = vrot.slane %v3301_v22, 4  ;;  %v3312_v36 = vrot.slane %v3311_v26, 4  ;;  %v1250_v37 = vrot.slane %v1248_v28, 5  ;;  %v3838_v39 = vrot.slane %v3729_v18, 5  ;;  %v255_v46 = vld [vmem:[#allocation2 + $0x48] sm:$0x1] }
  0x7b   : > { %v3841_v40 = vrot.slane %v3730_v62, 5  ;;  %v1235_v38 = vor.u32 %v1234_v33, %v1231_v17  ;;  %v1245_v43 = vor.u32 %v1244_v35, %v1240_v34  ;;  %v1253_v45 = vshrl.u32 %v1096_v29, 16  ;;  %v1644_v2 = vld [vmem:[#allocation2 + $0x3c] sm:$0xe]  ;;  %v1645_v5 = vld [vmem:[#allocation2 + $0x40] sm:$0xf] }
  0x7c   : > { %v3307_v42 = vsel %vm9562_vm14, %v3302_v32, %v3306_v11  ;;  %3979 = vrot.lane.b32.xlu0 %v8684_v15, %s9355_s15  ;;  %v3317_v47 = vsel %vm9562_vm14, %v3312_v36, %v3316_v27  ;;  %v3839_v19 = vsel %vm9526_vm13, %v8669_v30, %v3838_v39  ;;  %v3840_v49 = vrot.slane %v3838_v39, 4  ;;  %v1646_v12 = vld [vmem:[#allocation2 + $0x44] sm:$0x1]  ;;  %v477_v13 = vld [vmem:[%s9469_s9 + $0x28] sm:$0xf] }
  0x7d   : > { %v1256_v51 = vshll.u32 %v1096_v29, 16  ;;  %3115 = vrot.lane.b32.xlu1 %v9185_v31, %s9352_s12  ;;  %v8653_v53 = vcombine.low %v3307_v42, %v3317_v47  ;;  %v1236_v54 = vrot.slane %v1235_v38, 4  ;;  %v1246_v48 = vrot.slane %v1245_v43, 4  ;;  %v478_v22 = vld [vmem:[%s9469_s9 + $0x2c] sm:$0xf]  ;;  %v9199_v36 = vld [vmem:[%s12023_s1] sm:$0xff]  }
  0x7e   : > { %v1255_v55 = vrot.slane %v1253_v45, 4  ;;  %v3842_v58 = vsel %vm9526_vm13, %v3840_v49, %v3841_v40  ;;  %v1262_v20 = vshll.u32 %v1097_v44, 16  ;;  %v1266_v6 = vshrl.u32 %v1097_v44, 16  ;;  %v2142_v29 = vld [vmem:[#allocation2 + $0x3c] sm:$0xf]  ;;  %9043 = vmatprep.subr.bf16.mxu0 %v9199_v36 }
  0x7f   : > { %v1258_v59 = vrot.slane %v1256_v51, 5  ;;  %v1241_v60 = vsel %vm9562_vm14, %v1236_v54, %v1240_v34  ;;  %v1251_v61 = vsel %vm9562_vm14, %v1246_v48, %v1250_v37  ;;  %v8685_v63 = vcombine.low %v3839_v19, %v3842_v58  ;;  %v2143_v31 = vld [vmem:[#allocation2 + $0x40] sm:$0xf]  ;;  %v2144_v47 = vld [vmem:[#allocation2 + $0x44] sm:$0x1]  ;;  %9044 = vmatpush3.bf16.msra.mxu0 %v9199_v36 }
  0x80   : > { %v1272_v1 = vshll.u32 %v1098_v50, 16  ;;  %v8526_v7 = vcombine.low %v1241_v60, %v1251_v61  ;;  %v1264_v9 = vrot.slane %v1262_v20, 5  ;;  %v1268_v11 = vrot.slane %v1266_v6, 4  ;;  %v311_v19 = vld [vmem:[#allocation2 + $0x50] sm:$0x1]  ;;  %v9202_v20 = vld [vmem:[%s12023_s1 + $0x8] sm:$0xff]  }
  0x81   : > { %v1259_v8 = vor.u32 %v1258_v59, %v1255_v55  ;;  %3660 = vrot.lane.b32.xlu1 %v8653_v53, %s9357_s17  ;;  %3981 = vrot.lane.b32.xlu0 %v8685_v63, %s9355_s15  ;;  %v8542_v15 = vrot.slane %v1641_v52, 9  ;;  %v1758_v17 = vrot.slane %v1642_v57, 5  ;;  %v1761_v18 = vrot.slane %v1643_v56, 5  ;;  %v2687_v52 = vld [vmem:[#allocation2 + $0x3c] sm:$0xe] }
  0x82   : > { %v1274_v14 = vrot.slane %v1272_v1, 5  ;;  %v1269_v24 = vor.u32 %v1268_v11, %v1264_v9  ;;  %v8543_v25 = vrot.slane %v1644_v2, 9  ;;  %v1765_v62 = vrot.slane %v1645_v5, 5  ;;  %v9186_v53 = vld [vmem:[#allocation2 + $0x3c] sm:$0xff]   ;;  %v258_v58 = vld [vmem:[#allocation2 + $0x54] sm:$0x1]  ;;  %9045 = vmatprep.subr.bf16.mxu0 %v9202_v20 }
  0x83   : > { %v1260_v23 = vrot.slane %v1259_v8, 4  ;;  %v1759_v26 = vsel %vm9526_vm13, %v8542_v15, %v1758_v17  ;;  %v1760_v27 = vrot.slane %v1758_v17, 4  ;;  %v1768_v28 = vrot.slane %v1646_v12, 5  ;;  %v9759_v59 = vld [vmem:[%s9469_s9 + $0x30] sm:$0xf]  ;;  %9046 = vmatpush3.bf16.msra.mxu0 %v9202_v20 }
  0x84   : > { %v256_v30 = vsel %vm9445_vm3, 0, %v255_v46  ;;  %v1270_v33 = vrot.slane %v1269_v24, 4  ;;  %v1766_v34 = vsel %vm9526_vm13, %v8543_v25, %v1765_v62  ;;  %v1767_v35 = vrot.slane %v1765_v62, 4  ;;  %v2688_v61 = vld [vmem:[#allocation2 + $0x40] sm:$0xf] }
  0x85   : > { %v1265_v32 = vsel %vm9562_vm14, %v1260_v23, %v1264_v9  ;;  %257 = vst [vmem:[#allocation2 + $0x48] sm:$0x1] %v256_v30  ;;  %1572 = vrot.lane.b32.xlu1 %v8526_v7, %s9353_s13  ;;  %v1762_v37 = vsel %vm9526_vm13, %v1760_v27, %v1761_v18  ;;  %v587_v39 = vshrl.u32 %v477_v13, 16  ;;  %v590_v40 = vshll.u32 %v477_v13, 16  ;;  %v2689_v63 = vld [vmem:[#allocation2 + $0x44] sm:$0x1] }
  0x86   : > { %v595_v42 = vshrl.u32 %v478_v22, 16  ;;  %v1275_v38 = vsel %vm9562_vm14, %v1270_v33, %v1274_v14  ;;  %v8558_v43 = vcombine.low %v1759_v26, %v1762_v37  ;;  %v1769_v44 = vsel %vm9526_vm13, %v1767_v35, %v1768_v28  ;;  %v480_v8 = vld [vmem:[%s9469_s9 + $0x34] sm:$0xf]  ;;  %v314_v23 = vld [vmem:[#allocation2 + $0x5c] sm:$0x1] }
  0x87   : > { %v598_v45 = vshll.u32 %v478_v22, 16  ;;  %v8527_v49 = vcombine.low %v1265_v32, %v1275_v38  ;;  %v589_v50 = vrot.slane %v587_v39, 7  ;;  %v2275_v54 = vshrl.u32 %v2142_v29, 16  ;;  %v261_v27 = vld [vmem:[#allocation2 + $0x60] sm:$0x1] }
  0x88   : > { %v9755_v51 = vrot.slane %v595_v42, 7  ;;  %1896 = vrot.lane.b32.xlu0 %v8558_v43, %s9351_s11  ;;  %v2278_v48 = vshll.u32 %v2142_v29, 16  ;;  %v2284_v55 = vshll.u32 %v2143_v31, 16  ;;  %v2288_v57 = vshrl.u32 %v2143_v31, 16  ;;  %v9780_v28 = vld [vmem:[%s9469_s9 + $0x38] sm:$0xf] }
  0x89   : > { %1574 = vrot.lane.b32.xlu1 %v8527_v49, %s9353_s13  ;;  %v8559_v6 = vcombine.low %v1766_v34, %v1769_v44  ;;  %v592_v56 = vor.u32 %v590_v40, %v589_v50  ;;  %v593_v46 = vrot.slane %v589_v50, 4  ;;  %v2277_v1 = vrot.slane %v2275_v54, 4 }
  0x8a   : > { %v600_v60 = vor.u32 %v598_v45, %v9755_v51  ;;  %v2280_v2 = vrot.slane %v2278_v48, 5  ;;  %v2286_v5 = vrot.slane %v2284_v55, 5  ;;  %v2290_v7 = vrot.slane %v2288_v57, 4 }
  0x8b   : > { %v2294_v12 = vshll.u32 %v2144_v47, 16  ;;  %v312_v13 = vsel %vm9476_vm6, 0, %v311_v19  ;;  %v8606_v14 = vrot.slane %v2687_v52, 9  ;;  %v2801_v22 = vrot.slane %v2688_v61, 5 }
  0x8c   : > { %v601_v9 = vsel %vm9482_vm7, %v593_v46, %v600_v60  ;;  %v859_v11 = vld [vmem:[#allocation2 + $0x48] sm:$0xf]  ;;  %2073 = vrot.lane.b32.xlu0 %v9186_v53, %s9350_s10  ;;  %v2281_v17 = vor.u32 %v2280_v2, %v2277_v1  ;;  %v2291_v18 = vor.u32 %v2290_v7, %v2286_v5  ;;  %313 = vst [vmem:[#allocation2 + $0x50] sm:$0x1] %v312_v13  ;;  %v2804_v25 = vrot.slane %v2689_v63, 5 }
  0x8d   : > { %v860_v15 = vsel %vm9490_vm10, %v592_v56, %v859_v11  ;;  %862 = vst.msk [vmem:[#allocation2 + $0x4c] sm:$0xf] %vm225_vm0, %v601_v9  ;;  %1898 = vrot.lane.b32.xlu1 %v8559_v6, %s9351_s11  ;;  %v2296_v24 = vrot.slane %v2294_v12, 5  ;;  %v259_v62 = vsel %vm9445_vm3, 0, %v258_v58  ;;  %v604_v26 = vshrl.u32 %v9759_v59, 16 }
  0x8e   : > { %861 = vst [vmem:[#allocation2 + $0x48] sm:$0xf] %v860_v15  ;;  %v602_v30 = vrot.slane %v9755_v51, 4  ;;  %v2282_v29 = vrot.slane %v2281_v17, 4  ;;  %v2292_v31 = vrot.slane %v2291_v18, 4  ;;  %v2803_v32 = vrot.slane %v2801_v22, 4 }
  0x8f   : > { %260 = vst [vmem:[#allocation2 + $0x54] sm:$0x1] %v259_v62  ;;  %v2802_v33 = vsel %vm9526_vm13, %v8606_v14, %v2801_v22  ;;  %v606_v34 = vrot.slane %v604_v26, 7  ;;  %v612_v35 = vshrl.u32 %v480_v8, 16  ;;  %v615_v36 = vshll.u32 %v480_v8, 16 }
  0x90   : > { %v2287_v37 = vsel %vm9562_vm14, %v2282_v29, %v2286_v5  ;;  %v2297_v39 = vsel %vm9562_vm14, %v2292_v31, %v2296_v24  ;;  %v2805_v40 = vsel %vm9526_vm13, %v2803_v32, %v2804_v25  ;;  %v315_v42 = vsel %vm9476_vm6, 0, %v314_v23 }
  0x91   : > { %v8590_v38 = vcombine.low %v2287_v37, %v2297_v39  ;;  %v607_v43 = vshll.u32 %v9759_v59, 16  ;;  %316 = vst [vmem:[#allocation2 + $0x5c] sm:$0x1] %v315_v42  ;;  %v610_v44 = vrot.slane %v606_v34, 4  ;;  %v614_v45 = vrot.slane %v612_v35, 7 }
  0x92   : > { %v262_v47 = vsel %vm9445_vm3, 0, %v261_v27  ;;  %v621_v19 = vshrl.u32 %v9780_v28, 16  ;;  %v8622_v51 = vcombine.low %v2802_v33, %v2805_v40  ;;  %v624_v6 = vshll.u32 %v9780_v28, 16 }
  0x93   : > { %2618 = vrot.lane.b32.xlu0 %v8590_v38, %s9356_s16  ;;  %v863_v49 = vld [vmem:[#allocation2 + $0x50] sm:$0x1]  ;;  %263 = vst [vmem:[#allocation2 + $0x60] sm:$0x1] %v262_v47  ;;  %v617_v55 = vor.u32 %v615_v36, %v614_v45  ;;  %v609_v61 = vor.u32 %v607_v43, %v606_v34  ;;  %v619_v9 = vrot.slane %v614_v45, 4  ;;  %vm12031_vm8 = vcmask 130144  }
  0x94   : > { %v2146_v50 = vld [vmem:[#allocation2 + $0x4c] sm:$0xf]  ;;  %v864_v53 = vsel %vm9445_vm3, %v602_v30, %v863_v49  ;;  %v9809_v22 = vrot.slane %v621_v19, 7  ;;  %vm12034_vm9 = vcmask 162944   ;;  %vm12033_vm11 = vcmask 195744  }
  0x95   : > { %v9187_v52 = vld [vmem:[#allocation2 + $0x48] sm:$0xff]   ;;  %v2308_v48 = vshll.u32 %v2146_v50, 16  ;;  %865 = vst [vmem:[#allocation2 + $0x50] sm:$0x1] %v864_v53  ;;  %v2312_v59 = vshrl.u32 %v2146_v50, 16  ;;  %v618_v63 = vsel %vm9482_vm7, %v610_v44, %v617_v55  ;;  %vm12032_vm12 = vcmask 228544  }
  0x96   : > { %v2145_v54 = vld [vmem:[#allocation2 + $0x48] sm:$0xf]  ;;  %2075 = vrot.lane.b32.xlu1 %v9187_v52, %s9350_s10  ;;  %v2691_v46 = vld [vmem:[#allocation2 + $0x4c] sm:$0xf]  ;;  %869 = vst.msk [vmem:[#allocation2 + $0x58] sm:$0xf] %vm225_vm0, %v618_v63 }
  0x97   : > { %v2299_v57 = vshrl.u32 %v2145_v54, 16  ;;  %v2302_v58 = vshll.u32 %v2145_v54, 16  ;;  %v2690_v20 = vld [vmem:[#allocation2 + $0x48] sm:$0xe]  ;;  %v9802_v56 = vrot.slane %v2308_v48, 5  ;;  %v2314_v5 = vrot.slane %v2312_v59, 4  ;;  %2939 = vrot.lane.b32.xlu0 %v8622_v51, %s9354_s14 }
  0x98   : > { %v9188_v60 = vld [vmem:[#allocation2 + $0x48] sm:$0xff]   ;;  %v2808_v7 = vrot.slane %v2691_v46, 5  ;;  %v8607_v8 = vrot.slane %v2690_v20, 9  ;;  %v866_v11 = vld [vmem:[#allocation2 + $0x54] sm:$0xf]  ;;  %vm3702_vm4 = vcmask 261344  }
  0x99   : > { %v2301_v1 = vrot.slane %v2299_v57, 4  ;;  %v2304_v2 = vrot.slane %v2302_v58, 5  ;;  %v3186_v12 = vld [vmem:[#allocation2 + $0x48] sm:$0xf]  ;;  %v2315_v14 = vor.u32 %v2314_v5, %v9802_v56  ;;  %v3187_v17 = vld [vmem:[#allocation2 + $0x4c] sm:$0xf]  ;;  %v867_v24 = vsel %vm9490_vm10, %v609_v61, %v866_v11 }
  0x9a   : > { %v2810_v15 = vrot.slane %v2808_v7, 4  ;;  %v870_v18 = vld [vmem:[#allocation2 + $0x5c] sm:$0x1]  ;;  %v3319_v25 = vshrl.u32 %v3186_v12, 16  ;;  %v3322_v62 = vshll.u32 %v3186_v12, 16  ;;  %v3328_v26 = vshll.u32 %v3187_v17, 16 }
  0x9b   : > { %v2305_v13 = vor.u32 %v2304_v2, %v2301_v1  ;;  %v9811_v23 = vpop.permute.xlu0 %2065  ;;  %3117 = vrot.lane.b32.xlu0 %v9188_v60, %s9352_s12  ;;  %868 = vst [vmem:[#allocation2 + $0x54] sm:$0xf] %v867_v24  ;;  %v3332_v30 = vshrl.u32 %v3187_v17, 16  ;;  %v871_v29 = vsel %vm9445_vm3, %v619_v9, %v870_v18  ;;  %v3731_v31 = vld [vmem:[#allocation2 + $0x48] sm:$0xe]  ;;  %v9820_v35 = vsel %vm9526_vm13, %v8607_v8, %v2808_v7 }
  0x9c   : > { %v3732_v32 = vld [vmem:[#allocation2 + $0x4c] sm:$0xf]  ;;  %v2147_v33 = vld [vmem:[#allocation2 + $0x50] sm:$0x1]  ;;  %872 = vst [vmem:[#allocation2 + $0x5c] sm:$0x1] %v871_v29 }
  0x9d   : > { %v2306_v27 = vrot.slane %v2305_v13, 4  ;;  %v2692_v34 = vld [vmem:[#allocation2 + $0x50] sm:$0x1]  ;;  %v2316_v37 = vrot.slane %v2315_v14, 4  ;;  %v2318_v39 = vshll.u32 %v2147_v33, 16  ;;  %v3321_v42 = vrot.slane %v3319_v25, 4  ;;  %v9822_v38 = vpop.permute.xlu1 %1888 }
  0x9e   : > { %v3188_v36 = vld [vmem:[#allocation2 + $0x50] sm:$0x1]  ;;  %v2811_v40 = vrot.slane %v2692_v34, 5  ;;  %v3324_v43 = vrot.slane %v3322_v62, 5  ;;  %v3330_v44 = vrot.slane %v3328_v26, 5  ;;  %v3334_v45 = vrot.slane %v3332_v30, 4 }
  0x9f   : > { %v3338_v47 = vshll.u32 %v3188_v36, 16  ;;  %v2311_v19 = vsel %vm9562_vm14, %v2306_v27, %v9802_v56  ;;  %v2320_v49 = vrot.slane %v2318_v39, 5  ;;  %v3190_v50 = vld [vmem:[#allocation2 + $0x58] sm:$0xf]  ;;  %v8670_v51 = vrot.slane %v3731_v31, 9  ;;  %v9827_v53 = vpop.permute.xlu0 %3109 }
  0xa0   : > { %v3845_v52 = vrot.slane %v3732_v32, 5  ;;  %v2812_v54 = vsel %vm9526_vm13, %v2810_v15, %v2811_v40  ;;  %v3325_v48 = vor.u32 %v3324_v43, %v3321_v42  ;;  %v3335_v55 = vor.u32 %v3334_v45, %v3330_v44  ;;  %v3733_v46 = vld [vmem:[#allocation2 + $0x50] sm:$0x1]  ;;  %v1099_v60 = vld [vmem:[#allocation2 + $0x48] sm:$0xf] }
  0xa1   : > { %v3340_v57 = vrot.slane %v3338_v47, 5  ;;  %v2321_v58 = vsel %vm9562_vm14, %v2316_v37, %v2320_v49  ;;  %v3352_v59 = vshll.u32 %v3190_v50, 16  ;;  %v3356_v20 = vshrl.u32 %v3190_v50, 16  ;;  %v9841_v13 = vpop.permute.xlu1 %2067  ;;  %v1100_v17 = vld [vmem:[#allocation2 + $0x4c] sm:$0xf] }
  0xa2   : > { %v9836_v56 = vor.u32 %v624_v6, %v9809_v22  ;;  %v8591_v61 = vcombine.low %v2311_v19, %v2321_v58  ;;  %v3326_v63 = vrot.slane %v3325_v48, 4  ;;  %v3336_v1 = vrot.slane %v3335_v55, 4  ;;  %v3189_v7 = vld [vmem:[#allocation2 + $0x54] sm:$0xf]  ;;  %v1101_v26 = vld [vmem:[#allocation2 + $0x50] sm:$0x1] }
  0xa3   : > { %v3847_v2 = vrot.slane %v3845_v52, 4  ;;  %v8623_v5 = vcombine.low %v9820_v35, %v2812_v54  ;;  %v3191_v8 = vld [vmem:[#allocation2 + $0x5c] sm:$0x1]  ;;  %v3354_v9 = vrot.slane %v3352_v59, 5  ;;  %v3358_v11 = vrot.slane %v3356_v20, 4  ;;  %v9189_v34 = vld [vmem:[#allocation2 + $0x54] sm:$0xff]  }
  0xa4   : > { %v3846_v12 = vsel %vm9526_vm13, %v8670_v51, %v3845_v52  ;;  %2620 = vrot.lane.b32.xlu1 %v8591_v61, %s9356_s16  ;;  %v3331_v28 = vsel %vm9562_vm14, %v3326_v63, %v3330_v44  ;;  %v3341_v6 = vsel %vm9562_vm14, %v3336_v1, %v3340_v57  ;;  %v3343_v14 = vshrl.u32 %v3189_v7, 16  ;;  %v3735_v33 = vld [vmem:[#allocation2 + $0x58] sm:$0xf]  ;;  %v3734_v40 = vld [vmem:[#allocation2 + $0x54] sm:$0xe] }
  0xa5   : > { %v3346_v15 = vshll.u32 %v3189_v7, 16  ;;  %v8654_v18 = vcombine.low %v3331_v28, %v3341_v6  ;;  %v3359_v24 = vor.u32 %v3358_v11, %v3354_v9  ;;  %v3362_v25 = vshll.u32 %v3191_v8, 16  ;;  %v9848_v27 = vpop.permute.xlu0 %1564  ;;  %v3736_v47 = vld [vmem:[#allocation2 + $0x5c] sm:$0x1]  ;;  %v1102_v19 = vld [vmem:[#allocation2 + $0x54] sm:$0xf]  ;;  %v9856_v54 = vpop.permute.xlu1 %3111 }
  0xa6   : > { %v3848_v62 = vrot.slane %v3733_v46, 5  ;;  %v3345_v30 = vrot.slane %v3343_v14, 4  ;;  %v1277_v31 = vshrl.u32 %v1099_v60, 16  ;;  %v1280_v32 = vshll.u32 %v1099_v60, 16  ;;  %v1103_v59 = vld [vmem:[#allocation2 + $0x58] sm:$0xf] }
  0xa7   : > { %v3348_v29 = vrot.slane %v3346_v15, 5  ;;  %3662 = vrot.lane.b32.xlu0 %v8654_v18, %s9357_s17  ;;  %v3360_v35 = vrot.slane %v3359_v24, 4  ;;  %v3364_v36 = vrot.slane %v3362_v25, 5  ;;  %v1286_v39 = vshll.u32 %v1100_v17, 16  ;;  %v1104_v61 = vld [vmem:[#allocation2 + $0x5c] sm:$0x1] }
  0xa8   : > { %v3849_v37 = vsel %vm9526_vm13, %v3847_v2, %v3848_v62  ;;  %2941 = vrot.lane.b32.xlu1 %v8623_v5, %s9354_s14  ;;  %v1279_v44 = vrot.slane %v1277_v31, 4  ;;  %v1282_v45 = vrot.slane %v1280_v32, 5  ;;  %v1290_v51 = vshrl.u32 %v1100_v17, 16  ;;  %v1647_v14 = vld [vmem:[#allocation2 + $0x48] sm:$0xe] }
  0xa9   : > { %v3349_v42 = vor.u32 %v3348_v29, %v3345_v30  ;;  %v8686_v43 = vcombine.low %v3846_v12, %v3849_v37  ;;  %v3365_v49 = vsel %vm9562_vm14, %v3360_v35, %v3364_v36  ;;  %v1288_v50 = vrot.slane %v1286_v39, 5  ;;  %v1648_v15 = vld [vmem:[#allocation2 + $0x4c] sm:$0xf]  ;;  %v1650_v62 = vld [vmem:[#allocation2 + $0x54] sm:$0xe] }
  0xaa   : > { %v1296_v52 = vshll.u32 %v1101_v26, 16  ;;  %v1283_v55 = vor.u32 %v1282_v45, %v1279_v44  ;;  %v8671_v57 = vrot.slane %v3734_v40, 9  ;;  %v3852_v58 = vrot.slane %v3735_v33, 5  ;;  %v1651_v32 = vld [vmem:[#allocation2 + $0x58] sm:$0xf] }
  0xab   : > { %v3350_v48 = vrot.slane %v3349_v42, 4  ;;  %3983 = vrot.lane.b32.xlu0 %v8686_v43, %s9355_s15  ;;  %v1292_v20 = vrot.slane %v1290_v51, 4  ;;  %v3855_v60 = vrot.slane %v3736_v47, 5  ;;  %v1301_v63 = vshrl.u32 %v1102_v19, 16  ;;  %v1652_v39 = vld [vmem:[#allocation2 + $0x5c] sm:$0x1] }
  0xac   : > { %v1298_v46 = vrot.slane %v1296_v52, 5  ;;  %v9859_v1 = vpop.permute.xlu0 %2931  ;;  %3119 = vrot.lane.b32.xlu1 %v9189_v34, %s9352_s12  ;;  %v1284_v5 = vrot.slane %v1283_v55, 4  ;;  %v3853_v7 = vsel %vm9526_vm13, %v8671_v57, %v3852_v58  ;;  %v3854_v8 = vrot.slane %v3852_v58, 4  ;;  %v482_v47 = vld [vmem:[%s9469_s9 + $0x3c] sm:$0xf] }
  0xad   : > { %v3355_v2 = vsel %vm9562_vm14, %v3350_v48, %v3354_v9  ;;  %v1293_v12 = vor.u32 %v1292_v20, %v1288_v50  ;;  %v1303_v28 = vrot.slane %v1301_v63, 4  ;;  %v1304_v6 = vshll.u32 %v1102_v19, 16  ;;  %v1649_v9 = vld [vmem:[#allocation2 + $0x50] sm:$0x1]  ;;  %v9870_v33 = vpop.permute.xlu1 %1890  ;;  %v873_v58 = vld [vmem:[#allocation2 + $0x60] sm:$0xf] }
  0xae   : > { %v8655_v11 = vcombine.low %v3355_v2, %v3365_v49  ;;  %v1289_v17 = vsel %vm9562_vm14, %v1284_v5, %v1288_v50  ;;  %v3856_v18 = vsel %vm9526_vm13, %v3854_v8, %v3855_v60  ;;  %v1310_v24 = vshll.u32 %v1103_v59, 16  ;;  %v9190_v8 = vld [vmem:[#allocation2 + $0x54] sm:$0xff]  }
  0xaf   : > { %v1314_v25 = vshrl.u32 %v1103_v59, 16  ;;  %v1294_v26 = vrot.slane %v1293_v12, 4  ;;  %v8687_v30 = vcombine.low %v3853_v7, %v3856_v18  ;;  %v1306_v29 = vrot.slane %v1304_v6, 5  ;;  %v2150_v12 = vld [vmem:[#allocation2 + $0x5c] sm:$0x1] }
  0xb0   : > { %v1320_v31 = vshll.u32 %v1104_v61, 16  ;;  %3664 = vrot.lane.b32.xlu1 %v8655_v11, %s9357_s17  ;;  %v1312_v34 = vrot.slane %v1310_v24, 5  ;;  %v8544_v36 = vrot.slane %v1647_v14, 9  ;;  %v1772_v37 = vrot.slane %v1648_v15, 5  ;;  %v9873_v40 = vpop.permute.xlu0 %3975  ;;  %v2148_v61 = vld [vmem:[#allocation2 + $0x54] sm:$0xf] }
  0xb1   : > { %v1316_v35 = vrot.slane %v1314_v25, 4  ;;  %v1299_v42 = vsel %vm9562_vm14, %v1294_v26, %v1298_v46  ;;  %3985 = vrot.lane.b32.xlu0 %v8687_v30, %s9355_s15  ;;  %v1307_v43 = vor.u32 %v1306_v29, %v1303_v28  ;;  %v1775_v45 = vrot.slane %v1649_v9, 5  ;;  %v2149_v11 = vld [vmem:[#allocation2 + $0x58] sm:$0xf]  ;;  %v317_v28 = vld [vmem:[#allocation2 + $0x68] sm:$0x1]  ;;  %v9889_v6 = vpop.permute.xlu1 %2933 }
  0xb2   : > { %v1322_v44 = vrot.slane %v1320_v31, 5  ;;  %v8528_v19 = vcombine.low %v1289_v17, %v1299_v42  ;;  %v1773_v50 = vsel %vm9526_vm13, %v8544_v36, %v1772_v37  ;;  %v1774_v51 = vrot.slane %v1772_v37, 4  ;;  %v2693_v18 = vld [vmem:[#allocation2 + $0x54] sm:$0xe]  ;;  %v2694_v30 = vld [vmem:[#allocation2 + $0x58] sm:$0xf] }
  0xb3   : > { %v1317_v49 = vor.u32 %v1316_v35, %v1312_v34  ;;  %v1308_v52 = vrot.slane %v1307_v43, 4  ;;  %v8545_v48 = vrot.slane %v1650_v62, 9  ;;  %v1779_v55 = vrot.slane %v1651_v32, 5  ;;  %v264_v29 = vld [vmem:[#allocation2 + $0x6c] sm:$0x1] }
  0xb4   : > { %v1782_v57 = vrot.slane %v1652_v39, 5  ;;  %1576 = vrot.lane.b32.xlu1 %v8528_v19, %s9353_s13  ;;  %v1776_v20 = vsel %vm9526_vm13, %v1774_v51, %v1775_v45  ;;  %v627_v46 = vrot.slane %v9809_v22, 4  ;;  %v629_v60 = vshrl.u32 %v482_v47, 16  ;;  %v9898_v24 = vpop.permute.xlu0 %3977  ;;  %v483_v31 = vld [vmem:[%s9469_s9 + $0x40] sm:$0xf] }
  0xb5   : > { %v1318_v59 = vrot.slane %v1317_v49, 4  ;;  %v1313_v63 = vsel %vm9562_vm14, %v1308_v52, %v1312_v34  ;;  %v8560_v2 = vcombine.low %v1773_v50, %v1776_v20  ;;  %v1780_v5 = vsel %vm9526_vm13, %v8545_v48, %v1779_v55  ;;  %v484_v51 = vld [vmem:[%s9469_s9 + $0x44] sm:$0xf]  ;;  %v9913_v52 = vpop.permute.xlu1 %2612 }
  0xb6   : > { %v1781_v7 = vrot.slane %v1779_v55, 4  ;;  %v9893_v14 = vrot.slane %v629_v60, 7  ;;  %v632_v15 = vshll.u32 %v482_v47, 16  ;;  %v874_v17 = vsel %vm9490_vm10, %v9836_v56, %v873_v58  ;;  %v2695_v56 = vld [vmem:[#allocation2 + $0x5c] sm:$0x1] }
  0xb7   : > { %v1323_v22 = vsel %vm9562_vm14, %v1318_v59, %v1322_v44  ;;  %1900 = vrot.lane.b32.xlu0 %v8560_v2, %s9351_s11  ;;  %875 = vst [vmem:[#allocation2 + $0x60] sm:$0xf] %v874_v17  ;;  %v2323_v62 = vshrl.u32 %v2148_v61, 16  ;;  %v2326_v26 = vshll.u32 %v2148_v61, 16  ;;  %v2332_v35 = vshll.u32 %v2149_v11, 16 }
  0xb8   : > { %v8529_v25 = vcombine.low %v1313_v63, %v1323_v22  ;;  %v1783_v9 = vsel %vm9526_vm13, %v1781_v7, %v1782_v57  ;;  %v634_v34 = vor.u32 %v632_v15, %v9893_v14  ;;  %v2336_v39 = vshrl.u32 %v2149_v11, 16  ;;  %v9917_v59 = vpop.permute.xlu0 %1566 }
  0xb9   : > { %v8561_v32 = vcombine.low %v1780_v5, %v1783_v9  ;;  %v2325_v36 = vrot.slane %v2323_v62, 4  ;;  %v2328_v37 = vrot.slane %v2326_v26, 5  ;;  %v2342_v42 = vshll.u32 %v2150_v12, 16 }
  0xba   : > { %1578 = vrot.lane.b32.xlu1 %v8529_v25, %s9353_s13  ;;  %v635_v43 = vsel %vm9482_vm7, %v627_v46, %v634_v34  ;;  %v2334_v44 = vrot.slane %v2332_v35, 5  ;;  %v318_v45 = vsel %vm9476_vm6, 0, %v317_v28  ;;  %v2338_v19 = vrot.slane %v2336_v39, 4 }
  0xbb   : > { %2077 = vrot.lane.b32.xlu0 %v9190_v8, %s9350_s10  ;;  %876 = vst.msk [vmem:[#allocation2 + $0x64] sm:$0xf] %vm225_vm0, %v635_v43  ;;  %v2329_v47 = vor.u32 %v2328_v37, %v2325_v36  ;;  %319 = vst [vmem:[#allocation2 + $0x68] sm:$0x1] %v318_v45  ;;  %v8608_v49 = vrot.slane %v2693_v18, 9  ;;  %v2815_v50 = vrot.slane %v2694_v30, 5 }
  0xbc   : > { %v2344_v48 = vrot.slane %v2342_v42, 5  ;;  %v2818_v55 = vrot.slane %v2695_v56, 5  ;;  %v265_v57 = vsel %vm9445_vm3, 0, %v264_v29  ;;  %v638_v58 = vshrl.u32 %v483_v31, 16  ;;  %v320_v45 = vld [vmem:[#allocation2 + $0x74] sm:$0x1] }
  0xbd   : > { %v2330_v20 = vrot.slane %v2329_v47, 4  ;;  %v2339_v46 = vor.u32 %v2338_v19, %v2334_v44  ;;  %v2817_v60 = vrot.slane %v2815_v50, 4  ;;  %266 = vst [vmem:[#allocation2 + $0x6c] sm:$0x1] %v265_v57  ;;  %v636_v61 = vrot.slane %v9893_v14, 4  ;;  %v9931_v9 = vpop.permute.xlu1 %3656 }
  0xbe   : > { %1902 = vrot.lane.b32.xlu1 %v8561_v32, %s9351_s11  ;;  %v2151_v63 = vld [vmem:[#allocation2 + $0x60] sm:$0xf]  ;;  %v641_v2 = vshll.u32 %v483_v31, 16  ;;  %v2816_v12 = vsel %vm9526_vm13, %v8608_v49, %v2815_v50  ;;  %v640_v22 = vrot.slane %v638_v58, 7  ;;  %v646_v15 = vshrl.u32 %v484_v51, 16 }
  0xbf   : > { %v2335_v5 = vsel %vm9562_vm14, %v2330_v20, %v2334_v44  ;;  %v2340_v7 = vrot.slane %v2339_v46, 4  ;;  %v2347_v8 = vshrl.u32 %v2151_v63, 16  ;;  %v2350_v11 = vshll.u32 %v2151_v63, 16  ;;  %v9929_v25 = vld [vmem:[#allocation2 + $0x60] sm:$0xe]  ;;  %v9197_v46 = vld [vmem:[#allocation2 + $0xc] sm:$0xff]  }
  0xc0   : > { %v2819_v28 = vsel %vm9526_vm13, %v2817_v60, %v2818_v55  ;;  %v643_v36 = vor.u32 %v641_v2, %v640_v22  ;;  %v9939_v43 = vrot.slane %v646_v15, 7  ;;  %v3192_v44 = vld [vmem:[#allocation2 + $0x60] sm:$0xf]  ;;  %v644_v47 = vrot.slane %v640_v22, 4  ;;  %v9198_v60 = vld [vmem:[#allocation2 + $0x18] sm:$0xff]   ;;  %1066 = vst.msk [vmem:[#allocation4 + $0x8] sm:$0xff] %vm12030_vm15, %v9197_v46 }
  0xc1   : > { %v2345_v17 = vsel %vm9562_vm14, %v2340_v7, %v2344_v48  ;;  %v2349_v14 = vrot.slane %v2347_v8, 4  ;;  %v2352_v18 = vrot.slane %v2350_v11, 5  ;;  %v9933_v29 = vpop.permute.xlu0 %2610  ;;  %v8624_v35 = vcombine.low %v2816_v12, %v2819_v28  ;;  %v9194_v48 = vld [vmem:[#allocation2] sm:$0xff]   ;;  %v9207_v8 = vld [vmem:[#allocation2 + $0x30] sm:$0xff]   ;;  %1067 = vst.msk [vmem:[#allocation4 + $0x10] sm:$0xff] %vm12030_vm15, %v9198_v60 }
  0xc2   : > { %v9191_v62 = vld [vmem:[#allocation2 + $0x60] sm:$0xff]   ;;  %v8592_v26 = vcombine.low %v2335_v5, %v2345_v17  ;;  %v877_v30 = vld [vmem:[#allocation2 + $0x68] sm:$0x1]  ;;  %v649_v19 = vshll.u32 %v484_v51, 16  ;;  %v8609_v20 = vrot.slane %v9929_v25, 9  ;;  %v3367_v5 = vshrl.u32 %v3192_v44, 16 }
  0xc3   : > { %v878_v31 = vsel %vm9445_vm3, %v636_v61, %v877_v30  ;;  %v2152_v32 = vld [vmem:[#allocation2 + $0x64] sm:$0xf]  ;;  %v2353_v34 = vor.u32 %v2352_v18, %v2349_v14  ;;  %2079 = vrot.lane.b32.xlu1 %v9191_v62, %s9350_s10  ;;  %v9208_v11 = vld [vmem:[#allocation2 + $0x3c] sm:$0xff]   ;;  %v653_v22 = vrot.slane %v9939_v43, 4  ;;  %v3370_v15 = vshll.u32 %v3192_v44, 16  ;;  %1065 = vst.msk [vmem:[#allocation4] sm:$0xff] %vm12030_vm15, %v9194_v48 }
  0xc4   : > { %v2697_v56 = vld [vmem:[#allocation2 + $0x64] sm:$0xf]  ;;  %2622 = vrot.lane.b32.xlu0 %v8592_v26, %s9356_s16  ;;  %879 = vst [vmem:[#allocation2 + $0x68] sm:$0x1] %v878_v31  ;;  %v2356_v37 = vshll.u32 %v2152_v32, 16  ;;  %v2360_v39 = vshrl.u32 %v2152_v32, 16  ;;  %v651_v63 = vor.u32 %v649_v19, %v9939_v43 }
  0xc5   : > { %v2822_v42 = vrot.slane %v2697_v56, 5  ;;  %v880_v49 = vld [vmem:[#allocation2 + $0x6c] sm:$0xf]  ;;  %v3193_v50 = vld [vmem:[#allocation2 + $0x64] sm:$0xf]  ;;  %v9941_v55 = vrot.slane %v2353_v34, 4  ;;  %v1569_v51 = vpop.permute.xlu1 %1568 }
  0xc6   : > { %v9943_v57 = vrot.slane %v2356_v37, 5  ;;  %v2362_v58 = vrot.slane %v2360_v39, 4  ;;  %v881_v2 = vsel %vm9490_vm10, %v643_v36, %v880_v49  ;;  %v9200_v7 = vld [vmem:[#allocation2 + $0x24] sm:$0xff]   ;;  %v3376_v17 = vshll.u32 %v3193_v50, 16  ;;  %v3737_v14 = vld [vmem:[#allocation2 + $0x60] sm:$0xe] }
  0xc7   : > { %v2824_v61 = vrot.slane %v2822_v42, 4  ;;  %v9192_v28 = vld [vmem:[#allocation2 + $0x60] sm:$0xff]   ;;  %882 = vst [vmem:[#allocation2 + $0x6c] sm:$0xf] %v881_v2  ;;  %v652_v25 = vsel %vm9482_vm7, %v644_v47, %v651_v63  ;;  %v3369_v62 = vrot.slane %v3367_v5, 4  ;;  %v3380_v26 = vshrl.u32 %v3193_v50, 16 }
  0xc8   : > { %v2363_v12 = vor.u32 %v2362_v58, %v9943_v57  ;;  %2943 = vrot.lane.b32.xlu0 %v8624_v35, %s9354_s14  ;;  %v321_v30 = vsel %vm9476_vm6, 0, %v320_v45  ;;  %883 = vst.msk [vmem:[#allocation2 + $0x70] sm:$0xf] %vm225_vm0, %v652_v25  ;;  %v3372_v32 = vrot.slane %v3370_v15, 5  ;;  %v3378_v34 = vrot.slane %v3376_v17, 5 }
  0xc9   : > { %v9952_v18 = vpop.permute.xlu0 %3654  ;;  %322 = vst [vmem:[#allocation2 + $0x74] sm:$0x1] %v321_v30  ;;  %v2359_v56 = vsel %vm9562_vm14, %v9941_v55, %v9943_v57  ;;  %v9965_v37 = vsel %vm9526_vm13, %v8609_v20, %v2822_v42  ;;  %1068 = vst.msk [vmem:[#allocation4 + $0x18] sm:$0xff] %vm12030_vm15, %v9200_v7  ;;  %v3382_v42 = vrot.slane %v3380_v26, 4  ;;  %v3738_v19 = vld [vmem:[#allocation2 + $0x64] sm:$0xf] }
  0xca   : > { %v2364_v31 = vrot.slane %v2363_v12, 4  ;;  %1069 = vst.msk [vmem:[#allocation4 + $0x20] sm:$0xff] %vm12030_vm15, %v9207_v8  ;;  %1070 = vst.msk [vmem:[#allocation4 + $0x28] sm:$0xff] %vm12030_vm15, %v9208_v11  ;;  %v3373_v47 = vor.u32 %v3372_v32, %v3369_v62  ;;  %v8672_v48 = vrot.slane %v3737_v14, 9  ;;  %v3859_v2 = vrot.slane %v3738_v19, 5 }
  0xcb   : > { %v2153_v35 = vld [vmem:[#allocation2 + $0x68] sm:$0x1]  ;;  %v3383_v46 = vor.u32 %v3382_v42, %v3378_v34  ;;  %1613 = vst.msk [vmem:[#allocation4] sm:$0xff] %vm1612_vm1, %v9848_v27  ;;  %1614 = vst.msk [vmem:[#allocation4 + $0x8] sm:$0xff] %vm1612_vm1, %v9917_v59  ;;  %v1105_v5 = vld [vmem:[#allocation2 + $0x60] sm:$0xf] }
  0xcc   : > { %v2698_v36 = vld [vmem:[#allocation2 + $0x68] sm:$0x1]  ;;  %v2366_v44 = vshll.u32 %v2153_v35, 16  ;;  %3121 = vrot.lane.b32.xlu0 %v9192_v28, %s9352_s12  ;;  %v3374_v20 = vrot.slane %v3373_v47, 4  ;;  %1615 = vst.msk [vmem:[#allocation4 + $0x10] sm:$0xff] %vm1612_vm1, %v1569_v51  ;;  %v3861_v26 = vrot.slane %v3859_v2, 4 }
  0xcd   : > { %v3194_v39 = vld [vmem:[#allocation2 + $0x68] sm:$0x1]  ;;  %v2825_v45 = vrot.slane %v2698_v36, 5  ;;  %v1893_v49 = vpop.permute.xlu0 %1892  ;;  %v1571_v55 = vpop.permute.xlu1 %1570  ;;  %1937 = vst.msk [vmem:[#allocation4] sm:$0xff] %vm1936_vm5, %v9822_v38  ;;  %1938 = vst.msk [vmem:[#allocation4 + $0x8] sm:$0xff] %vm1936_vm5, %v9870_v33  ;;  %v3860_v33 = vsel %vm9526_vm13, %v8672_v48, %v3859_v2  ;;  %vm4023_vm2 = vcmask 294144  }
  0xce   : > { %v3386_v50 = vshll.u32 %v3194_v39, 16  ;;  %v2368_v57 = vrot.slane %v2366_v44, 5  ;;  %1616 = vst.msk [vmem:[#allocation4 + $0x18] sm:$0xff] %vm1612_vm1, %v1571_v55  ;;  %v3195_v63 = vld [vmem:[#allocation2 + $0x6c] sm:$0xf]  ;;  %v3379_v59 = vsel %vm9562_vm14, %v3374_v20, %v3378_v34  ;;  %v1328_v39 = vshll.u32 %v1105_v5, 16 }
  0xcf   : > { %v2826_v58 = vsel %vm9526_vm13, %v2824_v61, %v2825_v45  ;;  %1939 = vst.msk [vmem:[#allocation4 + $0x10] sm:$0xff] %vm1936_vm5, %v1893_v49  ;;  %v3384_v61 = vrot.slane %v3383_v46, 4  ;;  %v3391_v51 = vshrl.u32 %v3195_v63, 16  ;;  %v3739_v7 = vld [vmem:[#allocation2 + $0x68] sm:$0x1]  ;;  %v3394_v28 = vshll.u32 %v3195_v63, 16 }
  0xd0   : > { %v3388_v60 = vrot.slane %v3386_v50, 5  ;;  %v2369_v27 = vsel %vm9562_vm14, %v2364_v31, %v2368_v57  ;;  %v1106_v8 = vld [vmem:[#allocation2 + $0x64] sm:$0xf]  ;;  %v8625_v38 = vcombine.low %v9965_v37, %v2826_v58  ;;  %v884_v12 = vld [vmem:[#allocation2 + $0x74] sm:$0x1]  ;;  %v3862_v43 = vrot.slane %v3739_v7, 5 }
  0xd1   : > { %v8593_v11 = vcombine.low %v2359_v56, %v2369_v27  ;;  %v1895_v15 = vpop.permute.xlu1 %1894  ;;  %v885_v14 = vsel %vm9445_vm3, %v653_v22, %v884_v12  ;;  %v3196_v25 = vld [vmem:[#allocation2 + $0x70] sm:$0xf]  ;;  %v3393_v62 = vrot.slane %v3391_v51, 4  ;;  %v10001_v30 = vpop.permute.xlu0 %2069  ;;  %v3396_v32 = vrot.slane %v3394_v28, 5  ;;  %v1107_v56 = vld [vmem:[#allocation2 + $0x68] sm:$0x1] }
  0xd2   : > { %v3389_v17 = vsel %vm9562_vm14, %v3384_v61, %v3388_v60  ;;  %1940 = vst.msk [vmem:[#allocation4 + $0x18] sm:$0xff] %vm1936_vm5, %v1895_v15  ;;  %886 = vst [vmem:[#allocation2 + $0x74] sm:$0x1] %v885_v14  ;;  %v3400_v34 = vshll.u32 %v3196_v25, 16  ;;  %v3404_v35 = vshrl.u32 %v3196_v25, 16  ;;  %v1325_v37 = vshrl.u32 %v1105_v5, 16 }
  0xd3   : > { %2624 = vrot.lane.b32.xlu1 %v8593_v11, %s9356_s16  ;;  %v8656_v31 = vcombine.low %v3379_v59, %v3389_v17  ;;  %v3740_v36 = vld [vmem:[#allocation2 + $0x6c] sm:$0xe]  ;;  %v1334_v22 = vshll.u32 %v1106_v8, 16  ;;  %v3397_v45 = vor.u32 %v3396_v32, %v3393_v62  ;;  %v1338_v19 = vshrl.u32 %v1106_v8, 16  ;;  %v3741_v49 = vld [vmem:[#allocation2 + $0x70] sm:$0xf] }
  0xd4   : > { %v1108_v44 = vld [vmem:[#allocation2 + $0x6c] sm:$0xf]  ;;  %v3402_v47 = vrot.slane %v3400_v34, 5  ;;  %v3406_v42 = vrot.slane %v3404_v35, 4  ;;  %v3863_v50 = vsel %vm9526_vm13, %v3861_v26, %v3862_v43  ;;  %v1327_v48 = vrot.slane %v1325_v37, 4  ;;  %2115 = vst.msk [vmem:[#allocation4 + $0x8] sm:$0xff] %vm12031_vm8, %v9841_v13 }
  0xd5   : > { %3666 = vrot.lane.b32.xlu0 %v8656_v31, %s9357_s17  ;;  %v1330_v55 = vrot.slane %v1328_v39, 5  ;;  %v1336_v57 = vrot.slane %v1334_v22, 5  ;;  %v9193_v58 = vld [vmem:[#allocation2 + $0x6c] sm:$0xff]   ;;  %v3398_v20 = vrot.slane %v3397_v45, 4  ;;  %v8688_v60 = vcombine.low %v3860_v33, %v3863_v50  ;;  %v1653_v31 = vld [vmem:[#allocation2 + $0x60] sm:$0xe] }
  0xd6   : > { %v3407_v46 = vor.u32 %v3406_v42, %v3402_v47  ;;  %v1340_v63 = vrot.slane %v1338_v19, 4  ;;  %v1344_v5 = vshll.u32 %v1107_v56, 16  ;;  %v8673_v27 = vrot.slane %v3740_v36, 9  ;;  %v1109_v8 = vld [vmem:[#allocation2 + $0x70] sm:$0xf]  ;;  %2114 = vst.msk [vmem:[#allocation4] sm:$0xff] %vm12031_vm8, %v9811_v23 }
  0xd7   : > { %2945 = vrot.lane.b32.xlu1 %v8625_v38, %s9354_s14  ;;  %v1331_v2 = vor.u32 %v1330_v55, %v1327_v48  ;;  %v3866_v59 = vrot.slane %v3741_v49, 5  ;;  %v1349_v11 = vshrl.u32 %v1108_v44, 16  ;;  %v3403_v38 = vsel %vm9562_vm14, %v3398_v20, %v3402_v47  ;;  %v1654_v45 = vld [vmem:[#allocation2 + $0x64] sm:$0xf]  ;;  %v1655_v47 = vld [vmem:[#allocation2 + $0x68] sm:$0x1] }
  0xd8   : > { %v10008_v61 = vpop.permute.xlu0 %2614  ;;  %v3408_v51 = vrot.slane %v3407_v46, 4  ;;  %v1341_v7 = vor.u32 %v1340_v63, %v1336_v57  ;;  %v1346_v15 = vrot.slane %v1344_v5, 5  ;;  %v1352_v56 = vshll.u32 %v1108_v44, 16  ;;  %v1656_v55 = vld [vmem:[#allocation2 + $0x6c] sm:$0xe]  ;;  %2116 = vst.msk [vmem:[#allocation4 + $0x10] sm:$0xff] %vm12031_vm8, %v10001_v30 }
  0xd9   : > { %3987 = vrot.lane.b32.xlu0 %v8688_v60, %s9355_s15  ;;  %v3197_v12 = vld [vmem:[#allocation2 + $0x74] sm:$0x1]  ;;  %v1332_v28 = vrot.slane %v1331_v2, 4  ;;  %v3867_v17 = vsel %vm9526_vm13, %v8673_v27, %v3866_v59  ;;  %v3868_v62 = vrot.slane %v3866_v59, 4  ;;  %v1351_v35 = vrot.slane %v1349_v11, 4  ;;  %2660 = vst.msk [vmem:[#allocation4 + $0x8] sm:$0xff] %vm12034_vm9, %v9913_v52 }
  0xda   : > { %v3742_v33 = vld [vmem:[#allocation2 + $0x74] sm:$0x1]  ;;  %v3410_v14 = vshll.u32 %v3197_v12, 16  ;;  %v1342_v25 = vrot.slane %v1341_v7, 4  ;;  %v1358_v36 = vshll.u32 %v1109_v8, 16  ;;  %v1362_v22 = vshrl.u32 %v1109_v8, 16 }
  0xdb   : > { %3123 = vrot.lane.b32.xlu1 %v9193_v58, %s9352_s12  ;;  %v3869_v26 = vrot.slane %v3742_v33, 5  ;;  %v1337_v32 = vsel %vm9562_vm14, %v1332_v28, %v1336_v57  ;;  %v1110_v34 = vld [vmem:[#allocation2 + $0x74] sm:$0x1]  ;;  %v1354_v50 = vrot.slane %v1352_v56, 5  ;;  %v1657_v44 = vld [vmem:[#allocation2 + $0x70] sm:$0xf] }
  0xdc   : > { %v3412_v43 = vrot.slane %v3410_v14, 5  ;;  %v1347_v37 = vsel %vm9562_vm14, %v1342_v25, %v1346_v15  ;;  %v10022_v42 = vpop.permute.xlu0 %2935  ;;  %v1360_v48 = vrot.slane %v1358_v36, 5  ;;  %v267_v57 = vld [vmem:[#allocation2 + $0x78] sm:$0x1]  ;;  %v1364_v20 = vrot.slane %v1362_v22, 4  ;;  %v2072_v15 = vpop.permute.xlu1 %2071  ;;  %2659 = vst.msk [vmem:[#allocation4] sm:$0xff] %vm12034_vm9, %v9933_v29 }
  0xdd   : > { %v3870_v39 = vsel %vm9526_vm13, %v3868_v62, %v3869_v26  ;;  %v8530_v19 = vcombine.low %v1337_v32, %v1347_v37  ;;  %v1368_v46 = vshll.u32 %v1110_v34, 16  ;;  %v8546_v60 = vrot.slane %v1653_v31, 9  ;;  %v1658_v63 = vld [vmem:[#allocation2 + $0x74] sm:$0x1]  ;;  %v485_v7 = vld [vmem:[%s9469_s9 + $0x48] sm:$0xf] }
  0xde   : > { %v8689_v49 = vcombine.low %v3867_v17, %v3870_v39  ;;  %v3413_v58 = vsel %vm9562_vm14, %v3408_v51, %v3412_v43  ;;  %v1355_v5 = vor.u32 %v1354_v50, %v1351_v35  ;;  %v1786_v27 = vrot.slane %v1654_v45, 5  ;;  %v486_v14 = vld [vmem:[%s9469_s9 + $0x4c] sm:$0xf]  ;;  %2117 = vst.msk [vmem:[#allocation4 + $0x18] sm:$0xff] %vm12031_vm8, %v2072_v15  ;;  %v2700_v23 = vld [vmem:[#allocation2 + $0x70] sm:$0xf] }
  0xdf   : > { %v8657_v2 = vcombine.low %v3403_v38, %v3413_v58  ;;  %v1789_v59 = vrot.slane %v1655_v47, 5  ;;  %v1365_v8 = vor.u32 %v1364_v20, %v1360_v48  ;;  %v1370_v11 = vrot.slane %v1368_v46, 5  ;;  %v9213_v34 = vld [vmem:[#allocation2 + $0x48] sm:$0xff]   ;;  %2661 = vst.msk [vmem:[#allocation4 + $0x10] sm:$0xff] %vm12034_vm9, %v10008_v61 }
  0xe0   : > { %3989 = vrot.lane.b32.xlu0 %v8689_v49, %s9355_s15  ;;  %v8547_v12 = vrot.slane %v1656_v55, 9  ;;  %v1793_v28 = vrot.slane %v1657_v44, 5  ;;  %v1356_v51 = vrot.slane %v1355_v5, 4  ;;  %v1787_v33 = vsel %vm9526_vm13, %v8546_v60, %v1786_v27  ;;  %v10038_v32 = vpop.permute.xlu0 %3113  ;;  %v2154_v47 = vld [vmem:[#allocation2 + $0x6c] sm:$0xf]  ;;  %1071 = vst.msk [vmem:[#allocation4 + $0x30] sm:$0xff] %vm12030_vm15, %v9213_v34 }
  0xe1   : > { %3668 = vrot.lane.b32.xlu1 %v8657_v2, %s9357_s17  ;;  %v1788_v17 = vrot.slane %v1786_v27, 4  ;;  %v1796_v38 = vrot.slane %v1658_v63, 5  ;;  %v1366_v25 = vrot.slane %v1365_v8, 4  ;;  %v268_v31 = vsel %vm9445_vm3, 0, %v267_v57  ;;  %v2155_v55 = vld [vmem:[#allocation2 + $0x70] sm:$0xf] }
  0xe2   : > { %v10034_v62 = vsel %vm9526_vm13, %v8547_v12, %v1793_v28  ;;  %v1795_v26 = vrot.slane %v1793_v28, 4  ;;  %v1361_v35 = vsel %vm9562_vm14, %v1356_v51, %v1360_v48  ;;  %269 = vst [vmem:[#allocation2 + $0x78] sm:$0x1] %v268_v31  ;;  %v655_v36 = vshrl.u32 %v485_v7, 16  ;;  %v10052_v44 = vld [vmem:[#allocation2 + $0x74] sm:$0x1] }
  0xe3   : > { %v1790_v56 = vsel %vm9526_vm13, %v1788_v17, %v1789_v59  ;;  %v658_v43 = vshll.u32 %v485_v7, 16  ;;  %v1371_v37 = vsel %vm9562_vm14, %v1366_v25, %v1370_v11  ;;  %v663_v45 = vshrl.u32 %v486_v14, 16  ;;  %v323_v57 = vld [vmem:[#allocation2 + $0x80] sm:$0x1]  ;;  %v9195_v58 = vld [vmem:[#allocation2 + $0x6c] sm:$0xff]   ;;  %v9214_v60 = vld [vmem:[#allocation2 + $0x54] sm:$0xff]  }
  0xe4   : > { %v8562_v39 = vcombine.low %v1787_v33, %v1790_v56  ;;  %v10048_v22 = vsel %vm9526_vm13, %v1795_v26, %v1796_v38  ;;  %v8531_v49 = vcombine.low %v1361_v35, %v1371_v37  ;;  %v657_v50 = vrot.slane %v655_v36, 7  ;;  %v10063_v5 = vld [vmem:[#allocation2 + $0x6c] sm:$0xe]  ;;  %v270_v27 = vld [vmem:[#allocation2 + $0x84] sm:$0x1]  ;;  %1072 = vst.msk [vmem:[#allocation4 + $0x38] sm:$0xff] %vm12030_vm15, %v9214_v60 }
  0xe5   : > { %1580 = vrot.lane.b32.xlu1 %v8530_v19, %s9353_s13  ;;  %v666_v48 = vshll.u32 %v486_v14, 16  ;;  %v10055_v20 = vrot.slane %v663_v45, 7  ;;  %v8563_v19 = vcombine.low %v10034_v62, %v10048_v22  ;;  %v2371_v13 = vshrl.u32 %v2154_v47, 16  ;;  %v10074_v7 = vld [vmem:[%s9469_s9 + $0x50] sm:$0xf]  ;;  %2981 = vst.msk [vmem:[#allocation4 + $0x8] sm:$0xff] %vm12033_vm11, %v9889_v6 }
  0xe6   : > { %1904 = vrot.lane.b32.xlu0 %v8562_v39, %s9351_s11  ;;  %v660_v63 = vor.u32 %v658_v43, %v657_v50  ;;  %v661_v2 = vrot.slane %v657_v50, 4  ;;  %v2374_v52 = vshll.u32 %v2154_v47, 16  ;;  %v2380_v8 = vshll.u32 %v2155_v55, 16  ;;  %2980 = vst.msk [vmem:[#allocation4] sm:$0xff] %vm12033_vm11, %v9859_v1  ;;  %v2701_v12 = vld [vmem:[#allocation2 + $0x74] sm:$0x1] }
  0xe7   : > { %v2617_v46 = vpop.permute.xlu1 %2616  ;;  %v668_v59 = vor.u32 %v666_v48, %v10055_v20  ;;  %v2384_v11 = vshrl.u32 %v2155_v55, 16  ;;  %v2390_v29 = vshll.u32 %v10052_v44, 16  ;;  %2982 = vst.msk [vmem:[#allocation4 + $0x10] sm:$0xff] %vm12033_vm11, %v10022_v42  ;;  %v2373_v6 = vrot.slane %v2371_v13, 4 }
  0xe8   : > { %2662 = vst.msk [vmem:[#allocation4 + $0x18] sm:$0xff] %vm12034_vm9, %v2617_v46  ;;  %v324_v15 = vsel %vm9476_vm6, 0, %v323_v57  ;;  %v8610_v1 = vrot.slane %v10063_v5, 9  ;;  %v2382_v33 = vrot.slane %v2380_v8, 5  ;;  %v2829_v14 = vrot.slane %v2700_v23, 5 }
  0xe9   : > { %1582 = vrot.lane.b32.xlu1 %v8531_v49, %s9353_s13  ;;  %v669_v61 = vsel %vm9482_vm7, %v661_v2, %v668_v59  ;;  %v887_v28 = vld [vmem:[#allocation2 + $0x78] sm:$0xf]  ;;  %3159 = vst.msk [vmem:[#allocation4 + $0x8] sm:$0xff] %vm12032_vm12, %v9856_v54  ;;  %3158 = vst.msk [vmem:[#allocation4] sm:$0xff] %vm12032_vm12, %v9827_v53  ;;  %v2376_v54 = vrot.slane %v2374_v52, 5  ;;  %v2386_v17 = vrot.slane %v2384_v11, 4 }
  0xea   : > { %v3659_v30 = vpop.permute.xlu0 %3658  ;;  %2081 = vrot.lane.b32.xlu0 %v9195_v58, %s9350_s10  ;;  %3160 = vst.msk [vmem:[#allocation4 + $0x10] sm:$0xff] %vm12032_vm12, %v10038_v32  ;;  %v888_v51 = vsel %vm9490_vm10, %v660_v63, %v887_v28  ;;  %325 = vst [vmem:[#allocation2 + $0x80] sm:$0x1] %v324_v15  ;;  %v10108_v53 = vld [vmem:[%s9469_s9 + $0x54] sm:$0xf]  ;;  %v2392_v38 = vrot.slane %v2390_v29, 5  ;;  %v2830_v39 = vsel %vm9526_vm13, %v8610_v1, %v2829_v14 }
  0xeb   : > { %v2938_v42 = vpop.permute.xlu1 %2937  ;;  %890 = vst.msk [vmem:[#allocation2 + $0x7c] sm:$0xf] %vm225_vm0, %v669_v61  ;;  %889 = vst [vmem:[#allocation2 + $0x78] sm:$0xf] %v888_v51  ;;  %v2377_v62 = vor.u32 %v2376_v54, %v2373_v6  ;;  %v2387_v26 = vor.u32 %v2386_v17, %v2382_v33  ;;  %v2832_v31 = vrot.slane %v2701_v12, 5  ;;  %v2831_v34 = vrot.slane %v2829_v14, 4 }
  0xec   : > { %3704 = vst.msk [vmem:[#allocation4 + $0x8] sm:$0xff] %vm3702_vm4, %v9931_v9  ;;  %3703 = vst.msk [vmem:[#allocation4] sm:$0xff] %vm3702_vm4, %v9952_v18  ;;  %v271_v9 = vsel %vm9445_vm3, 0, %v270_v27  ;;  %v9204_v18 = vld [vmem:[%s12023_s1 + $0x10] ss:$0 sps:$4 sm:$0x33]  }
  0xed   : > { %2983 = vst.msk [vmem:[#allocation4 + $0x18] sm:$0xff] %vm12033_vm11, %v2938_v42  ;;  %1906 = vrot.lane.b32.xlu1 %v8563_v19, %s9351_s11  ;;  %272 = vst [vmem:[#allocation2 + $0x84] sm:$0x1] %v271_v9  ;;  %v326_v32 = vld [vmem:[#allocation2 + $0x8c] sm:$0x1]  ;;  %v675_v35 = vshll.u32 %v10074_v7, 16  ;;  %v2833_v55 = vsel %vm9526_vm13, %v2831_v34, %v2832_v31 }
  0xee   : > { %3705 = vst.msk [vmem:[#allocation4 + $0x10] sm:$0xff] %vm3702_vm4, %v3659_v30  ;;  %v3980_v25 = vpop.permute.xlu0 %3979  ;;  %v680_v56 = vshrl.u32 %v10108_v53, 16  ;;  %v2378_v43 = vrot.slane %v2377_v62, 4  ;;  %v2388_v37 = vrot.slane %v2387_v26, 4  ;;  %vm4132_vm15 = vcmask 1041408  }
  0xef   : > { %4025 = vst.msk [vmem:[#allocation4 + $0x8] sm:$0xff] %vm4023_vm2, %v9898_v24  ;;  %4024 = vst.msk [vmem:[#allocation4] sm:$0xff] %vm4023_vm2, %v9873_v40  ;;  %v672_v24 = vshrl.u32 %v10074_v7, 16  ;;  %v670_v40 = vrot.slane %v10055_v20, 4  ;;  %v3116_v36 = vpop.permute.xlu1 %3115  ;;  %v683_v45 = vshll.u32 %v10108_v53, 16  ;;  %9123 = vmatprep.subr.msk.bf16.mxu0 %vm4132_vm15, %v9204_v18  ;;  %v327_v47 = vsel %vm9476_vm6, 0, %v326_v32 }
  0xf0   : > { %4026 = vst.msk [vmem:[#allocation4 + $0x10] sm:$0xff] %vm4023_vm2, %v3980_v25  ;;  %v4134_v49 = vsel %vm4132_vm15, %v9204_v18, 0  ;;  %v2383_v50 = vsel %vm9562_vm14, %v2378_v43, %v2382_v33  ;;  %v2393_v48 = vsel %vm9562_vm14, %v2388_v37, %v2392_v38  ;;  %v10139_v44 = vrot.slane %v680_v56, 7  ;;  %328 = vst [vmem:[#allocation2 + $0x8c] sm:$0x1] %v327_v47 }
  0xf1   : > { %3161 = vst.msk [vmem:[#allocation4 + $0x18] sm:$0xff] %vm12032_vm12, %v3116_v36  ;;  %v674_v22 = vrot.slane %v672_v24, 7  ;;  %9048 = vmatpush3.bf16.msra.mxu0 %v4134_v49  ;;  %v8594_v57 = vcombine.low %v2383_v50, %v2393_v48  ;;  %v891_v58 = vld [vmem:[#allocation2 + $0x80] sm:$0x1]  ;;  %v8626_v23 = vcombine.low %v2830_v39, %v2833_v55  ;;  %vm4083_vm15 = vcmask 293888  }
  0xf2   : > { %v2158_v20 = vld [vmem:[#allocation2 + $0x7c] sm:$0xf]  ;;  %v892_v63 = vsel %vm9445_vm3, %v670_v40, %v891_v58  ;;  %v2157_v2 = vld [vmem:[#allocation2 + $0x78] sm:$0xf]  ;;  %v685_v11 = vor.u32 %v683_v45, %v10139_v44  ;;  %v687_v1 = vrot.slane %v10139_v44, 4 }
  0xf3   : > { %v3661_v46 = vpop.permute.xlu1 %3660  ;;  %v3982_v60 = vpop.permute.xlu0 %3981  ;;  %v9196_v19 = vld [vmem:[#allocation2 + $0x78] sm:$0xff]   ;;  %v2404_v5 = vshll.u32 %v2158_v20, 16  ;;  %2626 = vrot.lane.b32.xlu0 %v8594_v57, %s9356_s16  ;;  %893 = vst [vmem:[#allocation2 + $0x80] sm:$0x1] %v892_v63  ;;  %v2395_v27 = vshrl.u32 %v2157_v2, 16  ;;  %v2398_v59 = vshll.u32 %v2157_v2, 16  ;;  %v677_v8 = vor.u32 %v675_v35, %v674_v22 }
  0xf4   : > { %3706 = vst.msk [vmem:[#allocation4 + $0x18] sm:$0xff] %vm3702_vm4, %v3661_v46  ;;  %v2408_v13 = vshrl.u32 %v2158_v20, 16  ;;  %v10145_v7 = vld [vmem:[#allocation2 + $0x78] sm:$0xe]  ;;  %2083 = vrot.lane.b32.xlu1 %v9196_v19, %s9350_s10  ;;  %v2703_v52 = vld [vmem:[#allocation2 + $0x7c] sm:$0xf] }
  0xf5   : > { %4027 = vst.msk [vmem:[#allocation4 + $0x18] sm:$0xff] %vm4023_vm2, %v3982_v60  ;;  %v10149_v30 = vrot.slane %v2404_v5, 5  ;;  %v2397_v29 = vrot.slane %v2395_v27, 4  ;;  %v2400_v12 = vrot.slane %v2398_v59, 5  ;;  %v2836_v28 = vrot.slane %v2703_v52, 5  ;;  %v9201_v53 = vld [vmem:[#allocation2 + $0x78] sm:$0xff]  }
  0xf6   : > { %v2410_v61 = vrot.slane %v2408_v13, 4  ;;  %v678_v15 = vrot.slane %v674_v22, 4  ;;  %v894_v42 = vld [vmem:[#allocation2 + $0x84] sm:$0xf]  ;;  %v3198_v51 = vld [vmem:[#allocation2 + $0x78] sm:$0xf] }
  0xf7   : > { %v1573_v6 = vpop.permute.xlu1 %1572  ;;  %v2401_v54 = vor.u32 %v2400_v12, %v2397_v29  ;;  %2947 = vrot.lane.b32.xlu0 %v8626_v23, %s9354_s14  ;;  %v8611_v17 = vrot.slane %v10145_v7, 9  ;;  %v3199_v38 = vld [vmem:[#allocation2 + $0x7c] sm:$0xf]  ;;  %v898_v14 = vld [vmem:[#allocation2 + $0x8c] sm:$0x1]  ;;  %v895_v18 = vsel %vm9490_vm10, %v677_v8, %v894_v42  ;;  %v3415_v25 = vshrl.u32 %v3198_v51, 16 }
  0xf8   : > { %1617 = vst.msk [vmem:[#allocation4 + $0x20] sm:$0xff] %vm1612_vm1, %v1573_v6  ;;  %v2411_v33 = vor.u32 %v2410_v61, %v10149_v30  ;;  %v686_v9 = vsel %vm9482_vm7, %v678_v15, %v685_v11  ;;  %v3418_v62 = vshll.u32 %v3198_v51, 16  ;;  %v3743_v26 = vld [vmem:[#allocation2 + $0x78] sm:$0xe]  ;;  %v2838_v32 = vrot.slane %v2836_v28, 4  ;;  %v4040_v52 = vld [vmem:[#allocation4] sm:$0xff] }
  0xf9   : > { %v2402_v24 = vrot.slane %v2401_v54, 4  ;;  %896 = vst [vmem:[#allocation2 + $0x84] sm:$0xf] %v895_v18  ;;  %897 = vst.msk [vmem:[#allocation2 + $0x88] sm:$0xf] %vm225_vm0, %v686_v9  ;;  %v3424_v40 = vshll.u32 %v3199_v38, 16  ;;  %v899_v39 = vsel %vm9445_vm3, %v687_v1, %v898_v14  ;;  %v2837_v2 = vsel %vm9526_vm13, %v8611_v17, %v2836_v28  ;;  %9049 = vmatprep.mubr.msk.bf16.mxu0 %vm4083_vm15, %v4040_v52 }
  0xfa   : > { %v1897_v31 = vpop.permute.xlu0 %1896  ;;  %v3428_v34 = vshrl.u32 %v3199_v38, 16  ;;  %v3744_v35 = vld [vmem:[#allocation2 + $0x7c] sm:$0xf]  ;;  %v2159_v36 = vld [vmem:[#allocation2 + $0x80] sm:$0x1]  ;;  %v2412_v22 = vrot.slane %v2411_v33, 4 }
  0xfb   : > { %v1575_v56 = vpop.permute.xlu1 %1574  ;;  %1941 = vst.msk [vmem:[#allocation4 + $0x20] sm:$0xff] %vm1936_vm5, %v1897_v31  ;;  %v2704_v43 = vld [vmem:[#allocation2 + $0x80] sm:$0x1]  ;;  %v2414_v45 = vshll.u32 %v2159_v36, 16  ;;  %3125 = vrot.lane.b32.xlu0 %v9201_v53, %s9352_s12  ;;  %v3417_v49 = vrot.slane %v3415_v25, 4  ;;  %v3420_v50 = vrot.slane %v3418_v62, 5  ;;  %v2407_v20 = vsel %vm9562_vm14, %v2402_v24, %v10149_v30 }
  0xfc   : > { %v3200_v37 = vld [vmem:[#allocation2 + $0x80] sm:$0x1]  ;;  %1618 = vst.msk [vmem:[#allocation4 + $0x28] sm:$0xff] %vm1612_vm1, %v1575_v56  ;;  %v2839_v47 = vrot.slane %v2704_v43, 5  ;;  %900 = vst [vmem:[#allocation2 + $0x8c] sm:$0x1] %v899_v39 }
  0xfd   : > { %v3426_v48 = vrot.slane %v3424_v40, 5  ;;  %v3430_v55 = vrot.slane %v3428_v34, 4  ;;  %v3434_v44 = vshll.u32 %v3200_v37, 16  ;;  %v3745_v57 = vld [vmem:[#allocation2 + $0x80] sm:$0x1]  ;;  %v2416_v46 = vrot.slane %v2414_v45, 5 }
  0xfe   : > { %v2074_v58 = vpop.permute.xlu0 %2073  ;;  %v8674_v60 = vrot.slane %v3743_v26, 9  ;;  %v3873_v19 = vrot.slane %v3744_v35, 5  ;;  %v2840_v5 = vsel %vm9526_vm13, %v2838_v32, %v2839_v47  ;;  %v3421_v27 = vor.u32 %v3420_v50, %v3417_v49  ;;  %v1111_v12 = vld [vmem:[#allocation2 + $0x78] sm:$0xf]  ;;  %v4042_v61 = vld [vmem:[#allocation4 + $0x10] sm:$0xff] }
  0xff   : > { %v1899_v63 = vpop.permute.xlu1 %1898  ;;  %2118 = vst.msk [vmem:[#allocation4 + $0x20] sm:$0xff] %vm12031_vm8, %v2074_v58  ;;  %v3431_v59 = vor.u32 %v3430_v55, %v3426_v48  ;;  %v2417_v13 = vsel %vm9562_vm14, %v2412_v22, %v2416_v46  ;;  %v3436_v23 = vrot.slane %v3434_v44, 5  ;;  %v3876_v30 = vrot.slane %v3745_v57, 5  ;;  %v4041_v38 = vld [vmem:[#allocation4 + $0x8] sm:$0xff]  ;;  %v1113_v26 = vld [vmem:[#allocation2 + $0x80] sm:$0x1] }
 0x100   : > { %1942 = vst.msk [vmem:[#allocation4 + $0x28] sm:$0xff] %vm1936_vm5, %v1899_v63  ;;  %v3875_v7 = vrot.slane %v3873_v19, 4  ;;  %v8595_v8 = vcombine.low %v2407_v20, %v2417_v13  ;;  %v3422_v11 = vrot.slane %v3421_v27, 4  ;;  %v10180_v29 = vsel %vm9526_vm13, %v8674_v60, %v3873_v19  ;;  %v3201_v15 = vld [vmem:[#allocation2 + $0x84] sm:$0xf]  ;;  %9050 = vmatmul.mubr.msk.bf16.vlgmr.msra.gmra.mrb[0].mxu0 %vm4083_vm15, %v4041_v38  ;;  %v4043_v27 = vld [vmem:[#allocation4 + $0x18] sm:$0xff] }
 0x101   : > { %v8627_v28 = vcombine.low %v2837_v2, %v2840_v5  ;;  %v3432_v6 = vrot.slane %v3431_v59, 4  ;;  %v3202_v1 = vld [vmem:[#allocation2 + $0x88] sm:$0xf]  ;;  %v3439_v33 = vshrl.u32 %v3201_v15, 16  ;;  %v3442_v17 = vshll.u32 %v3201_v15, 16  ;;  %9053 = vmatprep.mubr.msk.bf16.mxu0 %vm4083_vm15, %v4042_v61 }
 0x102   : > { %v3877_v42 = vsel %vm9526_vm13, %v3875_v7, %v3876_v30  ;;  %2628 = vrot.lane.b32.xlu1 %v8595_v8, %s9356_s16  ;;  %v3427_v51 = vsel %vm9562_vm14, %v3422_v11, %v3426_v48  ;;  %v3448_v53 = vshll.u32 %v3202_v1, 16  ;;  %v3452_v9 = vshrl.u32 %v3202_v1, 16  ;;  %v1112_v62 = vld [vmem:[#allocation2 + $0x7c] sm:$0xf]  ;;  %v3746_v35 = vld [vmem:[#allocation2 + $0x84] sm:$0xe] }
 0x103   : > { %v3203_v54 = vld [vmem:[#allocation2 + $0x8c] sm:$0x1]  ;;  %v3437_v14 = vsel %vm9562_vm14, %v3432_v6, %v3436_v23  ;;  %v8690_v25 = vcombine.low %v10180_v29, %v3877_v42  ;;  %v3441_v32 = vrot.slane %v3439_v33, 4  ;;  %v3444_v40 = vrot.slane %v3442_v17, 5  ;;  %v3747_v39 = vld [vmem:[#allocation2 + $0x88] sm:$0xf] }
 0x104   : > { %v3458_v18 = vshll.u32 %v3203_v54, 16  ;;  %v8658_v24 = vcombine.low %v3427_v51, %v3437_v14  ;;  %v3450_v34 = vrot.slane %v3448_v53, 5  ;;  %v3454_v56 = vrot.slane %v3452_v9, 4  ;;  %v9203_v22 = vld [vmem:[#allocation2 + $0x84] sm:$0xff]   ;;  %v3748_v48 = vld [vmem:[#allocation2 + $0x8c] sm:$0x1] }
 0x105   : > { %v2619_v31 = vpop.permute.xlu0 %2618  ;;  %v1373_v43 = vshrl.u32 %v1111_v12, 16  ;;  %v1376_v37 = vshll.u32 %v1111_v12, 16  ;;  %v3445_v45 = vor.u32 %v3444_v40, %v3441_v32  ;;  %v1382_v47 = vshll.u32 %v1112_v62, 16  ;;  %v1114_v46 = vld [vmem:[#allocation2 + $0x84] sm:$0xf] }
 0x106   : > { %2663 = vst.msk [vmem:[#allocation4 + $0x20] sm:$0xff] %vm12034_vm9, %v2619_v31  ;;  %v3460_v36 = vrot.slane %v3458_v18, 5  ;;  %2949 = vrot.lane.b32.xlu1 %v8627_v28, %s9354_s14  ;;  %3670 = vrot.lane.b32.xlu0 %v8658_v24, %s9357_s17  ;;  %v1386_v49 = vshrl.u32 %v1112_v62, 16  ;;  %v1392_v50 = vshll.u32 %v1113_v26, 16  ;;  %v3455_v44 = vor.u32 %v3454_v56, %v3450_v34  ;;  %v1115_v8 = vld [vmem:[#allocation2 + $0x88] sm:$0xf] }
 0x107   : > { %v1375_v57 = vrot.slane %v1373_v43, 4  ;;  %v1378_v58 = vrot.slane %v1376_v37, 5  ;;  %v8675_v20 = vrot.slane %v3746_v35, 9  ;;  %v3446_v19 = vrot.slane %v3445_v45, 4  ;;  %v1659_v12 = vld [vmem:[#allocation2 + $0x78] sm:$0xe] }
 0x108   : > { %v2076_v55 = vpop.permute.xlu1 %2075  ;;  %v1384_v63 = vrot.slane %v1382_v47, 5  ;;  %v1388_v2 = vrot.slane %v1386_v49, 4  ;;  %v1394_v5 = vrot.slane %v1392_v50, 5  ;;  %v3456_v59 = vrot.slane %v3455_v44, 4  ;;  %v1116_v1 = vld [vmem:[#allocation2 + $0x8c] sm:$0x1]  ;;  %9054 = vmatmul.mubr.msk.bf16.gmra.mrb[4].mxu0 %vm4083_vm15, %v4043_v27 }
 0x109   : > { %2119 = vst.msk [vmem:[#allocation4 + $0x28] sm:$0xff] %vm12031_vm8, %v2076_v55  ;;  %v2940_v60 = vpop.permute.xlu0 %2939  ;;  %v1379_v13 = vor.u32 %v1378_v58, %v1375_v57  ;;  %v3880_v23 = vrot.slane %v3747_v39, 5  ;;  %v3883_v7 = vrot.slane %v3748_v48, 5  ;;  %v3451_v30 = vsel %vm9562_vm14, %v3446_v19, %v3450_v34  ;;  %v1660_v53 = vld [vmem:[#allocation2 + $0x7c] sm:$0xf]  ;;  %v9219_v39 = vld [vmem:[#allocation2 + $0x60] sm:$0xff]  }
 0x10a   : > { %2984 = vst.msk [vmem:[#allocation4 + $0x20] sm:$0xff] %vm12033_vm11, %v2940_v60  ;;  %3127 = vrot.lane.b32.xlu1 %v9203_v22, %s9352_s12  ;;  %3991 = vrot.lane.b32.xlu0 %v8690_v25, %s9355_s15  ;;  %v1389_v52 = vor.u32 %v1388_v2, %v1384_v63  ;;  %v1397_v11 = vshrl.u32 %v1114_v46, 16  ;;  %v1400_v29 = vshll.u32 %v1114_v46, 16  ;;  %v3461_v61 = vsel %vm9562_vm14, %v3456_v59, %v3460_v36  ;;  %v1661_v25 = vld [vmem:[#allocation2 + $0x80] sm:$0x1] }
 0x10b   : > { %v1380_v28 = vrot.slane %v1379_v13, 4  ;;  %v3881_v6 = vsel %vm9526_vm13, %v8675_v20, %v3880_v23  ;;  %v3882_v15 = vrot.slane %v3880_v23, 4  ;;  %v8659_v51 = vcombine.low %v3451_v30, %v3461_v61  ;;  %v1662_v62 = vld [vmem:[#allocation2 + $0x84] sm:$0xe]  ;;  %v1663_v40 = vld [vmem:[#allocation2 + $0x88] sm:$0xf] }
 0x10c   : > { %v1390_v54 = vrot.slane %v1389_v52, 4  ;;  %v1399_v33 = vrot.slane %v1397_v11, 4  ;;  %v1402_v17 = vrot.slane %v1400_v29, 5  ;;  %v1406_v9 = vshll.u32 %v1115_v8, 16  ;;  %v1664_v34 = vld [vmem:[#allocation2 + $0x8c] sm:$0x1] }
 0x10d   : > { %v3118_v42 = vpop.permute.xlu0 %3117  ;;  %v1385_v38 = vsel %vm9562_vm14, %v1380_v28, %v1384_v63  ;;  %v3884_v14 = vsel %vm9526_vm13, %v3882_v15, %v3883_v7  ;;  %v1410_v18 = vshrl.u32 %v1115_v8, 16  ;;  %v1416_v32 = vshll.u32 %v1116_v1, 16  ;;  %v273_v37 = vld [vmem:[#allocation2 + $0x90] sm:$0x1]  ;;  %v489_v50 = vld [vmem:[%s9469_s9 + $0x58] sm:$0xf] }
 0x10e   : > { %3162 = vst.msk [vmem:[#allocation4 + $0x20] sm:$0xff] %vm12032_vm12, %v3118_v42  ;;  %3672 = vrot.lane.b32.xlu1 %v8659_v51, %s9357_s17  ;;  %v1395_v26 = vsel %vm9562_vm14, %v1390_v54, %v1394_v5  ;;  %v8691_v31 = vcombine.low %v3881_v6, %v3884_v14  ;;  %v1403_v24 = vor.u32 %v1402_v17, %v1399_v33  ;;  %v1408_v56 = vrot.slane %v1406_v9, 5  ;;  %v490_v58 = vld [vmem:[%s9469_s9 + $0x5c] sm:$0xf]  ;;  %v2160_v63 = vld [vmem:[#allocation2 + $0x84] sm:$0xf] }
 0x10f   : > { %v8532_v35 = vcombine.low %v1385_v38, %v1395_v26  ;;  %v1412_v36 = vrot.slane %v1410_v18, 4  ;;  %v8548_v43 = vrot.slane %v1659_v12, 9  ;;  %v1418_v45 = vrot.slane %v1416_v32, 5  ;;  %v2161_v2 = vld [vmem:[#allocation2 + $0x88] sm:$0xf]  ;;  %v9220_v23 = vld [vmem:[#allocation2 + $0x6c] sm:$0xff]  }
 0x110   : > { %3993 = vrot.lane.b32.xlu0 %v8691_v31, %s9355_s15  ;;  %v1404_v22 = vrot.slane %v1403_v24, 4  ;;  %v1800_v47 = vrot.slane %v1660_v53, 5  ;;  %v1803_v49 = vrot.slane %v1661_v25, 5  ;;  %v8549_v55 = vrot.slane %v1662_v62, 9  ;;  %v329_v11 = vld [vmem:[#allocation2 + $0x98] sm:$0x1] }
 0x111   : > { %v1413_v48 = vor.u32 %v1412_v36, %v1408_v56  ;;  %v1807_v44 = vrot.slane %v1663_v40, 5  ;;  %v1810_v57 = vrot.slane %v1664_v34, 5  ;;  %vm12053_vm8 = vcmask 31744   ;;  %v2162_v42 = vld [vmem:[#allocation2 + $0x8c] sm:$0x1]  ;;  %v9205_v33 = vld [vmem:[#allocation2 + $0x84] sm:$0xff]  }
 0x112   : > { %1073 = vst.msk [vmem:[#allocation4 + $0x40] sm:$0xff] %vm12053_vm8, %v9219_v39  ;;  %1584 = vrot.lane.b32.xlu1 %v8532_v35, %s9353_s13  ;;  %v1409_v20 = vsel %vm9562_vm14, %v1404_v22, %v1408_v56  ;;  %v1801_v46 = vsel %vm9526_vm13, %v8548_v43, %v1800_v47  ;;  %v1802_v60 = vrot.slane %v1800_v47, 4  ;;  %v274_v19 = vsel %vm9445_vm3, 0, %v273_v37  ;;  %1074 = vst.msk [vmem:[#allocation4 + $0x48] sm:$0xff] %vm12053_vm8, %v9220_v23  ;;  %v2705_v54 = vld [vmem:[#allocation2 + $0x84] sm:$0xe] }
 0x113   : > { %v1414_v5 = vrot.slane %v1413_v48, 4  ;;  %v1808_v27 = vsel %vm9526_vm13, %v8549_v55, %v1807_v44  ;;  %v1809_v59 = vrot.slane %v1807_v44, 4  ;;  %275 = vst [vmem:[#allocation2 + $0x90] sm:$0x1] %v274_v19  ;;  %v689_v13 = vshrl.u32 %v489_v50, 16 }
 0x114   : > { %v1804_v7 = vsel %vm9526_vm13, %v1802_v60, %v1803_v49  ;;  %v692_v30 = vshll.u32 %v489_v50, 16  ;;  %v697_v52 = vshrl.u32 %v490_v58, 16  ;;  %v700_v8 = vshll.u32 %v490_v58, 16  ;;  %v2706_v9 = vld [vmem:[#allocation2 + $0x88] sm:$0xf] }
 0x115   : > { %v1419_v12 = vsel %vm9562_vm14, %v1414_v5, %v1418_v45  ;;  %v8564_v61 = vcombine.low %v1801_v46, %v1804_v7  ;;  %v1811_v28 = vsel %vm9526_vm13, %v1809_v59, %v1810_v57  ;;  %v691_v6 = vrot.slane %v689_v13, 7  ;;  %v276_v18 = vld [vmem:[#allocation2 + $0x9c] sm:$0x1]  ;;  %v10242_v32 = vld [vmem:[%s9469_s9 + $0x60] sm:$0xf] }
 0x116   : > { %v2621_v29 = vpop.permute.xlu1 %2620  ;;  %v8533_v15 = vcombine.low %v1409_v20, %v1419_v12  ;;  %v10236_v1 = vrot.slane %v697_v52, 7  ;;  %v2419_v51 = vshrl.u32 %v2160_v63, 16  ;;  %v2422_v38 = vshll.u32 %v2160_v63, 16  ;;  %v492_v40 = vld [vmem:[%s9469_s9 + $0x64] sm:$0xf] }
 0x117   : > { %2664 = vst.msk [vmem:[#allocation4 + $0x28] sm:$0xff] %vm12034_vm9, %v2621_v29  ;;  %1908 = vrot.lane.b32.xlu0 %v8564_v61, %s9351_s11  ;;  %v694_v17 = vor.u32 %v692_v30, %v691_v6  ;;  %v695_v53 = vrot.slane %v691_v6, 4  ;;  %v2428_v14 = vshll.u32 %v2161_v2, 16  ;;  %v8565_v62 = vcombine.low %v1808_v27, %v1811_v28  ;;  %v2707_v37 = vld [vmem:[#allocation2 + $0x8c] sm:$0x1]  ;;  %v9223_v61 = vld [vmem:[#allocation2 + $0x78] sm:$0xff]  }
 0x118   : > { %1586 = vrot.lane.b32.xlu1 %v8533_v15, %s9353_s13  ;;  %v702_v26 = vor.u32 %v700_v8, %v10236_v1  ;;  %v2421_v31 = vrot.slane %v2419_v51, 4  ;;  %v2432_v24 = vshrl.u32 %v2161_v2, 16  ;;  %v2424_v35 = vrot.slane %v2422_v38, 5  ;;  %v332_v44 = vld [vmem:[#allocation2 + $0xa4] sm:$0x1]  ;;  %1075 = vst.msk [vmem:[#allocation4 + $0x50] sm:$0xff] %vm12053_vm8, %v9223_v61 }
 0x119   : > { %v3663_v25 = vpop.permute.xlu0 %3662  ;;  %v2430_v56 = vrot.slane %v2428_v14, 5  ;;  %v2438_v36 = vshll.u32 %v2162_v42, 16  ;;  %v330_v43 = vsel %vm9476_vm6, 0, %v329_v11  ;;  %v8612_v47 = vrot.slane %v2705_v54, 9  ;;  %v279_v63 = vld [vmem:[#allocation2 + $0xa8] sm:$0x1] }
 0x11a   : > { %v2942_v34 = vpop.permute.xlu1 %2941  ;;  %3707 = vst.msk [vmem:[#allocation4 + $0x20] sm:$0xff] %vm3702_vm4, %v3663_v25  ;;  %v703_v39 = vsel %vm9482_vm7, %v695_v53, %v702_v26  ;;  %v901_v22 = vld [vmem:[#allocation2 + $0x90] sm:$0xf]  ;;  %v2434_v45 = vrot.slane %v2432_v24, 4  ;;  %331 = vst [vmem:[#allocation2 + $0x98] sm:$0x1] %v330_v43  ;;  %v2425_v48 = vor.u32 %v2424_v35, %v2421_v31 }
 0x11b   : > { %2985 = vst.msk [vmem:[#allocation4 + $0x28] sm:$0xff] %vm12033_vm11, %v2942_v34  ;;  %v2843_v49 = vrot.slane %v2706_v9, 5  ;;  %2085 = vrot.lane.b32.xlu0 %v9205_v33, %s9350_s10  ;;  %v902_v50 = vsel %vm9490_vm10, %v694_v17, %v901_v22  ;;  %v2440_v55 = vrot.slane %v2438_v36, 5  ;;  %v2846_v46 = vrot.slane %v2707_v37, 5  ;;  %v10263_v13 = vld [vmem:[%s9469_s9 + $0x68] sm:$0xf] }
 0x11c   : > { %904 = vst.msk [vmem:[#allocation2 + $0x94] sm:$0xf] %vm225_vm0, %v703_v39  ;;  %1910 = vrot.lane.b32.xlu1 %v8565_v62, %s9351_s11  ;;  %903 = vst [vmem:[#allocation2 + $0x90] sm:$0xf] %v902_v50  ;;  %v2435_v58 = vor.u32 %v2434_v45, %v2430_v56  ;;  %v277_v60 = vsel %vm9445_vm3, 0, %v276_v18  ;;  %v704_v2 = vrot.slane %v10236_v1, 4 }
 0x11d   : > { %v3984_v57 = vpop.permute.xlu0 %3983  ;;  %v2845_v20 = vrot.slane %v2843_v49, 4  ;;  %v2426_v5 = vrot.slane %v2425_v48, 4  ;;  %278 = vst [vmem:[#allocation2 + $0x9c] sm:$0x1] %v277_v60  ;;  %v706_v27 = vshrl.u32 %v10242_v32, 16  ;;  %v714_v59 = vshrl.u32 %v492_v40, 16 }
 0x11e   : > { %v3120_v19 = vpop.permute.xlu1 %3119  ;;  %4028 = vst.msk [vmem:[#allocation4 + $0x20] sm:$0xff] %vm4023_vm2, %v3984_v57  ;;  %v2436_v23 = vrot.slane %v2435_v58, 4  ;;  %v2844_v7 = vsel %vm9526_vm13, %v8612_v47, %v2843_v49  ;;  %v717_v30 = vshll.u32 %v492_v40, 16  ;;  %v333_v52 = vsel %vm9476_vm6, 0, %v332_v44  ;;  %v9224_v28 = vld [vmem:[#allocation2 + $0x84] sm:$0xff]  }
 0x11f   : > { %3163 = vst.msk [vmem:[#allocation4 + $0x28] sm:$0xff] %vm12032_vm12, %v3120_v19  ;;  %v2431_v8 = vsel %vm9562_vm14, %v2426_v5, %v2430_v56  ;;  %v708_v11 = vrot.slane %v706_v27, 7  ;;  %v709_v29 = vshll.u32 %v10242_v32, 16  ;;  %v10272_v12 = vrot.slane %v714_v59, 7  ;;  %334 = vst [vmem:[#allocation2 + $0xa4] sm:$0x1] %v333_v52 }
 0x120   : > { %v2441_v6 = vsel %vm9562_vm14, %v2436_v23, %v2440_v55  ;;  %v2847_v15 = vsel %vm9526_vm13, %v2845_v20, %v2846_v46  ;;  %v280_v1 = vsel %vm9445_vm3, 0, %v279_v63  ;;  %v723_v42 = vshrl.u32 %v10263_v13, 16  ;;  %vm12054_vm12 = vmmov %vm12053_vm8 }
 0x121   : > { %v8596_v54 = vcombine.low %v2431_v8, %v2441_v6  ;;  %v905_v33 = vld [vmem:[#allocation2 + $0x98] sm:$0x1]  ;;  %v712_v17 = vrot.slane %v708_v11, 4  ;;  %v719_v53 = vor.u32 %v717_v30, %v10272_v12  ;;  %281 = vst [vmem:[#allocation2 + $0xa8] sm:$0x1] %v280_v1  ;;  %v726_v38 = vshll.u32 %v10263_v13, 16 }
 0x122   : > { %v3665_v51 = vpop.permute.xlu1 %3664  ;;  %1076 = vst.msk [vmem:[#allocation4 + $0x58] sm:$0xff] %vm12054_vm12, %v9224_v28  ;;  %v906_v9 = vsel %vm9445_vm3, %v704_v2, %v905_v33  ;;  %v8628_v24 = vcombine.low %v2844_v7, %v2847_v15  ;;  %v711_v32 = vor.u32 %v709_v29, %v708_v11  ;;  %v721_v44 = vrot.slane %v10272_v12, 4 }
 0x123   : > { %3708 = vst.msk [vmem:[#allocation4 + $0x28] sm:$0xff] %vm3702_vm4, %v3665_v51  ;;  %v3986_v14 = vpop.permute.xlu0 %3985  ;;  %v2164_v18 = vld [vmem:[#allocation2 + $0x94] sm:$0xf]  ;;  %2630 = vrot.lane.b32.xlu0 %v8596_v54, %s9356_s16  ;;  %907 = vst [vmem:[#allocation2 + $0x98] sm:$0x1] %v906_v9  ;;  %v720_v40 = vsel %vm9482_vm7, %v712_v17, %v719_v53  ;;  %v10299_v20 = vrot.slane %v723_v42, 7 }
 0x124   : > { %v2709_v25 = vld [vmem:[#allocation2 + $0x94] sm:$0xf]  ;;  %4029 = vst.msk [vmem:[#allocation4 + $0x28] sm:$0xff] %vm4023_vm2, %v3986_v14  ;;  %v2163_v26 = vld [vmem:[#allocation2 + $0x90] sm:$0xf]  ;;  %v2452_v31 = vshll.u32 %v2164_v18, 16 }
 0x125   : > { %v9206_v62 = vld [vmem:[#allocation2 + $0x90] sm:$0xff]   ;;  %v2443_v34 = vshrl.u32 %v2163_v26, 16  ;;  %v2446_v35 = vshll.u32 %v2163_v26, 16  ;;  %v2456_v56 = vshrl.u32 %v2164_v18, 16  ;;  %v2850_v43 = vrot.slane %v2709_v25, 5 }
 0x126   : > { %v2708_v36 = vld [vmem:[#allocation2 + $0x90] sm:$0xe]  ;;  %911 = vst.msk [vmem:[#allocation2 + $0xa0] sm:$0xf] %vm225_vm0, %v720_v40  ;;  %v1577_v37 = vpop.permute.xlu1 %1576  ;;  %2087 = vrot.lane.b32.xlu1 %v9206_v62, %s9350_s10  ;;  %v10294_v39 = vrot.slane %v2452_v31, 5  ;;  %vm12055_vm12 = vcmask 130144  }
 0x127   : > { %v8613_v22 = vrot.slane %v2708_v36, 9  ;;  %1619 = vst.msk [vmem:[#allocation4 + $0x30] sm:$0xff] %vm1612_vm1, %v1577_v37  ;;  %v2445_v45 = vrot.slane %v2443_v34, 4  ;;  %v2448_v47 = vrot.slane %v2446_v35, 5  ;;  %v2458_v49 = vrot.slane %v2456_v56, 4  ;;  %v9209_v48 = vld [vmem:[#allocation2 + $0x90] sm:$0xff]   ;;  %2951 = vrot.lane.b32.xlu0 %v8628_v24, %s9354_s14  ;;  %vm12056_vm8 = vmmov %vm12055_vm12 }
 0x128   : > { %v2852_v50 = vrot.slane %v2850_v43, 4  ;;  %v4044_v55 = vld [vmem:[#allocation4 + $0x20] sm:$0xff]  ;;  %v908_v57 = vld [vmem:[#allocation2 + $0x9c] sm:$0xf]  ;;  %v912_v27 = vld [vmem:[#allocation2 + $0xa4] sm:$0x1] }
 0x129   : > { %v3204_v58 = vld [vmem:[#allocation2 + $0x90] sm:$0xf]  ;;  %v1901_v46 = vpop.permute.xlu0 %1900  ;;  %9057 = vmatprep.mubr.msk.bf16.mxu0 %vm4083_vm15, %v4044_v55  ;;  %v2449_v60 = vor.u32 %v2448_v47, %v2445_v45  ;;  %v2459_v19 = vor.u32 %v2458_v49, %v10294_v39  ;;  %v909_v63 = vsel %vm9490_vm10, %v711_v32, %v908_v57  ;;  %v3205_v2 = vld [vmem:[#allocation2 + $0x94] sm:$0xf]  ;;  %v913_v30 = vsel %vm9445_vm3, %v721_v44, %v912_v27 }
 0x12a   : > { %v3463_v5 = vshrl.u32 %v3204_v58, 16  ;;  %1943 = vst.msk [vmem:[#allocation4 + $0x30] sm:$0xff] %vm1936_vm5, %v1901_v46  ;;  %910 = vst [vmem:[#allocation2 + $0x9c] sm:$0xf] %v909_v63  ;;  %v3466_v59 = vshll.u32 %v3204_v58, 16  ;;  %v3472_v23 = vshll.u32 %v3205_v2, 16  ;;  %v10312_v6 = vsel %vm9526_vm13, %v8613_v22, %v2850_v43 }
 0x12b   : > { %v3476_v7 = vshrl.u32 %v3205_v2, 16  ;;  %v4045_v8 = vld [vmem:[#allocation4 + $0x28] sm:$0xff]  ;;  %v2450_v29 = vrot.slane %v2449_v60, 4  ;;  %v2460_v12 = vrot.slane %v2459_v19, 4  ;;  %914 = vst [vmem:[#allocation2 + $0xa4] sm:$0x1] %v913_v30  ;;  %3129 = vrot.lane.b32.xlu0 %v9209_v48, %s9352_s12  ;;  %v10327_v43 = vor.u32 %v726_v38, %v10299_v20 }
 0x12c   : > { %v1579_v52 = vpop.permute.xlu1 %1578  ;;  %v2165_v11 = vld [vmem:[#allocation2 + $0x98] sm:$0x1]  ;;  %9058 = vmatmul.mubr.msk.bf16.gmra.mrb[8].mxu0 %vm4083_vm15, %v4045_v8  ;;  %v3465_v54 = vrot.slane %v3463_v5, 4  ;;  %v3468_v33 = vrot.slane %v3466_v59, 5  ;;  %v3474_v17 = vrot.slane %v3472_v23, 5  ;;  %v9225_v59 = vld [vmem:[#allocation2 + $0x90] sm:$0xff]  }
 0x12d   : > { %v2710_v61 = vld [vmem:[#allocation2 + $0x98] sm:$0x1]  ;;  %1620 = vst.msk [vmem:[#allocation4 + $0x38] sm:$0xff] %vm1612_vm1, %v1579_v52  ;;  %v2462_v28 = vshll.u32 %v2165_v11, 16  ;;  %v2078_v42 = vpop.permute.xlu0 %2077  ;;  %v2455_v51 = vsel %vm9562_vm14, %v2450_v29, %v10294_v39  ;;  %v3208_v53 = vld [vmem:[#allocation2 + $0xa0] sm:$0xf] }
 0x12e   : > { %v2853_v15 = vrot.slane %v2710_v61, 5  ;;  %v3206_v1 = vld [vmem:[#allocation2 + $0x98] sm:$0x1]  ;;  %2120 = vst.msk [vmem:[#allocation4 + $0x30] sm:$0xff] %vm12055_vm12, %v2078_v42  ;;  %v3478_v18 = vrot.slane %v3476_v7, 4  ;;  %v3469_v31 = vor.u32 %v3468_v33, %v3465_v54  ;;  %v3496_v24 = vshll.u32 %v3208_v53, 16 }
 0x12f   : > { %v2464_v14 = vrot.slane %v2462_v28, 5  ;;  %v3482_v25 = vshll.u32 %v3206_v1, 16  ;;  %v3749_v62 = vld [vmem:[#allocation2 + $0x90] sm:$0xe]  ;;  %v3500_v32 = vshrl.u32 %v3208_v53, 16  ;;  %vm12057_vm12 = vcmask 31744  }
 0x130   : > { %v2854_v9 = vsel %vm9526_vm13, %v2852_v50, %v2853_v15  ;;  %v1903_v26 = vpop.permute.xlu1 %1902  ;;  %v3479_v34 = vor.u32 %v3478_v18, %v3474_v17  ;;  %v3750_v56 = vld [vmem:[#allocation2 + $0x94] sm:$0xf]  ;;  %v3751_v36 = vld [vmem:[#allocation2 + $0x98] sm:$0x1]  ;;  %v3470_v22 = vrot.slane %v3469_v31, 4  ;;  %v8676_v47 = vrot.slane %v3749_v62, 9 }
 0x131   : > { %1944 = vst.msk [vmem:[#allocation4 + $0x38] sm:$0xff] %vm1936_vm5, %v1903_v26  ;;  %v2465_v40 = vsel %vm9562_vm14, %v2460_v12, %v2464_v14  ;;  %v3484_v35 = vrot.slane %v3482_v25, 5  ;;  %v8629_v39 = vcombine.low %v10312_v6, %v2854_v9  ;;  %v3207_v45 = vld [vmem:[#allocation2 + $0x9c] sm:$0xf]  ;;  %v1117_v49 = vld [vmem:[#allocation2 + $0x90] sm:$0xf] }
 0x132   : > { %v8597_v37 = vcombine.low %v2455_v51, %v2465_v40  ;;  %v3480_v50 = vrot.slane %v3479_v34, 4  ;;  %v3209_v48 = vld [vmem:[#allocation2 + $0xa4] sm:$0x1]  ;;  %v3487_v55 = vshrl.u32 %v3207_v45, 16  ;;  %v3490_v44 = vshll.u32 %v3207_v45, 16  ;;  %v9210_v23 = vld [vmem:[#allocation2 + $0x9c] sm:$0xff]  }
 0x133   : > { %v3498_v57 = vrot.slane %v3496_v24, 5  ;;  %v3475_v58 = vsel %vm9562_vm14, %v3470_v22, %v3474_v17  ;;  %v3502_v13 = vrot.slane %v3500_v32, 4  ;;  %v3506_v38 = vshll.u32 %v3209_v48, 16  ;;  %v1118_v60 = vld [vmem:[#allocation2 + $0x94] sm:$0xf]  ;;  %1077 = vst.msk [vmem:[#allocation4 + $0x60] sm:$0xff] %vm12057_vm12, %v9225_v59 }
 0x134   : > { %2632 = vrot.lane.b32.xlu1 %v8597_v37, %s9356_s16  ;;  %v3887_v46 = vrot.slane %v3750_v56, 5  ;;  %v3485_v19 = vsel %vm9562_vm14, %v3480_v50, %v3484_v35  ;;  %v3489_v63 = vrot.slane %v3487_v55, 4  ;;  %v3492_v2 = vrot.slane %v3490_v44, 5  ;;  %v1119_v27 = vld [vmem:[#allocation2 + $0x98] sm:$0x1]  ;;  %v9226_v1 = vld [vmem:[#allocation2 + $0x9c] sm:$0xff]  }
 0x135   : > { %v3890_v5 = vrot.slane %v3751_v36, 5  ;;  %v8660_v7 = vcombine.low %v3475_v58, %v3485_v19  ;;  %v3503_v30 = vor.u32 %v3502_v13, %v3498_v57  ;;  %v3508_v52 = vrot.slane %v3506_v38, 5  ;;  %v2080_v11 = vpop.permute.xlu1 %2079  ;;  %v3752_v15 = vld [vmem:[#allocation2 + $0x9c] sm:$0xe]  ;;  %v3753_v17 = vld [vmem:[#allocation2 + $0xa0] sm:$0xf] }
 0x136   : > { %v3888_v8 = vsel %vm9526_vm13, %v8676_v47, %v3887_v46  ;;  %v2623_v29 = vpop.permute.xlu0 %2622  ;;  %v3493_v12 = vor.u32 %v3492_v2, %v3489_v63  ;;  %v3889_v61 = vrot.slane %v3887_v46, 4  ;;  %v1421_v28 = vshrl.u32 %v1117_v49, 16  ;;  %2121 = vst.msk [vmem:[#allocation4 + $0x38] sm:$0xff] %vm12056_vm8, %v2080_v11  ;;  %v3754_v25 = vld [vmem:[#allocation2 + $0xa4] sm:$0x1]  ;;  %vm12058_vm8 = vmmov %vm12057_vm12 }
 0x137   : > { %v1424_v6 = vshll.u32 %v1117_v49, 16  ;;  %2665 = vst.msk [vmem:[#allocation4 + $0x30] sm:$0xff] %vm12034_vm9, %v2623_v29  ;;  %3674 = vrot.lane.b32.xlu0 %v8660_v7, %s9357_s17  ;;  %v3504_v42 = vrot.slane %v3503_v30, 4  ;;  %v1430_v51 = vshll.u32 %v1118_v60, 16  ;;  %v1434_v54 = vshrl.u32 %v1118_v60, 16 }
 0x138   : > { %2953 = vrot.lane.b32.xlu1 %v8629_v39, %s9354_s14  ;;  %v1440_v33 = vshll.u32 %v1119_v27, 16  ;;  %v3494_v53 = vrot.slane %v3493_v12, 4  ;;  %v3891_v14 = vsel %vm9526_vm13, %v3889_v61, %v3890_v5  ;;  %v1423_v9 = vrot.slane %v1421_v28, 4  ;;  %1078 = vst.msk [vmem:[#allocation4 + $0x68] sm:$0xff] %vm12058_vm8, %v9226_v1  ;;  %v1120_v32 = vld [vmem:[#allocation2 + $0x9c] sm:$0xf] }
 0x139   : > { %v1426_v18 = vrot.slane %v1424_v6, 5  ;;  %v3509_v62 = vsel %vm9562_vm14, %v3504_v42, %v3508_v52  ;;  %v8692_v26 = vcombine.low %v3888_v8, %v3891_v14  ;;  %v1432_v31 = vrot.slane %v1430_v51, 5  ;;  %v1121_v40 = vld [vmem:[#allocation2 + $0xa0] sm:$0xf]  ;;  %v1122_v39 = vld [vmem:[#allocation2 + $0xa4] sm:$0x1] }
 0x13a   : > { %v1436_v24 = vrot.slane %v1434_v54, 4  ;;  %v2944_v34 = vpop.permute.xlu0 %2943  ;;  %v3499_v35 = vsel %vm9562_vm14, %v3494_v53, %v3498_v57  ;;  %v1442_v36 = vrot.slane %v1440_v33, 5  ;;  %v8677_v37 = vrot.slane %v3752_v15, 9  ;;  %v1665_v50 = vld [vmem:[#allocation2 + $0x90] sm:$0xe] }
 0x13b   : > { %v1427_v56 = vor.u32 %v1426_v18, %v1423_v9  ;;  %2986 = vst.msk [vmem:[#allocation4 + $0x30] sm:$0xff] %vm12033_vm11, %v2944_v34  ;;  %v8661_v22 = vcombine.low %v3499_v35, %v3509_v62  ;;  %3995 = vrot.lane.b32.xlu0 %v8692_v26, %s9355_s15  ;;  %v3894_v47 = vrot.slane %v3753_v17, 5  ;;  %v3897_v49 = vrot.slane %v3754_v25, 5  ;;  %v1666_v57 = vld [vmem:[#allocation2 + $0x94] sm:$0xf] }
 0x13c   : > { %3131 = vrot.lane.b32.xlu1 %v9210_v23, %s9352_s12  ;;  %v1437_v45 = vor.u32 %v1436_v24, %v1432_v31  ;;  %v1445_v55 = vshrl.u32 %v1120_v32, 16  ;;  %v1448_v44 = vshll.u32 %v1120_v32, 16  ;;  %v1454_v58 = vshll.u32 %v1121_v40, 16  ;;  %v1667_v19 = vld [vmem:[#allocation2 + $0x98] sm:$0x1] }
 0x13d   : > { %v1428_v48 = vrot.slane %v1427_v56, 4  ;;  %v3895_v38 = vsel %vm9526_vm13, %v8677_v37, %v3894_v47  ;;  %v3896_v46 = vrot.slane %v3894_v47, 4  ;;  %v1458_v60 = vshrl.u32 %v1121_v40, 16  ;;  %v1668_v23 = vld [vmem:[#allocation2 + $0x9c] sm:$0xe] }
 0x13e   : > { %v1438_v13 = vrot.slane %v1437_v45, 4  ;;  %v3122_v63 = vpop.permute.xlu0 %3121  ;;  %v1447_v5 = vrot.slane %v1445_v55, 4  ;;  %v1450_v27 = vrot.slane %v1448_v44, 5  ;;  %v1456_v59 = vrot.slane %v1454_v58, 5  ;;  %v1669_v11 = vld [vmem:[#allocation2 + $0xa0] sm:$0xf] }
 0x13f   : > { %v1433_v2 = vsel %vm9562_vm14, %v1428_v48, %v1432_v31  ;;  %vm12059_vm12 = vcmask 228544   ;;  %v3898_v30 = vsel %vm9526_vm13, %v3896_v46, %v3897_v49  ;;  %v1460_v52 = vrot.slane %v1458_v60, 4  ;;  %v1670_v29 = vld [vmem:[#allocation2 + $0xa4] sm:$0x1]  ;;  %v494_v15 = vld [vmem:[%s9469_s9 + $0x6c] sm:$0xf] }
 0x140   : > { %3164 = vst.msk [vmem:[#allocation4 + $0x30] sm:$0xff] %vm12059_vm12, %v3122_v63  ;;  %3676 = vrot.lane.b32.xlu1 %v8661_v22, %s9357_s17  ;;  %v1443_v7 = vsel %vm9562_vm14, %v1438_v13, %v1442_v36  ;;  %v1464_v8 = vshll.u32 %v1122_v39, 16  ;;  %v8693_v61 = vcombine.low %v3895_v38, %v3898_v30  ;;  %v1451_v28 = vor.u32 %v1450_v27, %v1447_v5  ;;  %v915_v33 = vld [vmem:[#allocation2 + $0xa8] sm:$0xf]  ;;  %v2166_v18 = vld [vmem:[#allocation2 + $0x9c] sm:$0xf]  ;;  %vm12060_vm8 = vmmov %vm12059_vm12 }
 0x141   : > { %v8534_v12 = vcombine.low %v1433_v2, %v1443_v7  ;;  %v8550_v6 = vrot.slane %v1665_v50, 9  ;;  %v1461_v1 = vor.u32 %v1460_v52, %v1456_v59  ;;  %v1814_v51 = vrot.slane %v1666_v57, 5  ;;  %v2167_v25 = vld [vmem:[#allocation2 + $0xa0] sm:$0xf]  ;;  %v2168_v22 = vld [vmem:[#allocation2 + $0xa4] sm:$0x1] }
 0x142   : > { %v1466_v42 = vrot.slane %v1464_v8, 5  ;;  %v1817_v54 = vrot.slane %v1667_v19, 5  ;;  %3997 = vrot.lane.b32.xlu0 %v8693_v61, %s9355_s15  ;;  %v1452_v17 = vrot.slane %v1451_v28, 4  ;;  %v8551_v53 = vrot.slane %v1668_v23, 9  ;;  %v335_v45 = vld [vmem:[#allocation2 + $0xb0] sm:$0x1] }
 0x143   : > { %v1821_v14 = vrot.slane %v1669_v11, 5  ;;  %v1824_v9 = vrot.slane %v1670_v29, 5  ;;  %v1462_v62 = vrot.slane %v1461_v1, 4  ;;  %v1815_v26 = vsel %vm9526_vm13, %v8550_v6, %v1814_v51  ;;  %v2711_v55 = vld [vmem:[#allocation2 + $0x9c] sm:$0xe] }
 0x144   : > { %1588 = vrot.lane.b32.xlu1 %v8534_v12, %s9353_s13  ;;  %v1816_v31 = vrot.slane %v1814_v51, 4  ;;  %v729_v24 = vrot.slane %v10299_v20, 4  ;;  %v1457_v32 = vsel %vm9562_vm14, %v1452_v17, %v1456_v59  ;;  %v731_v35 = vshrl.u32 %v494_v15, 16  ;;  %v282_v44 = vld [vmem:[#allocation2 + $0xb4] sm:$0x1]  ;;  %v9211_v19 = vld [vmem:[#allocation2 + $0x9c] sm:$0xff]  }
 0x145   : > { %v1822_v40 = vsel %vm9526_vm13, %v8551_v53, %v1821_v14  ;;  %v1823_v34 = vrot.slane %v1821_v14, 4  ;;  %v2625_v56 = vpop.permute.xlu1 %2624  ;;  %v1467_v36 = vsel %vm9562_vm14, %v1462_v62, %v1466_v42  ;;  %v734_v39 = vshll.u32 %v494_v15, 16  ;;  %v2712_v46 = vld [vmem:[#allocation2 + $0xa0] sm:$0xf]  ;;  %v495_v60 = vld [vmem:[%s9469_s9 + $0x70] sm:$0xf] }
 0x146   : > { %v1818_v37 = vsel %vm9526_vm13, %v1816_v31, %v1817_v54  ;;  %v916_v20 = vsel %vm9490_vm10, %v10327_v43, %v915_v33  ;;  %2666 = vst.msk [vmem:[#allocation4 + $0x38] sm:$0xff] %vm12034_vm9, %v2625_v56  ;;  %v8535_v47 = vcombine.low %v1457_v32, %v1467_v36  ;;  %v10382_v48 = vrot.slane %v731_v35, 7  ;;  %v2713_v59 = vld [vmem:[#allocation2 + $0xa4] sm:$0x1]  ;;  %v496_v11 = vld [vmem:[%s9469_s9 + $0x74] sm:$0xf] }
 0x147   : > { %v8566_v49 = vcombine.low %v1815_v26, %v1818_v37  ;;  %v1825_v50 = vsel %vm9526_vm13, %v1823_v34, %v1824_v9  ;;  %917 = vst [vmem:[#allocation2 + $0xa8] sm:$0xf] %v916_v20  ;;  %v3667_v58 = vpop.permute.xlu0 %3666  ;;  %v2467_v13 = vshrl.u32 %v2166_v18, 16  ;;  %v2470_v38 = vshll.u32 %v2166_v18, 16 }
 0x148   : > { %v8567_v57 = vcombine.low %v1822_v40, %v1825_v50  ;;  %v2476_v43 = vshll.u32 %v2167_v25, 16  ;;  %3709 = vst.msk [vmem:[#allocation4 + $0x30] sm:$0xff] %vm3702_vm4, %v3667_v58  ;;  %1590 = vrot.lane.b32.xlu1 %v8535_v47, %s9353_s13  ;;  %v736_v63 = vor.u32 %v734_v39, %v10382_v48  ;;  %v738_v2 = vrot.slane %v10382_v48, 4 }
 0x149   : > { %1912 = vrot.lane.b32.xlu0 %v8566_v49, %s9351_s11  ;;  %v2480_v5 = vshrl.u32 %v2167_v25, 16  ;;  %v2486_v27 = vshll.u32 %v2168_v22, 16  ;;  %v2946_v23 = vpop.permute.xlu1 %2945  ;;  %v2469_v7 = vrot.slane %v2467_v13, 4  ;;  %v2472_v30 = vrot.slane %v2470_v38, 5 }
 0x14a   : > { %v2478_v52 = vrot.slane %v2476_v43, 5  ;;  %v336_v8 = vsel %vm9476_vm6, 0, %v335_v45  ;;  %2987 = vst.msk [vmem:[#allocation4 + $0x38] sm:$0xff] %vm12033_vm11, %v2946_v23  ;;  %v737_v29 = vsel %vm9482_vm7, %v729_v24, %v736_v63  ;;  %v8614_v28 = vrot.slane %v2711_v55, 9  ;;  %v338_v63 = vld [vmem:[#allocation2 + $0xbc] sm:$0x1] }
 0x14b   : > { %v2482_v12 = vrot.slane %v2480_v5, 4  ;;  %v2488_v61 = vrot.slane %v2486_v27, 5  ;;  %337 = vst [vmem:[#allocation2 + $0xb0] sm:$0x1] %v336_v8  ;;  %v3988_v6 = vpop.permute.xlu0 %3987  ;;  %918 = vst.msk [vmem:[#allocation2 + $0xac] sm:$0xf] %vm225_vm0, %v737_v29  ;;  %v2473_v15 = vor.u32 %v2472_v30, %v2469_v7 }
 0x14c   : > { %v2857_v1 = vrot.slane %v2712_v46, 5  ;;  %v2860_v42 = vrot.slane %v2713_v59, 5  ;;  %v283_v51 = vsel %vm9445_vm3, 0, %v282_v44  ;;  %4030 = vst.msk [vmem:[#allocation4 + $0x30] sm:$0xff] %vm4023_vm2, %v3988_v6  ;;  %1914 = vrot.lane.b32.xlu1 %v8567_v57, %s9351_s11  ;;  %v740_v33 = vshrl.u32 %v495_v60, 16 }
 0x14d   : > { %2089 = vrot.lane.b32.xlu0 %v9211_v19, %s9350_s10  ;;  %v2483_v54 = vor.u32 %v2482_v12, %v2478_v52  ;;  %284 = vst [vmem:[#allocation2 + $0xb4] sm:$0x1] %v283_v51  ;;  %v743_v17 = vshll.u32 %v495_v60, 16  ;;  %v748_v53 = vshrl.u32 %v496_v11, 16  ;;  %v3124_v14 = vpop.permute.xlu1 %3123  ;;  %v2474_v9 = vrot.slane %v2473_v15, 4 }
 0x14e   : > { %v2169_v18 = vld [vmem:[#allocation2 + $0xa8] sm:$0xf]  ;;  %v2859_v25 = vrot.slane %v2857_v1, 4  ;;  %3165 = vst.msk [vmem:[#allocation4 + $0x38] sm:$0xff] %vm12060_vm8, %v3124_v14  ;;  %v742_v24 = vrot.slane %v740_v33, 7  ;;  %v2858_v40 = vsel %vm9526_vm13, %v8614_v28, %v2857_v1  ;;  %v751_v49 = vshll.u32 %v496_v11, 16 }
 0x14f   : > { %v2484_v62 = vrot.slane %v2483_v54, 4  ;;  %v2491_v26 = vshrl.u32 %v2169_v18, 16  ;;  %v2494_v31 = vshll.u32 %v2169_v18, 16  ;;  %v2479_v32 = vsel %vm9562_vm14, %v2474_v9, %v2478_v52  ;;  %v10407_v34 = vld [vmem:[#allocation2 + $0xa8] sm:$0xe] }
 0x150   : > { %v10409_v35 = vrot.slane %v748_v53, 7  ;;  %v2861_v39 = vsel %vm9526_vm13, %v2859_v25, %v2860_v42  ;;  %v745_v45 = vor.u32 %v743_v17, %v742_v24  ;;  %v746_v47 = vrot.slane %v742_v24, 4  ;;  %v3210_v50 = vld [vmem:[#allocation2 + $0xa8] sm:$0xf] }
 0x151   : > { %v2489_v56 = vsel %vm9562_vm14, %v2484_v62, %v2488_v61  ;;  %v2493_v36 = vrot.slane %v2491_v26, 4  ;;  %v2496_v37 = vrot.slane %v2494_v31, 5  ;;  %v8615_v57 = vrot.slane %v10407_v34, 9  ;;  %v10420_v5 = vld [vmem:[#allocation2 + $0xa8] sm:$0xe] }
 0x152   : > { %v8598_v20 = vcombine.low %v2479_v32, %v2489_v56  ;;  %v919_v22 = vld [vmem:[#allocation2 + $0xb0] sm:$0x1]  ;;  %v9212_v48 = vld [vmem:[#allocation2 + $0xa8] sm:$0xff]   ;;  %v3990_v13 = vpop.permute.xlu0 %3989  ;;  %v8630_v46 = vcombine.low %v2858_v40, %v2861_v39  ;;  %v753_v19 = vor.u32 %v751_v49, %v10409_v35  ;;  %v3511_v23 = vshrl.u32 %v3210_v50, 16 }
 0x153   : > { %v920_v55 = vsel %vm9445_vm3, %v738_v2, %v919_v22  ;;  %v2170_v44 = vld [vmem:[#allocation2 + $0xac] sm:$0xf]  ;;  %v2497_v58 = vor.u32 %v2496_v37, %v2493_v36  ;;  %v3669_v27 = vpop.permute.xlu1 %3668  ;;  %2091 = vrot.lane.b32.xlu1 %v9212_v48, %s9350_s10  ;;  %v10423_v7 = vld [vmem:[#allocation2 + $0xa8] sm:$0xf]  ;;  %v755_v28 = vrot.slane %v10409_v35, 4  ;;  %v3514_v15 = vshll.u32 %v3210_v50, 16 }
 0x154   : > { %2634 = vrot.lane.b32.xlu0 %v8598_v20, %s9356_s16  ;;  %921 = vst [vmem:[#allocation2 + $0xb0] sm:$0x1] %v920_v55  ;;  %v2500_v38 = vshll.u32 %v2170_v44, 16  ;;  %v2504_v43 = vshrl.u32 %v2170_v44, 16  ;;  %v2715_v60 = vld [vmem:[#allocation2 + $0xac] sm:$0xf]  ;;  %v754_v8 = vsel %vm9482_vm7, %v746_v47, %v753_v19 }
 0x155   : > { %v2864_v2 = vrot.slane %v2715_v60, 5  ;;  %v922_v59 = vld [vmem:[#allocation2 + $0xb4] sm:$0xf]  ;;  %3710 = vst.msk [vmem:[#allocation4 + $0x38] sm:$0xff] %vm3702_vm4, %v3669_v27  ;;  %v3211_v29 = vld [vmem:[#allocation2 + $0xac] sm:$0xf] }
 0x156   : > { %v10426_v30 = vrot.slane %v2500_v38, 5  ;;  %v2506_v52 = vrot.slane %v2504_v43, 4  ;;  %v923_v11 = vsel %vm9490_vm10, %v745_v45, %v922_v59  ;;  %v3756_v12 = vld [vmem:[#allocation2 + $0xac] sm:$0xf]  ;;  %4031 = vst.msk [vmem:[#allocation4 + $0x38] sm:$0xff] %vm4023_vm2, %v3990_v13  ;;  %v10433_v61 = vrot.slane %v2497_v58, 4 }
 0x157   : > { %924 = vst [vmem:[#allocation2 + $0xb4] sm:$0xf] %v923_v11  ;;  %925 = vst.msk [vmem:[#allocation2 + $0xb8] sm:$0xf] %vm225_vm0, %v754_v8  ;;  %v3513_v6 = vrot.slane %v3511_v23, 4  ;;  %v4046_v1 = vld [vmem:[#allocation4 + $0x30] sm:$0xff]  ;;  %v1581_v53 = vpop.permute.xlu1 %1580  ;;  %v10448_v56 = vsel %vm9526_vm13, %v8615_v57, %v2864_v2 }
 0x158   : > { %v2507_v42 = vor.u32 %v2506_v52, %v10426_v30  ;;  %2955 = vrot.lane.b32.xlu0 %v8630_v46, %s9354_s14  ;;  %v2866_v51 = vrot.slane %v2864_v2, 4  ;;  %v9215_v54 = vld [vmem:[#allocation2 + $0xa8] sm:$0xff]   ;;  %v3520_v33 = vshll.u32 %v3211_v29, 16  ;;  %v3524_v17 = vshrl.u32 %v3211_v29, 16  ;;  %9061 = vmatprep.mubr.msk.bf16.mxu0 %vm4083_vm15, %v4046_v1  ;;  %1621 = vst.msk [vmem:[#allocation4 + $0x40] sm:$0xff] %vm1612_vm1, %v1581_v53  ;;  %v1905_v62 = vpop.permute.xlu0 %1904 }
 0x159   : > { %v3516_v14 = vrot.slane %v3514_v15, 5  ;;  %v339_v9 = vsel %vm9476_vm6, 0, %v338_v63  ;;  %v8678_v18 = vrot.slane %v10420_v5, 9  ;;  %v3901_v25 = vrot.slane %v3756_v12, 5  ;;  %1945 = vst.msk [vmem:[#allocation4 + $0x40] sm:$0xff] %vm1936_vm5, %v1905_v62 }
 0x15a   : > { %v2508_v26 = vrot.slane %v2507_v42, 4  ;;  %v3522_v31 = vrot.slane %v3520_v33, 5  ;;  %v3526_v24 = vrot.slane %v3524_v17, 4  ;;  %340 = vst [vmem:[#allocation2 + $0xbc] sm:$0x1] %v339_v9  ;;  %v1469_v32 = vshrl.u32 %v10423_v7, 16 }
 0x15b   : > { %v2171_v40 = vld [vmem:[#allocation2 + $0xb0] sm:$0x1]  ;;  %v3517_v37 = vor.u32 %v3516_v14, %v3513_v6  ;;  %v1583_v49 = vpop.permute.xlu1 %1582  ;;  %v2503_v50 = vsel %vm9562_vm14, %v10433_v61, %v10426_v30  ;;  %v3903_v55 = vrot.slane %v3901_v25, 4  ;;  %v3902_v38 = vsel %vm9526_vm13, %v8678_v18, %v3901_v25  ;;  %v1124_v52 = vld [vmem:[#allocation2 + $0xac] sm:$0xf] }
 0x15c   : > { %v2716_v34 = vld [vmem:[#allocation2 + $0xb0] sm:$0x1]  ;;  %v2510_v39 = vshll.u32 %v2171_v40, 16  ;;  %3133 = vrot.lane.b32.xlu0 %v9215_v54, %s9352_s12  ;;  %v3527_v22 = vor.u32 %v3526_v24, %v3522_v31  ;;  %1622 = vst.msk [vmem:[#allocation4 + $0x48] sm:$0xff] %vm1612_vm1, %v1583_v49  ;;  %v2082_v58 = vpop.permute.xlu0 %2081  ;;  %v10460_v43 = vrot.slane %v1469_v32, 4  ;;  %vm12061_vm12 = vcmask 130144  }
 0x15d   : > { %v3212_v36 = vld [vmem:[#allocation2 + $0xb0] sm:$0x1]  ;;  %v2867_v20 = vrot.slane %v2716_v34, 5  ;;  %v3518_v48 = vrot.slane %v3517_v37, 4  ;;  %2122 = vst.msk [vmem:[#allocation4 + $0x40] sm:$0xff] %vm12061_vm12, %v2082_v58  ;;  %v4047_v1 = vld [vmem:[#allocation4 + $0x38] sm:$0xff] }
 0x15e   : > { %v3530_v45 = vshll.u32 %v3212_v36, 16  ;;  %v3757_v47 = vld [vmem:[#allocation2 + $0xb0] sm:$0x1]  ;;  %v2512_v57 = vrot.slane %v2510_v39, 5  ;;  %v3528_v19 = vrot.slane %v3527_v22, 4  ;;  %9062 = vmatmul.mubr.msk.bf16.gmra.mrb[12].mxu0 %vm4083_vm15, %v4047_v1  ;;  %v1472_v18 = vshll.u32 %v10423_v7, 16 }
 0x15f   : > { %v3904_v44 = vrot.slane %v3757_v47, 5  ;;  %v2868_v13 = vsel %vm9526_vm13, %v2866_v51, %v2867_v20  ;;  %v3523_v60 = vsel %vm9562_vm14, %v3518_v48, %v3522_v31  ;;  %v3213_v5 = vld [vmem:[#allocation2 + $0xb4] sm:$0xf]  ;;  %v3214_v27 = vld [vmem:[#allocation2 + $0xb8] sm:$0xf]  ;;  %v1907_v8 = vpop.permute.xlu1 %1906  ;;  %v1478_v62 = vshll.u32 %v1124_v52, 16 }
 0x160   : > { %v8631_v46 = vcombine.low %v10448_v56, %v2868_v13  ;;  %v3532_v63 = vrot.slane %v3530_v45, 5  ;;  %v2513_v2 = vsel %vm9562_vm14, %v2508_v26, %v2512_v57  ;;  %v3535_v59 = vshrl.u32 %v3213_v5, 16  ;;  %v1125_v15 = vld [vmem:[#allocation2 + $0xb0] sm:$0x1]  ;;  %1946 = vst.msk [vmem:[#allocation4 + $0x48] sm:$0xff] %vm1936_vm5, %v1907_v8  ;;  %v9227_v36 = vld [vmem:[#allocation2 + $0xa8] sm:$0xff]  }
 0x161   : > { %v3538_v23 = vshll.u32 %v3213_v5, 16  ;;  %v3544_v30 = vshll.u32 %v3214_v27, 16  ;;  %v8599_v11 = vcombine.low %v2503_v50, %v2513_v2  ;;  %v926_v12 = vld [vmem:[#allocation2 + $0xbc] sm:$0x1]  ;;  %v3548_v61 = vshrl.u32 %v3214_v27, 16  ;;  %v9216_v20 = vld [vmem:[#allocation2 + $0xb4] sm:$0xff]  }
 0x162   : > { %v3533_v29 = vsel %vm9562_vm14, %v3528_v19, %v3532_v63  ;;  %v3905_v6 = vsel %vm9526_vm13, %v3903_v55, %v3904_v44  ;;  %v927_v51 = vsel %vm9445_vm3, %v755_v28, %v926_v12  ;;  %v3537_v54 = vrot.slane %v3535_v59, 4  ;;  %v3759_v17 = vld [vmem:[#allocation2 + $0xb8] sm:$0xf]  ;;  %v3758_v25 = vld [vmem:[#allocation2 + $0xb4] sm:$0xe] }
 0x163   : > { %v8662_v42 = vcombine.low %v3523_v60, %v3533_v29  ;;  %v3540_v33 = vrot.slane %v3538_v23, 5  ;;  %2636 = vrot.lane.b32.xlu1 %v8599_v11, %s9356_s16  ;;  %928 = vst [vmem:[#allocation2 + $0xbc] sm:$0x1] %v927_v51  ;;  %v10479_v53 = vrot.slane %v3544_v30, 5  ;;  %v3550_v14 = vrot.slane %v3548_v61, 4  ;;  %v9228_v12 = vld [vmem:[#allocation2 + $0xb4] sm:$0xff]  }
 0x164   : > { %v8694_v9 = vcombine.low %v3902_v38, %v3905_v6  ;;  %v1482_v28 = vshrl.u32 %v1124_v52, 16  ;;  %v1488_v26 = vshll.u32 %v1125_v15, 16  ;;  %v1126_v31 = vld [vmem:[#allocation2 + $0xb4] sm:$0xf]  ;;  %v10483_v24 = vld [vmem:[#allocation2 + $0xa8] sm:$0xe] }
 0x165   : > { %3678 = vrot.lane.b32.xlu0 %v8662_v42, %s9357_s17  ;;  %v3541_v35 = vor.u32 %v3540_v33, %v3537_v54  ;;  %v3551_v32 = vor.u32 %v3550_v14, %v10479_v53  ;;  %v1474_v40 = vrot.slane %v1472_v18, 5  ;;  %v3908_v34 = vrot.slane %v3759_v17, 5  ;;  %v1127_v56 = vld [vmem:[#allocation2 + $0xb8] sm:$0xf]  ;;  %v2627_v50 = vpop.permute.xlu0 %2626  ;;  %v1672_v60 = vld [vmem:[#allocation2 + $0xac] sm:$0xf] }
 0x166   : > { %v10486_v37 = vrot.slane %v1478_v62, 5  ;;  %v1484_v39 = vrot.slane %v1482_v28, 4  ;;  %v8679_v7 = vrot.slane %v3758_v25, 9  ;;  %v1490_v49 = vrot.slane %v1488_v26, 5  ;;  %v2084_v57 = vpop.permute.xlu1 %2083  ;;  %2667 = vst.msk [vmem:[#allocation4 + $0x40] sm:$0xff] %vm12034_vm9, %v2627_v50 }
 0x167   : > { %2957 = vrot.lane.b32.xlu1 %v8631_v46, %s9354_s14  ;;  %v3542_v22 = vrot.slane %v3541_v35, 4  ;;  %v3552_v45 = vrot.slane %v3551_v32, 4  ;;  %v1475_v47 = vor.u32 %v1474_v40, %v10460_v43  ;;  %vm12062_vm8 = vcmask 31744   ;;  %2123 = vst.msk [vmem:[#allocation4 + $0x48] sm:$0xff] %vm12061_vm12, %v2084_v57  ;;  %v1673_v59 = vld [vmem:[#allocation2 + $0xb0] sm:$0x1] }
 0x168   : > { %1079 = vst.msk [vmem:[#allocation4 + $0x70] sm:$0xff] %vm12062_vm8, %v9227_v36  ;;  %v1485_v48 = vor.u32 %v1484_v39, %v10486_v37  ;;  %v3910_v55 = vrot.slane %v3908_v34, 4  ;;  %v1493_v44 = vshrl.u32 %v1126_v31, 16  ;;  %v1496_v58 = vshll.u32 %v1126_v31, 16  ;;  %v1674_v42 = vld [vmem:[#allocation2 + $0xb4] sm:$0xe] }
 0x169   : > { %3999 = vrot.lane.b32.xlu0 %v8694_v9, %s9355_s15  ;;  %v1476_v13 = vrot.slane %v1475_v47, 4  ;;  %v1502_v38 = vshll.u32 %v1127_v56, 16  ;;  %v1506_v46 = vshrl.u32 %v1127_v56, 16  ;;  %v8552_v43 = vrot.slane %v10483_v24, 9  ;;  %v2948_v29 = vpop.permute.xlu0 %2947  ;;  %v285_v51 = vld [vmem:[#allocation2 + $0xc0] sm:$0x1] }
 0x16a   : > { %v3215_v19 = vld [vmem:[#allocation2 + $0xbc] sm:$0x1]  ;;  %v1486_v63 = vrot.slane %v1485_v48, 4  ;;  %v3909_v27 = vsel %vm9526_vm13, %v8679_v7, %v3908_v34  ;;  %v1495_v2 = vrot.slane %v1493_v44, 4  ;;  %v3547_v23 = vsel %vm9562_vm14, %v3542_v22, %v10479_v53  ;;  %2988 = vst.msk [vmem:[#allocation4 + $0x40] sm:$0xff] %vm12033_vm11, %v2948_v29 }
 0x16b   : > { %v3760_v5 = vld [vmem:[#allocation2 + $0xbc] sm:$0x1]  ;;  %3135 = vrot.lane.b32.xlu1 %v9216_v20, %s9352_s12  ;;  %v3554_v30 = vshll.u32 %v3215_v19, 16  ;;  %v1498_v11 = vrot.slane %v1496_v58, 5  ;;  %v1481_v61 = vsel %vm9562_vm14, %v1476_v13, %v10486_v37  ;;  %v1504_v6 = vrot.slane %v1502_v38, 5  ;;  %1080 = vst.msk [vmem:[#allocation4 + $0x78] sm:$0xff] %vm12062_vm8, %v9228_v12 }
 0x16c   : > { %v3911_v52 = vrot.slane %v3760_v5, 5  ;;  %v1128_v8 = vld [vmem:[#allocation2 + $0xbc] sm:$0x1]  ;;  %v1508_v15 = vrot.slane %v1506_v46, 4  ;;  %v1491_v33 = vsel %vm9562_vm14, %v1486_v63, %v1490_v49  ;;  %v1675_v14 = vld [vmem:[#allocation2 + $0xb8] sm:$0xf] }
 0x16d   : > { %v1512_v1 = vshll.u32 %v1128_v8, 16  ;;  %v3556_v54 = vrot.slane %v3554_v30, 5  ;;  %v1499_v53 = vor.u32 %v1498_v11, %v1495_v2  ;;  %v1676_v9 = vld [vmem:[#allocation2 + $0xbc] sm:$0x1]  ;;  %v1828_v62 = vrot.slane %v1672_v60, 5  ;;  %v3126_v40 = vpop.permute.xlu0 %3125 }
 0x16e   : > { %v3912_v17 = vsel %vm9526_vm13, %v3910_v55, %v3911_v52  ;;  %v1509_v25 = vor.u32 %v1508_v15, %v1504_v6  ;;  %v1831_v31 = vrot.slane %v1673_v59, 5  ;;  %v8553_v24 = vrot.slane %v1674_v42, 9  ;;  %v497_v32 = vld [vmem:[%s9469_s9 + $0x78] sm:$0xf]  ;;  %v498_v39 = vld [vmem:[%s9469_s9 + $0x7c] sm:$0xf] }
 0x16f   : > { %v8695_v18 = vcombine.low %v3909_v27, %v3912_v17  ;;  %v1514_v35 = vrot.slane %v1512_v1, 5  ;;  %v3557_v28 = vsel %vm9562_vm14, %v3552_v45, %v3556_v54  ;;  %v1500_v26 = vrot.slane %v1499_v53, 4  ;;  %v2172_v47 = vld [vmem:[#allocation2 + $0xb4] sm:$0xf]  ;;  %v2173_v44 = vld [vmem:[#allocation2 + $0xb8] sm:$0xf] }
 0x170   : > { %v8663_v34 = vcombine.low %v3547_v23, %v3557_v28  ;;  %v1510_v56 = vrot.slane %v1509_v25, 4  ;;  %v1829_v36 = vsel %vm9526_vm13, %v8552_v43, %v1828_v62  ;;  %v1830_v37 = vrot.slane %v1828_v62, 4  ;;  %v341_v63 = vld [vmem:[#allocation2 + $0xc8] sm:$0x1]  ;;  %v9217_v27 = vld [vmem:[#allocation2 + $0xb4] sm:$0xff]  }
 0x171   : > { %4001 = vrot.lane.b32.xlu0 %v8695_v18, %s9355_s15  ;;  %vm12063_vm12 = vcmask 228544   ;;  %v8536_v7 = vcombine.low %v1481_v61, %v1491_v33  ;;  %v1835_v20 = vrot.slane %v1675_v14, 5  ;;  %v1838_v22 = vrot.slane %v1676_v9, 5  ;;  %v2174_v2 = vld [vmem:[#allocation2 + $0xbc] sm:$0x1] }
 0x172   : > { %3166 = vst.msk [vmem:[#allocation4 + $0x40] sm:$0xff] %vm12063_vm12, %v3126_v40  ;;  %v286_v45 = vsel %vm9445_vm3, 0, %v285_v51  ;;  %3680 = vrot.lane.b32.xlu1 %v8663_v34, %s9357_s17  ;;  %v1505_v49 = vsel %vm9562_vm14, %v1500_v26, %v1504_v6  ;;  %v1832_v50 = vsel %vm9526_vm13, %v1830_v37, %v1831_v31  ;;  %v757_v48 = vshrl.u32 %v497_v32, 16  ;;  %v2717_v12 = vld [vmem:[#allocation2 + $0xb4] sm:$0xe] }
 0x173   : > { %287 = vst [vmem:[#allocation2 + $0xc0] sm:$0x1] %v286_v45  ;;  %v760_v55 = vshll.u32 %v497_v32, 16  ;;  %v1515_v58 = vsel %vm9562_vm14, %v1510_v56, %v1514_v35  ;;  %v8568_v57 = vcombine.low %v1829_v36, %v1832_v50  ;;  %v10530_v13 = vsel %vm9526_vm13, %v8553_v24, %v1835_v20  ;;  %v2718_v61 = vld [vmem:[#allocation2 + $0xb8] sm:$0xf] }
 0x174   : > { %v1837_v38 = vrot.slane %v1835_v20, 4  ;;  %v759_v46 = vrot.slane %v757_v48, 7  ;;  %v765_v60 = vshrl.u32 %v498_v39, 16  ;;  %v768_v43 = vshll.u32 %v498_v39, 16  ;;  %v2629_v6 = vpop.permute.xlu1 %2628  ;;  %v2719_v54 = vld [vmem:[#allocation2 + $0xbc] sm:$0x1] }
 0x175   : > { %v2515_v19 = vshrl.u32 %v2172_v47, 16  ;;  %1916 = vrot.lane.b32.xlu0 %v8568_v57, %s9351_s11  ;;  %v2518_v59 = vshll.u32 %v2172_v47, 16  ;;  %v2524_v23 = vshll.u32 %v2173_v44, 16  ;;  %v2528_v30 = vshrl.u32 %v2173_v44, 16  ;;  %2668 = vst.msk [vmem:[#allocation4 + $0x48] sm:$0xff] %vm12034_vm9, %v2629_v6 }
 0x176   : > { %v1839_v5 = vsel %vm9526_vm13, %v1837_v38, %v1838_v22  ;;  %1592 = vrot.lane.b32.xlu1 %v8536_v7, %s9353_s13  ;;  %v8537_v52 = vcombine.low %v1505_v49, %v1515_v58  ;;  %v762_v8 = vor.u32 %v760_v55, %v759_v46  ;;  %v763_v11 = vrot.slane %v759_v46, 4  ;;  %v288_v9 = vld [vmem:[#allocation2 + $0xcc] sm:$0x1]  ;;  %v344_v18 = vld [vmem:[#allocation2 + $0xd4] sm:$0x1] }
 0x177   : > { %v767_v29 = vrot.slane %v765_v60, 7  ;;  %v2517_v15 = vrot.slane %v2515_v19, 4  ;;  %v2520_v1 = vrot.slane %v2518_v59, 5  ;;  %v2526_v42 = vrot.slane %v2524_v23, 5  ;;  %v3220_v31 = vld [vmem:[#allocation2 + $0xd0] sm:$0xf] }
 0x178   : > { %v2530_v51 = vrot.slane %v2528_v30, 4  ;;  %v8569_v33 = vcombine.low %v10530_v13, %v1839_v5  ;;  %v2534_v53 = vshll.u32 %v2174_v2, 16  ;;  %v342_v14 = vsel %vm9476_vm6, 0, %v341_v63  ;;  %v2950_v56 = vpop.permute.xlu1 %2949  ;;  %v3671_v36 = vpop.permute.xlu0 %3670  ;;  %v10562_v58 = vld [vmem:[#allocation2 + $0xcc] sm:$0xe] }
 0x179   : > { %v770_v17 = vor.u32 %v768_v43, %v767_v29  ;;  %2093 = vrot.lane.b32.xlu0 %v9217_v27, %s9350_s10  ;;  %v2521_v35 = vor.u32 %v2520_v1, %v2517_v15  ;;  %343 = vst [vmem:[#allocation2 + $0xc8] sm:$0x1] %v342_v14  ;;  %v8616_v28 = vrot.slane %v2717_v12, 9  ;;  %v2871_v26 = vrot.slane %v2718_v61, 5  ;;  %2989 = vst.msk [vmem:[#allocation4 + $0x48] sm:$0xff] %vm12033_vm11, %v2950_v56 }
 0x17a   : > { %v929_v25 = vld [vmem:[#allocation2 + $0xc0] sm:$0xf]  ;;  %v2531_v62 = vor.u32 %v2530_v51, %v2526_v42  ;;  %1594 = vrot.lane.b32.xlu1 %v8537_v52, %s9353_s13  ;;  %v2536_v40 = vrot.slane %v2534_v53, 5  ;;  %v2874_v34 = vrot.slane %v2719_v54, 5  ;;  %v772_v37 = vrot.slane %v767_v29, 4  ;;  %3711 = vst.msk [vmem:[#allocation4 + $0x40] sm:$0xff] %vm3702_vm4, %v3671_v36 }
 0x17b   : > { %v771_v24 = vsel %vm9482_vm7, %v763_v11, %v770_v17  ;;  %v930_v32 = vsel %vm9490_vm10, %v762_v8, %v929_v25  ;;  %v2522_v39 = vrot.slane %v2521_v35, 4  ;;  %v2873_v20 = vrot.slane %v2871_v26, 4  ;;  %v10564_v13 = vld [vmem:[#allocation2 + $0xd0] sm:$0xf]  ;;  %s9359_s13 = smov 40  }
 0x17c   : > { %931 = vst [vmem:[#allocation2 + $0xc0] sm:$0xf] %v930_v32  ;;  %932 = vst.msk [vmem:[#allocation2 + $0xc4] sm:$0xf] %vm225_vm0, %v771_v24  ;;  %v2532_v7 = vrot.slane %v2531_v62, 4  ;;  %v2872_v22 = vsel %vm9526_vm13, %v8616_v28, %v2871_v26  ;;  %v289_v21 = vsel %vm9445_vm3, 0, %v288_v9  ;;  %v3128_v10 = vpop.permute.xlu1 %3127  ;;  %v3992_v57 = vpop.permute.xlu0 %3991 }
 0x17d   : > { %v345_v45 = vsel %vm9476_vm6, 0, %v344_v18  ;;  %v3592_v47 = vshll.u32 %v3220_v31, 16  ;;  %v2527_v49 = vsel %vm9562_vm14, %v2522_v39, %v2526_v42  ;;  %v2875_v48 = vsel %vm9526_vm13, %v2873_v20, %v2874_v34  ;;  %290 = vst [vmem:[#allocation2 + $0xcc] sm:$0x1] %v289_v21  ;;  %vm12064_vm0 = vmmov %vm12063_vm12 }
 0x17e   : > { %v2537_v50 = vsel %vm9562_vm14, %v2532_v7, %v2536_v40  ;;  %346 = vst [vmem:[#allocation2 + $0xd4] sm:$0x1] %v345_v45  ;;  %v3596_v55 = vshrl.u32 %v3220_v31, 16  ;;  %1918 = vrot.lane.b32.xlu1 %v8569_v33, %s9351_s11  ;;  %3167 = vst.msk [vmem:[#allocation4 + $0x48] sm:$0xff] %vm12064_vm0, %v3128_v10  ;;  %v8632_v46 = vcombine.low %v2872_v22, %v2875_v48  ;;  %v8681_v63 = vrot.slane %v10562_v58, 9 }
 0x17f   : > { %v8600_v44 = vcombine.low %v2527_v49, %v2537_v50  ;;  %4032 = vst.msk [vmem:[#allocation4 + $0x40] sm:$0xff] %vm4023_vm2, %v3992_v57  ;;  %v10571_v43 = vrot.slane %v3592_v47, 5  ;;  %v3922_v27 = vrot.slane %v10564_v13, 5  ;;  %vm12036_vm6 = vcmask 60416  }
 0x180   : > { %v933_v38 = vld [vmem:[#allocation2 + $0xc8] sm:$0x1]  ;;  %v10573_v19 = vrot.slane %v3596_v55, 4  ;;  %v3673_v2 = vpop.permute.xlu1 %3672  ;;  %vm350_vm10 = vcmask 57344   ;;  %vm12066_vm8 = vsmask.f32 256 }
 0x181   : > { %2638 = vrot.lane.b32.xlu0 %v8600_v44, %s9356_s16  ;;  %v934_v60 = vsel %vm9445_vm3, %v772_v37, %v933_v38  ;;  %3712 = vst.msk [vmem:[#allocation4 + $0x48] sm:$0xff] %vm3702_vm4, %v3673_v2  ;;  %vm12065_vm3 = vcmask 130144   ;;  %vm10612_vm12 = vmand %vm350_vm10, %vm12066_vm8  ;;  %vm12069_vm0 = vsmask.f32 7938  ;;  %vm12073_vm8 = vcmask 228544  }
 0x182   : > { %935 = vst [vmem:[#allocation2 + $0xc8] sm:$0x1] %v934_v60  ;;  %v3994_v12 = vpop.permute.xlu0 %3993  ;;  %v3599_v24 = vor.u32 %v10573_v19, %v10571_v43  ;;  %348 = vst.msk [vmem:[#allocation3] sm:$0xf] %vm12036_vm6, %v9349_v3 }
 0x183   : > { %v9218_v5 = vld [vmem:[#allocation2 + $0xc0] sm:$0xff]   ;;  %4033 = vst.msk [vmem:[#allocation4 + $0x48] sm:$0xff] %vm4023_vm2, %v3994_v12 }
 0x184   : > { %v2175_v59 = vld [vmem:[#allocation2 + $0xc0] sm:$0xf]  ;;  %v2176_v23 = vld [vmem:[#allocation2 + $0xc4] sm:$0xf]  ;;  %2095 = vrot.lane.b32.xlu1 %v9218_v5, %s9350_s10  ;;  %v1585_v33 = vpop.permute.xlu1 %1584  ;;  %v3219_v20 = vld [vmem:[#allocation2 + $0xcc] sm:$0xf] }
 0x185   : > { %v2720_v30 = vld [vmem:[#allocation2 + $0xc0] sm:$0xe]  ;;  %v2539_v0 = vshrl.u32 %v2175_v59, 16  ;;  %v2542_v52 = vshll.u32 %v2175_v59, 16  ;;  %v2548_v8 = vshll.u32 %v2176_v23, 16  ;;  %v2552_v11 = vshrl.u32 %v2176_v23, 16  ;;  %2959 = vrot.lane.b32.xlu0 %v8632_v46, %s9354_s14 }
 0x186   : > { %v2721_v29 = vld [vmem:[#allocation2 + $0xc4] sm:$0xf]  ;;  %v8617_v61 = vrot.slane %v2720_v30, 9  ;;  %v3216_v53 = vld [vmem:[#allocation2 + $0xc0] sm:$0xf]  ;;  %1623 = vst.msk [vmem:[#allocation4 + $0x50] sm:$0xff] %vm1612_vm1, %v1585_v33 }
 0x187   : > { %v2878_v6 = vrot.slane %v2721_v29, 5  ;;  %v2541_v15 = vrot.slane %v2539_v0, 4  ;;  %v2544_v1 = vrot.slane %v2542_v52, 5  ;;  %v2550_v42 = vrot.slane %v2548_v8, 5  ;;  %v9221_v54 = vld [vmem:[#allocation2 + $0xc0] sm:$0xff]   ;;  %v4048_v14 = vld [vmem:[#allocation4 + $0x40] sm:$0xff] }
 0x188   : > { %v2554_v51 = vrot.slane %v2552_v11, 4  ;;  %v3217_v25 = vld [vmem:[#allocation2 + $0xc4] sm:$0xf]  ;;  %v3559_v35 = vshrl.u32 %v3216_v53, 16  ;;  %v3562_v62 = vshll.u32 %v3216_v53, 16  ;;  %9065 = vmatprep.mubr.msk.bf16.mxu0 %vm4083_vm15, %v4048_v14  ;;  %v3583_v2 = vshrl.u32 %v3219_v20, 16 }
 0x189   : > { %v2880_v17 = vrot.slane %v2878_v6, 4  ;;  %v2545_v9 = vor.u32 %v2544_v1, %v2541_v15  ;;  %3137 = vrot.lane.b32.xlu0 %v9221_v54, %s9352_s12  ;;  %v2177_v28 = vld [vmem:[#allocation2 + $0xc8] sm:$0x1]  ;;  %v3568_v39 = vshll.u32 %v3217_v25, 16  ;;  %v3572_v7 = vshrl.u32 %v3217_v25, 16  ;;  %v1909_v22 = vpop.permute.xlu0 %1908  ;;  %s9358_s10 = smov 48  }
 0x18a   : > { %v2555_v18 = vor.u32 %v2554_v51, %v2550_v42  ;;  %v2722_v26 = vld [vmem:[#allocation2 + $0xc8] sm:$0x1]  ;;  %v2558_v34 = vshll.u32 %v2177_v28, 16  ;;  %v3561_v36 = vrot.slane %v3559_v35, 4  ;;  %v3564_v37 = vrot.slane %v3562_v62, 5  ;;  %v1587_v55 = vpop.permute.xlu1 %1586  ;;  %1947 = vst.msk [vmem:[#allocation4 + $0x50] sm:$0xff] %vm1936_vm5, %v1909_v22 }
 0x18b   : > { %v3218_v31 = vld [vmem:[#allocation2 + $0xc8] sm:$0x1]  ;;  %v2546_v32 = vrot.slane %v2545_v9, 4  ;;  %v2881_v56 = vrot.slane %v2722_v26, 5  ;;  %v2879_v47 = vsel %vm9526_vm13, %v8617_v61, %v2878_v6  ;;  %v3221_v50 = vld [vmem:[#allocation2 + $0xd4] sm:$0x1] }
 0x18c   : > { %v2556_v40 = vrot.slane %v2555_v18, 4  ;;  %v2560_v45 = vrot.slane %v2558_v34, 5  ;;  %v3578_v49 = vshll.u32 %v3218_v31, 16  ;;  %v3761_v48 = vld [vmem:[#allocation2 + $0xc0] sm:$0xe]  ;;  %v3565_v10 = vor.u32 %v3564_v37, %v3561_v36  ;;  %1624 = vst.msk [vmem:[#allocation4 + $0x58] sm:$0xff] %vm1612_vm1, %v1587_v55 }
 0x18d   : > { %v2551_v21 = vsel %vm9562_vm14, %v2546_v32, %v2550_v42  ;;  %v2882_v44 = vsel %vm9526_vm13, %v2880_v17, %v2881_v56  ;;  %v3570_v57 = vrot.slane %v3568_v39, 5  ;;  %v3574_v38 = vrot.slane %v3572_v7, 4  ;;  %v3762_v46 = vld [vmem:[#allocation2 + $0xc4] sm:$0xf]  ;;  %v4049_v60 = vld [vmem:[#allocation4 + $0x48] sm:$0xff]  ;;  %v2086_v11 = vpop.permute.xlu0 %2085  ;;  %v9222_v35 = vld [vmem:[#allocation2 + $0xcc] sm:$0xff]  }
 0x18e   : > { %v2561_v19 = vsel %vm9562_vm14, %v2556_v40, %v2560_v45  ;;  %v3580_v5 = vrot.slane %v3578_v49, 5  ;;  %v3586_v59 = vshll.u32 %v3219_v20, 16  ;;  %v3763_v23 = vld [vmem:[#allocation2 + $0xc8] sm:$0x1]  ;;  %9066 = vmatmul.mubr.msk.bf16.gmra.mrb[16].mxu0 %vm4083_vm15, %v4049_v60  ;;  %v3566_v0 = vrot.slane %v3565_v10, 4  ;;  %v1911_v15 = vpop.permute.xlu1 %1910  ;;  %2124 = vst.msk [vmem:[#allocation4 + $0x50] sm:$0xff] %vm12065_vm3, %v2086_v11  ;;  %vm10641_vm3 = vmand %vm350_vm10, %vm12069_vm0 }
 0x18f   : > { %v8601_v30 = vcombine.low %v2551_v21, %v2561_v19  ;;  %v3575_v52 = vor.u32 %v3574_v38, %v3570_v57  ;;  %v3602_v8 = vshll.u32 %v3221_v50, 16  ;;  %v3585_v29 = vrot.slane %v3583_v2, 4  ;;  %1948 = vst.msk [vmem:[#allocation4 + $0x58] sm:$0xff] %vm1936_vm5, %v1911_v15  ;;  %v3766_v9 = vld [vmem:[#allocation2 + $0xd4] sm:$0x1]  ;;  %vm12074_vm0 = vmmov %vm12073_vm8 }
 0x190   : > { %v3588_v12 = vrot.slane %v3586_v59, 5  ;;  %v8680_v61 = vrot.slane %v3761_v48, 9  ;;  %v3915_v6 = vrot.slane %v3762_v46, 5  ;;  %v8633_v1 = vcombine.low %v2879_v47, %v2882_v44  ;;  %v364_v32 = vld [vmem:[#allocation3 + $0x18] sm:$0x1] }
 0x191   : > { %2640 = vrot.lane.b32.xlu1 %v8601_v30, %s9356_s16  ;;  %v3571_v42 = vsel %vm9562_vm14, %v3566_v0, %v3570_v57  ;;  %v3576_v51 = vrot.slane %v3575_v52, 4  ;;  %v3918_v54 = vrot.slane %v3763_v23, 5  ;;  %v3600_v17 = vrot.slane %v3599_v24, 4  ;;  %349 = vst.msk [vmem:[#allocation3 + $0x4] sm:$0xf] %vm12036_vm6, %v9349_v3 }
 0x192   : > { %v3589_v33 = vor.u32 %v3588_v12, %v3585_v29  ;;  %v3604_v53 = vrot.slane %v3602_v8, 5  ;;  %v3917_v14 = vrot.slane %v3915_v6, 4  ;;  %v3916_v25 = vsel %vm9526_vm13, %v8680_v61, %v3915_v6  ;;  %351 = vst.msk [vmem:[#allocation3 + $0x8] sm:$0x1] %vm350_vm10, %v9349_v3  ;;  %355 = vst.msk [vmem:[#allocation3 + $0xd4] sm:$0x1] %vm350_vm10, %v9349_v3 }
 0x193   : > { %v3581_v18 = vsel %vm9562_vm14, %v3576_v51, %v3580_v5  ;;  %v3924_v31 = vrot.slane %v3922_v27, 4  ;;  %353 = vst.msk [vmem:[#allocation3 + $0xcc] sm:$0xf] %vm12036_vm6, %v9349_v3  ;;  %354 = vst.msk [vmem:[#allocation3 + $0xd0] sm:$0xf] %vm12036_vm6, %v9349_v3  ;;  %v3925_v40 = vrot.slane %v3766_v9, 5  ;;  %v3923_v50 = vsel %vm9526_vm13, %v8681_v63, %v3922_v27 }
 0x194   : > { %v8664_v62 = vcombine.low %v3571_v42, %v3581_v18  ;;  %v3590_v28 = vrot.slane %v3589_v33, 4  ;;  %v3919_v26 = vsel %vm9526_vm13, %v3917_v14, %v3918_v54  ;;  %v365_v34 = vsel %vm10612_vm12, 0, %v364_v32  ;;  %v361_v56 = vld [vmem:[#allocation3 + $0xc] sm:$0x1]  ;;  %v419_v36 = vld [vmem:[#allocation3 + $0x20] sm:$0x1] }
 0x195   : > { %2961 = vrot.lane.b32.xlu1 %v8633_v1, %s9354_s14  ;;  %v3605_v39 = vsel %vm9562_vm14, %v3600_v17, %v3604_v53  ;;  %v8696_v7 = vcombine.low %v3916_v25, %v3919_v26  ;;  %366 = vst [vmem:[#allocation3 + $0x18] sm:$0x1] %v365_v34  ;;  %v362_v3 = vsel %vm10612_vm12, 0, %v361_v56  ;;  %v416_v22 = vld [vmem:[#allocation3 + $0x14] sm:$0x1]  ;;  %v2631_v21 = vpop.permute.xlu0 %2630  ;;  %v3926_v48 = vsel %vm9526_vm13, %v3924_v31, %v3925_v40  ;;  %s9360_s14 = smov 64  }
 0x196   : > { %3682 = vrot.lane.b32.xlu0 %v8664_v62, %s9357_s17  ;;  %v3595_v37 = vsel %vm9562_vm14, %v3590_v28, %v10571_v43  ;;  %363 = vst [vmem:[#allocation3 + $0xc] sm:$0x1] %v362_v3  ;;  %v420_v43 = vsel %vm10641_vm3, 0, %v419_v36  ;;  %v417_v45 = vsel %vm10641_vm3, 0, %v416_v22  ;;  %2669 = vst.msk [vmem:[#allocation4 + $0x50] sm:$0xff] %vm12034_vm9, %v2631_v21  ;;  %vm12072_vm10 = vcmask 130144  }
 0x197   : > { %421 = vst [vmem:[#allocation3 + $0x20] sm:$0x1] %v420_v43  ;;  %418 = vst [vmem:[#allocation3 + $0x14] sm:$0x1] %v417_v45  ;;  %v8665_v47 = vcombine.low %v3595_v37, %v3605_v39  ;;  %v358_v44 = vld [vmem:[#allocation3] sm:$0x1]  ;;  %v8697_v63 = vcombine.low %v3923_v50, %v3926_v48 }
 0x198   : > { %v2088_v49 = vpop.permute.xlu1 %2087  ;;  %v5070_v57 = vld [vmem:[#allocation3 + $0x4] sm:$0xf]  ;;  %v359_v38 = vsel %vm10612_vm12, 0, %v358_v44  ;;  %v370_v5 = vld [vmem:[#allocation3 + $0x30] sm:$0x1] }
 0x199   : > { %3139 = vrot.lane.b32.xlu1 %v9222_v35, %s9352_s12  ;;  %2125 = vst.msk [vmem:[#allocation4 + $0x58] sm:$0xff] %vm12072_vm10, %v2088_v49  ;;  %v2952_v55 = vpop.permute.xlu0 %2951  ;;  %v413_v10 = vld [vmem:[#allocation3 + $0x8] sm:$0x1]  ;;  %v5127_v13 = vshll.u32 %v5070_v57, 16  ;;  %v5131_v46 = vshrl.u32 %v5070_v57, 16  ;;  %v371_v2 = vsel %vm10612_vm12, 0, %v370_v5 }
 0x19a   : > { %4003 = vrot.lane.b32.xlu0 %v8696_v7, %s9355_s15  ;;  %2990 = vst.msk [vmem:[#allocation4 + $0x50] sm:$0xff] %vm12033_vm11, %v2952_v55  ;;  %v414_v58 = vsel %vm10641_vm3, 0, %v413_v10  ;;  %360 = vst [vmem:[#allocation3] sm:$0x1] %v359_v38  ;;  %v367_v59 = vld [vmem:[#allocation3 + $0x24] sm:$0x1] }
 0x19b   : > { %415 = vst [vmem:[#allocation3 + $0x8] sm:$0x1] %v414_v58  ;;  %v5129_v60 = vrot.slane %v5127_v13, 5  ;;  %v5133_v19 = vrot.slane %v5131_v46, 4  ;;  %v425_v23 = vld [vmem:[#allocation3 + $0x38] sm:$0x1] }
 0x19c   : > { %v5615_v30 = vld [vmem:[#allocation3 + $0x4] sm:$0xf]  ;;  %372 = vst [vmem:[#allocation3 + $0x30] sm:$0x1] %v371_v2  ;;  %v368_v0 = vsel %vm10612_vm12, 0, %v367_v59  ;;  %v426_v52 = vsel %vm10641_vm3, 0, %v425_v23 }
 0x19d   : > { %3684 = vrot.lane.b32.xlu1 %v8665_v47, %s9357_s17  ;;  %v3130_v27 = vpop.permute.xlu0 %3129  ;;  %v422_v8 = vld [vmem:[#allocation3 + $0x2c] sm:$0x1]  ;;  %369 = vst [vmem:[#allocation3 + $0x24] sm:$0x1] %v368_v0  ;;  %427 = vst [vmem:[#allocation3 + $0x38] sm:$0x1] %v426_v52  ;;  %v5134_v61 = vor.u32 %v5133_v19, %v5129_v60 }
 0x19e   : > { %3168 = vst.msk [vmem:[#allocation4 + $0x50] sm:$0xff] %vm12073_vm8, %v3130_v27  ;;  %v423_v11 = vsel %vm10641_vm3, 0, %v422_v8  ;;  %v376_v29 = vld [vmem:[#allocation3 + $0x48] sm:$0x1]  ;;  %v373_v12 = vld [vmem:[#allocation3 + $0x3c] sm:$0x1]  ;;  %vm12075_vm8 = vmmov %vm12072_vm10 }
 0x19f   : > { %424 = vst [vmem:[#allocation3 + $0x2c] sm:$0x1] %v423_v11  ;;  %v377_v6 = vsel %vm10612_vm12, 0, %v376_v29  ;;  %v374_v15 = vsel %vm10612_vm12, 0, %v373_v12  ;;  %v431_v1 = vld [vmem:[#allocation3 + $0x50] sm:$0x1] }
 0x1a0   : > { %v428_v42 = vld [vmem:[#allocation3 + $0x44] sm:$0x1]  ;;  %v5614_v33 = vld [vmem:[#allocation3] sm:$0xe]  ;;  %378 = vst [vmem:[#allocation3 + $0x48] sm:$0x1] %v377_v6 }
 0x1a1   : > { %4005 = vrot.lane.b32.xlu1 %v8697_v63, %s9355_s15  ;;  %v5069_v51 = vld [vmem:[#allocation3] sm:$0xf]  ;;  %375 = vst [vmem:[#allocation3 + $0x3c] sm:$0x1] %v374_v15  ;;  %v5712_v18 = vrot.slane %v5615_v30, 5  ;;  %v432_v35 = vsel %vm10641_vm3, 0, %v431_v1 }
 0x1a2   : > { %v5071_v54 = vld [vmem:[#allocation3 + $0x8] sm:$0x1]  ;;  %v5118_v53 = vshrl.u32 %v5069_v51, 16  ;;  %v5121_v14 = vshll.u32 %v5069_v51, 16  ;;  %v429_v62 = vsel %vm10641_vm3, 0, %v428_v42  ;;  %v5135_v31 = vrot.slane %v5134_v61, 4 }
 0x1a3   : > { %v5616_v17 = vld [vmem:[#allocation3 + $0x8] sm:$0x1]  ;;  %v5137_v9 = vshll.u32 %v5071_v54, 16  ;;  %433 = vst [vmem:[#allocation3 + $0x50] sm:$0x1] %v432_v35  ;;  %v8782_v34 = vrot.slane %v5614_v33, 9 }
 0x1a4   : > { %v5120_v28 = vrot.slane %v5118_v53, 4  ;;  %v5123_v26 = vrot.slane %v5121_v14, 5  ;;  %430 = vst [vmem:[#allocation3 + $0x44] sm:$0x1] %v429_v62  ;;  %v5714_v56 = vrot.slane %v5712_v18, 4  ;;  %v5715_v36 = vrot.slane %v5616_v17, 5 }
 0x1a5   : > { %v5139_v32 = vrot.slane %v5137_v9, 5  ;;  %v5713_v21 = vsel %vm9526_vm13, %v8782_v34, %v5712_v18  ;;  %v382_v57 = vld [vmem:[#allocation3 + $0x60] sm:$0x1]  ;;  %v437_v5 = vld [vmem:[#allocation3 + $0x68] sm:$0x1]  ;;  %s9361_s17 = smov 56  }
 0x1a6   : > { %v2633_v25 = vpop.permute.xlu1 %2632  ;;  %v5124_v40 = vor.u32 %v5123_v26, %v5120_v28  ;;  %v5716_v43 = vsel %vm9526_vm13, %v5714_v56, %v5715_v36  ;;  %v383_v38 = vsel %vm10612_vm12, 0, %v382_v57  ;;  %v438_v59 = vsel %vm10641_vm3, 0, %v437_v5  ;;  %v434_v23 = vld [vmem:[#allocation3 + $0x5c] sm:$0x1]  ;;  %v10725_v12 = vld [vmem:[%s12024_s2] ss:$0 sm:$0xff] }
 0x1a7   : > { %2670 = vst.msk [vmem:[#allocation4 + $0x58] sm:$0xff] %vm12034_vm9, %v2633_v25  ;;  %v5140_v3 = vsel %vm9562_vm14, %v5135_v31, %v5139_v32  ;;  %v8798_v50 = vcombine.low %v5713_v21, %v5716_v43  ;;  %384 = vst [vmem:[#allocation3 + $0x60] sm:$0x1] %v383_v38  ;;  %v435_v0 = vsel %vm10641_vm3, 0, %v434_v23  ;;  %v4823_v23 = vld [vmem:[#allocation3 + $0x20] sm:$0x1] }
 0x1a8   : > { %v5125_v7 = vrot.slane %v5124_v40, 4  ;;  %439 = vst [vmem:[#allocation3 + $0x68] sm:$0x1] %v438_v59  ;;  %436 = vst [vmem:[#allocation3 + $0x5c] sm:$0x1] %v435_v0 }
 0x1a9   : > { %v3675_v39 = vpop.permute.xlu0 %3674 }
 0x1aa   : > { %v2954_v37 = vpop.permute.xlu1 %2953  ;;  %3713 = vst.msk [vmem:[#allocation4 + $0x50] sm:$0xff] %vm3702_vm4, %v3675_v39  ;;  %v5130_v22 = vsel %vm9562_vm14, %v5125_v7, %v5129_v60  ;;  %v379_v60 = vld [vmem:[#allocation3 + $0x54] sm:$0x1]  ;;  %v4819_v39 = vld [vmem:[#allocation3 + $0x18] sm:$0xf] }
 0x1ab   : > { %2991 = vst.msk [vmem:[#allocation4 + $0x58] sm:$0xff] %vm12033_vm11, %v2954_v37  ;;  %v8766_v49 = vcombine.low %v5130_v22, %v5140_v3  ;;  %v380_v19 = vsel %vm10612_vm12, 0, %v379_v60  ;;  %v4812_v60 = vld [vmem:[#allocation3 + $0xc] sm:$0xf] }
 0x1ac   : > { %381 = vst [vmem:[#allocation3 + $0x54] sm:$0x1] %v380_v19 }
 0x1ad   : > { %v3996_v47 = vpop.permute.xlu0 %3995  ;;  %5549 = vrot.lane.b32.xlu0 %v8766_v49, %s9351_s11 }
 0x1ae   : > { %v3132_v45 = vpop.permute.xlu1 %3131  ;;  %4034 = vst.msk [vmem:[#allocation4 + $0x50] sm:$0xff] %vm4023_vm2, %v3996_v47 }
 0x1af   : > { %3169 = vst.msk [vmem:[#allocation4 + $0x58] sm:$0xff] %vm12074_vm0, %v3132_v45 }
 0x1b1   : > { %5870 = vrot.lane.b32.xlu0 %v8798_v50, %s9356_s16 }
 0x1b2   : > { %v3677_v48 = vpop.permute.xlu1 %3676 }
 0x1b3   : > { %3714 = vst.msk [vmem:[#allocation4 + $0x58] sm:$0xff] %vm3702_vm4, %v3677_v48 }
 0x1b4   : > { %v3998_v55 = vpop.permute.xlu0 %3997 }
 0x1b5   : > { %4035 = vst.msk [vmem:[#allocation4 + $0x58] sm:$0xff] %vm4023_vm2, %v3998_v55  ;;  %v4050_v10 = vld [vmem:[#allocation4 + $0x50] sm:$0xff] }
 0x1b6   : > { %v1589_v44 = vpop.permute.xlu1 %1588  ;;  %9069 = vmatprep.mubr.msk.bf16.mxu0 %vm4083_vm15, %v4050_v10 }
 0x1b7   : > { %1625 = vst.msk [vmem:[#allocation4 + $0x60] sm:$0xff] %vm1612_vm1, %v1589_v44 }
 0x1ba   : > { %v1591_v58 = vpop.permute.xlu1 %1590 }
 0x1bb   : > { %v1913_v13 = vpop.permute.xlu0 %1912  ;;  %1626 = vst.msk [vmem:[#allocation4 + $0x68] sm:$0xff] %vm1612_vm1, %v1591_v58 }
 0x1bc   : > { %1949 = vst.msk [vmem:[#allocation4 + $0x60] sm:$0xff] %vm1936_vm5, %v1913_v13  ;;  %v4051_v46 = vld [vmem:[#allocation4 + $0x58] sm:$0xff] }
 0x1bd   : > { %9070 = vmatmul.mubr.msk.bf16.gmra.mrb[20].mxu0 %vm4083_vm15, %v4051_v46 }
 0x1be   : > { %v1915_v63 = vpop.permute.xlu1 %1914 }
 0x1bf   : > { %v2090_v27 = vpop.permute.xlu0 %2089  ;;  %1950 = vst.msk [vmem:[#allocation4 + $0x68] sm:$0xff] %vm1936_vm5, %v1915_v63 }
 0x1c0   : > { %2126 = vst.msk [vmem:[#allocation4 + $0x60] sm:$0xff] %vm12072_vm10, %v2090_v27 }
 0x1c5   : > { %v2092_v30 = vpop.permute.xlu1 %2091 }
 0x1c6   : > { %v2635_v2 = vpop.permute.xlu0 %2634  ;;  %2127 = vst.msk [vmem:[#allocation4 + $0x68] sm:$0xff] %vm12075_vm8, %v2092_v30 }
 0x1c7   : > { %2671 = vst.msk [vmem:[#allocation4 + $0x60] sm:$0xff] %vm12034_vm9, %v2635_v2 }
 0x1ca   : > { %v2956_v52 = vpop.permute.xlu0 %2955 }
 0x1cb   : > { %2992 = vst.msk [vmem:[#allocation4 + $0x60] sm:$0xff] %vm12033_vm11, %v2956_v52 }
 0x1ce   : > { %v3134_v8 = vpop.permute.xlu0 %3133 }
 0x1cf   : > { %3170 = vst.msk [vmem:[#allocation4 + $0x60] sm:$0xff] %vm12074_vm0, %v3134_v8 }
 0x1d3   : > { %v9051_v61 = vpop.f32.mrb[0].mxu0 }
 0x1d4   : > { %v4179_v15 = vadd.f32 %v9051_v61, %v10725_v12  ;;  %v4170_v1 = vpop.f32.mrb[1].mxu0 }
 0x1d5   : > { %v2637_v11 = vpop.permute.xlu1 %2636  ;;  %v4171_v51 = vadd.f32 %v10725_v12, %v4170_v1  ;;  %v9052_v54 = vpop.f32.mrb[2].mxu0 }
 0x1d6   : > { %2672 = vst.msk [vmem:[#allocation4 + $0x68] sm:$0xff] %vm12034_vm9, %v2637_v11  ;;  %vm4299_vm10 = vcmp.gt.f32.partialorder %v4179_v15, 0.0  ;;  %v4331_v33 = vmul.f32 0.01, %v4179_v15  ;;  %v4182_v17 = vadd.f32 %v9052_v54, %v10725_v12  ;;  %v4173_v53 = vpop.f32.mrb[3].mxu0 }
 0x1d7   : > { %v3679_v29 = vpop.permute.xlu0 %3678  ;;  %vm4297_vm8 = vcmp.gt.f32.partialorder %v4171_v51, 0.0  ;;  %v4329_v14 = vmul.f32 0.01, %v4171_v51  ;;  %v4174_v9 = vadd.f32 %v10725_v12, %v4173_v53  ;;  %v4816_v11 = vld [vmem:[#allocation3 + $0x14] sm:$0x1] }
 0x1d8   : > { %3715 = vst.msk [vmem:[#allocation4 + $0x60] sm:$0xff] %vm3702_vm4, %v3679_v29  ;;  %v4363_v25 = vsel %vm4299_vm10, %v4179_v15, %v4331_v33  ;;  %vm4300_vm0 = vcmp.gt.f32.partialorder %v4182_v17, 0.0  ;;  %v4332_v35 = vmul.f32 0.01, %v4182_v17 }
 0x1d9   : > { %v2958_v6 = vpop.permute.xlu1 %2957  ;;  %v8972_v62 = vpack.c.bf16 %v4363_v25, %v4363_v25  ;;  %v4361_v28 = vsel %vm4297_vm8, %v4171_v51, %v4329_v14  ;;  %vm4298_vm9 = vcmp.gt.f32.partialorder %v4174_v9, 0.0  ;;  %v4330_v26 = vmul.f32 0.01, %v4174_v9  ;;  %v388_v25 = vld [vmem:[#allocation3 + $0x78] sm:$0x1] }
 0x1da   : > { %2993 = vst.msk [vmem:[#allocation4 + $0x68] sm:$0xff] %vm12033_vm11, %v2958_v6  ;;  %vm12076_vm11 = vcmask 228544   ;;  %v8970_v31 = vpack.c.bf16 %v4361_v28, %v4361_v28  ;;  %v4364_v32 = vsel %vm4300_vm0, %v4182_v17, %v4332_v35 }
 0x1db   : > { %v4000_v42 = vpop.permute.xlu0 %3999  ;;  %v4507_v40 = vshrl.u32 %v8972_v62, 16  ;;  %v4510_v34 = vshll.u32 %v8972_v62, 16  ;;  %v8973_v56 = vpack.c.bf16 %v4364_v32, %v4364_v32  ;;  %v4362_v36 = vsel %vm4298_vm9, %v4174_v9, %v4330_v26  ;;  %v9055_v37 = vpop.f32.mrb[4].mxu0 }
 0x1dc   : > { %4036 = vst.msk [vmem:[#allocation4 + $0x60] sm:$0xff] %vm4023_vm2, %v4000_v42  ;;  %v4490_v7 = vshrl.u32 %v8970_v31, 16  ;;  %v4493_v3 = vshll.u32 %v8970_v31, 16  ;;  %v8971_v22 = vpack.c.bf16 %v4362_v36, %v4362_v36  ;;  %v4195_v21 = vadd.f32 %v9055_v37, %v10725_v12  ;;  %v4186_v43 = vpop.f32.mrb[5].mxu0  ;;  %v4833_v36 = vld [vmem:[#allocation3 + $0x30] sm:$0xf] }
 0x1dd   : > { %v3136_v18 = vpop.permute.xlu1 %3135  ;;  %v4509_v49 = vrot.slane %v4507_v40, 7  ;;  %v4515_v50 = vshrl.u32 %v8973_v56, 16  ;;  %v4518_v48 = vshll.u32 %v8973_v56, 16  ;;  %v4187_v55 = vadd.f32 %v10725_v12, %v4186_v43  ;;  %v9056_v44 = vpop.f32.mrb[6].mxu0  ;;  %v4826_v43 = vld [vmem:[#allocation3 + $0x24] sm:$0xf] }
 0x1de   : > { %3171 = vst.msk [vmem:[#allocation4 + $0x68] sm:$0xff] %vm12076_vm11, %v3136_v18  ;;  %vm12077_vm11 = vsmask.f32 7938  ;;  %v4492_v57 = vrot.slane %v4490_v7, 7  ;;  %v4498_v38 = vshrl.u32 %v8971_v22, 16  ;;  %v4501_v58 = vshll.u32 %v8971_v22, 16 }
 0x1df   : > { %vm10740_vm9 = vmand %vm12036_vm6, %vm12077_vm11  ;;  %vm4303_vm10 = vcmp.gt.f32.partialorder %v4195_v21, 0.0  ;;  %v4189_v13 = vpop.f32.mrb[7].mxu0  ;;  %v4512_v63 = vor.u32 %v4510_v34, %v4509_v49  ;;  %v4513_v27 = vrot.slane %v4509_v49, 4  ;;  %v4517_v19 = vrot.slane %v4515_v50, 7 }
 0x1e0   : > { %v4335_v5 = vmul.f32 0.01, %v4195_v21  ;;  %v4495_v2 = vor.u32 %v4493_v3, %v4492_v57  ;;  %v4496_v59 = vrot.slane %v4492_v57, 4  ;;  %v4500_v30 = vrot.slane %v4498_v38, 7 }
 0x1e1   : > { %vm4301_vm8 = vcmp.gt.f32.partialorder %v4187_v55, 0.0  ;;  %v4820_v0 = vsel %vm10740_vm9, %v4512_v63, %v4819_v39  ;;  %v4520_v52 = vor.u32 %v4518_v48, %v4517_v19  ;;  %v4522_v8 = vrot.slane %v4517_v19, 4 }
 0x1e2   : > { %v4367_v29 = vsel %vm4303_vm10, %v4195_v21, %v4335_v5  ;;  %4821 = vst [vmem:[#allocation3 + $0x18] sm:$0xf] %v4820_v0  ;;  %v4813_v6 = vsel %vm10740_vm9, %v4495_v2, %v4812_v60  ;;  %v4503_v15 = vor.u32 %v4501_v58, %v4500_v30  ;;  %v4505_v1 = vrot.slane %v4500_v30, 4  ;;  %v4837_v5 = vld [vmem:[#allocation3 + $0x38] sm:$0x1] }
 0x1e3   : > { %v4002_v45 = vpop.permute.xlu0 %4001  ;;  %v4052_v47 = vld [vmem:[#allocation4 + $0x60] sm:$0xff]  ;;  %v8976_v42 = vpack.c.bf16 %v4367_v29, %v4367_v29  ;;  %4814 = vst [vmem:[#allocation3 + $0xc] sm:$0xf] %v4813_v6  ;;  %v4521_v54 = vsel %vm9482_vm7, %v4513_v27, %v4520_v52  ;;  %v4824_v33 = vsel %vm10612_vm12, %v4522_v8, %v4823_v23  ;;  %v4333_v17 = vmul.f32 0.01, %v4187_v55 }
 0x1e4   : > { %9073 = vmatprep.mubr.msk.bf16.mxu0 %vm4083_vm15, %v4052_v47  ;;  %v3681_v46 = vpop.permute.xlu1 %3680  ;;  %v4198_v53 = vadd.f32 %v9056_v44, %v10725_v12  ;;  %4822 = vst.msk [vmem:[#allocation3 + $0x1c] sm:$0xf] %vm12036_vm6, %v4521_v54  ;;  %4825 = vst [vmem:[#allocation3 + $0x20] sm:$0x1] %v4824_v33  ;;  %v4504_v14 = vsel %vm9482_vm7, %v4496_v59, %v4503_v15  ;;  %v4817_v9 = vsel %vm10612_vm12, %v4505_v1, %v4816_v11  ;;  %vm12080_vm11 = vcmask 130144  }
 0x1e5   : > { %3716 = vst.msk [vmem:[#allocation4 + $0x68] sm:$0xff] %vm3702_vm4, %v3681_v46  ;;  %v4541_v18 = vshrl.u32 %v8976_v42, 16  ;;  %4818 = vst [vmem:[#allocation3 + $0x14] sm:$0x1] %v4817_v9  ;;  %v4365_v35 = vsel %vm4301_vm8, %v4187_v55, %v4333_v17  ;;  %v4190_v28 = vadd.f32 %v10725_v12, %v4189_v13  ;;  %v4544_v32 = vshll.u32 %v8976_v42, 16 }
 0x1e6   : > { %4037 = vst.msk [vmem:[#allocation4 + $0x68] sm:$0xff] %vm4023_vm2, %v4002_v45  ;;  %vm4304_vm0 = vcmp.gt.f32.partialorder %v4198_v53, 0.0  ;;  %v4336_v62 = vmul.f32 0.01, %v4198_v53  ;;  %v8974_v40 = vpack.c.bf16 %v4365_v35, %v4365_v35  ;;  %v389_v34 = vsel %vm10612_vm12, 0, %v388_v25 }
 0x1e7   : > { %v1917_v61 = vpop.permute.xlu0 %1916  ;;  %4815 = vst.msk [vmem:[#allocation3 + $0x10] sm:$0xf] %vm12036_vm6, %v4504_v14  ;;  %v10766_v31 = vrot.slane %v4541_v18, 7  ;;  %vm4302_vm10 = vcmp.gt.f32.partialorder %v4190_v28, 0.0  ;;  %v4334_v39 = vmul.f32 0.01, %v4190_v28 }
 0x1e8   : > { %v1593_v51 = vpop.permute.xlu1 %1592  ;;  %v4368_v37 = vsel %vm4304_vm0, %v4198_v53, %v4336_v62  ;;  %390 = vst [vmem:[#allocation3 + $0x78] sm:$0x1] %v389_v34  ;;  %v4524_v21 = vshrl.u32 %v8974_v40, 16  ;;  %vm12035_vm8 = vcmask 64512   ;;  %v4527_v55 = vshll.u32 %v8974_v40, 16  ;;  %v9244_v53 = vld [vmem:[#allocation3] sm:$0xff]  }
 0x1e9   : > { %1627 = vst.msk [vmem:[#allocation4 + $0x70] sm:$0xff] %vm1612_vm1, %v1593_v51  ;;  %v4546_v3 = vor.u32 %v4544_v32, %v10766_v31  ;;  %v4547_v22 = vrot.slane %v10766_v31, 4  ;;  %v10775_v45 = vld [vmem:[#allocation3 + $0x18] sm:$0xe]  ;;  %v8977_v47 = vpack.c.bf16 %v4368_v37, %v4368_v37  ;;  %v4366_v49 = vsel %vm4302_vm10, %v4190_v28, %v4334_v39  ;;  %v4830_v6 = vld [vmem:[#allocation3 + $0x2c] sm:$0x1] }
 0x1ea   : > { %1951 = vst.msk [vmem:[#allocation4 + $0x70] sm:$0xff] %vm1936_vm5, %v1917_v61  ;;  %v10779_v48 = vrot.slane %v4524_v21, 7  ;;  %v8975_v44 = vpack.c.bf16 %v4366_v49, %v4366_v49  ;;  %v10781_v57 = vld [vmem:[#allocation3 + $0x18] sm:$0xe]  ;;  %v8847_v60 = vrot.slane %v10775_v45, 9  ;;  %vm12083_vm0 = vcmask 195744  }
 0x1eb   : > { %v2094_v26 = vpop.permute.xlu0 %2093  ;;  %v4834_v50 = vsel %vm10740_vm9, %v4546_v3, %v4833_v36  ;;  %v9229_v58 = vld [vmem:[#allocation3 + $0x18] sm:$0xff]   ;;  %v4549_v13 = vshrl.u32 %v8977_v47, 16  ;;  %v4552_v19 = vshll.u32 %v8977_v47, 16  ;;  %v6662_v30 = vld [vmem:[#allocation3 + $0x20] sm:$0x1]  ;;  %v8910_v17 = vrot.slane %v10781_v57, 9 }
 0x1ec   : > { %v1595_v56 = vpop.permute.xlu1 %1594  ;;  %2128 = vst.msk [vmem:[#allocation4 + $0x70] sm:$0xff] %vm12080_vm11, %v2094_v26  ;;  %4835 = vst [vmem:[#allocation3 + $0x30] sm:$0xf] %v4834_v50  ;;  %v9230_v46 = vld [vmem:[#allocation3 + $0x18] sm:$0xff]   ;;  %v4529_v63 = vor.u32 %v4527_v55, %v10779_v48  ;;  %v4530_v27 = vrot.slane %v10779_v48, 4  ;;  %7091 = vrot.lane.b32.xlu0 %v9229_v58, %s9358_s10  ;;  %v4532_v52 = vshrl.u32 %v8975_v44, 16 }
 0x1ed   : > { %1628 = vst.msk [vmem:[#allocation4 + $0x78] sm:$0xff] %vm1612_vm1, %v1595_v56  ;;  %v4053_v7 = vld [vmem:[#allocation4 + $0x68] sm:$0xff]  ;;  %v6661_v23 = vld [vmem:[#allocation3 + $0x1c] sm:$0xf]  ;;  %v4551_v0 = vrot.slane %v4549_v13, 7  ;;  %vm12081_vm1 = vcmask 162944   ;;  %6049 = vrot.lane.b32.xlu1 %v9230_v46, %s9352_s12 }
 0x1ee   : > { %9074 = vmatmul.mubr.msk.bf16.gmra.mrb[24].mxu0 %vm4083_vm15, %v4053_v7  ;;  %v9231_v59 = vld [vmem:[#allocation3 + $0xc] sm:$0xff]   ;;  %v4827_v8 = vsel %vm10740_vm9, %v4529_v63, %v4826_v43  ;;  %v6762_v11 = vrot.slane %v6661_v23, 5  ;;  %v6765_v29 = vrot.slane %v6662_v30, 5  ;;  %v4535_v61 = vshll.u32 %v8975_v44, 16  ;;  %v7702_v15 = vld [vmem:[#allocation3 + $0x1c] sm:$0xf]  ;;  %vm12085_vm10 = vmmov %vm12081_vm1 }
 0x1ef   : > { %v9249_v1 = vld [vmem:[#allocation3 + $0x18] sm:$0xff]   ;;  %4828 = vst [vmem:[#allocation3 + $0x24] sm:$0xf] %v4827_v8  ;;  %v4554_v42 = vor.u32 %v4552_v19, %v4551_v0  ;;  %v4556_v51 = vrot.slane %v4551_v0, 4  ;;  %v4534_v54 = vrot.slane %v4532_v52, 7  ;;  %v7799_v9 = vrot.slane %v7702_v15, 5 }
 0x1f0   : > { %v1919_v38 = vpop.permute.xlu1 %1918  ;;  %v7703_v33 = vld [vmem:[#allocation3 + $0x20] sm:$0x1]  ;;  %v6764_v14 = vrot.slane %v6762_v11, 4  ;;  %v5617_v25 = vld [vmem:[#allocation3 + $0xc] sm:$0xe]  ;;  %5055 = vst.msk [vmem:[#allocation4 + $0x10] sm:$0xff] %vm12035_vm8, %v9249_v1  ;;  %6047 = vrot.lane.b32.xlu0 %v9231_v59, %s9352_s12  ;;  %v6763_v36 = vsel %vm9526_vm13, %v8847_v60, %v6762_v11 }
 0x1f1   : > { %1952 = vst.msk [vmem:[#allocation4 + $0x78] sm:$0xff] %vm1936_vm5, %v1919_v38  ;;  %v7802_v18 = vrot.slane %v7703_v33, 5  ;;  %v9252_v35 = vld [vmem:[#allocation3 + $0xc] sm:$0xff]   ;;  %v4555_v26 = vsel %vm9482_vm7, %v4547_v22, %v4554_v42  ;;  %v4838_v31 = vsel %vm10612_vm12, %v4556_v51, %v4837_v5  ;;  %v4537_v32 = vor.u32 %v4535_v61, %v4534_v54  ;;  %v5619_v56 = vld [vmem:[#allocation3 + $0x14] sm:$0x1]  ;;  %vm12082_vm5 = vmmov %vm12080_vm11 }
 0x1f2   : > { %v4539_v40 = vrot.slane %v4534_v54, 4  ;;  %v5618_v34 = vld [vmem:[#allocation3 + $0x10] sm:$0xf]  ;;  %5053 = vst.msk [vmem:[#allocation4] sm:$0xff] %vm12035_vm8, %v9244_v53  ;;  %v6766_v37 = vsel %vm9526_vm13, %v6764_v14, %v6765_v29  ;;  %4839 = vst [vmem:[#allocation3 + $0x38] sm:$0x1] %v4838_v31  ;;  %v7800_v50 = vsel %vm9526_vm13, %v8910_v17, %v7799_v9 }
 0x1f3   : > { %v2639_v2 = vpop.permute.xlu0 %2638  ;;  %4836 = vst.msk [vmem:[#allocation3 + $0x34] sm:$0xf] %vm12036_vm6, %v4555_v26  ;;  %v7801_v39 = vrot.slane %v7799_v9, 4  ;;  %v8783_v7 = vrot.slane %v5617_v25, 9  ;;  %v5620_v3 = vld [vmem:[#allocation3 + $0x18] sm:$0xe]  ;;  %v8863_v21 = vcombine.low %v6763_v36, %v6766_v37  ;;  %v4538_v43 = vsel %vm9482_vm7, %v4530_v27, %v4537_v32 }
 0x1f4   : > { %2673 = vst.msk [vmem:[#allocation4 + $0x70] sm:$0xff] %vm12081_vm1, %v2639_v2  ;;  %v5621_v22 = vld [vmem:[#allocation3 + $0x1c] sm:$0xf]  ;;  %v4831_v45 = vsel %vm10612_vm12, %v4539_v40, %v4830_v6  ;;  %v5719_v47 = vrot.slane %v5618_v34, 5  ;;  %v5622_v49 = vld [vmem:[#allocation3 + $0x20] sm:$0x1] }
 0x1f5   : > { %5054 = vst.msk [vmem:[#allocation4 + $0x8] sm:$0xff] %vm12035_vm8, %v9252_v35  ;;  %4832 = vst [vmem:[#allocation3 + $0x2c] sm:$0x1] %v4831_v45  ;;  %v7803_v48 = vsel %vm9526_vm13, %v7801_v39, %v7802_v18  ;;  %v5722_v55 = vrot.slane %v5619_v56, 5  ;;  %v5726_v44 = vrot.slane %v5621_v22, 5  ;;  %6915 = vrot.lane.b32.xlu1 %v8863_v21, %s9359_s13  ;;  %v8784_v63 = vrot.slane %v5620_v3, 9 }
 0x1f6   : > { %v2096_v62 = vpop.permute.xlu1 %2095  ;;  %4829 = vst.msk [vmem:[#allocation3 + $0x28] sm:$0xf] %vm12036_vm6, %v4538_v43  ;;  %v6657_v57 = vld [vmem:[#allocation3 + $0xc] sm:$0xe]  ;;  %v6658_v38 = vld [vmem:[#allocation3 + $0x10] sm:$0xf]  ;;  %v8926_v13 = vcombine.low %v7800_v50, %v7803_v48  ;;  %v5720_v2 = vsel %vm9526_vm13, %v8783_v7, %v5719_v47 }
 0x1f7   : > { %v2960_v28 = vpop.permute.xlu0 %2959  ;;  %2129 = vst.msk [vmem:[#allocation4 + $0x78] sm:$0xff] %vm12082_vm5, %v2096_v62  ;;  %v5721_v46 = vrot.slane %v5719_v47, 4  ;;  %v6659_v27 = vld [vmem:[#allocation3 + $0x14] sm:$0x1]  ;;  %vm12084_vm11 = vcmask 228544   ;;  %v5728_v60 = vrot.slane %v5726_v44, 4  ;;  %v5727_v23 = vsel %vm9526_vm13, %v8784_v63, %v5726_v44 }
 0x1f8   : > { %2994 = vst.msk [vmem:[#allocation4 + $0x70] sm:$0xff] %vm12083_vm0, %v2960_v28  ;;  %v5729_v19 = vrot.slane %v5622_v49, 5  ;;  %v6755_v5 = vrot.slane %v6658_v38, 5  ;;  %7957 = vrot.lane.b32.xlu0 %v8926_v13, %s9360_s14  ;;  %v8846_v30 = vrot.slane %v6657_v57, 9  ;;  %v7156_v0 = vld [vmem:[#allocation3 + $0x18] sm:$0xf] }
 0x1f9   : > { %v5723_v59 = vsel %vm9526_vm13, %v5721_v46, %v5722_v55  ;;  %v7157_v52 = vld [vmem:[#allocation3 + $0x1c] sm:$0xf]  ;;  %v6758_v61 = vrot.slane %v6659_v27, 5  ;;  %v7158_v6 = vld [vmem:[#allocation3 + $0x20] sm:$0x1]  ;;  %v7205_v51 = vshrl.u32 %v7156_v0, 16 }
 0x1fa   : > { %v8799_v8 = vcombine.low %v5720_v2, %v5723_v59  ;;  %v5730_v11 = vsel %vm9526_vm13, %v5728_v60, %v5729_v19  ;;  %v6757_v29 = vrot.slane %v6755_v5, 4  ;;  %v6115_v15 = vld [vmem:[#allocation3 + $0x18] sm:$0xf]  ;;  %v6756_v42 = vsel %vm9526_vm13, %v8846_v30, %v6755_v5  ;;  %v9233_v33 = vld [vmem:[#allocation3 + $0x30] sm:$0xff]   ;;  %v6116_v9 = vld [vmem:[#allocation3 + $0x1c] sm:$0xf] }
 0x1fb   : > { %v3138_v58 = vpop.permute.xlu0 %3137  ;;  %v8800_v1 = vcombine.low %v5727_v23, %v5730_v11  ;;  %v7208_v17 = vshll.u32 %v7156_v0, 16  ;;  %v7214_v53 = vshll.u32 %v7157_v52, 16  ;;  %v7218_v14 = vshrl.u32 %v7157_v52, 16  ;;  %v6117_v62 = vld [vmem:[#allocation3 + $0x20] sm:$0x1]  ;;  %v9232_v21 = vld [vmem:[#allocation3 + $0x30] sm:$0xff]  }
 0x1fc   : > { %3172 = vst.msk [vmem:[#allocation4 + $0x70] sm:$0xff] %vm12084_vm11, %v3138_v58  ;;  %5872 = vrot.lane.b32.xlu1 %v8799_v8, %s9356_s16  ;;  %v6759_v54 = vsel %vm9526_vm13, %v6757_v29, %v6758_v61  ;;  %v7207_v25 = vrot.slane %v7205_v51, 4  ;;  %v7224_v35 = vshll.u32 %v7158_v6, 16  ;;  %v6185_v28 = vshrl.u32 %v6115_v15, 16  ;;  %v6112_v51 = vld [vmem:[#allocation3 + $0xc] sm:$0xf] }
 0x1fd   : > { %5874 = vrot.lane.b32.xlu0 %v8800_v1, %s9356_s16  ;;  %v8862_v18 = vcombine.low %v6756_v42, %v6759_v54  ;;  %v7210_v31 = vrot.slane %v7208_v17, 5  ;;  %v7216_v32 = vrot.slane %v7214_v53, 5  ;;  %v7220_v40 = vrot.slane %v7218_v14, 4  ;;  %v6113_v14 = vld [vmem:[#allocation3 + $0x10] sm:$0xf] }
 0x1fe   : > { %v6188_v34 = vshll.u32 %v6115_v15, 16  ;;  %v7226_v36 = vrot.slane %v7224_v35, 5  ;;  %v6187_v37 = vrot.slane %v6185_v28, 4  ;;  %v6194_v39 = vshll.u32 %v6116_v9, 16 }
 0x1ff   : > { %v9059_v26 = vpop.f32.mrb[8].mxu0  ;;  %v6198_v7 = vshrl.u32 %v6116_v9, 16  ;;  %v7211_v43 = vor.u32 %v7210_v31, %v7207_v25  ;;  %v7221_v45 = vor.u32 %v7220_v40, %v7216_v32  ;;  %v6204_v49 = vshll.u32 %v6117_v62, 16 }
 0x200   : > { %v4202_v56 = vpop.f32.mrb[9].mxu0  ;;  %6053 = vrot.lane.b32.xlu1 %v9233_v33, %s9352_s12  ;;  %v6190_v47 = vrot.slane %v6188_v34, 5  ;;  %v6196_v48 = vrot.slane %v6194_v39, 5  ;;  %v4211_v44 = vadd.f32 %v9059_v26, %v10725_v12  ;;  %v6161_v26 = vshrl.u32 %v6112_v51, 16 }
 0x201   : > { %v9060_v3 = vpop.f32.mrb[10].mxu0  ;;  %6913 = vrot.lane.b32.xlu0 %v8862_v18, %s9359_s13  ;;  %v6200_v55 = vrot.slane %v6198_v7, 4  ;;  %v4203_v57 = vadd.f32 %v10725_v12, %v4202_v56  ;;  %v7212_v38 = vrot.slane %v7211_v43, 4  ;;  %v7222_v58 = vrot.slane %v7221_v45, 4  ;;  %v9234_v56 = vld [vmem:[#allocation3 + $0x24] sm:$0xff]  }
 0x202   : > { %v4205_v50 = vpop.f32.mrb[11].mxu0  ;;  %v6191_v13 = vor.u32 %v6190_v47, %v6187_v37  ;;  %v6206_v46 = vrot.slane %v6204_v49, 5  ;;  %vm4307_vm1 = vcmp.gt.f32.partialorder %v4211_v44, 0.0  ;;  %v4339_v27 = vmul.f32 0.01, %v4211_v44  ;;  %v9235_v45 = vld [vmem:[#allocation3 + $0x24] sm:$0xff]  }
 0x203   : > { %v2641_v22 = vpop.permute.xlu1 %2640  ;;  %v6201_v63 = vor.u32 %v6200_v55, %v6196_v48  ;;  %vm4305_vm5 = vcmp.gt.f32.partialorder %v4203_v57, 0.0  ;;  %v7217_v19 = vsel %vm9562_vm14, %v7212_v38, %v7216_v32  ;;  %v7227_v5 = vsel %vm9562_vm14, %v7222_v58, %v7226_v36  ;;  %v4847_v32 = vld [vmem:[#allocation3 + $0x48] sm:$0xf] }
 0x204   : > { %2674 = vst.msk [vmem:[#allocation4 + $0x78] sm:$0xff] %vm12085_vm10, %v2641_v22  ;;  %v6192_v2 = vrot.slane %v6191_v13, 4  ;;  %v4337_v59 = vmul.f32 0.01, %v4203_v57  ;;  %v8894_v30 = vcombine.low %v7217_v19, %v7227_v5  ;;  %v4371_v52 = vsel %vm4307_vm1, %v4211_v44, %v4339_v27  ;;  %v4840_v22 = vld [vmem:[#allocation3 + $0x3c] sm:$0xf] }
 0x205   : > { %7095 = vrot.lane.b32.xlu0 %v9232_v21, %s9358_s10  ;;  %v6202_v0 = vrot.slane %v6201_v63, 4  ;;  %v4214_v8 = vadd.f32 %v9060_v3, %v10725_v12  ;;  %v8980_v29 = vpack.c.bf16 %v4371_v52, %v4371_v52  ;;  %v4206_v6 = vadd.f32 %v10725_v12, %v4205_v50  ;;  %v5075_v13 = vld [vmem:[#allocation3 + $0x18] sm:$0xf]  ;;  %v4851_v27 = vld [vmem:[#allocation3 + $0x50] sm:$0x1] }
 0x206   : > { %v6197_v11 = vsel %vm9562_vm14, %v6192_v2, %v6196_v48  ;;  %v4369_v61 = vsel %vm4305_vm5, %v4203_v57, %v4337_v59  ;;  %vm12086_vm1 = vcmask 228544   ;;  %v6164_v31 = vshll.u32 %v6112_v51, 16  ;;  %v6114_v48 = vld [vmem:[#allocation3 + $0x14] sm:$0x1] }
 0x207   : > { %v2962_v60 = vpop.permute.xlu1 %2961  ;;  %v6207_v15 = vsel %vm9562_vm14, %v6202_v0, %v6206_v46  ;;  %v8978_v1 = vpack.c.bf16 %v4369_v61, %v4369_v61  ;;  %vm4308_vm11 = vcmp.gt.f32.partialorder %v4214_v8, 0.0  ;;  %v4340_v42 = vmul.f32 0.01, %v4214_v8  ;;  %v9257_v46 = vld [vmem:[#allocation3 + $0x30] sm:$0xff]   ;;  %v5076_v61 = vld [vmem:[#allocation3 + $0x1c] sm:$0xf] }
 0x208   : > { %2995 = vst.msk [vmem:[#allocation4 + $0x78] sm:$0xff] %vm12083_vm0, %v2962_v60  ;;  %v3683_v23 = vpop.permute.xlu0 %3682  ;;  %v8831_v33 = vcombine.low %v6197_v11, %v6207_v15  ;;  %v4575_v17 = vshrl.u32 %v8980_v29, 16  ;;  %v4578_v53 = vshll.u32 %v8980_v29, 16  ;;  %vm4306_vm10 = vcmp.gt.f32.partialorder %v4206_v6, 0.0 }
 0x209   : > { %3717 = vst.msk [vmem:[#allocation4 + $0x70] sm:$0xff] %vm3702_vm4, %v3683_v23  ;;  %7636 = vrot.lane.b32.xlu0 %v8894_v30, %s9361_s17  ;;  %v4558_v12 = vshrl.u32 %v8978_v1, 16  ;;  %v4561_v18 = vshll.u32 %v8978_v1, 16  ;;  %v4372_v25 = vsel %vm4308_vm11, %v4214_v8, %v4340_v42  ;;  %v4338_v35 = vmul.f32 0.01, %v4206_v6 }
 0x20a   : > { %6594 = vrot.lane.b32.xlu1 %v8831_v33, %s9355_s15  ;;  %v4577_v62 = vrot.slane %v4575_v17, 7  ;;  %v8981_v28 = vpack.c.bf16 %v4372_v25, %v4372_v25  ;;  %v6170_v36 = vshll.u32 %v6113_v14, 16  ;;  %v6174_v37 = vshrl.u32 %v6113_v14, 16  ;;  %v4844_v30 = vld [vmem:[#allocation3 + $0x44] sm:$0x1]  ;;  %5057 = vst.msk [vmem:[#allocation4 + $0x20] sm:$0xff] %vm12035_vm8, %v9257_v46 }
 0x20b   : > { %v3140_v54 = vpop.permute.xlu1 %3139  ;;  %v10857_v40 = vrot.slane %v4558_v12, 7  ;;  %v4370_v34 = vsel %vm4306_vm10, %v4206_v6, %v4338_v35  ;;  %v6163_v55 = vrot.slane %v6161_v26, 4  ;;  %v6166_v38 = vrot.slane %v6164_v31, 5  ;;  %v5077_v33 = vld [vmem:[#allocation3 + $0x20] sm:$0x1] }
 0x20c   : > { %3173 = vst.msk [vmem:[#allocation4 + $0x78] sm:$0xff] %vm12086_vm1, %v3140_v54  ;;  %v4004_v9 = vpop.permute.xlu0 %4003  ;;  %v4580_v7 = vor.u32 %v4578_v53, %v4577_v62  ;;  %v4581_v3 = vrot.slane %v4577_v62, 4  ;;  %v4583_v21 = vshrl.u32 %v8981_v28, 16  ;;  %v4586_v43 = vshll.u32 %v8981_v28, 16  ;;  %v7707_v17 = vld [vmem:[#allocation3 + $0x30] sm:$0xe] }
 0x20d   : > { %4038 = vst.msk [vmem:[#allocation4 + $0x70] sm:$0xff] %vm4023_vm2, %v4004_v9  ;;  %v4563_v47 = vor.u32 %v4561_v18, %v10857_v40  ;;  %v4564_v49 = vrot.slane %v10857_v40, 4  ;;  %v8979_v50 = vpack.c.bf16 %v4370_v34, %v4370_v34  ;;  %6051 = vrot.lane.b32.xlu0 %v9234_v56, %s9352_s12  ;;  %v6172_v58 = vrot.slane %v6170_v36, 5  ;;  %v7708_v18 = vld [vmem:[#allocation3 + $0x34] sm:$0xf] }
 0x20e   : > { %v4848_v44 = vsel %vm10740_vm9, %v4580_v7, %v4847_v32  ;;  %v4585_v57 = vrot.slane %v4583_v21, 7  ;;  %7093 = vrot.lane.b32.xlu1 %v9235_v45, %s9358_s10  ;;  %v6176_v5 = vrot.slane %v6174_v37, 4  ;;  %v6167_v0 = vor.u32 %v6166_v38, %v6163_v55  ;;  %v7709_v26 = vld [vmem:[#allocation3 + $0x38] sm:$0x1]  ;;  %v5072_v56 = vld [vmem:[#allocation3 + $0xc] sm:$0xf] }
 0x20f   : > { %v3685_v39 = vpop.permute.xlu1 %3684  ;;  %4849 = vst [vmem:[#allocation3 + $0x48] sm:$0xf] %v4848_v44  ;;  %v4841_v63 = vsel %vm10740_vm9, %v4563_v47, %v4840_v22  ;;  %v4566_v60 = vshrl.u32 %v8979_v50, 16  ;;  %v4569_v19 = vshll.u32 %v8979_v50, 16  ;;  %v6180_v52 = vshll.u32 %v6114_v48, 16 }
 0x210   : > { %3718 = vst.msk [vmem:[#allocation4 + $0x78] sm:$0xff] %vm3702_vm4, %v3685_v39  ;;  %4842 = vst [vmem:[#allocation3 + $0x3c] sm:$0xf] %v4841_v63  ;;  %v4588_v59 = vor.u32 %v4586_v43, %v4585_v57  ;;  %v4590_v23 = vrot.slane %v4585_v57, 4  ;;  %v6177_v29 = vor.u32 %v6176_v5, %v6172_v58  ;;  %v5166_v6 = vshrl.u32 %v5075_v13, 16 }
 0x211   : > { %v4568_v11 = vrot.slane %v4566_v60, 7  ;;  %v5169_v15 = vshll.u32 %v5075_v13, 16  ;;  %v6168_v51 = vrot.slane %v6167_v0, 4  ;;  %v6182_v54 = vrot.slane %v6180_v52, 5  ;;  %v5073_v36 = vld [vmem:[#allocation3 + $0x10] sm:$0xf] }
 0x212   : > { %v4589_v1 = vsel %vm9482_vm7, %v4581_v3, %v4588_v59  ;;  %v4852_v42 = vsel %vm10612_vm12, %v4590_v23, %v4851_v27  ;;  %v6178_v9 = vrot.slane %v6177_v29, 4  ;;  %v5168_v12 = vrot.slane %v5166_v6, 4  ;;  %v5074_v22 = vld [vmem:[#allocation3 + $0x14] sm:$0x1]  ;;  %v5628_v27 = vld [vmem:[#allocation3 + $0x38] sm:$0x1] }
 0x213   : > { %v4006_v2 = vpop.permute.xlu1 %4005  ;;  %4850 = vst.msk [vmem:[#allocation3 + $0x4c] sm:$0xf] %vm12036_vm6, %v4589_v1  ;;  %4853 = vst [vmem:[#allocation3 + $0x50] sm:$0x1] %v4852_v42  ;;  %v4571_v53 = vor.u32 %v4569_v19, %v4568_v11  ;;  %v4573_v14 = vrot.slane %v4568_v11, 4  ;;  %v6173_v25 = vsel %vm9562_vm14, %v6168_v51, %v6172_v58  ;;  %v5171_v35 = vrot.slane %v5169_v15, 5 }
 0x214   : > { %4039 = vst.msk [vmem:[#allocation4 + $0x78] sm:$0xff] %vm4023_vm2, %v4006_v2  ;;  %v4054_v8 = vld [vmem:[#allocation4 + $0x70] sm:$0xff]  ;;  %v5175_v62 = vshll.u32 %v5076_v61, 16  ;;  %v5179_v28 = vshrl.u32 %v5076_v61, 16  ;;  %v6183_v40 = vsel %vm9562_vm14, %v6178_v9, %v6182_v54  ;;  %v5185_v34 = vshll.u32 %v5077_v33, 16 }
 0x215   : > { %9077 = vmatprep.mubr.msk.bf16.mxu0 %vm4083_vm15, %v4054_v8  ;;  %v4572_v31 = vsel %vm9482_vm7, %v4564_v49, %v4571_v53  ;;  %v4845_v32 = vsel %vm10612_vm12, %v4573_v14, %v4844_v30  ;;  %vm5597_vm2 = vcmask 130112   ;;  %v8830_v37 = vcombine.low %v6173_v25, %v6183_v40  ;;  %v5626_v49 = vld [vmem:[#allocation3 + $0x30] sm:$0xe]  ;;  %v5627_v38 = vld [vmem:[#allocation3 + $0x34] sm:$0xf]  ;;  %v9261_v51 = vld [vmem:[#allocation3 + $0x24] sm:$0xff]  }
 0x216   : > { %4843 = vst.msk [vmem:[#allocation3 + $0x40] sm:$0xf] %vm12036_vm6, %v4572_v31  ;;  %4846 = vst [vmem:[#allocation3 + $0x44] sm:$0x1] %v4845_v32  ;;  %v5172_v39 = vor.u32 %v5171_v35, %v5168_v12  ;;  %v5177_v7 = vrot.slane %v5175_v62, 5  ;;  %v5181_v3 = vrot.slane %v5179_v28, 4 }
 0x217   : > { %v5187_v21 = vrot.slane %v5185_v34, 5  ;;  %v8912_v43 = vrot.slane %v7707_v17, 9  ;;  %v7813_v45 = vrot.slane %v7708_v18, 5  ;;  %v7816_v47 = vrot.slane %v7709_v26, 5  ;;  %6592 = vrot.lane.b32.xlu0 %v8830_v37, %s9355_s15  ;;  %v6666_v60 = vld [vmem:[#allocation3 + $0x30] sm:$0xe] }
 0x218   : > { %v5173_v48 = vrot.slane %v5172_v39, 4  ;;  %v5182_v55 = vor.u32 %v5181_v3, %v5177_v7  ;;  %v5142_v44 = vshrl.u32 %v5072_v56, 16  ;;  %v5145_v57 = vshll.u32 %v5072_v56, 16  ;;  %v6667_v19 = vld [vmem:[#allocation3 + $0x34] sm:$0xf]  ;;  %5056 = vst.msk [vmem:[#allocation4 + $0x18] sm:$0xff] %vm12035_vm8, %v9261_v51 }
 0x219   : > { %v7814_v58 = vsel %vm9526_vm13, %v8912_v43, %v7813_v45  ;;  %v7815_v13 = vrot.slane %v7813_v45, 4  ;;  %v5151_v46 = vshll.u32 %v5073_v36, 16  ;;  %v5155_v63 = vshrl.u32 %v5073_v36, 16  ;;  %v6668_v30 = vld [vmem:[#allocation3 + $0x38] sm:$0x1] }
 0x21a   : > { %v5178_v5 = vsel %vm9562_vm14, %v5173_v48, %v5177_v7  ;;  %v5183_v2 = vrot.slane %v5182_v55, 4  ;;  %v5144_v59 = vrot.slane %v5142_v44, 4  ;;  %v5147_v23 = vrot.slane %v5145_v57, 5  ;;  %v7704_v1 = vld [vmem:[#allocation3 + $0x24] sm:$0xe] }
 0x21b   : > { %v4055_v50 = vld [vmem:[#allocation4 + $0x78] sm:$0xff]  ;;  %v7817_v0 = vsel %vm9526_vm13, %v7815_v13, %v7816_v47  ;;  %v5153_v52 = vrot.slane %v5151_v46, 5  ;;  %v5157_v8 = vrot.slane %v5155_v63, 4  ;;  %v5161_v11 = vshll.u32 %v5074_v22, 16  ;;  %v7705_v42 = vld [vmem:[#allocation3 + $0x28] sm:$0xf] }
 0x21c   : > { %9078 = vmatmul.mubr.msk.bf16.gmra.mrb[28].mxu0 %vm4083_vm15, %v4055_v50  ;;  %v5188_v29 = vsel %vm9562_vm14, %v5183_v2, %v5187_v21  ;;  %v8928_v61 = vcombine.low %v7814_v58, %v7817_v0  ;;  %v5148_v6 = vor.u32 %v5147_v23, %v5144_v59  ;;  %v8786_v15 = vrot.slane %v5626_v49, 9  ;;  %v7706_v14 = vld [vmem:[#allocation3 + $0x2c] sm:$0x1]  ;;  %v5623_v9 = vld [vmem:[#allocation3 + $0x24] sm:$0xe] }
 0x21d   : > { %v8768_v54 = vcombine.low %v5178_v5, %v5188_v29  ;;  %v5158_v33 = vor.u32 %v5157_v8, %v5153_v52  ;;  %v5163_v17 = vrot.slane %v5161_v11, 5  ;;  %v5740_v53 = vrot.slane %v5627_v38, 5  ;;  %v5624_v62 = vld [vmem:[#allocation3 + $0x28] sm:$0xf]  ;;  %v5625_v40 = vld [vmem:[#allocation3 + $0x2c] sm:$0x1] }
 0x21e   : > { %7961 = vrot.lane.b32.xlu0 %v8928_v61, %s9360_s14  ;;  %v5149_v12 = vrot.slane %v5148_v6, 4  ;;  %v5743_v18 = vrot.slane %v5628_v27, 5  ;;  %v8849_v25 = vrot.slane %v6666_v60, 9  ;;  %v6776_v35 = vrot.slane %v6667_v19, 5  ;;  %v6663_v34 = vld [vmem:[#allocation3 + $0x24] sm:$0xe] }
 0x21f   : > { %5553 = vrot.lane.b32.xlu1 %v8768_v54, %s9351_s11  ;;  %v5159_v28 = vrot.slane %v5158_v33, 4  ;;  %v5741_v26 = vsel %vm9526_vm13, %v8786_v15, %v5740_v53  ;;  %v5742_v31 = vrot.slane %v5740_v53, 4  ;;  %v6779_v32 = vrot.slane %v6668_v30, 5  ;;  %v5550_v56 = vpop.permute.xlu0 %5549  ;;  %v6664_v45 = vld [vmem:[#allocation3 + $0x28] sm:$0xf] }
 0x220   : > { %v5154_v36 = vsel %vm9562_vm14, %v5149_v12, %v5153_v52  ;;  %v6777_v37 = vsel %vm9526_vm13, %v8849_v25, %v6776_v35  ;;  %v6778_v39 = vrot.slane %v6776_v35, 4  ;;  %v8911_v7 = vrot.slane %v7704_v1, 9  ;;  %5598 = vst.msk [vmem:[#allocation4] sm:$0xff] %vm5597_vm2, %v5550_v56  ;;  %v6665_v47 = vld [vmem:[#allocation3 + $0x2c] sm:$0x1] }
 0x221   : > { %v5164_v3 = vsel %vm9562_vm14, %v5159_v28, %v5163_v17  ;;  %v5744_v22 = vsel %vm9526_vm13, %v5742_v31, %v5743_v18  ;;  %v7806_v21 = vrot.slane %v7705_v42, 5  ;;  %v7809_v43 = vrot.slane %v7706_v14, 5  ;;  %v7162_v44 = vld [vmem:[#allocation3 + $0x30] sm:$0xf]  ;;  %v7163_v19 = vld [vmem:[#allocation3 + $0x34] sm:$0xf] }
 0x222   : > { %v8767_v49 = vcombine.low %v5154_v36, %v5164_v3  ;;  %v8802_v50 = vcombine.low %v5741_v26, %v5744_v22  ;;  %v6780_v48 = vsel %vm9526_vm13, %v6778_v39, %v6779_v32  ;;  %v8785_v55 = vrot.slane %v5623_v9, 9  ;;  %v7164_v23 = vld [vmem:[#allocation3 + $0x38] sm:$0x1]  ;;  %v6121_v29 = vld [vmem:[#allocation3 + $0x30] sm:$0xf]  ;;  %v9236_v36 = vld [vmem:[#allocation3 + $0x48] sm:$0xff]  }
 0x223   : > { %v8865_v57 = vcombine.low %v6777_v37, %v6780_v48  ;;  %v7807_v38 = vsel %vm9526_vm13, %v8911_v7, %v7806_v21  ;;  %v7808_v58 = vrot.slane %v7806_v21, 4  ;;  %v5733_v13 = vrot.slane %v5624_v62, 5  ;;  %v6122_v42 = vld [vmem:[#allocation3 + $0x34] sm:$0xf]  ;;  %v6123_v53 = vld [vmem:[#allocation3 + $0x38] sm:$0x1] }
 0x224   : > { %5551 = vrot.lane.b32.xlu1 %v8767_v49, %s9351_s11  ;;  %5878 = vrot.lane.b32.xlu0 %v8802_v50, %s9356_s16  ;;  %v5736_v46 = vrot.slane %v5625_v40, 5  ;;  %v8848_v63 = vrot.slane %v6663_v34, 9  ;;  %v6769_v27 = vrot.slane %v6664_v45, 5  ;;  %v6772_v60 = vrot.slane %v6665_v47, 5  ;;  %v6118_v25 = vld [vmem:[#allocation3 + $0x24] sm:$0xf] }
 0x225   : > { %v7810_v5 = vsel %vm9526_vm13, %v7808_v58, %v7809_v43  ;;  %v5734_v2 = vsel %vm9526_vm13, %v8785_v55, %v5733_v13  ;;  %v5735_v59 = vrot.slane %v5733_v13, 4  ;;  %v7253_v30 = vshrl.u32 %v7162_v44, 16  ;;  %v6119_v56 = vld [vmem:[#allocation3 + $0x28] sm:$0xf]  ;;  %v6120_v47 = vld [vmem:[#allocation3 + $0x2c] sm:$0x1] }
 0x226   : > { %v8927_v0 = vcombine.low %v7807_v38, %v7810_v5  ;;  %v6770_v52 = vsel %vm9526_vm13, %v8848_v63, %v6769_v27  ;;  %v6771_v8 = vrot.slane %v6769_v27, 4  ;;  %v7256_v11 = vshll.u32 %v7162_v44, 16  ;;  %v9237_v37 = vld [vmem:[#allocation3 + $0x48] sm:$0xff]   ;;  %v10934_v63 = vld [vmem:[#allocation3 + $0x34] sm:$0xf] }
 0x227   : > { %v5737_v61 = vsel %vm9526_vm13, %v5735_v59, %v5736_v46  ;;  %v7255_v6 = vrot.slane %v7253_v30, 4  ;;  %v7262_v15 = vshll.u32 %v7163_v19, 16  ;;  %v7266_v1 = vshrl.u32 %v7163_v19, 16 }
 0x228   : > { %6919 = vrot.lane.b32.xlu1 %v8865_v57, %s9359_s13  ;;  %7959 = vrot.lane.b32.xlu0 %v8927_v0, %s9360_s14  ;;  %v8801_v51 = vcombine.low %v5734_v2, %v5737_v61  ;;  %v6773_v54 = vsel %vm9526_vm13, %v6771_v8, %v6772_v60  ;;  %v7258_v33 = vrot.slane %v7256_v11, 5  ;;  %v7272_v17 = vshll.u32 %v7164_v23, 16  ;;  %v5081_v57 = vld [vmem:[#allocation3 + $0x30] sm:$0xf] }
 0x229   : > { %v8864_v14 = vcombine.low %v6770_v52, %v6773_v54  ;;  %v7264_v9 = vrot.slane %v7262_v15, 5  ;;  %v7268_v12 = vrot.slane %v7266_v1, 4  ;;  %v6233_v18 = vshrl.u32 %v6121_v29, 16 }
 0x22a   : > { %v7259_v35 = vor.u32 %v7258_v33, %v7255_v6  ;;  %v7274_v62 = vrot.slane %v7272_v17, 5  ;;  %v6236_v28 = vshll.u32 %v6121_v29, 16  ;;  %v6242_v26 = vshll.u32 %v6122_v42, 16  ;;  %v10946_v6 = vld [vmem:[%s12024_s2] ss:$0 sm:$0xff] }
 0x22b   : > { %v7269_v31 = vor.u32 %v7268_v12, %v7264_v9  ;;  %v6235_v32 = vrot.slane %v6233_v18, 4  ;;  %v6246_v40 = vshrl.u32 %v6122_v42, 16  ;;  %v6252_v34 = vshll.u32 %v6123_v53, 16 }
 0x22c   : > { %5876 = vrot.lane.b32.xlu1 %v8801_v51, %s9356_s16  ;;  %6917 = vrot.lane.b32.xlu0 %v8864_v14, %s9359_s13  ;;  %v7260_v39 = vrot.slane %v7259_v35, 4  ;;  %v6238_v7 = vrot.slane %v6236_v28, 5  ;;  %v6244_v3 = vrot.slane %v6242_v26, 5  ;;  %v6209_v22 = vshrl.u32 %v6118_v25, 16  ;;  %v9238_v28 = vld [vmem:[#allocation3 + $0x3c] sm:$0xff]  }
 0x22d   : > { %v7270_v21 = vrot.slane %v7269_v31, 4  ;;  %v6248_v43 = vrot.slane %v6246_v40, 4  ;;  %v6254_v45 = vrot.slane %v6252_v34, 5  ;;  %v6212_v49 = vshll.u32 %v6118_v25, 16 }
 0x22e   : > { %v7265_v50 = vsel %vm9562_vm14, %v7260_v39, %v7264_v9  ;;  %v6239_v48 = vor.u32 %v6238_v7, %v6235_v32  ;;  %v6211_v55 = vrot.slane %v6209_v22, 4  ;;  %v6218_v44 = vshll.u32 %v6119_v56, 16 }
 0x22f   : > { %v7275_v38 = vsel %vm9562_vm14, %v7270_v21, %v7274_v62  ;;  %v6249_v58 = vor.u32 %v6248_v43, %v6244_v3  ;;  %v6214_v13 = vrot.slane %v6212_v49, 5  ;;  %v6222_v46 = vshrl.u32 %v6119_v56, 16  ;;  %v4861_v49 = vld [vmem:[#allocation3 + $0x60] sm:$0xf] }
 0x230   : > { %7099 = vrot.lane.b32.xlu0 %v9236_v36, %s9358_s10  ;;  %6057 = vrot.lane.b32.xlu1 %v9237_v37, %s9352_s12  ;;  %v8896_v27 = vcombine.low %v7265_v50, %v7275_v38  ;;  %v6240_v60 = vrot.slane %v6239_v48, 4  ;;  %v6220_v19 = vrot.slane %v6218_v44, 5  ;;  %v6228_v5 = vshll.u32 %v6120_v47, 16  ;;  %v9239_v37 = vld [vmem:[#allocation3 + $0x3c] sm:$0xff]   ;;  %v4854_v38 = vld [vmem:[#allocation3 + $0x54] sm:$0xf] }
 0x231   : > { %v6250_v2 = vrot.slane %v6249_v58, 4  ;;  %v6215_v59 = vor.u32 %v6214_v13, %v6211_v55  ;;  %v6224_v23 = vrot.slane %v6222_v46, 4  ;;  %v5214_v30 = vshrl.u32 %v5081_v57, 16  ;;  %v9063_v52 = vpop.f32.mrb[12].mxu0 }
 0x232   : > { %v6245_v0 = vsel %vm9562_vm14, %v6240_v60, %v6244_v3  ;;  %v6230_v8 = vrot.slane %v6228_v5, 5  ;;  %v5217_v11 = vshll.u32 %v5081_v57, 16  ;;  %v5223_v29 = vshll.u32 %v10934_v63, 16  ;;  %v4218_v1 = vpop.f32.mrb[13].mxu0  ;;  %v5083_v5 = vld [vmem:[#allocation3 + $0x38] sm:$0x1] }
 0x233   : > { %v6255_v61 = vsel %vm9562_vm14, %v6250_v2, %v6254_v45  ;;  %v4227_v15 = vadd.f32 %v10946_v6, %v9063_v52  ;;  %v6216_v42 = vrot.slane %v6215_v59, 4  ;;  %v6225_v51 = vor.u32 %v6224_v23, %v6220_v19  ;;  %v9064_v17 = vpop.f32.mrb[14].mxu0  ;;  %v4858_v52 = vld [vmem:[#allocation3 + $0x5c] sm:$0x1] }
 0x234   : > { %7640 = vrot.lane.b32.xlu0 %v8896_v27, %s9361_s17  ;;  %v8833_v54 = vcombine.low %v6245_v0, %v6255_v61  ;;  %v4219_v33 = vadd.f32 %v10946_v6, %v4218_v1  ;;  %v5216_v53 = vrot.slane %v5214_v30, 4  ;;  %v5219_v14 = vrot.slane %v5217_v11, 5  ;;  %v4221_v18 = vpop.f32.mrb[15].mxu0  ;;  %v4865_v0 = vld [vmem:[#allocation3 + $0x68] sm:$0x1] }
 0x235   : > { %vm4311_vm4 = vcmp.gt.f32.partialorder %v4227_v15, 0.0  ;;  %v4343_v9 = vmul.f32 0.01, %v4227_v15  ;;  %v4230_v12 = vadd.f32 %v10946_v6, %v9064_v17  ;;  %v6221_v25 = vsel %vm9562_vm14, %v6216_v42, %v6220_v19  ;;  %v7713_v1 = vld [vmem:[#allocation3 + $0x48] sm:$0xe] }
 0x236   : > { %6598 = vrot.lane.b32.xlu1 %v8833_v54, %s9355_s15  ;;  %vm4309_vm15 = vcmp.gt.f32.partialorder %v4219_v33, 0.0  ;;  %v4341_v35 = vmul.f32 0.01, %v4219_v33  ;;  %v4222_v62 = vadd.f32 %v10946_v6, %v4221_v18  ;;  %v6226_v26 = vrot.slane %v6225_v51, 4  ;;  %v9266_v42 = vld [vmem:[#allocation3 + $0x48] sm:$0xff]  }
 0x237   : > { %v4375_v31 = vsel %vm4311_vm4, %v4227_v15, %v4343_v9  ;;  %vm4312_vm5 = vcmp.gt.f32.partialorder %v4230_v12, 0.0  ;;  %v4344_v32 = vmul.f32 0.01, %v4230_v12  ;;  %v5220_v40 = vor.u32 %v5219_v14, %v5216_v53  ;;  %v7714_v17 = vld [vmem:[#allocation3 + $0x4c] sm:$0xf]  ;;  %5059 = vst.msk [vmem:[#allocation4 + $0x30] sm:$0xff] %vm12035_vm8, %v9266_v42 }
 0x238   : > { %v8984_v34 = vpack.c.bf16 %v4375_v31, %v4375_v31  ;;  %v4373_v56 = vsel %vm4309_vm15, %v4219_v33, %v4341_v35  ;;  %vm4310_vm0 = vcmp.gt.f32.partialorder %v4222_v62, 0.0  ;;  %v4342_v36 = vmul.f32 0.01, %v4222_v62  ;;  %6055 = vrot.lane.b32.xlu0 %v9238_v28, %s9352_s12  ;;  %v7715_v53 = vld [vmem:[#allocation3 + $0x50] sm:$0x1] }
 0x239   : > { %v8982_v39 = vpack.c.bf16 %v4373_v56, %v4373_v56  ;;  %v4376_v7 = vsel %vm4312_vm5, %v4230_v12, %v4344_v32  ;;  %v6231_v3 = vsel %vm9562_vm14, %v6226_v26, %v6230_v8  ;;  %v10959_v22 = vrot.slane %v5220_v40, 4  ;;  %v7160_v35 = vld [vmem:[#allocation3 + $0x28] sm:$0xf] }
 0x23a   : > { %v4609_v21 = vshrl.u32 %v8984_v34, 16  ;;  %v4612_v43 = vshll.u32 %v8984_v34, 16  ;;  %v8985_v45 = vpack.c.bf16 %v4376_v7, %v4376_v7  ;;  %v4374_v47 = vsel %vm4310_vm0, %v4222_v62, %v4342_v36  ;;  %7097 = vrot.lane.b32.xlu1 %v9239_v37, %s9358_s10  ;;  %v9267_v62 = vld [vmem:[#allocation3 + $0x3c] sm:$0xff]   ;;  %v7161_v37 = vld [vmem:[#allocation3 + $0x2c] sm:$0x1] }
 0x23b   : > { %v4592_v50 = vshrl.u32 %v8982_v39, 16  ;;  %v4595_v48 = vshll.u32 %v8982_v39, 16  ;;  %v8983_v55 = vpack.c.bf16 %v4374_v47, %v4374_v47  ;;  %v8832_v44 = vcombine.low %v6221_v25, %v6231_v3  ;;  %v7159_v25 = vld [vmem:[#allocation3 + $0x24] sm:$0xf]  ;;  %v5632_v39 = vld [vmem:[#allocation3 + $0x48] sm:$0xe] }
 0x23c   : > { %v4611_v57 = vrot.slane %v4609_v21, 7  ;;  %v4617_v58 = vshrl.u32 %v8985_v45, 16  ;;  %v4620_v13 = vshll.u32 %v8985_v45, 16  ;;  %v5225_v46 = vrot.slane %v5223_v29, 5  ;;  %5058 = vst.msk [vmem:[#allocation4 + $0x28] sm:$0xff] %vm12035_vm8, %v9267_v62 }
 0x23d   : > { %v4594_v27 = vrot.slane %v4592_v50, 7  ;;  %v4600_v60 = vshrl.u32 %v8983_v55, 16  ;;  %v4603_v19 = vshll.u32 %v8983_v55, 16  ;;  %6596 = vrot.lane.b32.xlu0 %v8832_v44, %s9355_s15  ;;  %v5227_v2 = vshrl.u32 %v10934_v63, 16  ;;  %v5078_v55 = vld [vmem:[#allocation3 + $0x24] sm:$0xf] }
 0x23e   : > { %v4614_v59 = vor.u32 %v4612_v43, %v4611_v57  ;;  %v4615_v23 = vrot.slane %v4611_v57, 4  ;;  %v4619_v30 = vrot.slane %v4617_v58, 7  ;;  %v5226_v8 = vsel %vm9562_vm14, %v10959_v22, %v5225_v46  ;;  %v5633_v43 = vld [vmem:[#allocation3 + $0x4c] sm:$0xf] }
 0x23f   : > { %v4597_v11 = vor.u32 %v4595_v48, %v4594_v27  ;;  %v4598_v61 = vrot.slane %v4594_v27, 4  ;;  %v4602_v29 = vrot.slane %v4600_v60, 7  ;;  %v5229_v15 = vrot.slane %v5227_v2, 4  ;;  %v5634_v48 = vld [vmem:[#allocation3 + $0x50] sm:$0x1] }
 0x240   : > { %v4862_v51 = vsel %vm10740_vm9, %v4614_v59, %v4861_v49  ;;  %v4622_v54 = vor.u32 %v4620_v13, %v4619_v30  ;;  %v4624_v63 = vrot.slane %v4619_v30, 4  ;;  %v5233_v33 = vshll.u32 %v5083_v5, 16  ;;  %v5079_v13 = vld [vmem:[#allocation3 + $0x28] sm:$0xf]  ;;  %v5080_v5 = vld [vmem:[#allocation3 + $0x2c] sm:$0x1] }
 0x241   : > { %4863 = vst [vmem:[#allocation3 + $0x60] sm:$0xf] %v4862_v51  ;;  %v4855_v14 = vsel %vm10740_vm9, %v4597_v11, %v4854_v38  ;;  %v4605_v9 = vor.u32 %v4603_v19, %v4602_v29  ;;  %v4607_v12 = vrot.slane %v4602_v29, 4  ;;  %v5230_v18 = vor.u32 %v5229_v15, %v5225_v46  ;;  %v7711_v29 = vld [vmem:[#allocation3 + $0x40] sm:$0xf] }
 0x242   : > { %4856 = vst [vmem:[#allocation3 + $0x54] sm:$0xf] %v4855_v14  ;;  %v4623_v28 = vsel %vm9482_vm7, %v4615_v23, %v4622_v54  ;;  %v4866_v26 = vsel %vm10612_vm12, %v4624_v63, %v4865_v0  ;;  %v5235_v31 = vrot.slane %v5233_v33, 5  ;;  %v8914_v32 = vrot.slane %v7713_v1, 9  ;;  %v7712_v54 = vld [vmem:[#allocation3 + $0x44] sm:$0x1] }
 0x243   : > { %4864 = vst.msk [vmem:[#allocation3 + $0x64] sm:$0xf] %vm12036_vm6, %v4623_v28  ;;  %4867 = vst [vmem:[#allocation3 + $0x68] sm:$0x1] %v4866_v26  ;;  %v4606_v40 = vsel %vm9482_vm7, %v4598_v61, %v4605_v9  ;;  %v4859_v34 = vsel %vm10612_vm12, %v4607_v12, %v4858_v52  ;;  %v5231_v56 = vrot.slane %v5230_v18, 4  ;;  %v7827_v36 = vrot.slane %v7714_v17, 5 }
 0x244   : > { %4857 = vst.msk [vmem:[#allocation3 + $0x58] sm:$0xf] %vm12036_vm6, %v4606_v40  ;;  %4860 = vst [vmem:[#allocation3 + $0x5c] sm:$0x1] %v4859_v34  ;;  %v7830_v7 = vrot.slane %v7715_v53, 5  ;;  %v7229_v3 = vshrl.u32 %v7159_v25, 16 }
 0x245   : > { %v7232_v22 = vshll.u32 %v7159_v25, 16  ;;  %v7238_v21 = vshll.u32 %v7160_v35, 16  ;;  %v5236_v45 = vsel %vm9562_vm14, %v5231_v56, %v5235_v31  ;;  %v7828_v47 = vsel %vm9526_vm13, %v8914_v32, %v7827_v36  ;;  %v7710_v61 = vld [vmem:[#allocation3 + $0x3c] sm:$0xe]  ;;  %v6672_v63 = vld [vmem:[#allocation3 + $0x48] sm:$0xe] }
 0x246   : > { %v7829_v49 = vrot.slane %v7827_v36, 4  ;;  %v7242_v50 = vshrl.u32 %v7160_v35, 16  ;;  %v8770_v44 = vcombine.low %v5226_v8, %v5236_v45  ;;  %v7231_v57 = vrot.slane %v7229_v3, 4  ;;  %v6673_v9 = vld [vmem:[#allocation3 + $0x4c] sm:$0xf] }
 0x247   : > { %v7234_v38 = vrot.slane %v7232_v22, 5  ;;  %v7240_v58 = vrot.slane %v7238_v21, 5  ;;  %v7248_v60 = vshll.u32 %v7161_v37, 16  ;;  %v8788_v19 = vrot.slane %v5632_v39, 9  ;;  %v6674_v12 = vld [vmem:[#allocation3 + $0x50] sm:$0x1] }
 0x248   : > { %v7831_v46 = vsel %vm9526_vm13, %v7829_v49, %v7830_v7  ;;  %v7244_v27 = vrot.slane %v7242_v50, 4  ;;  %5557 = vrot.lane.b32.xlu1 %v8770_v44, %s9351_s11  ;;  %v5754_v23 = vrot.slane %v5633_v43, 5  ;;  %v5757_v30 = vrot.slane %v5634_v48, 5  ;;  %v6669_v28 = vld [vmem:[#allocation3 + $0x3c] sm:$0xe] }
 0x249   : > { %v8930_v2 = vcombine.low %v7828_v47, %v7831_v46  ;;  %v7235_v59 = vor.u32 %v7234_v38, %v7231_v57  ;;  %v7250_v52 = vrot.slane %v7248_v60, 5  ;;  %v5190_v8 = vshrl.u32 %v5078_v55, 16  ;;  %v6670_v39 = vld [vmem:[#allocation3 + $0x40] sm:$0xf]  ;;  %v6671_v43 = vld [vmem:[#allocation3 + $0x44] sm:$0x1] }
 0x24a   : > { %v7245_v0 = vor.u32 %v7244_v27, %v7240_v58  ;;  %v5193_v11 = vshll.u32 %v5078_v55, 16  ;;  %v5755_v1 = vsel %vm9526_vm13, %v8788_v19, %v5754_v23  ;;  %v5756_v42 = vrot.slane %v5754_v23, 4  ;;  %v5629_v48 = vld [vmem:[#allocation3 + $0x3c] sm:$0xe]  ;;  %v5631_v19 = vld [vmem:[#allocation3 + $0x44] sm:$0x1] }
 0x24b   : > { %7965 = vrot.lane.b32.xlu0 %v8930_v2, %s9360_s14  ;;  %v7236_v15 = vrot.slane %v7235_v59, 4  ;;  %v5199_v51 = vshll.u32 %v5079_v13, 16  ;;  %v5192_v17 = vrot.slane %v5190_v8, 4  ;;  %v5203_v14 = vshrl.u32 %v5079_v13, 16 }
 0x24c   : > { %v7246_v33 = vrot.slane %v7245_v0, 4  ;;  %v5195_v53 = vrot.slane %v5193_v11, 5  ;;  %v5758_v25 = vsel %vm9526_vm13, %v5756_v42, %v5757_v30  ;;  %v5209_v62 = vshll.u32 %v5080_v5, 16  ;;  %v7168_v5 = vld [vmem:[#allocation3 + $0x48] sm:$0xf] }
 0x24d   : > { %v7241_v18 = vsel %vm9562_vm14, %v7236_v15, %v7240_v58  ;;  %v5201_v35 = vrot.slane %v5199_v51, 5  ;;  %v8804_v31 = vcombine.low %v5755_v1, %v5758_v25  ;;  %v5205_v40 = vrot.slane %v5203_v14, 4  ;;  %v5630_v58 = vld [vmem:[#allocation3 + $0x40] sm:$0xf]  ;;  %v6128_v14 = vld [vmem:[#allocation3 + $0x4c] sm:$0xf] }
 0x24e   : > { %v7251_v26 = vsel %vm9562_vm14, %v7246_v33, %v7250_v52  ;;  %v5196_v32 = vor.u32 %v5195_v53, %v5192_v17  ;;  %v5211_v56 = vrot.slane %v5209_v62, 5  ;;  %v8913_v36 = vrot.slane %v7710_v61, 9  ;;  %v7169_v61 = vld [vmem:[#allocation3 + $0x4c] sm:$0xf] }
 0x24f   : > { %v8895_v34 = vcombine.low %v7241_v18, %v7251_v26  ;;  %v7820_v37 = vrot.slane %v7711_v29, 5  ;;  %5882 = vrot.lane.b32.xlu0 %v8804_v31, %s9356_s16  ;;  %v5206_v3 = vor.u32 %v5205_v40, %v5201_v35  ;;  %v7823_v22 = vrot.slane %v7712_v54, 5  ;;  %v7170_v29 = vld [vmem:[#allocation3 + $0x50] sm:$0x1]  ;;  %v6127_v54 = vld [vmem:[#allocation3 + $0x48] sm:$0xf] }
 0x250   : > { %v5197_v7 = vrot.slane %v5196_v32, 4  ;;  %v8851_v21 = vrot.slane %v6672_v63, 9  ;;  %v6790_v49 = vrot.slane %v6673_v9, 5  ;;  %v6793_v50 = vrot.slane %v6674_v12, 5  ;;  %v385_v32 = vld [vmem:[#allocation3 + $0x6c] sm:$0x1] }
 0x251   : > { %7638 = vrot.lane.b32.xlu1 %v8895_v34, %s9361_s17  ;;  %v7821_v45 = vsel %vm9526_vm13, %v8913_v36, %v7820_v37  ;;  %v7822_v47 = vrot.slane %v7820_v37, 4  ;;  %v5207_v44 = vrot.slane %v5206_v3, 4  ;;  %v8850_v57 = vrot.slane %v6669_v28, 9  ;;  %v9240_v34 = vld [vmem:[#allocation3 + $0x60] sm:$0xff]  }
 0x252   : > { %v5202_v55 = vsel %vm9562_vm14, %v5197_v7, %v5201_v35  ;;  %v6783_v38 = vrot.slane %v6670_v39, 5  ;;  %v6791_v46 = vsel %vm9526_vm13, %v8851_v21, %v6790_v49  ;;  %v6792_v27 = vrot.slane %v6790_v49, 4  ;;  %v6129_v35 = vld [vmem:[#allocation3 + $0x50] sm:$0x1]  ;;  %v443_v39 = vld [vmem:[#allocation3 + $0x80] sm:$0x1] }
 0x253   : > { %v7824_v13 = vsel %vm9526_vm13, %v7822_v47, %v7823_v22  ;;  %v6786_v60 = vrot.slane %v6671_v43, 5  ;;  %v5212_v2 = vsel %vm9562_vm14, %v5207_v44, %v5211_v56  ;;  %v8787_v8 = vrot.slane %v5629_v48, 9  ;;  %v440_v43 = vld [vmem:[#allocation3 + $0x74] sm:$0x1]  ;;  %v6124_v48 = vld [vmem:[#allocation3 + $0x3c] sm:$0xf] }
 0x254   : > { %v8929_v59 = vcombine.low %v7821_v45, %v7824_v13  ;;  %v6784_v23 = vsel %vm9526_vm13, %v8850_v57, %v6783_v38  ;;  %v6785_v30 = vrot.slane %v6783_v38, 4  ;;  %v8769_v0 = vcombine.low %v5202_v55, %v5212_v2  ;;  %v11027_v55 = vpop.permute.xlu0 %5870  ;;  %v11031_v13 = vld [vmem:[#allocation3 + $0x40] sm:$0xf] }
 0x255   : > { %v6794_v52 = vsel %vm9526_vm13, %v6792_v27, %v6793_v50  ;;  %v5747_v11 = vrot.slane %v5630_v58, 5  ;;  %v5750_v42 = vrot.slane %v5631_v19, 5  ;;  %v7301_v51 = vshrl.u32 %v7168_v5, 16 }
 0x256   : > { %7963 = vrot.lane.b32.xlu0 %v8929_v59, %s9360_s14  ;;  %v8867_v15 = vcombine.low %v6791_v46, %v6794_v52  ;;  %v6787_v1 = vsel %vm9526_vm13, %v6785_v30, %v6786_v60  ;;  %5555 = vrot.lane.b32.xlu1 %v8769_v0, %s9351_s11  ;;  %v7304_v53 = vshll.u32 %v7168_v5, 16  ;;  %v7310_v12 = vshll.u32 %v7169_v61, 16  ;;  %v9241_v5 = vld [vmem:[#allocation3 + $0x60] sm:$0xff]  }
 0x257   : > { %v8866_v63 = vcombine.low %v6784_v23, %v6787_v1  ;;  %v5748_v33 = vsel %vm9526_vm13, %v8787_v8, %v5747_v11  ;;  %v5749_v17 = vrot.slane %v5747_v11, 4  ;;  %v7303_v9 = vrot.slane %v7301_v51, 4 }
 0x258   : > { %v7314_v18 = vshrl.u32 %v7169_v61, 16  ;;  %v7320_v25 = vshll.u32 %v7170_v29, 16  ;;  %v7306_v28 = vrot.slane %v7304_v53, 5  ;;  %v6281_v26 = vshrl.u32 %v6127_v54, 16 }
 0x259   : > { %v5751_v62 = vsel %vm9526_vm13, %v5749_v17, %v5750_v42  ;;  %v6284_v31 = vshll.u32 %v6127_v54, 16  ;;  %v7312_v56 = vrot.slane %v7310_v12, 5  ;;  %v6290_v21 = vshll.u32 %v6128_v14, 16 }
 0x25a   : > { %6921 = vrot.lane.b32.xlu0 %v8866_v63, %s9359_s13  ;;  %v8803_v40 = vcombine.low %v5748_v33, %v5751_v62  ;;  %v7316_v36 = vrot.slane %v7314_v18, 4  ;;  %v7322_v37 = vrot.slane %v7320_v25, 5  ;;  %6923 = vrot.lane.b32.xlu1 %v8867_v15, %s9359_s13  ;;  %v7307_v7 = vor.u32 %v7306_v28, %v7303_v9  ;;  %v9271_v9 = vld [vmem:[#allocation3 + $0x60] sm:$0xff]  }
 0x25b   : > { %v6283_v3 = vrot.slane %v6281_v26, 4  ;;  %v6286_v22 = vrot.slane %v6284_v31, 5  ;;  %v6294_v47 = vshrl.u32 %v6128_v14, 16  ;;  %v6300_v49 = vshll.u32 %v6129_v35, 16  ;;  %5061 = vst.msk [vmem:[#allocation4 + $0x40] sm:$0xff] %vm12035_vm8, %v9271_v9  ;;  %v9273_v26 = vld [vmem:[#allocation3 + $0x54] sm:$0xff]  }
 0x25c   : > { %v7317_v45 = vor.u32 %v7316_v36, %v7312_v56  ;;  %v386_v50 = vsel %vm10612_vm12, 0, %v385_v32  ;;  %v7308_v44 = vrot.slane %v7307_v7, 4  ;;  %v6292_v38 = vrot.slane %v6290_v21, 5  ;;  %5060 = vst.msk [vmem:[#allocation4 + $0x38] sm:$0xff] %vm12035_vm8, %v9273_v26  ;;  %v6126_v21 = vld [vmem:[#allocation3 + $0x44] sm:$0x1] }
 0x25d   : > { %v6287_v57 = vor.u32 %v6286_v22, %v6283_v3  ;;  %387 = vst [vmem:[#allocation3 + $0x6c] sm:$0x1] %v386_v50  ;;  %v444_v58 = vsel %vm10641_vm3, 0, %v443_v39  ;;  %v6296_v27 = vrot.slane %v6294_v47, 4  ;;  %v6302_v60 = vrot.slane %v6300_v49, 5 }
 0x25e   : > { %7103 = vrot.lane.b32.xlu0 %v9240_v34, %s9358_s10  ;;  %v7318_v46 = vrot.slane %v7317_v45, 4  ;;  %445 = vst [vmem:[#allocation3 + $0x80] sm:$0x1] %v444_v58  ;;  %v441_v19 = vsel %vm10641_vm3, 0, %v440_v43  ;;  %5880 = vrot.lane.b32.xlu1 %v8803_v40, %s9356_s16  ;;  %v7313_v2 = vsel %vm9562_vm14, %v7308_v44, %v7312_v56  ;;  %v6257_v30 = vshrl.u32 %v6124_v48, 16  ;;  %v11047_v14 = vpop.permute.xlu0 %7091  ;;  %v9242_v34 = vld [vmem:[#allocation3 + $0x54] sm:$0xff]  }
 0x25f   : > { %v6288_v59 = vrot.slane %v6287_v57, 4  ;;  %442 = vst [vmem:[#allocation3 + $0x74] sm:$0x1] %v441_v19  ;;  %v6260_v0 = vshll.u32 %v6124_v48, 16  ;;  %v6297_v8 = vor.u32 %v6296_v27, %v6292_v38  ;;  %v6266_v29 = vshll.u32 %v11031_v13, 16 }
 0x260   : > { %v7323_v52 = vsel %vm9562_vm14, %v7318_v46, %v7322_v37  ;;  %v6259_v54 = vrot.slane %v6257_v30, 4  ;;  %v4875_v44 = vld [vmem:[#allocation3 + $0x78] sm:$0xf]  ;;  %v6270_v19 = vshrl.u32 %v11031_v13, 16  ;;  %v5089_v13 = vld [vmem:[#allocation3 + $0x50] sm:$0x1] }
 0x261   : > { %v9067_v23 = vpop.f32.mrb[16].mxu0  ;;  %v8898_v15 = vcombine.low %v7313_v2, %v7323_v52  ;;  %v6293_v1 = vsel %vm9562_vm14, %v6288_v59, %v6292_v38  ;;  %v6298_v63 = vrot.slane %v6297_v8, 4  ;;  %v6262_v25 = vrot.slane %v6260_v0, 5  ;;  %v9243_v46 = vld [vmem:[#allocation3 + $0x54] sm:$0xff]   ;;  %v5087_v2 = vld [vmem:[#allocation3 + $0x48] sm:$0xf] }
 0x262   : > { %v4243_v11 = vadd.f32 %v10946_v6, %v9067_v23  ;;  %v4234_v61 = vpop.f32.mrb[17].mxu0  ;;  %6061 = vrot.lane.b32.xlu1 %v9241_v5, %s9352_s12  ;;  %v11060_v43 = vrot.slane %v6266_v29, 5  ;;  %v6276_v5 = vshll.u32 %v6126_v21, 16  ;;  %v5088_v8 = vld [vmem:[#allocation3 + $0x4c] sm:$0xf]  ;;  %vm5918_vm15 = vcmask 195712  }
 0x263   : > { %v4235_v42 = vadd.f32 %v10946_v6, %v4234_v61  ;;  %v9068_v51 = vpop.f32.mrb[18].mxu0  ;;  %7644 = vrot.lane.b32.xlu0 %v8898_v15, %s9361_s17  ;;  %v6303_v35 = vsel %vm9562_vm14, %v6298_v63, %v6302_v60  ;;  %v6263_v39 = vor.u32 %v6262_v25, %v6259_v54  ;;  %v5262_v25 = vshrl.u32 %v5087_v2, 16  ;;  %5919 = vst.msk [vmem:[#allocation4] sm:$0xff] %vm5918_vm15, %v11027_v55 }
 0x264   : > { %vm4315_vm11 = vcmp.gt.f32.partialorder %v4243_v11, 0.0  ;;  %v4347_v33 = vmul.f32 0.01, %v4243_v11  ;;  %v4246_v17 = vadd.f32 %v10946_v6, %v9068_v51  ;;  %v4237_v53 = vpop.f32.mrb[19].mxu0  ;;  %v8835_v31 = vcombine.low %v6293_v1, %v6303_v35  ;;  %v4868_v30 = vld [vmem:[#allocation3 + $0x6c] sm:$0xf] }
 0x265   : > { %vm4313_vm10 = vcmp.gt.f32.partialorder %v4235_v42, 0.0  ;;  %v4345_v12 = vmul.f32 0.01, %v4235_v42  ;;  %v4238_v18 = vadd.f32 %v10946_v6, %v4237_v53  ;;  %v11055_v6 = vpop.permute.xlu0 %6047  ;;  %v11063_v50 = vrot.slane %v6263_v39, 4  ;;  %v4879_v15 = vld [vmem:[#allocation3 + $0x80] sm:$0x1] }
 0x266   : > { %v4379_v62 = vsel %vm4315_vm11, %v4243_v11, %v4347_v33  ;;  %vm4316_vm1 = vcmp.gt.f32.partialorder %v4246_v17, 0.0  ;;  %v4348_v28 = vmul.f32 0.01, %v4246_v17  ;;  %6602 = vrot.lane.b32.xlu1 %v8835_v31, %s9355_s15  ;;  %v9255_v11 = vld [vmem:[%s12025_s3] sm:$0xff]   ;;  %v4872_v53 = vld [vmem:[#allocation3 + $0x74] sm:$0x1] }
 0x267   : > { %v8988_v32 = vpack.c.bf16 %v4379_v62, %v4379_v62  ;;  %v4377_v40 = vsel %vm4313_vm10, %v4235_v42, %v4345_v12  ;;  %vm4314_vm4 = vcmp.gt.f32.partialorder %v4238_v18, 0.0  ;;  %v4346_v37 = vmul.f32 0.01, %v4238_v18  ;;  %6059 = vrot.lane.b32.xlu0 %v9242_v34, %s9352_s12  ;;  %9081 = vmatprep.subr.bf16.mxu1 %v9255_v11  ;;  %v7165_v31 = vld [vmem:[#allocation3 + $0x3c] sm:$0xf] }
 0x268   : > { %v8986_v56 = vpack.c.bf16 %v4377_v40, %v4377_v40  ;;  %v4380_v36 = vsel %vm4316_vm1, %v4246_v17, %v4348_v28  ;;  %v6269_v60 = vsel %vm9562_vm14, %v11063_v50, %v11060_v43  ;;  %v6272_v42 = vrot.slane %v6270_v19, 4  ;;  %9082 = vmatpush3.bf16.msra.mxu1 %v9255_v11  ;;  %v7166_v39 = vld [vmem:[#allocation3 + $0x40] sm:$0xf]  ;;  %v5639_v11 = vld [vmem:[#allocation3 + $0x64] sm:$0xf] }
 0x269   : > { %v4643_v7 = vshrl.u32 %v8988_v32, 16  ;;  %v4646_v3 = vshll.u32 %v8988_v32, 16  ;;  %v8989_v22 = vpack.c.bf16 %v4380_v36, %v4380_v36  ;;  %v4378_v49 = vsel %vm4314_vm4, %v4238_v18, %v4346_v37  ;;  %v9256_v32 = vld [vmem:[%s12025_s3 + $0x8] sm:$0xff]   ;;  %v7719_v37 = vld [vmem:[#allocation3 + $0x60] sm:$0xe] }
 0x26a   : > { %v4626_v45 = vshrl.u32 %v8986_v56, 16  ;;  %v4629_v47 = vshll.u32 %v8986_v56, 16  ;;  %v8987_v58 = vpack.c.bf16 %v4378_v49, %v4378_v49  ;;  %7101 = vrot.lane.b32.xlu1 %v9243_v46, %s9358_s10  ;;  %v11074_v51 = vpop.permute.xlu0 %7957  ;;  %v6273_v12 = vor.u32 %v6272_v42, %v11060_v43  ;;  %9083 = vmatprep.subr.bf16.mxu1 %v9256_v32  ;;  %v5638_v19 = vld [vmem:[#allocation3 + $0x60] sm:$0xe] }
 0x26b   : > { %v4645_v48 = vrot.slane %v4643_v7, 7  ;;  %v4651_v57 = vshrl.u32 %v8989_v22, 16  ;;  %v4654_v38 = vshll.u32 %v8989_v22, 16  ;;  %v6278_v18 = vrot.slane %v6276_v5, 5  ;;  %v9258_v5 = vld [vmem:[%s12025_s3 + $0x10] sm:$0xff]  }
 0x26c   : > { %v4628_v27 = vrot.slane %v4626_v45, 7  ;;  %v4634_v52 = vshrl.u32 %v8987_v58, 16  ;;  %v4637_v1 = vshll.u32 %v8987_v58, 16  ;;  %v6274_v40 = vrot.slane %v6273_v12, 4  ;;  %v7720_v45 = vld [vmem:[#allocation3 + $0x64] sm:$0xf]  ;;  %9084 = vmatpush3.bf16.msra.mxu1 %v9256_v32 }
 0x26d   : > { %v4648_v59 = vor.u32 %v4646_v3, %v4645_v48  ;;  %v4649_v23 = vrot.slane %v4645_v48, 4  ;;  %v4653_v0 = vrot.slane %v4651_v57, 7  ;;  %v5264_v34 = vrot.slane %v5262_v25, 4  ;;  %9085 = vmatprep.subr.bf16.mxu1 %v9258_v5  ;;  %v5084_v25 = vld [vmem:[#allocation3 + $0x3c] sm:$0xf] }
 0x26e   : > { %v4631_v61 = vor.u32 %v4629_v47, %v4628_v27  ;;  %v4632_v29 = vrot.slane %v4628_v27, 4  ;;  %v4636_v17 = vrot.slane %v4634_v52, 7  ;;  %v5265_v56 = vshll.u32 %v5087_v2, 16  ;;  %v7721_v47 = vld [vmem:[#allocation3 + $0x68] sm:$0x1] }
 0x26f   : > { %v4876_v54 = vsel %vm10740_vm9, %v4648_v59, %v4875_v44  ;;  %v4656_v63 = vor.u32 %v4654_v38, %v4653_v0  ;;  %v4658_v33 = vrot.slane %v4653_v0, 4  ;;  %v5271_v36 = vshll.u32 %v5088_v8, 16  ;;  %v11089_v7 = vpop.permute.xlu0 %5874  ;;  %v11098_v44 = vpop.permute.xlu1 %6049  ;;  %v7167_v27 = vld [vmem:[#allocation3 + $0x44] sm:$0x1] }
 0x270   : > { %4877 = vst [vmem:[#allocation3 + $0x78] sm:$0xf] %v4876_v54  ;;  %v4869_v9 = vsel %vm10740_vm9, %v4631_v61, %v4868_v30  ;;  %v4639_v28 = vor.u32 %v4637_v1, %v4636_v17  ;;  %v4641_v26 = vrot.slane %v4636_v17, 4  ;;  %v5275_v21 = vshrl.u32 %v5088_v8, 16  ;;  %v5640_v61 = vld [vmem:[#allocation3 + $0x68] sm:$0x1]  ;;  %9086 = vmatpush3.bf16.msra.mxu1 %v9258_v5 }
 0x271   : > { %4870 = vst [vmem:[#allocation3 + $0x6c] sm:$0xf] %v4869_v9  ;;  %v4657_v35 = vsel %vm9482_vm7, %v4649_v23, %v4656_v63  ;;  %v4880_v62 = vsel %vm10612_vm12, %v4658_v33, %v4879_v15  ;;  %v5281_v43 = vshll.u32 %v5089_v13, 16  ;;  %v6279_v49 = vsel %vm9562_vm14, %v6274_v40, %v6278_v18 }
 0x272   : > { %4878 = vst.msk [vmem:[#allocation3 + $0x7c] sm:$0xf] %vm12036_vm6, %v4657_v35  ;;  %4881 = vst [vmem:[#allocation3 + $0x80] sm:$0x1] %v4880_v62  ;;  %v4640_v3 = vsel %vm9482_vm7, %v4632_v29, %v4639_v28  ;;  %v4873_v22 = vsel %vm10612_vm12, %v4641_v26, %v4872_v53  ;;  %v5267_v50 = vrot.slane %v5265_v56, 5  ;;  %v5273_v48 = vrot.slane %v5271_v36, 5 }
 0x273   : > { %4871 = vst.msk [vmem:[#allocation3 + $0x70] sm:$0xf] %vm12036_vm6, %v4640_v3  ;;  %4874 = vst [vmem:[#allocation3 + $0x74] sm:$0x1] %v4873_v22  ;;  %v8834_v57 = vcombine.low %v6269_v60, %v6279_v49  ;;  %v5277_v38 = vrot.slane %v5275_v21, 4  ;;  %v5283_v58 = vrot.slane %v5281_v43, 5  ;;  %v11106_v55 = vpop.permute.xlu0 %6913  ;;  %v11110_v13 = vpop.permute.xlu1 %6915 }
 0x274   : > { %v8916_v46 = vrot.slane %v7719_v37, 9  ;;  %v5268_v2 = vor.u32 %v5267_v50, %v5264_v34  ;;  %v7841_v59 = vrot.slane %v7720_v45, 5  ;;  %v7844_v23 = vrot.slane %v7721_v47, 5  ;;  %v5086_v37 = vld [vmem:[#allocation3 + $0x44] sm:$0x1] }
 0x275   : > { %v7277_v30 = vshrl.u32 %v7165_v31, 16  ;;  %6600 = vrot.lane.b32.xlu0 %v8834_v57, %s9355_s15  ;;  %v5278_v0 = vor.u32 %v5277_v38, %v5273_v48  ;;  %v7280_v60 = vshll.u32 %v7165_v31, 16  ;;  %v7286_v52 = vshll.u32 %v7166_v39, 16  ;;  %v5085_v31 = vld [vmem:[#allocation3 + $0x40] sm:$0xf] }
 0x276   : > { %v7290_v8 = vshrl.u32 %v7166_v39, 16  ;;  %v5269_v29 = vrot.slane %v5268_v2, 4  ;;  %v7842_v15 = vsel %vm9526_vm13, %v8916_v46, %v7841_v59  ;;  %v7843_v1 = vrot.slane %v7841_v59, 4  ;;  %v7716_v50 = vld [vmem:[#allocation3 + $0x54] sm:$0xe] }
 0x277   : > { %v7279_v42 = vrot.slane %v7277_v30, 4  ;;  %v5279_v54 = vrot.slane %v5278_v0, 4  ;;  %v7282_v63 = vrot.slane %v7280_v60, 5  ;;  %v7288_v33 = vrot.slane %v7286_v52, 5  ;;  %v11118_v32 = vpop.permute.xlu0 %7095  ;;  %v6678_v30 = vld [vmem:[#allocation3 + $0x60] sm:$0xe] }
 0x278   : > { %v7292_v17 = vrot.slane %v7290_v8, 4  ;;  %v5274_v53 = vsel %vm9562_vm14, %v5269_v29, %v5273_v48  ;;  %v7845_v9 = vsel %vm9526_vm13, %v7843_v1, %v7844_v23  ;;  %v7296_v12 = vshll.u32 %v7167_v27, 16  ;;  %v11124_v48 = vpop.permute.xlu1 %5872  ;;  %v7717_v27 = vld [vmem:[#allocation3 + $0x58] sm:$0xf]  ;;  %v6679_v0 = vld [vmem:[#allocation3 + $0x64] sm:$0xf] }
 0x279   : > { %v8790_v18 = vrot.slane %v5638_v19, 9  ;;  %v5284_v35 = vsel %vm9562_vm14, %v5279_v54, %v5283_v58  ;;  %v8932_v62 = vcombine.low %v7842_v15, %v7845_v9  ;;  %v7283_v28 = vor.u32 %v7282_v63, %v7279_v42  ;;  %v7718_v19 = vld [vmem:[#allocation3 + $0x5c] sm:$0x1]  ;;  %v6675_v29 = vld [vmem:[#allocation3 + $0x54] sm:$0xe] }
 0x27a   : > { %v7293_v26 = vor.u32 %v7292_v17, %v7288_v33  ;;  %v8772_v40 = vcombine.low %v5274_v53, %v5284_v35  ;;  %v7298_v34 = vrot.slane %v7296_v12, 5  ;;  %v5768_v56 = vrot.slane %v5639_v11, 5  ;;  %v6676_v63 = vld [vmem:[#allocation3 + $0x58] sm:$0xf] }
 0x27b   : > { %v5771_v36 = vrot.slane %v5640_v61, 5  ;;  %7969 = vrot.lane.b32.xlu0 %v8932_v62, %s9360_s14  ;;  %v7284_v39 = vrot.slane %v7283_v28, 4  ;;  %v5238_v22 = vshrl.u32 %v5084_v25, 16  ;;  %v5241_v21 = vshll.u32 %v5084_v25, 16  ;;  %v6680_v61 = vld [vmem:[#allocation3 + $0x68] sm:$0x1]  ;;  %v11132_v15 = vpop.permute.xlu0 %7636 }
 0x27c   : > { %v7294_v3 = vrot.slane %v7293_v26, 4  ;;  %5561 = vrot.lane.b32.xlu1 %v8772_v40, %s9351_s11  ;;  %v5769_v43 = vsel %vm9526_vm13, %v8790_v18, %v5768_v56  ;;  %v5770_v45 = vrot.slane %v5768_v56, 4  ;;  %v5247_v47 = vshll.u32 %v5085_v31, 16  ;;  %v9275_v17 = vld [vmem:[#allocation3 + $0x78] sm:$0xff]   ;;  %v9276_v40 = vld [vmem:[#allocation3 + $0x6c] sm:$0xff]  }
 0x27d   : > { %v5251_v49 = vshrl.u32 %v5085_v31, 16  ;;  %v7289_v57 = vsel %vm9562_vm14, %v7284_v39, %v7288_v33  ;;  %v5240_v58 = vrot.slane %v5238_v22, 4  ;;  %v5243_v46 = vrot.slane %v5241_v21, 5  ;;  %v11135_v33 = vpop.permute.xlu1 %6053  ;;  %v6677_v25 = vld [vmem:[#allocation3 + $0x5c] sm:$0x1]  ;;  %5063 = vst.msk [vmem:[#allocation4 + $0x50] sm:$0xff] %vm12035_vm8, %v9275_v17 }
 0x27e   : > { %v7299_v38 = vsel %vm9562_vm14, %v7294_v3, %v7298_v34  ;;  %v5772_v2 = vsel %vm9526_vm13, %v5770_v45, %v5771_v36  ;;  %v5249_v59 = vrot.slane %v5247_v47, 5  ;;  %v5257_v8 = vshll.u32 %v5086_v37, 16  ;;  %v5635_v31 = vld [vmem:[#allocation3 + $0x54] sm:$0xe]  ;;  %v5636_v37 = vld [vmem:[#allocation3 + $0x58] sm:$0xf] }
 0x27f   : > { %v8897_v5 = vcombine.low %v7289_v57, %v7299_v38  ;;  %v5253_v23 = vrot.slane %v5251_v49, 4  ;;  %v8806_v60 = vcombine.low %v5769_v43, %v5772_v2  ;;  %v5244_v52 = vor.u32 %v5243_v46, %v5240_v58  ;;  %v5637_v39 = vld [vmem:[#allocation3 + $0x5c] sm:$0x1]  ;;  %v7174_v45 = vld [vmem:[#allocation3 + $0x60] sm:$0xf]  ;;  %5062 = vst.msk [vmem:[#allocation4 + $0x48] sm:$0xff] %vm12035_vm8, %v9276_v40  ;;  %v11154_v58 = vpop.permute.xlu0 %6051 }
 0x280   : > { %v8915_v11 = vrot.slane %v7716_v50, 9  ;;  %v7834_v42 = vrot.slane %v7717_v27, 5  ;;  %v7837_v54 = vrot.slane %v7718_v19, 5  ;;  %vm6095_vm5 = vcmask 261312   ;;  %v7175_v47 = vld [vmem:[#allocation3 + $0x64] sm:$0xf] }
 0x281   : > { %7642 = vrot.lane.b32.xlu1 %v8897_v5, %s9361_s17  ;;  %v5254_v1 = vor.u32 %v5253_v23, %v5249_v59  ;;  %5886 = vrot.lane.b32.xlu0 %v8806_v60, %s9356_s16  ;;  %v5245_v53 = vrot.slane %v5244_v52, 4  ;;  %v5259_v9 = vrot.slane %v5257_v8, 5  ;;  %6096 = vst.msk [vmem:[#allocation4] sm:$0xff] %vm6095_vm5, %v11055_v6  ;;  %v8853_v12 = vrot.slane %v6678_v30, 9  ;;  %v9259_v46 = vld [vmem:[%s12025_s3 + $0x18] sm:$0xff]   ;;  %v11161_v23 = vpop.permute.xlu1 %6594 }
 0x282   : > { %v6804_v18 = vrot.slane %v6679_v0, 5  ;;  %v7835_v62 = vsel %vm9526_vm13, %v8915_v11, %v7834_v42  ;;  %v7836_v28 = vrot.slane %v7834_v42, 4  ;;  %v6807_v26 = vrot.slane %v6680_v61, 5  ;;  %v6133_v8 = vld [vmem:[#allocation3 + $0x60] sm:$0xf]  ;;  %9087 = vmatprep.subr.bf16.mxu1 %v9259_v46 }
 0x283   : > { %v5255_v35 = vrot.slane %v5254_v1, 4  ;;  %v5250_v34 = vsel %vm9562_vm14, %v5245_v53, %v5249_v59  ;;  %v8852_v36 = vrot.slane %v6675_v29, 9  ;;  %v6797_v21 = vrot.slane %v6676_v63, 5  ;;  %v7176_v59 = vld [vmem:[#allocation3 + $0x68] sm:$0x1]  ;;  %9088 = vmatpush3.bf16.msra.mxu1 %v9259_v46 }
 0x284   : > { %v6805_v56 = vsel %vm9526_vm13, %v8853_v12, %v6804_v18  ;;  %v6806_v6 = vrot.slane %v6804_v18, 4  ;;  %v7838_v22 = vsel %vm9526_vm13, %v7836_v28, %v7837_v54  ;;  %v6800_v43 = vrot.slane %v6677_v25, 5  ;;  %v6134_v42 = vld [vmem:[#allocation3 + $0x64] sm:$0xf] }
 0x285   : > { %v5260_v3 = vsel %vm9562_vm14, %v5255_v35, %v5259_v9  ;;  %v8931_v50 = vcombine.low %v7835_v62, %v7838_v22  ;;  %v8789_v38 = vrot.slane %v5635_v31, 9  ;;  %v6798_v19 = vsel %vm9526_vm13, %v8852_v36, %v6797_v21  ;;  %v394_v9 = vld [vmem:[#allocation3 + $0x90] sm:$0x1]  ;;  %v6135_v35 = vld [vmem:[#allocation3 + $0x68] sm:$0x1] }
 0x286   : > { %v8771_v49 = vcombine.low %v5250_v34, %v5260_v3  ;;  %v6808_v57 = vsel %vm9526_vm13, %v6806_v6, %v6807_v26  ;;  %v6799_v5 = vrot.slane %v6797_v21, 4  ;;  %v5761_v2 = vrot.slane %v5636_v37, 5  ;;  %v9245_v26 = vld [vmem:[#allocation3 + $0x78] sm:$0xff]   ;;  %v11175_v21 = vpop.permute.xlu1 %7093 }
 0x287   : > { %v8869_v27 = vcombine.low %v6805_v56, %v6808_v57  ;;  %7967 = vrot.lane.b32.xlu0 %v8931_v50, %s9360_s14  ;;  %v5764_v30 = vrot.slane %v5637_v39, 5  ;;  %v7349_v0 = vshrl.u32 %v7174_v45, 16  ;;  %v7352_v60 = vshll.u32 %v7174_v45, 16  ;;  %v391_v56 = vld [vmem:[#allocation3 + $0x84] sm:$0x1] }
 0x288   : > { %5559 = vrot.lane.b32.xlu1 %v8771_v49, %s9351_s11  ;;  %v7358_v52 = vshll.u32 %v7175_v47, 16  ;;  %v6801_v11 = vsel %vm9526_vm13, %v6799_v5, %v6800_v43  ;;  %v5762_v61 = vsel %vm9526_vm13, %v8789_v38, %v5761_v2  ;;  %v5763_v29 = vrot.slane %v5761_v2, 4  ;;  %v449_v22 = vld [vmem:[#allocation3 + $0x98] sm:$0x1]  ;;  %v446_v50 = vld [vmem:[#allocation3 + $0x8c] sm:$0x1] }
 0x289   : > { %v7362_v1 = vshrl.u32 %v7175_v47, 16  ;;  %v8868_v54 = vcombine.low %v6798_v19, %v6801_v11  ;;  %v7351_v63 = vrot.slane %v7349_v0, 4  ;;  %v7354_v17 = vrot.slane %v7352_v60, 5  ;;  %v11173_v6 = vpop.permute.xlu0 %6592  ;;  %v11181_v19 = vld [vmem:[#allocation3 + $0x54] sm:$0xf]  ;;  %v9246_v5 = vld [vmem:[#allocation3 + $0x78] sm:$0xff]  }
 0x28a   : > { %v7360_v53 = vrot.slane %v7358_v52, 5  ;;  %v5765_v12 = vsel %vm9526_vm13, %v5763_v29, %v5764_v30  ;;  %v7368_v25 = vshll.u32 %v7176_v59, 16  ;;  %v6329_v62 = vshrl.u32 %v6133_v8, 16  ;;  %v11194_v11 = vld [vmem:[%s12024_s2] ss:$0 sm:$0xff] }
 0x28b   : > { %v7364_v18 = vrot.slane %v7362_v1, 4  ;;  %6925 = vrot.lane.b32.xlu0 %v8868_v54, %s9359_s13  ;;  %v8805_v28 = vcombine.low %v5762_v61, %v5765_v12  ;;  %v7355_v31 = vor.u32 %v7354_v17, %v7351_v63  ;;  %v6332_v40 = vshll.u32 %v6133_v8, 16 }
 0x28c   : > { %6927 = vrot.lane.b32.xlu1 %v8869_v27, %s9359_s13  ;;  %v6338_v34 = vshll.u32 %v6134_v42, 16  ;;  %v7370_v37 = vrot.slane %v7368_v25, 5  ;;  %v6331_v39 = vrot.slane %v6329_v62, 4  ;;  %v6342_v3 = vshrl.u32 %v6134_v42, 16 }
 0x28d   : > { %v7365_v36 = vor.u32 %v7364_v18, %v7360_v53  ;;  %v7356_v43 = vrot.slane %v7355_v31, 4  ;;  %v6334_v45 = vrot.slane %v6332_v40, 5  ;;  %v6348_v49 = vshll.u32 %v6135_v35, 16 }
 0x28e   : > { %v6340_v47 = vrot.slane %v6338_v34, 5  ;;  %v6344_v38 = vrot.slane %v6342_v3, 4  ;;  %v395_v46 = vsel %vm10612_vm12, 0, %v394_v9  ;;  %v392_v27 = vsel %vm10612_vm12, 0, %v391_v56  ;;  %v9247_v3 = vld [vmem:[#allocation3 + $0x6c] sm:$0xff]  }
 0x28f   : > { %v7366_v57 = vrot.slane %v7365_v36, 4  ;;  %7107 = vrot.lane.b32.xlu0 %v9245_v26, %s9358_s10  ;;  %v7361_v2 = vsel %vm9562_vm14, %v7356_v43, %v7360_v53  ;;  %v6335_v59 = vor.u32 %v6334_v45, %v6331_v39  ;;  %v6350_v30 = vrot.slane %v6348_v49, 5  ;;  %396 = vst [vmem:[#allocation3 + $0x90] sm:$0x1] %v395_v46  ;;  %393 = vst [vmem:[#allocation3 + $0x84] sm:$0x1] %v392_v27 }
 0x290   : > { %5884 = vrot.lane.b32.xlu1 %v8805_v28, %s9356_s16  ;;  %v9071_v0 = vpop.f32.mrb[20].mxu0  ;;  %v450_v60 = vsel %vm10641_vm3, 0, %v449_v22  ;;  %v6345_v8 = vor.u32 %v6344_v38, %v6340_v47  ;;  %v447_v1 = vsel %vm10641_vm3, 0, %v446_v50  ;;  %v6305_v53 = vshrl.u32 %v11181_v19, 16  ;;  %v11201_v9 = vpop.permute.xlu0 %7961 }
 0x291   : > { %v7371_v52 = vsel %vm9562_vm14, %v7366_v57, %v7370_v37  ;;  %v4259_v61 = vadd.f32 %v11194_v11, %v9071_v0  ;;  %v4250_v29 = vpop.f32.mrb[21].mxu0  ;;  %451 = vst [vmem:[#allocation3 + $0x98] sm:$0x1] %v450_v60  ;;  %v6336_v54 = vrot.slane %v6335_v59, 4  ;;  %448 = vst [vmem:[#allocation3 + $0x8c] sm:$0x1] %v447_v1  ;;  %v5554_v62 = vpop.permute.xlu1 %5553 }
 0x292   : > { %v8900_v42 = vcombine.low %v7361_v2, %v7371_v52  ;;  %v4251_v63 = vadd.f32 %v11194_v11, %v4250_v29  ;;  %v9072_v17 = vpop.f32.mrb[22].mxu0  ;;  %v6346_v12 = vrot.slane %v6345_v8, 4  ;;  %5600 = vst.msk [vmem:[#allocation4 + $0x10] sm:$0xff] %vm5597_vm2, %v5554_v62  ;;  %v6131_v57 = vld [vmem:[#allocation3 + $0x58] sm:$0xf]  ;;  %v9248_v52 = vld [vmem:[#allocation3 + $0x6c] sm:$0xff]  }
 0x293   : > { %vm4319_vm0 = vcmp.gt.f32.partialorder %v4259_v61, 0.0  ;;  %v4351_v18 = vmul.f32 0.01, %v4259_v61  ;;  %v4262_v25 = vadd.f32 %v11194_v11, %v9072_v17  ;;  %v4253_v35 = vpop.f32.mrb[23].mxu0  ;;  %v6341_v28 = vsel %vm9562_vm14, %v6336_v54, %v6340_v47  ;;  %5921 = vst.msk [vmem:[#allocation4 + $0x10] sm:$0xff] %vm5918_vm15, %v11089_v7 }
 0x294   : > { %6065 = vrot.lane.b32.xlu1 %v9246_v5, %s9352_s12  ;;  %7648 = vrot.lane.b32.xlu0 %v8900_v42, %s9361_s17  ;;  %vm4317_vm11 = vcmp.gt.f32.partialorder %v4251_v63, 0.0  ;;  %v4349_v26 = vmul.f32 0.01, %v4251_v63  ;;  %v4254_v31 = vadd.f32 %v11194_v11, %v4253_v35  ;;  %v6351_v40 = vsel %vm9562_vm14, %v6346_v12, %v6350_v30  ;;  %6098 = vst.msk [vmem:[#allocation4 + $0x10] sm:$0xff] %vm6095_vm5, %v11154_v58  ;;  %v6132_v12 = vld [vmem:[#allocation3 + $0x5c] sm:$0x1] }
 0x295   : > { %v4383_v34 = vsel %vm4319_vm0, %v4259_v61, %v4351_v18  ;;  %vm4320_vm10 = vcmp.gt.f32.partialorder %v4262_v25, 0.0  ;;  %v4352_v56 = vmul.f32 0.01, %v4262_v25  ;;  %v8837_v36 = vcombine.low %v6341_v28, %v6351_v40  ;;  %v5093_v18 = vld [vmem:[#allocation3 + $0x60] sm:$0xf] }
 0x296   : > { %v8992_v37 = vpack.c.bf16 %v4383_v34, %v4383_v34  ;;  %v4381_v39 = vsel %vm4317_vm11, %v4251_v63, %v4349_v26  ;;  %vm4318_vm1 = vcmp.gt.f32.partialorder %v4254_v31, 0.0  ;;  %v4350_v45 = vmul.f32 0.01, %v4254_v31  ;;  %v5552_v38 = vpop.permute.xlu1 %5551  ;;  %v11218_v46 = vpop.permute.xlu0 %5878  ;;  %v4889_v8 = vld [vmem:[#allocation3 + $0x90] sm:$0xf] }
 0x297   : > { %v8990_v22 = vpack.c.bf16 %v4381_v39, %v4381_v39  ;;  %v4384_v43 = vsel %vm4320_vm10, %v4262_v25, %v4352_v56  ;;  %v6307_v7 = vrot.slane %v6305_v53, 4  ;;  %v6308_v58 = vshll.u32 %v11181_v19, 16  ;;  %5599 = vst.msk [vmem:[#allocation4 + $0x8] sm:$0xff] %vm5597_vm2, %v5552_v38  ;;  %v4882_v63 = vld [vmem:[#allocation3 + $0x84] sm:$0xf] }
 0x298   : > { %6606 = vrot.lane.b32.xlu1 %v8837_v36, %s9355_s15  ;;  %v4677_v47 = vshrl.u32 %v8992_v37, 16  ;;  %v4680_v49 = vshll.u32 %v8992_v37, 16  ;;  %v8993_v50 = vpack.c.bf16 %v4384_v43, %v4384_v43  ;;  %6063 = vrot.lane.b32.xlu0 %v9247_v3, %s9352_s12  ;;  %v4382_v2 = vsel %vm4318_vm1, %v4254_v31, %v4350_v45  ;;  %5920 = vst.msk [vmem:[#allocation4 + $0x8] sm:$0xff] %vm5918_vm15, %v11124_v48  ;;  %v4893_v62 = vld [vmem:[#allocation3 + $0x98] sm:$0x1] }
 0x299   : > { %v4660_v27 = vshrl.u32 %v8990_v22, 16  ;;  %v4663_v5 = vshll.u32 %v8990_v22, 16  ;;  %v8991_v60 = vpack.c.bf16 %v4382_v2, %v4382_v2  ;;  %v6310_v29 = vrot.slane %v6308_v58, 5  ;;  %6097 = vst.msk [vmem:[#allocation4 + $0x8] sm:$0xff] %vm6095_vm5, %v11098_v44  ;;  %v5094_v31 = vld [vmem:[#allocation3 + $0x64] sm:$0xf] }
 0x29a   : > { %v4679_v59 = vrot.slane %v4677_v47, 7  ;;  %v4685_v30 = vshrl.u32 %v8993_v50, 16  ;;  %v4688_v0 = vshll.u32 %v8993_v50, 16  ;;  %v6314_v1 = vshll.u32 %v6131_v57, 16  ;;  %v11228_v25 = vpop.permute.xlu0 %7959  ;;  %v4886_v36 = vld [vmem:[#allocation3 + $0x8c] sm:$0x1] }
 0x29b   : > { %v4662_v61 = vrot.slane %v4660_v27, 7  ;;  %v6318_v42 = vshrl.u32 %v6131_v57, 16  ;;  %v4668_v53 = vshrl.u32 %v8991_v60, 16  ;;  %v4671_v28 = vshll.u32 %v8991_v60, 16  ;;  %v5095_v43 = vld [vmem:[#allocation3 + $0x68] sm:$0x1]  ;;  %v11238_v27 = vpop.permute.xlu1 %6919 }
 0x29c   : > { %v4682_v54 = vor.u32 %v4680_v49, %v4679_v59  ;;  %v4683_v19 = vrot.slane %v4679_v59, 4  ;;  %v4687_v17 = vrot.slane %v4685_v30, 7  ;;  %7105 = vrot.lane.b32.xlu1 %v9248_v52, %s9358_s10  ;;  %v6311_v26 = vor.u32 %v6310_v29, %v6307_v7  ;;  %v7725_v45 = vld [vmem:[#allocation3 + $0x78] sm:$0xe]  ;;  %v7726_v7 = vld [vmem:[#allocation3 + $0x7c] sm:$0xf] }
 0x29d   : > { %v4665_v48 = vor.u32 %v4663_v5, %v4662_v61  ;;  %v4666_v35 = vrot.slane %v4662_v61, 4  ;;  %v4670_v56 = vrot.slane %v4668_v53, 7  ;;  %v6316_v3 = vrot.slane %v6314_v1, 5  ;;  %v7727_v38 = vld [vmem:[#allocation3 + $0x80] sm:$0x1] }
 0x29e   : > { %v4890_v44 = vsel %vm10740_vm9, %v4682_v54, %v4889_v8  ;;  %v4690_v40 = vor.u32 %v4688_v0, %v4687_v17  ;;  %v4692_v34 = vrot.slane %v4687_v17, 4  ;;  %v6312_v39 = vrot.slane %v6311_v26, 4  ;;  %v11240_v5 = vpop.permute.xlu0 %6917  ;;  %v7171_v0 = vld [vmem:[#allocation3 + $0x54] sm:$0xf] }
 0x29f   : > { %4891 = vst [vmem:[#allocation3 + $0x90] sm:$0xf] %v4890_v44  ;;  %v4883_v37 = vsel %vm10740_vm9, %v4665_v48, %v4882_v63  ;;  %v6320_v22 = vrot.slane %v6318_v42, 4  ;;  %v4673_v50 = vor.u32 %v4671_v28, %v4670_v56  ;;  %v4675_v57 = vrot.slane %v4670_v56, 4  ;;  %v7173_v48 = vld [vmem:[#allocation3 + $0x5c] sm:$0x1] }
 0x2a0   : > { %4884 = vst [vmem:[#allocation3 + $0x84] sm:$0xf] %v4883_v37  ;;  %v4691_v47 = vsel %vm9482_vm7, %v4683_v19, %v4690_v40  ;;  %v4894_v49 = vsel %vm10612_vm12, %v4692_v34, %v4893_v62  ;;  %v6317_v2 = vsel %vm9562_vm14, %v6312_v39, %v6316_v3  ;;  %v6324_v59 = vshll.u32 %v6132_v12, 16  ;;  %v7172_v19 = vld [vmem:[#allocation3 + $0x58] sm:$0xf] }
 0x2a1   : > { %4892 = vst.msk [vmem:[#allocation3 + $0x94] sm:$0xf] %vm12036_vm6, %v4691_v47  ;;  %4895 = vst [vmem:[#allocation3 + $0x98] sm:$0x1] %v4894_v49  ;;  %v6321_v58 = vor.u32 %v6320_v22, %v6316_v3  ;;  %v5310_v30 = vshrl.u32 %v5093_v18, 16  ;;  %v4674_v60 = vsel %vm9482_vm7, %v4666_v35, %v4673_v50  ;;  %v4887_v52 = vsel %vm10612_vm12, %v4675_v57, %v4886_v36 }
 0x2a2   : > { %v5313_v8 = vshll.u32 %v5093_v18, 16  ;;  %v5319_v61 = vshll.u32 %v5094_v31, 16  ;;  %4885 = vst.msk [vmem:[#allocation3 + $0x88] sm:$0xf] %vm12036_vm6, %v4674_v60  ;;  %4888 = vst [vmem:[#allocation3 + $0x8c] sm:$0x1] %v4887_v52  ;;  %v11252_v26 = vpop.permute.xlu0 %7099 }
 0x2a3   : > { %v6322_v29 = vrot.slane %v6321_v58, 4  ;;  %v6326_v1 = vrot.slane %v6324_v59, 5  ;;  %v5312_v42 = vrot.slane %v5310_v30, 4  ;;  %v5323_v54 = vshrl.u32 %v5094_v31, 16  ;;  %v5644_v36 = vld [vmem:[#allocation3 + $0x78] sm:$0xe]  ;;  %v11254_v31 = vpop.permute.xlu1 %5876 }
 0x2a4   : > { %v5315_v63 = vrot.slane %v5313_v8, 5  ;;  %v5321_v17 = vrot.slane %v5319_v61, 5  ;;  %v5329_v53 = vshll.u32 %v5095_v43, 16  ;;  %v8918_v12 = vrot.slane %v7725_v45, 9  ;;  %v5645_v43 = vld [vmem:[#allocation3 + $0x7c] sm:$0xf] }
 0x2a5   : > { %v6327_v35 = vsel %vm9562_vm14, %v6322_v29, %v6326_v1  ;;  %v5325_v62 = vrot.slane %v5323_v54, 4  ;;  %v7855_v28 = vrot.slane %v7726_v7, 5  ;;  %v7858_v18 = vrot.slane %v7727_v38, 5  ;;  %v5646_v45 = vld [vmem:[#allocation3 + $0x80] sm:$0x1] }
 0x2a6   : > { %v8836_v44 = vcombine.low %v6317_v2, %v6327_v35  ;;  %v5316_v40 = vor.u32 %v5315_v63, %v5312_v42  ;;  %v5331_v34 = vrot.slane %v5329_v53, 5  ;;  %v7325_v56 = vshrl.u32 %v7171_v0, 16  ;;  %v5090_v7 = vld [vmem:[#allocation3 + $0x54] sm:$0xf]  ;;  %v5091_v8 = vld [vmem:[#allocation3 + $0x58] sm:$0xf] }
 0x2a7   : > { %v5326_v37 = vor.u32 %v5325_v62, %v5321_v17  ;;  %v7856_v39 = vsel %vm9526_vm13, %v8918_v12, %v7855_v28  ;;  %v7857_v3 = vrot.slane %v7855_v28, 4  ;;  %v7328_v22 = vshll.u32 %v7171_v0, 16  ;;  %v11263_v61 = vpop.permute.xlu1 %6057  ;;  %v5092_v35 = vld [vmem:[#allocation3 + $0x5c] sm:$0x1]  ;;  %v7722_v62 = vld [vmem:[#allocation3 + $0x6c] sm:$0xe] }
 0x2a8   : > { %6604 = vrot.lane.b32.xlu0 %v8836_v44, %s9355_s15  ;;  %v5317_v47 = vrot.slane %v5316_v40, 4  ;;  %v7327_v49 = vrot.slane %v7325_v56, 4  ;;  %v7334_v50 = vshll.u32 %v7172_v19, 16  ;;  %v7338_v57 = vshrl.u32 %v7172_v19, 16  ;;  %v11267_v19 = vpop.permute.xlu0 %7640  ;;  %v9277_v63 = vld [vmem:[#allocation3 + $0x90] sm:$0xff]  }
 0x2a9   : > { %v5327_v38 = vrot.slane %v5326_v37, 4  ;;  %v7859_v2 = vsel %vm9526_vm13, %v7857_v3, %v7858_v18  ;;  %v7330_v58 = vrot.slane %v7328_v22, 5  ;;  %v7344_v59 = vshll.u32 %v7173_v48, 16  ;;  %v7723_v56 = vld [vmem:[#allocation3 + $0x70] sm:$0xf]  ;;  %5065 = vst.msk [vmem:[#allocation4 + $0x60] sm:$0xff] %vm12035_vm8, %v9277_v63 }
 0x2aa   : > { %v5322_v30 = vsel %vm9562_vm14, %v5317_v47, %v5321_v17  ;;  %v8934_v60 = vcombine.low %v7856_v39, %v7859_v2  ;;  %v7336_v0 = vrot.slane %v7334_v50, 5  ;;  %v7340_v52 = vrot.slane %v7338_v57, 4  ;;  %v7724_v3 = vld [vmem:[#allocation3 + $0x74] sm:$0x1]  ;;  %v9278_v22 = vld [vmem:[#allocation3 + $0x84] sm:$0xff]  }
 0x2ab   : > { %v5332_v29 = vsel %vm9562_vm14, %v5327_v38, %v5331_v34  ;;  %v7331_v1 = vor.u32 %v7330_v58, %v7327_v49  ;;  %v7346_v42 = vrot.slane %v7344_v59, 5  ;;  %v8792_v54 = vrot.slane %v5644_v36, 9  ;;  %v6684_v50 = vld [vmem:[#allocation3 + $0x78] sm:$0xe]  ;;  %v6685_v58 = vld [vmem:[#allocation3 + $0x7c] sm:$0xf] }
 0x2ac   : > { %v8774_v53 = vcombine.low %v5322_v30, %v5332_v29  ;;  %7973 = vrot.lane.b32.xlu0 %v8934_v60, %s9360_s14  ;;  %v7341_v12 = vor.u32 %v7340_v52, %v7336_v0  ;;  %v5782_v17 = vrot.slane %v5645_v43, 5  ;;  %v5785_v48 = vrot.slane %v5646_v45, 5  ;;  %v6686_v59 = vld [vmem:[#allocation3 + $0x80] sm:$0x1]  ;;  %v11280_v30 = vpop.permute.xlu1 %6598  ;;  %5064 = vst.msk [vmem:[#allocation4 + $0x58] sm:$0xff] %vm12035_vm8, %v9278_v22 }
 0x2ad   : > { %v7332_v28 = vrot.slane %v7331_v1, 4  ;;  %v5286_v18 = vshrl.u32 %v5090_v7, 16  ;;  %v5289_v44 = vshll.u32 %v5090_v7, 16  ;;  %v5295_v40 = vshll.u32 %v5091_v8, 16  ;;  %v6681_v29 = vld [vmem:[#allocation3 + $0x6c] sm:$0xe] }
 0x2ae   : > { %5565 = vrot.lane.b32.xlu1 %v8774_v53, %s9351_s11  ;;  %v7342_v34 = vrot.slane %v7341_v12, 4  ;;  %v5783_v36 = vsel %vm9526_vm13, %v8792_v54, %v5782_v17  ;;  %v5784_v37 = vrot.slane %v5782_v17, 4  ;;  %v5299_v39 = vshrl.u32 %v5091_v8, 16  ;;  %v6682_v1 = vld [vmem:[#allocation3 + $0x70] sm:$0xf]  ;;  %v11283_v54 = vpop.permute.xlu0 %6055 }
 0x2af   : > { %v7337_v43 = vsel %vm9562_vm14, %v7332_v28, %v7336_v0  ;;  %v5288_v45 = vrot.slane %v5286_v18, 4  ;;  %v5291_v47 = vrot.slane %v5289_v44, 5  ;;  %v5297_v49 = vrot.slane %v5295_v40, 5  ;;  %v6683_v17 = vld [vmem:[#allocation3 + $0x74] sm:$0x1] }
 0x2b0   : > { %v7347_v57 = vsel %vm9562_vm14, %v7342_v34, %v7346_v42  ;;  %v5786_v7 = vsel %vm9526_vm13, %v5784_v37, %v5785_v48  ;;  %v5301_v38 = vrot.slane %v5299_v39, 4  ;;  %v5305_v2 = vshll.u32 %v5092_v35, 16  ;;  %v5641_v44 = vld [vmem:[#allocation3 + $0x6c] sm:$0xe]  ;;  %v5642_v22 = vld [vmem:[#allocation3 + $0x70] sm:$0xf] }
 0x2b1   : > { %v8899_v60 = vcombine.low %v7337_v43, %v7347_v57  ;;  %v8808_v0 = vcombine.low %v5783_v36, %v5786_v7  ;;  %v5292_v52 = vor.u32 %v5291_v47, %v5288_v45  ;;  %v8917_v8 = vrot.slane %v7722_v62, 9  ;;  %v5643_v43 = vld [vmem:[#allocation3 + $0x74] sm:$0x1]  ;;  %v11297_v7 = vpop.permute.xlu1 %7097 }
 0x2b2   : > { %v5302_v42 = vor.u32 %v5301_v38, %v5297_v49  ;;  %v5307_v63 = vrot.slane %v5305_v2, 5  ;;  %v7848_v53 = vrot.slane %v7723_v56, 5  ;;  %v7851_v12 = vrot.slane %v7724_v3, 5 }
 0x2b3   : > { %7646 = vrot.lane.b32.xlu1 %v8899_v60, %s9361_s17  ;;  %5890 = vrot.lane.b32.xlu0 %v8808_v0, %s9356_s16  ;;  %v5293_v48 = vrot.slane %v5292_v52, 4  ;;  %v8855_v35 = vrot.slane %v6684_v50, 9  ;;  %v6818_v28 = vrot.slane %v6685_v58, 5  ;;  %v6821_v18 = vrot.slane %v6686_v59, 5  ;;  %v7180_v59 = vld [vmem:[#allocation3 + $0x78] sm:$0xf]  ;;  %v6597_v0 = vpop.permute.xlu0 %6596 }
 0x2b4   : > { %v5303_v40 = vrot.slane %v5302_v42, 4  ;;  %v7849_v62 = vsel %vm9526_vm13, %v8917_v8, %v7848_v53  ;;  %v7850_v34 = vrot.slane %v7848_v53, 4  ;;  %v8854_v36 = vrot.slane %v6681_v29, 9  ;;  %v7181_v60 = vld [vmem:[#allocation3 + $0x7c] sm:$0xf] }
 0x2b5   : > { %v5298_v56 = vsel %vm9562_vm14, %v5293_v48, %v5297_v49  ;;  %v6819_v37 = vsel %vm9526_vm13, %v8855_v35, %v6818_v28  ;;  %v6820_v39 = vrot.slane %v6818_v28, 4  ;;  %v6811_v3 = vrot.slane %v6682_v1, 5  ;;  %v7182_v42 = vld [vmem:[#allocation3 + $0x80] sm:$0x1] }
 0x2b6   : > { %v5308_v45 = vsel %vm9562_vm14, %v5303_v40, %v5307_v63  ;;  %v7852_v47 = vsel %vm9526_vm13, %v7850_v34, %v7851_v12  ;;  %v6814_v50 = vrot.slane %v6683_v17, 5  ;;  %v8791_v57 = vrot.slane %v5641_v44, 9  ;;  %v6139_v63 = vld [vmem:[#allocation3 + $0x78] sm:$0xf]  ;;  %v6140_v44 = vld [vmem:[#allocation3 + $0x7c] sm:$0xf] }
 0x2b7   : > { %v8773_v38 = vcombine.low %v5298_v56, %v5308_v45  ;;  %v8933_v2 = vcombine.low %v7849_v62, %v7852_v47  ;;  %v6822_v49 = vsel %vm9526_vm13, %v6820_v39, %v6821_v18  ;;  %v6812_v58 = vsel %vm9526_vm13, %v8854_v36, %v6811_v3  ;;  %v400_v40 = vld [vmem:[#allocation3 + $0xa8] sm:$0x1]  ;;  %v397_v39 = vld [vmem:[#allocation3 + $0x9c] sm:$0x1] }
 0x2b8   : > { %v8871_v52 = vcombine.low %v6819_v37, %v6822_v49  ;;  %v6813_v8 = vrot.slane %v6811_v3, 4  ;;  %v5775_v29 = vrot.slane %v5642_v22, 5  ;;  %v5778_v1 = vrot.slane %v5643_v43, 5 }
 0x2b9   : > { %5563 = vrot.lane.b32.xlu1 %v8773_v38, %s9351_s11  ;;  %7971 = vrot.lane.b32.xlu0 %v8933_v2, %s9360_s14  ;;  %vm6640_vm4 = vcmask 326912   ;;  %vm6961_vm0 = vcmask 392512   ;;  %vm12037_vm11 = vcmask 458112   ;;  %vm7684_vm10 = vcmask 523712   ;;  %v455_v2 = vld [vmem:[#allocation3 + $0xb0] sm:$0x1] }
 0x2ba   : > { %v6815_v53 = vsel %vm9526_vm13, %v6813_v8, %v6814_v50  ;;  %v5776_v12 = vsel %vm9526_vm13, %v8791_v57, %v5775_v29  ;;  %v5777_v17 = vrot.slane %v5775_v29, 4  ;;  %vm12038_vm1 = vcmask 589312   ;;  %6641 = vst.msk [vmem:[#allocation4] sm:$0xff] %vm6640_vm4, %v11173_v6  ;;  %6642 = vst.msk [vmem:[#allocation4 + $0x8] sm:$0xff] %vm6640_vm4, %v11161_v23 }
 0x2bb   : > { %6643 = vst.msk [vmem:[#allocation4 + $0x10] sm:$0xff] %vm6640_vm4, %v6597_v0  ;;  %v8870_v48 = vcombine.low %v6812_v58, %v6815_v53  ;;  %v7397_v35 = vshrl.u32 %v7180_v59, 16  ;;  %v7400_v28 = vshll.u32 %v7180_v59, 16  ;;  %v7406_v18 = vshll.u32 %v7181_v60, 16 }
 0x2bc   : > { %6962 = vst.msk [vmem:[#allocation4] sm:$0xff] %vm6961_vm0, %v11106_v55  ;;  %6963 = vst.msk [vmem:[#allocation4 + $0x8] sm:$0xff] %vm6961_vm0, %v11110_v13  ;;  %v5779_v23 = vsel %vm9526_vm13, %v5777_v17, %v5778_v1  ;;  %v7410_v6 = vshrl.u32 %v7181_v60, 16  ;;  %v7416_v62 = vshll.u32 %v7182_v42, 16  ;;  %v6141_v55 = vld [vmem:[#allocation3 + $0x80] sm:$0x1]  ;;  %v5558_v13 = vpop.permute.xlu1 %5557 }
 0x2bd   : > { %6964 = vst.msk [vmem:[#allocation4 + $0x10] sm:$0xff] %vm6961_vm0, %v11240_v5  ;;  %v6377_v34 = vshrl.u32 %v6139_v63, 16  ;;  %6931 = vrot.lane.b32.xlu1 %v8871_v52, %s9359_s13  ;;  %6929 = vrot.lane.b32.xlu0 %v8870_v48, %s9359_s13  ;;  %v8807_v5 = vcombine.low %v5776_v12, %v5779_v23  ;;  %v7399_v36 = vrot.slane %v7397_v35, 4  ;;  %v7402_v56 = vrot.slane %v7400_v28, 5 }
 0x2be   : > { %7140 = vst.msk [vmem:[#allocation4] sm:$0xff] %vm12037_vm11, %v11047_v14  ;;  %7141 = vst.msk [vmem:[#allocation4 + $0x8] sm:$0xff] %vm12037_vm11, %v11175_v21  ;;  %v9250_v14 = vld [vmem:[#allocation3 + $0x90] sm:$0xff]   ;;  %v7408_v37 = vrot.slane %v7406_v18, 5  ;;  %v7418_v21 = vrot.slane %v7416_v62, 5  ;;  %v6380_v22 = vshll.u32 %v6139_v63, 16 }
 0x2bf   : > { %7142 = vst.msk [vmem:[#allocation4 + $0x10] sm:$0xff] %vm12037_vm11, %v11118_v32  ;;  %v7412_v32 = vrot.slane %v7410_v6, 4  ;;  %v6379_v3 = vrot.slane %v6377_v34, 4  ;;  %v7403_v43 = vor.u32 %v7402_v56, %v7399_v36  ;;  %v6386_v45 = vshll.u32 %v6140_v44, 16  ;;  %v452_v18 = vld [vmem:[#allocation3 + $0xa4] sm:$0x1] }
 0x2c0   : > { %7685 = vst.msk [vmem:[#allocation4] sm:$0xff] %vm7684_vm10, %v11132_v15  ;;  %7687 = vst.msk [vmem:[#allocation4 + $0x10] sm:$0xff] %vm7684_vm10, %v11267_v19  ;;  %v11341_v15 = vpop.permute.xlu0 %7965  ;;  %v6390_v19 = vshrl.u32 %v6140_v44, 16  ;;  %v6396_v47 = vshll.u32 %v6141_v55, 16  ;;  %v6382_v50 = vrot.slane %v6380_v22, 5  ;;  %v401_v57 = vsel %vm10612_vm12, 0, %v400_v40 }
 0x2c1   : > { %5602 = vst.msk [vmem:[#allocation4 + $0x20] sm:$0xff] %vm5597_vm2, %v5558_v13  ;;  %v9075_v38 = vpop.f32.mrb[24].mxu0  ;;  %5888 = vrot.lane.b32.xlu1 %v8807_v5, %s9356_s16  ;;  %7111 = vrot.lane.b32.xlu0 %v9250_v14, %s9358_s10  ;;  %v7404_v49 = vrot.slane %v7403_v43, 4  ;;  %v6388_v58 = vrot.slane %v6386_v45, 5  ;;  %402 = vst [vmem:[#allocation3 + $0xa8] sm:$0x1] %v401_v57 }
 0x2c2   : > { %8006 = vst.msk [vmem:[#allocation4] sm:$0xff] %vm12038_vm1, %v11074_v51  ;;  %8008 = vst.msk [vmem:[#allocation4 + $0x10] sm:$0xff] %vm12038_vm1, %v11201_v9  ;;  %v7413_v51 = vor.u32 %v7412_v32, %v7408_v37  ;;  %v398_v9 = vsel %vm10612_vm12, 0, %v397_v39  ;;  %v6392_v59 = vrot.slane %v6390_v19, 4  ;;  %v6398_v60 = vrot.slane %v6396_v47, 5  ;;  %v9253_v47 = vld [vmem:[#allocation3 + $0x84] sm:$0xff]  }
 0x2c3   : > { %5923 = vst.msk [vmem:[#allocation4 + $0x20] sm:$0xff] %vm5918_vm15, %v11218_v46  ;;  %v9251_v46 = vld [vmem:[#allocation3 + $0x90] sm:$0xff]   ;;  %399 = vst [vmem:[#allocation3 + $0x9c] sm:$0x1] %v398_v9  ;;  %v6383_v52 = vor.u32 %v6382_v50, %v6379_v3  ;;  %v4275_v8 = vadd.f32 %v11194_v11, %v9075_v38  ;;  %v7409_v42 = vsel %vm9562_vm14, %v7404_v49, %v7408_v37  ;;  %v456_v53 = vsel %vm10641_vm3, 0, %v455_v2  ;;  %v7639_v44 = vpop.permute.xlu1 %7638 }
 0x2c4   : > { %6100 = vst.msk [vmem:[#allocation4 + $0x20] sm:$0xff] %vm6095_vm5, %v11283_v54  ;;  %v4266_v54 = vpop.f32.mrb[25].mxu0  ;;  %v7414_v0 = vrot.slane %v7413_v51, 4  ;;  %v6393_v63 = vor.u32 %v6392_v59, %v6388_v58  ;;  %457 = vst [vmem:[#allocation3 + $0xb0] sm:$0x1] %v456_v53  ;;  %v11360_v40 = vpop.permute.xlu0 %5882  ;;  %v453_v56 = vsel %vm10641_vm3, 0, %v452_v18 }
 0x2c5   : > { %v4267_v29 = vadd.f32 %v11194_v11, %v4266_v54  ;;  %v9076_v1 = vpop.f32.mrb[26].mxu0  ;;  %v6384_v35 = vrot.slane %v6383_v52, 4  ;;  %vm4323_vm8 = vcmp.gt.f32.partialorder %v4275_v8, 0.0  ;;  %v4355_v28 = vmul.f32 0.01, %v4275_v8  ;;  %6069 = vrot.lane.b32.xlu1 %v9251_v46, %s9352_s12  ;;  %7686 = vst.msk [vmem:[#allocation4 + $0x8] sm:$0xff] %vm7684_vm10, %v7639_v44 }
 0x2c6   : > { %v4278_v12 = vadd.f32 %v11194_v11, %v9076_v1  ;;  %v4269_v17 = vpop.f32.mrb[27].mxu0  ;;  %v7419_v48 = vsel %vm9562_vm14, %v7414_v0, %v7418_v21  ;;  %v6394_v6 = vrot.slane %v6393_v63, 4  ;;  %8007 = vst.msk [vmem:[#allocation4 + $0x8] sm:$0xff] %vm12038_vm1, %v11228_v25  ;;  %454 = vst [vmem:[#allocation3 + $0xa4] sm:$0x1] %v453_v56  ;;  %v9254_v54 = vld [vmem:[#allocation3 + $0x84] sm:$0xff]  }
 0x2c7   : > { %v8902_v23 = vcombine.low %v7409_v42, %v7419_v48  ;;  %vm4321_vm6 = vcmp.gt.f32.partialorder %v4267_v29, 0.0  ;;  %v4353_v62 = vmul.f32 0.01, %v4267_v29  ;;  %v6389_v55 = vsel %vm9562_vm14, %v6384_v35, %v6388_v58  ;;  %v6136_v22 = vld [vmem:[#allocation3 + $0x6c] sm:$0xf] }
 0x2c8   : > { %v4387_v34 = vsel %vm4323_vm8, %v4275_v8, %v4355_v28  ;;  %vm4324_vm11 = vcmp.gt.f32.partialorder %v4278_v12, 0.0  ;;  %v4356_v13 = vmul.f32 0.01, %v4278_v12  ;;  %v6399_v5 = vsel %vm9562_vm14, %v6394_v6, %v6398_v60  ;;  %v11374_v43 = vld [vmem:[#allocation3 + $0x70] sm:$0xf]  ;;  %v5556_v38 = vpop.permute.xlu1 %5555  ;;  %v11378_v9 = vpop.permute.xlu0 %7963 }
 0x2c9   : > { %7652 = vrot.lane.b32.xlu0 %v8902_v23, %s9361_s17  ;;  %v8996_v14 = vpack.c.bf16 %v4387_v34, %v4387_v34  ;;  %v4385_v36 = vsel %vm4321_vm6, %v4267_v29, %v4353_v62  ;;  %v8022_v37 = vld [vmem:[#allocation4] sm:$0xff]  ;;  %v8839_v39 = vcombine.low %v6389_v55, %v6399_v5  ;;  %v4270_v3 = vadd.f32 %v11194_v11, %v4269_v17  ;;  %v4903_v2 = vld [vmem:[#allocation3 + $0xa8] sm:$0xf]  ;;  %v6138_v23 = vld [vmem:[#allocation3 + $0x74] sm:$0x1] }
 0x2ca   : > { %v8994_v32 = vpack.c.bf16 %v4385_v36, %v4385_v36  ;;  %v4388_v21 = vsel %vm4324_vm11, %v4278_v12, %v4356_v13  ;;  %vm8081_vm8 = vcmask 588800   ;;  %v6353_v58 = vshrl.u32 %v6136_v22, 16  ;;  %5601 = vst.msk [vmem:[#allocation4 + $0x18] sm:$0xff] %vm5597_vm2, %v5556_v38  ;;  %v4896_v1 = vld [vmem:[#allocation3 + $0x9c] sm:$0xf] }
 0x2cb   : > { %v4711_v25 = vshrl.u32 %v8996_v14, 16  ;;  %v4714_v45 = vshll.u32 %v8996_v14, 16  ;;  %v8997_v19 = vpack.c.bf16 %v4388_v21, %v4388_v21  ;;  %6610 = vrot.lane.b32.xlu1 %v8839_v39, %s9355_s15  ;;  %vm4322_vm6 = vcmp.gt.f32.partialorder %v4270_v3, 0.0  ;;  %9091 = vmatprep.mubr.msk.bf16.mxu1 %vm8081_vm8, %v8022_v37  ;;  %5922 = vst.msk [vmem:[#allocation4 + $0x18] sm:$0xff] %vm5918_vm15, %v11254_v31  ;;  %v4907_v17 = vld [vmem:[#allocation3 + $0xb0] sm:$0x1] }
 0x2cc   : > { %v4694_v51 = vshrl.u32 %v8994_v32, 16  ;;  %v4697_v50 = vshll.u32 %v8994_v32, 16  ;;  %v4354_v57 = vmul.f32 0.01, %v4270_v3  ;;  %v6356_v0 = vshll.u32 %v6136_v22, 16  ;;  %6099 = vst.msk [vmem:[#allocation4 + $0x18] sm:$0xff] %vm6095_vm5, %v11135_v33  ;;  %v11405_v39 = vpop.permute.xlu1 %6923 }
 0x2cd   : > { %v4713_v11 = vrot.slane %v4711_v25, 7  ;;  %v4719_v46 = vshrl.u32 %v8997_v19, 16  ;;  %v4722_v49 = vshll.u32 %v8997_v19, 16  ;;  %6067 = vrot.lane.b32.xlu0 %v9253_v47, %s9352_s12  ;;  %v6362_v52 = vshll.u32 %v11374_v43, 16  ;;  %6644 = vst.msk [vmem:[#allocation4 + $0x18] sm:$0xff] %vm6640_vm4, %v11280_v30  ;;  %v11398_v30 = vpop.permute.xlu0 %6921 }
 0x2ce   : > { %v4696_v59 = vrot.slane %v4694_v51, 7  ;;  %v4386_v60 = vsel %vm4322_vm6, %v4270_v3, %v4354_v57  ;;  %v6355_v48 = vrot.slane %v6353_v58, 4  ;;  %v6358_v35 = vrot.slane %v6356_v0, 5  ;;  %v5099_v6 = vld [vmem:[#allocation3 + $0x78] sm:$0xf]  ;;  %6965 = vst.msk [vmem:[#allocation4 + $0x18] sm:$0xff] %vm6961_vm0, %v11238_v27 }
 0x2cf   : > { %v4716_v8 = vor.u32 %v4714_v45, %v4713_v11  ;;  %v4717_v29 = vrot.slane %v4713_v11, 4  ;;  %v4721_v42 = vrot.slane %v4719_v46, 7  ;;  %v8995_v63 = vpack.c.bf16 %v4386_v60, %v4386_v60  ;;  %7109 = vrot.lane.b32.xlu1 %v9254_v54, %s9358_s10  ;;  %v5100_v13 = vld [vmem:[#allocation3 + $0x7c] sm:$0xf]  ;;  %v5101_v56 = vld [vmem:[#allocation3 + $0x80] sm:$0x1] }
 0x2d0   : > { %v4699_v53 = vor.u32 %v4697_v50, %v4696_v59  ;;  %v4700_v12 = vrot.slane %v4696_v59, 4  ;;  %v6359_v55 = vor.u32 %v6358_v35, %v6355_v48  ;;  %v6364_v34 = vrot.slane %v6362_v52, 5  ;;  %v7731_v37 = vld [vmem:[#allocation3 + $0x90] sm:$0xe]  ;;  %v7177_v25 = vld [vmem:[#allocation3 + $0x6c] sm:$0xf] }
 0x2d1   : > { %v4904_v31 = vsel %vm10740_vm9, %v4716_v8, %v4903_v2  ;;  %v4724_v28 = vor.u32 %v4722_v49, %v4721_v42  ;;  %v4726_v18 = vrot.slane %v4721_v42, 4  ;;  %v4702_v44 = vshrl.u32 %v8995_v63, 16  ;;  %v7732_v50 = vld [vmem:[#allocation3 + $0x94] sm:$0xf]  ;;  %v7733_v2 = vld [vmem:[#allocation3 + $0x98] sm:$0x1] }
 0x2d2   : > { %4905 = vst [vmem:[#allocation3 + $0xa8] sm:$0xf] %v4904_v31  ;;  %v4897_v33 = vsel %vm10740_vm9, %v4699_v53, %v4896_v1  ;;  %v4705_v62 = vshll.u32 %v8995_v63, 16  ;;  %vm12087_vm11 = vcmask 458112   ;;  %v6366_v36 = vshrl.u32 %v11374_v43, 16  ;;  %v11415_v1 = vpop.permute.xlu0 %7103 }
 0x2d3   : > { %7143 = vst.msk [vmem:[#allocation4 + $0x18] sm:$0xff] %vm12087_vm11, %v11297_v7  ;;  %4898 = vst [vmem:[#allocation3 + $0x9c] sm:$0xf] %v4897_v33  ;;  %v4725_v5 = vsel %vm9482_vm7, %v4717_v29, %v4724_v28  ;;  %v4908_v27 = vsel %vm10612_vm12, %v4726_v18, %v4907_v17  ;;  %v4704_v14 = vrot.slane %v4702_v44, 7  ;;  %vm12088_vm6 = vcmask 60416   ;;  %v11417_v17 = vpop.permute.xlu1 %5880 }
 0x2d4   : > { %4906 = vst.msk [vmem:[#allocation3 + $0xac] sm:$0xf] %vm12088_vm6, %v4725_v5  ;;  %4909 = vst [vmem:[#allocation3 + $0xb0] sm:$0x1] %v4908_v27  ;;  %v4900_v7 = vld [vmem:[#allocation3 + $0xa4] sm:$0x1] }
 0x2d5   : > { %v6360_v32 = vrot.slane %v6359_v55, 4  ;;  %v6372_v21 = vshll.u32 %v6138_v23, 16  ;;  %v5358_v3 = vshrl.u32 %v5099_v6, 16  ;;  %v5361_v22 = vshll.u32 %v5099_v6, 16  ;;  %vm12089_vm11 = vmmov %vm12088_vm6  ;;  %v7178_v8 = vld [vmem:[#allocation3 + $0x70] sm:$0xf] }
 0x2d6   : > { %v4707_v45 = vor.u32 %v4705_v62, %v4704_v14  ;;  %v4709_v19 = vrot.slane %v4704_v14, 4  ;;  %v6368_v47 = vrot.slane %v6366_v36, 4  ;;  %v5367_v51 = vshll.u32 %v5100_v13, 16  ;;  %v7179_v29 = vld [vmem:[#allocation3 + $0x74] sm:$0x1] }
 0x2d7   : > { %v6365_v43 = vsel %vm9562_vm14, %v6360_v32, %v6364_v34  ;;  %v6374_v57 = vrot.slane %v6372_v21, 5  ;;  %v5360_v38 = vrot.slane %v5358_v3, 4  ;;  %v5363_v11 = vrot.slane %v5361_v22, 5  ;;  %v5650_v33 = vld [vmem:[#allocation3 + $0x90] sm:$0xe] }
 0x2d8   : > { %v4708_v46 = vsel %vm9482_vm7, %v4700_v12, %v4707_v45  ;;  %v4901_v49 = vsel %vm10612_vm12, %v4709_v19, %v4900_v7  ;;  %v6369_v58 = vor.u32 %v6368_v47, %v6364_v34  ;;  %v5369_v59 = vrot.slane %v5367_v51, 5  ;;  %v5096_v62 = vld [vmem:[#allocation3 + $0x6c] sm:$0xf]  ;;  %v5651_v27 = vld [vmem:[#allocation3 + $0x94] sm:$0xf]  ;;  %v11428_v19 = vpop.permute.xlu0 %7644 }
 0x2d9   : > { %4899 = vst.msk [vmem:[#allocation3 + $0xa0] sm:$0xf] %vm12089_vm11, %v4708_v46  ;;  %4902 = vst [vmem:[#allocation3 + $0xa4] sm:$0x1] %v4901_v49  ;;  %v5364_v60 = vor.u32 %v5363_v11, %v5360_v38  ;;  %v5371_v54 = vshrl.u32 %v5100_v13, 16  ;;  %v5377_v0 = vshll.u32 %v5101_v56, 16  ;;  %v11430_v38 = vpop.permute.xlu1 %6061 }
 0x2da   : > { %v8920_v52 = vrot.slane %v7731_v37, 9  ;;  %v6370_v42 = vrot.slane %v6369_v58, 4  ;;  %v7869_v63 = vrot.slane %v7732_v50, 5  ;;  %v7872_v53 = vrot.slane %v7733_v2, 5  ;;  %v5652_v14 = vld [vmem:[#allocation3 + $0x98] sm:$0x1] }
 0x2db   : > { %v7373_v12 = vshrl.u32 %v7177_v25, 16  ;;  %v5365_v48 = vrot.slane %v5364_v60, 4  ;;  %v5373_v35 = vrot.slane %v5371_v54, 4  ;;  %v5379_v31 = vrot.slane %v5377_v0, 5  ;;  %v5097_v32 = vld [vmem:[#allocation3 + $0x70] sm:$0xf] }
 0x2dc   : > { %v7376_v28 = vshll.u32 %v7177_v25, 16  ;;  %v6375_v18 = vsel %vm9562_vm14, %v6370_v42, %v6374_v57  ;;  %v7870_v44 = vsel %vm9526_vm13, %v8920_v52, %v7869_v63  ;;  %v7871_v23 = vrot.slane %v7869_v63, 4  ;;  %v5098_v45 = vld [vmem:[#allocation3 + $0x74] sm:$0x1]  ;;  %v7728_v57 = vld [vmem:[#allocation3 + $0x84] sm:$0xe] }
 0x2dd   : > { %v7375_v6 = vrot.slane %v7373_v12, 4  ;;  %v8838_v55 = vcombine.low %v6365_v43, %v6375_v18  ;;  %v5370_v34 = vsel %vm9562_vm14, %v5365_v48, %v5369_v59  ;;  %v5374_v13 = vor.u32 %v5373_v35, %v5369_v59  ;;  %v7729_v58 = vld [vmem:[#allocation3 + $0x88] sm:$0xf]  ;;  %v7730_v52 = vld [vmem:[#allocation3 + $0x8c] sm:$0x1] }
 0x2de   : > { %v7378_v5 = vrot.slane %v7376_v28, 5  ;;  %v7873_v36 = vsel %vm9526_vm13, %v7871_v23, %v7872_v53  ;;  %v7382_v56 = vshll.u32 %v7178_v8, 16  ;;  %v7386_v37 = vshrl.u32 %v7178_v8, 16  ;;  %v6690_v8 = vld [vmem:[#allocation3 + $0x90] sm:$0xe]  ;;  %v9280_v23 = vld [vmem:[#allocation3 + $0xa8] sm:$0xff]  }
 0x2df   : > { %v7392_v7 = vshll.u32 %v7179_v29, 16  ;;  %6608 = vrot.lane.b32.xlu0 %v8838_v55, %s9355_s15  ;;  %v5375_v21 = vrot.slane %v5374_v13, 4  ;;  %v8936_v3 = vcombine.low %v7870_v44, %v7873_v36  ;;  %v8794_v25 = vrot.slane %v5650_v33, 9  ;;  %v6691_v12 = vld [vmem:[#allocation3 + $0x94] sm:$0xf] }
 0x2e0   : > { %v7379_v22 = vor.u32 %v7378_v5, %v7375_v6  ;;  %v7384_v47 = vrot.slane %v7382_v56, 5  ;;  %v7388_v51 = vrot.slane %v7386_v37, 4  ;;  %v5796_v43 = vrot.slane %v5651_v27, 5  ;;  %v9279_v48 = vld [vmem:[#allocation3 + $0x9c] sm:$0xff]   ;;  %v6692_v44 = vld [vmem:[#allocation3 + $0x98] sm:$0x1]  ;;  %v11442_v5 = vpop.permute.xlu0 %6059  ;;  %v11447_v37 = vpop.permute.xlu1 %6602 }
 0x2e1   : > { %v7394_v50 = vrot.slane %v7392_v7, 5  ;;  %v5380_v11 = vsel %vm9562_vm14, %v5375_v21, %v5379_v31  ;;  %v5799_v46 = vrot.slane %v5652_v14, 5  ;;  %v5334_v49 = vshrl.u32 %v5096_v62, 16  ;;  %v6687_v13 = vld [vmem:[#allocation3 + $0x84] sm:$0xe] }
 0x2e2   : > { %v7380_v2 = vrot.slane %v7379_v22, 4  ;;  %v8776_v59 = vcombine.low %v5370_v34, %v5380_v11  ;;  %v7389_v60 = vor.u32 %v7388_v51, %v7384_v47  ;;  %v5797_v54 = vsel %vm9526_vm13, %v8794_v25, %v5796_v43  ;;  %v6688_v56 = vld [vmem:[#allocation3 + $0x88] sm:$0xf]  ;;  %v6689_v51 = vld [vmem:[#allocation3 + $0x8c] sm:$0x1] }
 0x2e3   : > { %v5798_v0 = vrot.slane %v5796_v43, 4  ;;  %7977 = vrot.lane.b32.xlu0 %v8936_v3, %s9360_s14  ;;  %v5336_v42 = vrot.slane %v5334_v49, 4  ;;  %v5337_v63 = vshll.u32 %v5096_v62, 16  ;;  %v5343_v53 = vshll.u32 %v5097_v32, 16 }
 0x2e4   : > { %v7385_v29 = vsel %vm9562_vm14, %v7380_v2, %v7384_v47  ;;  %5569 = vrot.lane.b32.xlu1 %v8776_v59, %s9351_s11  ;;  %v7390_v35 = vrot.slane %v7389_v60, 4  ;;  %v5347_v28 = vshrl.u32 %v5097_v32, 16  ;;  %v5353_v18 = vshll.u32 %v5098_v45, 16  ;;  %v5647_v2 = vld [vmem:[#allocation3 + $0x84] sm:$0xe] }
 0x2e5   : > { %v5800_v31 = vsel %vm9526_vm13, %v5798_v0, %v5799_v46  ;;  %v5339_v33 = vrot.slane %v5337_v63, 5  ;;  %v5345_v55 = vrot.slane %v5343_v53, 5  ;;  %v8919_v34 = vrot.slane %v7728_v57, 9  ;;  %v5648_v60 = vld [vmem:[#allocation3 + $0x88] sm:$0xf] }
 0x2e6   : > { %v8810_v6 = vcombine.low %v5797_v54, %v5800_v31  ;;  %vm12090_vm6 = vcmask 64512   ;;  %v7395_v62 = vsel %vm9562_vm14, %v7390_v35, %v7394_v50  ;;  %v5349_v27 = vrot.slane %v5347_v28, 4  ;;  %v5649_v54 = vld [vmem:[#allocation3 + $0x8c] sm:$0x1]  ;;  %v7187_v63 = vld [vmem:[#allocation3 + $0x94] sm:$0xf]  ;;  %v11466_v28 = vpop.permute.xlu1 %7101 }
 0x2e7   : > { %5066 = vst.msk [vmem:[#allocation4 + $0x68] sm:$0xff] %vm12090_vm6, %v9279_v48  ;;  %v5355_v14 = vrot.slane %v5353_v18, 5  ;;  %v7862_v36 = vrot.slane %v7729_v58, 5  ;;  %vm12091_vm11 = vmmov %vm12090_vm6  ;;  %v8901_v7 = vcombine.low %v7385_v29, %v7395_v62  ;;  %v5340_v32 = vor.u32 %v5339_v33, %v5336_v42  ;;  %v7186_v42 = vld [vmem:[#allocation3 + $0x90] sm:$0xf]  ;;  %v6601_v53 = vpop.permute.xlu0 %6600 }
 0x2e8   : > { %5067 = vst.msk [vmem:[#allocation4 + $0x70] sm:$0xff] %vm12091_vm11, %v9280_v23  ;;  %5894 = vrot.lane.b32.xlu0 %v8810_v6, %s9356_s16  ;;  %v7865_v21 = vrot.slane %v7730_v52, 5  ;;  %v8857_v3 = vrot.slane %v6690_v8, 9  ;;  %v5350_v22 = vor.u32 %v5349_v27, %v5345_v55  ;;  %v6832_v47 = vrot.slane %v6691_v12, 5  ;;  %v7188_v33 = vld [vmem:[#allocation3 + $0x98] sm:$0x1] }
 0x2e9   : > { %v7863_v25 = vsel %vm9526_vm13, %v8919_v34, %v7862_v36  ;;  %v7864_v45 = vrot.slane %v7862_v36, 4  ;;  %7650 = vrot.lane.b32.xlu1 %v8901_v7, %s9361_s17  ;;  %v5341_v50 = vrot.slane %v5340_v32, 4  ;;  %v6835_v43 = vrot.slane %v6692_v44, 5  ;;  %6645 = vst.msk [vmem:[#allocation4 + $0x20] sm:$0xff] %vm6640_vm4, %v6601_v53  ;;  %v6145_v27 = vld [vmem:[#allocation3 + $0x90] sm:$0xf] }
 0x2ea   : > { %v8856_v57 = vrot.slane %v6687_v13, 9  ;;  %v6825_v11 = vrot.slane %v6688_v56, 5  ;;  %v5351_v46 = vrot.slane %v5350_v22, 4  ;;  %v6833_v58 = vsel %vm9526_vm13, %v8857_v3, %v6832_v47  ;;  %6966 = vst.msk [vmem:[#allocation4 + $0x20] sm:$0xff] %vm6961_vm0, %v11398_v30  ;;  %v6146_v32 = vld [vmem:[#allocation3 + $0x94] sm:$0xf] }
 0x2eb   : > { %v7866_v49 = vsel %vm9526_vm13, %v7864_v45, %v7865_v21  ;;  %v6834_v59 = vrot.slane %v6832_v47, 4  ;;  %v5346_v0 = vsel %vm9562_vm14, %v5341_v50, %v5345_v55  ;;  %v6828_v35 = vrot.slane %v6689_v51, 5  ;;  %v6147_v47 = vld [vmem:[#allocation3 + $0x98] sm:$0x1] }
 0x2ec   : > { %v8935_v52 = vcombine.low %v7863_v25, %v7866_v49  ;;  %v6826_v8 = vsel %vm9526_vm13, %v8856_v57, %v6825_v11  ;;  %v6827_v29 = vrot.slane %v6825_v11, 4  ;;  %v5356_v12 = vsel %vm9562_vm14, %v5351_v46, %v5355_v14  ;;  %v406_v25 = vld [vmem:[#allocation3 + $0xc0] sm:$0x1] }
 0x2ed   : > { %v6836_v48 = vsel %vm9526_vm13, %v6834_v59, %v6835_v43  ;;  %v8793_v31 = vrot.slane %v5647_v2, 9  ;;  %v8775_v18 = vcombine.low %v5346_v0, %v5356_v12  ;;  %v5789_v23 = vrot.slane %v5648_v60, 5 }
 0x2ee   : > { %7975 = vrot.lane.b32.xlu0 %v8935_v52, %s9360_s14  ;;  %v8873_v44 = vcombine.low %v6833_v58, %v6836_v48  ;;  %v5792_v6 = vrot.slane %v5649_v54, 5  ;;  %v6829_v55 = vsel %vm9526_vm13, %v6827_v29, %v6828_v35  ;;  %v7445_v34 = vshrl.u32 %v7186_v42, 16  ;;  %v5562_v49 = vpop.permute.xlu1 %5561  ;;  %v403_v54 = vld [vmem:[#allocation3 + $0xb4] sm:$0x1]  ;;  %v11488_v52 = vpop.permute.xlu0 %7969 }
 0x2ef   : > { %v7448_v13 = vshll.u32 %v7186_v42, 16  ;;  %v7454_v62 = vshll.u32 %v7187_v63, 16  ;;  %vm12092_vm6 = vcmask 458112   ;;  %5567 = vrot.lane.b32.xlu1 %v8775_v18, %s9351_s11  ;;  %v8872_v14 = vcombine.low %v6826_v8, %v6829_v55  ;;  %v9079_v43 = vpop.f32.mrb[28].mxu0  ;;  %5604 = vst.msk [vmem:[#allocation4 + $0x30] sm:$0xff] %vm5597_vm2, %v5562_v49 }
 0x2f0   : > { %7144 = vst.msk [vmem:[#allocation4 + $0x20] sm:$0xff] %vm12092_vm6, %v11252_v26  ;;  %v5790_v36 = vsel %vm9526_vm13, %v8793_v31, %v5789_v23  ;;  %v5791_v56 = vrot.slane %v5789_v23, 4  ;;  %v7458_v7 = vshrl.u32 %v7187_v63, 16  ;;  %v7447_v30 = vrot.slane %v7445_v34, 4  ;;  %v4282_v46 = vpop.f32.mrb[29].mxu0 }
 0x2f1   : > { %7689 = vst.msk [vmem:[#allocation4 + $0x20] sm:$0xff] %vm7684_vm10, %v11428_v19  ;;  %v7450_v21 = vrot.slane %v7448_v13, 5  ;;  %v7456_v3 = vrot.slane %v7454_v62, 5  ;;  %v7464_v22 = vshll.u32 %v7188_v33, 16  ;;  %v6425_v51 = vshrl.u32 %v6145_v27, 16  ;;  %v9080_v0 = vpop.f32.mrb[30].mxu0 }
 0x2f2   : > { %8010 = vst.msk [vmem:[#allocation4 + $0x20] sm:$0xff] %vm12038_vm1, %v11341_v15  ;;  %6933 = vrot.lane.b32.xlu0 %v8872_v14, %s9359_s13  ;;  %v5793_v26 = vsel %vm9526_vm13, %v5791_v56, %v5792_v6  ;;  %v7460_v45 = vrot.slane %v7458_v7, 4  ;;  %v6428_v50 = vshll.u32 %v6145_v27, 16  ;;  %v6434_v2 = vshll.u32 %v6146_v32, 16  ;;  %v11492_v53 = vpop.f32.mrb[31].mxu0 }
 0x2f3   : > { %v8809_v57 = vcombine.low %v5790_v36, %v5793_v26  ;;  %v7451_v19 = vor.u32 %v7450_v21, %v7447_v30  ;;  %v7466_v11 = vrot.slane %v7464_v22, 5  ;;  %6935 = vrot.lane.b32.xlu1 %v8873_v44, %s9359_s13  ;;  %v6427_v15 = vrot.slane %v6425_v51, 4  ;;  %5925 = vst.msk [vmem:[#allocation4 + $0x30] sm:$0xff] %vm5918_vm15, %v11360_v40  ;;  %v11499_v31 = vld [vmem:[%s12024_s2] ss:$0 sm:$0xff]  ;;  %v7643_v55 = vpop.permute.xlu1 %7642  ;;  %v11520_v21 = vpop.permute.xlu0 %5886 }
 0x2f4   : > { %v7461_v58 = vor.u32 %v7460_v45, %v7456_v3  ;;  %v6430_v59 = vrot.slane %v6428_v50, 5  ;;  %v6438_v60 = vshrl.u32 %v6146_v32, 16  ;;  %v6436_v29 = vrot.slane %v6434_v2, 5  ;;  %6102 = vst.msk [vmem:[#allocation4 + $0x30] sm:$0xff] %vm6095_vm5, %v11442_v5  ;;  %v461_v33 = vld [vmem:[#allocation3 + $0xc8] sm:$0x1] }
 0x2f5   : > { %v7452_v8 = vrot.slane %v7451_v19, 4  ;;  %v6444_v42 = vshll.u32 %v6147_v47, 16  ;;  %v407_v63 = vsel %vm10612_vm12, 0, %v406_v25  ;;  %v4291_v18 = vadd.f32 %v11499_v31, %v9079_v43  ;;  %v6142_v5 = vld [vmem:[#allocation3 + $0x84] sm:$0xf]  ;;  %7688 = vst.msk [vmem:[#allocation4 + $0x18] sm:$0xff] %vm7684_vm10, %v7643_v55 }
 0x2f6   : > { %v7462_v12 = vrot.slane %v7461_v58, 4  ;;  %v6431_v48 = vor.u32 %v6430_v59, %v6427_v15  ;;  %v6440_v35 = vrot.slane %v6438_v60, 4  ;;  %408 = vst [vmem:[#allocation3 + $0xc0] sm:$0x1] %v407_v63  ;;  %v404_v40 = vsel %vm10612_vm12, 0, %v403_v54  ;;  %8009 = vst.msk [vmem:[#allocation4 + $0x18] sm:$0xff] %vm12038_vm1, %v11378_v9 }
 0x2f7   : > { %v7457_v44 = vsel %vm9562_vm14, %v7452_v8, %v7456_v3  ;;  %v6446_v23 = vrot.slane %v6444_v42, 5  ;;  %v4283_v6 = vadd.f32 %v11499_v31, %v4282_v46  ;;  %5892 = vrot.lane.b32.xlu1 %v8809_v57, %s9356_s16  ;;  %vm4327_vm11 = vcmp.gt.f32.partialorder %v4291_v18, 0.0  ;;  %405 = vst [vmem:[#allocation3 + $0xb4] sm:$0x1] %v404_v40  ;;  %v6143_v51 = vld [vmem:[#allocation3 + $0x88] sm:$0xf] }
 0x2f8   : > { %v7467_v34 = vsel %vm9562_vm14, %v7462_v12, %v7466_v11  ;;  %v6432_v13 = vrot.slane %v6431_v48, 4  ;;  %v6441_v62 = vor.u32 %v6440_v35, %v6436_v29  ;;  %v4359_v14 = vmul.f32 0.01, %v4291_v18  ;;  %v6144_v57 = vld [vmem:[#allocation3 + $0x8c] sm:$0x1] }
 0x2f9   : > { %v8904_v27 = vcombine.low %v7457_v44, %v7467_v34  ;;  %vm4325_vm6 = vcmp.gt.f32.partialorder %v4283_v6, 0.0  ;;  %v4357_v36 = vmul.f32 0.01, %v4283_v6  ;;  %v462_v32 = vsel %vm10641_vm3, 0, %v461_v33  ;;  %v458_v15 = vld [vmem:[#allocation3 + $0xbc] sm:$0x1] }
 0x2fa   : > { %v6437_v56 = vsel %vm9562_vm14, %v6432_v13, %v6436_v29  ;;  %v6442_v7 = vrot.slane %v6441_v62, 4  ;;  %v4294_v30 = vadd.f32 %v11499_v31, %v9080_v0  ;;  %v4391_v3 = vsel %vm4327_vm11, %v4291_v18, %v4359_v14  ;;  %463 = vst [vmem:[#allocation3 + $0xc8] sm:$0x1] %v462_v32  ;;  %v5560_v59 = vpop.permute.xlu1 %5559  ;;  %v9260_v18 = vld [vmem:[#allocation3 + $0x9c] sm:$0xff]   ;;  %v11533_v44 = vld [vmem:[%s12025_s3 + $0x20] ss:$0 sps:$4 sm:$0xff]  }
 0x2fb   : > { %7656 = vrot.lane.b32.xlu0 %v8904_v27, %s9361_s17  ;;  %v4389_v22 = vsel %vm4325_vm6, %v4283_v6, %v4357_v36  ;;  %v6401_v25 = vshrl.u32 %v6142_v5, 16  ;;  %v6404_v26 = vshll.u32 %v6142_v5, 16  ;;  %v9000_v45 = vpack.c.bf16 %v4391_v3, %v4391_v3  ;;  %5603 = vst.msk [vmem:[#allocation4 + $0x28] sm:$0xff] %vm5597_vm2, %v5560_v59  ;;  %v7734_v27 = vld [vmem:[#allocation3 + $0x9c] sm:$0xe] }
 0x2fc   : > { %v6447_v9 = vsel %vm9562_vm14, %v6442_v7, %v6446_v23  ;;  %v8998_v47 = vpack.c.bf16 %v4389_v22, %v4389_v22  ;;  %vm4328_vm1 = vcmp.gt.f32.partialorder %v4294_v30, 0.0  ;;  %v4360_v43 = vmul.f32 0.01, %v4294_v30  ;;  %5924 = vst.msk [vmem:[#allocation4 + $0x28] sm:$0xff] %vm5918_vm15, %v11417_v17  ;;  %v11537_v23 = vpop.permute.xlu0 %7967  ;;  %v7736_v7 = vld [vmem:[#allocation3 + $0xa4] sm:$0x1] }
 0x2fd   : > { %v8841_v50 = vcombine.low %v6437_v56, %v6447_v9  ;;  %v6403_v19 = vrot.slane %v6401_v25, 4  ;;  %v6406_v11 = vrot.slane %v6404_v26, 5  ;;  %v4745_v2 = vshrl.u32 %v9000_v45, 16  ;;  %v4917_v60 = vld [vmem:[#allocation3 + $0xc0] sm:$0xf]  ;;  %6101 = vst.msk [vmem:[#allocation4 + $0x28] sm:$0xff] %vm6095_vm5, %v11263_v61 }
 0x2fe   : > { %v4748_v46 = vshll.u32 %v9000_v45, 16  ;;  %v4728_v49 = vshrl.u32 %v8998_v47, 16  ;;  %v4731_v58 = vshll.u32 %v8998_v47, 16  ;;  %v4910_v54 = vld [vmem:[#allocation3 + $0xb4] sm:$0xf]  ;;  %v4392_v0 = vsel %vm4328_vm1, %v4294_v30, %v4360_v43  ;;  %6646 = vst.msk [vmem:[#allocation4 + $0x28] sm:$0xff] %vm6640_vm4, %v11447_v37 }
 0x2ff   : > { %6614 = vrot.lane.b32.xlu1 %v8841_v50, %s9355_s15  ;;  %v6407_v8 = vor.u32 %v6406_v11, %v6403_v19  ;;  %v6410_v29 = vshll.u32 %v6143_v51, 16  ;;  %v6414_v42 = vshrl.u32 %v6143_v51, 16  ;;  %v4747_v63 = vrot.slane %v4745_v2, 7  ;;  %v7735_v61 = vld [vmem:[#allocation3 + $0xa0] sm:$0xf]  ;;  %6967 = vst.msk [vmem:[#allocation4 + $0x28] sm:$0xff] %vm6961_vm0, %v11405_v39  ;;  %v11562_v51 = vpop.permute.xlu1 %6927 }
 0x300   : > { %v11528_v12 = vrot.slane %v4728_v49, 7  ;;  %v9001_v48 = vpack.c.bf16 %v4392_v0, %v4392_v0  ;;  %v6420_v35 = vshll.u32 %v6144_v57, 16  ;;  %v459_v55 = vsel %vm10641_vm3, 0, %v458_v15  ;;  %v5105_v22 = vld [vmem:[#allocation3 + $0x90] sm:$0xf] }
 0x301   : > { %v6408_v40 = vrot.slane %v6407_v8, 4  ;;  %v6412_v6 = vrot.slane %v6410_v29, 5  ;;  %v6416_v33 = vrot.slane %v6414_v42, 4  ;;  %v4750_v34 = vor.u32 %v4748_v46, %v4747_v63  ;;  %460 = vst [vmem:[#allocation3 + $0xbc] sm:$0x1] %v459_v55 }
 0x302   : > { %v4751_v13 = vrot.slane %v4747_v63, 4  ;;  %v4733_v62 = vor.u32 %v4731_v58, %v11528_v12  ;;  %v4734_v5 = vrot.slane %v11528_v12, 4  ;;  %v4753_v17 = vshrl.u32 %v9001_v48, 16  ;;  %v4921_v26 = vld [vmem:[#allocation3 + $0xc8] sm:$0x1] }
 0x303   : > { %v4756_v14 = vshll.u32 %v9001_v48, 16  ;;  %v6413_v36 = vsel %vm9562_vm14, %v6408_v40, %v6412_v6  ;;  %v6417_v56 = vor.u32 %v6416_v33, %v6412_v6  ;;  %7113 = vrot.lane.b32.xlu1 %v9260_v18, %s9358_s10  ;;  %v4918_v32 = vsel %vm10740_vm9, %v4750_v34, %v4917_v60  ;;  %v5106_v43 = vld [vmem:[#allocation3 + $0x94] sm:$0xf]  ;;  %v5107_v49 = vld [vmem:[#allocation3 + $0x98] sm:$0x1] }
 0x304   : > { %v4911_v30 = vsel %vm10740_vm9, %v4733_v62, %v4910_v54  ;;  %v6422_v37 = vrot.slane %v6420_v35, 5  ;;  %v4286_v3 = vadd.f32 %v11499_v31, %v11492_v53  ;;  %vm12093_vm1 = vcmask 458112   ;;  %4919 = vst [vmem:[#allocation3 + $0xc0] sm:$0xf] %v4918_v32  ;;  %v11564_v53 = vpop.permute.xlu0 %6925  ;;  %v7183_v42 = vld [vmem:[#allocation3 + $0x84] sm:$0xf] }
 0x305   : > { %7145 = vst.msk [vmem:[#allocation4 + $0x28] sm:$0xff] %vm12093_vm1, %v11466_v28  ;;  %4912 = vst [vmem:[#allocation3 + $0xb4] sm:$0xf] %v4911_v30  ;;  %v4755_v25 = vrot.slane %v4753_v17, 7  ;;  %v6418_v9 = vrot.slane %v6417_v56, 4  ;;  %vm8130_vm11 = vcmask 1043456  }
 0x306   : > { %v8921_v39 = vrot.slane %v7734_v27, 9  ;;  %vm4326_vm6 = vcmp.gt.f32.partialorder %v4286_v3, 0.0  ;;  %v4358_v45 = vmul.f32 0.01, %v4286_v3  ;;  %9124 = vmatprep.subr.msk.bf16.mxu1 %vm8130_vm11, %v11533_v44  ;;  %v7876_v10 = vrot.slane %v7735_v61, 5  ;;  %v8023_v62 = vld [vmem:[#allocation4 + $0x8] sm:$0xff]  ;;  %v11580_v27 = vpop.permute.xlu1 %5884 }
 0x307   : > { %v7879_v47 = vrot.slane %v7736_v7, 5  ;;  %v4758_v31 = vor.u32 %v4756_v14, %v4755_v25  ;;  %v4760_v28 = vrot.slane %v4755_v25, 4  ;;  %v6423_v50 = vsel %vm9562_vm14, %v6418_v9, %v6422_v37  ;;  %v7184_v40 = vld [vmem:[#allocation3 + $0x88] sm:$0xf]  ;;  %v6150_v12 = vld [vmem:[#allocation3 + $0xa4] sm:$0x1] }
 0x308   : > { %v5406_v57 = vshrl.u32 %v5105_v22, 16  ;;  %v8840_v19 = vcombine.low %v6413_v36, %v6423_v50  ;;  %v4390_v11 = vsel %vm4326_vm6, %v4286_v3, %v4358_v45  ;;  %v7877_v2 = vsel %vm9526_vm13, %v8921_v39, %v7876_v10  ;;  %v11582_v17 = vpop.permute.xlu0 %7107  ;;  %v4914_v7 = vld [vmem:[#allocation3 + $0xbc] sm:$0x1]  ;;  %v6149_v50 = vld [vmem:[#allocation3 + $0xa0] sm:$0xf] }
 0x309   : > { %v7878_v46 = vrot.slane %v7876_v10, 4  ;;  %v4759_v58 = vsel %vm9482_vm7, %v4751_v13, %v4758_v31  ;;  %v4922_v15 = vsel %vm10612_vm12, %v4760_v28, %v4921_v26  ;;  %v8999_v59 = vpack.c.bf16 %v4390_v11, %v4390_v11  ;;  %v7185_v13 = vld [vmem:[#allocation3 + $0x8c] sm:$0x1]  ;;  %v9263_v26 = vld [vmem:[#allocation3 + $0x9c] sm:$0xff]  }
 0x30a   : > { %v5408_v60 = vrot.slane %v5406_v57, 4  ;;  %vm12094_vm9 = vcmask 60416   ;;  %4923 = vst [vmem:[#allocation3 + $0xc8] sm:$0x1] %v4922_v15  ;;  %6612 = vrot.lane.b32.xlu0 %v8840_v19, %s9355_s15  ;;  %v5409_v0 = vshll.u32 %v5105_v22, 16  ;;  %v5415_v8 = vshll.u32 %v5106_v43, 16 }
 0x30b   : > { %4920 = vst.msk [vmem:[#allocation3 + $0xc4] sm:$0xf] %vm12094_vm9, %v4759_v58  ;;  %v7880_v54 = vsel %vm9526_vm13, %v7878_v46, %v7879_v47  ;;  %v5419_v29 = vshrl.u32 %v5106_v43, 16  ;;  %v4736_v63 = vshrl.u32 %v8999_v59, 16  ;;  %v4739_v48 = vshll.u32 %v8999_v59, 16  ;;  %v8024_v22 = vld [vmem:[#allocation4 + $0x10] sm:$0xff]  ;;  %vm12095_vm1 = vmmov %vm12094_vm9  ;;  %v11599_v58 = vpop.permute.xlu1 %6065 }
 0x30c   : > { %v8937_v35 = vcombine.low %v7877_v2, %v7880_v54  ;;  %v5425_v18 = vshll.u32 %v5107_v49, 16  ;;  %v5411_v6 = vrot.slane %v5409_v0, 5  ;;  %v5417_v33 = vrot.slane %v5415_v8, 5  ;;  %v6148_v45 = vld [vmem:[#allocation3 + $0x9c] sm:$0xf]  ;;  %v11601_v15 = vpop.permute.xlu0 %7648 }
 0x30d   : > { %v5421_v55 = vrot.slane %v5419_v29, 4  ;;  %v8132_v34 = vsel %vm8130_vm11, %v11533_v44, 0  ;;  %v4738_v14 = vrot.slane %v4736_v63, 7  ;;  %v7421_v56 = vshrl.u32 %v7183_v42, 16  ;;  %v5102_v49 = vld [vmem:[#allocation3 + $0x84] sm:$0xf] }
 0x30e   : > { %v5427_v36 = vrot.slane %v5425_v18, 5  ;;  %9090 = vmatpush3.bf16.msra.mxu1 %v8132_v34  ;;  %v7424_v61 = vshll.u32 %v7183_v42, 16  ;;  %7979 = vrot.lane.b32.xlu0 %v8937_v35, %s9360_s14  ;;  %v5412_v32 = vor.u32 %v5411_v6, %v5408_v60  ;;  %v7430_v37 = vshll.u32 %v7184_v40, 16  ;;  %v5103_v8 = vld [vmem:[#allocation3 + $0x88] sm:$0xf]  ;;  %v8025_v34 = vld [vmem:[#allocation4 + $0x18] sm:$0xff] }
 0x30f   : > { %v5422_v30 = vor.u32 %v5421_v55, %v5417_v33  ;;  %v7434_v3 = vshrl.u32 %v7184_v40, 16  ;;  %v4741_v44 = vor.u32 %v4739_v48, %v4738_v14  ;;  %v4743_v25 = vrot.slane %v4738_v14, 4  ;;  %v5104_v35 = vld [vmem:[#allocation3 + $0x8c] sm:$0x1]  ;;  %v6693_v55 = vld [vmem:[#allocation3 + $0x9c] sm:$0xe] }
 0x310   : > { %v7423_v9 = vrot.slane %v7421_v56, 4  ;;  %v7426_v39 = vrot.slane %v7424_v61, 5  ;;  %v5413_v10 = vrot.slane %v5412_v32, 4  ;;  %v7432_v31 = vrot.slane %v7430_v37, 5  ;;  %v6694_v56 = vld [vmem:[#allocation3 + $0xa0] sm:$0xf] }
 0x311   : > { %v5423_v47 = vrot.slane %v5422_v30, 4  ;;  %v7436_v28 = vrot.slane %v7434_v3, 4  ;;  %9092 = vmatmul.mubr.msk.bf16.vlgmr.msra.gmra.mrb[0].mxu1 %vm8081_vm8, %v8023_v62  ;;  %v4742_v43 = vsel %vm9482_vm7, %v4734_v5, %v4741_v44  ;;  %v4915_v57 = vsel %vm10612_vm12, %v4743_v25, %v4914_v7  ;;  %v6695_v37 = vld [vmem:[#allocation3 + $0xa4] sm:$0x1] }
 0x312   : > { %v7427_v19 = vor.u32 %v7426_v39, %v7423_v9  ;;  %v7440_v11 = vshll.u32 %v7185_v13, 16  ;;  %9095 = vmatprep.mubr.msk.bf16.mxu1 %vm8081_vm8, %v8024_v22  ;;  %4913 = vst.msk [vmem:[#allocation3 + $0xb8] sm:$0xf] %vm12095_vm1, %v4742_v43  ;;  %4916 = vst [vmem:[#allocation3 + $0xbc] sm:$0x1] %v4915_v57  ;;  %v5418_v2 = vsel %vm9562_vm14, %v5413_v10, %v5417_v33  ;;  %6071 = vrot.lane.b32.xlu0 %v9263_v26, %s9352_s12  ;;  %v8026_v39 = vld [vmem:[#allocation4 + $0x20] sm:$0xff]  ;;  %v11611_v10 = vpop.permute.xlu0 %6063 }
 0x313   : > { %v5428_v46 = vsel %vm9562_vm14, %v5423_v47, %v5427_v36  ;;  %v7437_v16 = vor.u32 %v7436_v28, %v7432_v31  ;;  %v6449_v5 = vshrl.u32 %v6148_v45, 16  ;;  %v6452_v0 = vshll.u32 %v6148_v45, 16  ;;  %v5653_v26 = vld [vmem:[#allocation3 + $0x9c] sm:$0xe]  ;;  %v5654_v9 = vld [vmem:[#allocation3 + $0xa0] sm:$0xf]  ;;  %v11609_v45 = vpop.permute.xlu1 %6606 }
 0x314   : > { %v8778_v59 = vcombine.low %v5418_v2, %v5428_v46  ;;  %v7428_v60 = vrot.slane %v7427_v19, 4  ;;  %v7442_v54 = vrot.slane %v7440_v11, 5  ;;  %v6458_v63 = vshll.u32 %v6149_v50, 16  ;;  %v5655_v43 = vld [vmem:[#allocation3 + $0xa4] sm:$0x1] }
 0x315   : > { %v7438_v29 = vrot.slane %v7437_v16, 4  ;;  %v6451_v42 = vrot.slane %v6449_v5, 4  ;;  %v6462_v48 = vshrl.u32 %v6149_v50, 16  ;;  %v6454_v40 = vrot.slane %v6452_v0, 5  ;;  %v7192_v46 = vld [vmem:[#allocation3 + $0xa8] sm:$0xf] }
 0x316   : > { %5573 = vrot.lane.b32.xlu1 %v8778_v59, %s9351_s11  ;;  %v7433_v18 = vsel %vm9562_vm14, %v7428_v60, %v7432_v31  ;;  %v6468_v6 = vshll.u32 %v6150_v12, 16  ;;  %v5382_v33 = vshrl.u32 %v5102_v49, 16  ;;  %v6460_v62 = vrot.slane %v6458_v63, 5  ;;  %v9272_v20 = vld [vmem:[#allocation3 + $0xc0] sm:$0xff]  }
 0x317   : > { %v7443_v13 = vsel %vm9562_vm14, %v7438_v29, %v7442_v54  ;;  %v6464_v14 = vrot.slane %v6462_v48, 4  ;;  %v5385_v36 = vshll.u32 %v5102_v49, 16  ;;  %v6455_v7 = vor.u32 %v6454_v40, %v6451_v42 }
 0x318   : > { %v8903_v61 = vcombine.low %v7433_v18, %v7443_v13  ;;  %v6470_v32 = vrot.slane %v6468_v6, 5  ;;  %v5384_v30 = vrot.slane %v5382_v33, 4  ;;  %v5391_v44 = vshll.u32 %v5103_v8, 16  ;;  %v7194_v33 = vld [vmem:[#allocation3 + $0xb0] sm:$0x1] }
 0x319   : > { %v6465_v3 = vor.u32 %v6464_v14, %v6460_v62  ;;  %v5387_v22 = vrot.slane %v5385_v36, 5  ;;  %v5395_v25 = vshrl.u32 %v5103_v8, 16  ;;  %9096 = vmatmul.mubr.msk.bf16.gmra.mrb[4].mxu1 %vm8081_vm8, %v8025_v34  ;;  %v6456_v47 = vrot.slane %v6455_v7, 4  ;;  %v9281_v8 = vld [vmem:[#allocation3 + $0xb4] sm:$0xff]   ;;  %v11625_v34 = vpop.permute.xlu1 %7105  ;;  %v7190_v7 = vld [vmem:[#allocation3 + $0xa0] sm:$0xf] }
 0x31a   : > { %7654 = vrot.lane.b32.xlu1 %v8903_v61, %s9361_s17  ;;  %v5401_v31 = vshll.u32 %v5104_v35, 16  ;;  %v8858_v28 = vrot.slane %v6693_v55, 9  ;;  %v6839_v50 = vrot.slane %v6694_v56, 5  ;;  %9099 = vmatprep.mubr.msk.bf16.mxu1 %vm8081_vm8, %v8026_v39  ;;  %v5393_v11 = vrot.slane %v5391_v44, 5  ;;  %v7193_v35 = vld [vmem:[#allocation3 + $0xac] sm:$0xf]  ;;  %v6605_v13 = vpop.permute.xlu0 %6604 }
 0x31b   : > { %v6466_v57 = vrot.slane %v6465_v3, 4  ;;  %v5388_v19 = vor.u32 %v5387_v22, %v5384_v30  ;;  %v5397_v2 = vrot.slane %v5395_v25, 4  ;;  %v6461_v16 = vsel %vm9562_vm14, %v6456_v47, %v6460_v62  ;;  %v7189_v61 = vld [vmem:[#allocation3 + $0x9c] sm:$0xf]  ;;  %6647 = vst.msk [vmem:[#allocation4 + $0x30] sm:$0xff] %vm6640_vm4, %v6605_v13 }
 0x31c   : > { %v5403_v12 = vrot.slane %v5401_v31, 5  ;;  %v6840_v5 = vsel %vm9526_vm13, %v8858_v28, %v6839_v50  ;;  %v6841_v49 = vrot.slane %v6839_v50, 4  ;;  %v6842_v0 = vrot.slane %v6695_v37, 5  ;;  %v7191_v22 = vld [vmem:[#allocation3 + $0xa4] sm:$0x1]  ;;  %6968 = vst.msk [vmem:[#allocation4 + $0x30] sm:$0xff] %vm6961_vm0, %v11564_v53 }
 0x31d   : > { %v6471_v59 = vsel %vm9562_vm14, %v6466_v57, %v6470_v32  ;;  %v5389_v60 = vrot.slane %v5388_v19, 4  ;;  %v5398_v54 = vor.u32 %v5397_v2, %v5393_v11  ;;  %v8795_v42 = vrot.slane %v5653_v26, 9  ;;  %v7737_v39 = vld [vmem:[#allocation3 + $0xa8] sm:$0xe]  ;;  %v7738_v47 = vld [vmem:[#allocation3 + $0xac] sm:$0xf] }
 0x31e   : > { %v8842_v29 = vcombine.low %v6461_v16, %v6471_v59  ;;  %v5803_v63 = vrot.slane %v5654_v9, 5  ;;  %v5806_v48 = vrot.slane %v5655_v43, 5  ;;  %v6843_v6 = vsel %vm9526_vm13, %v6841_v49, %v6842_v0  ;;  %v7739_v57 = vld [vmem:[#allocation3 + $0xb0] sm:$0x1]  ;;  %v9264_v59 = vld [vmem:[#allocation3 + $0xa8] sm:$0xff]  }
 0x31f   : > { %v5394_v18 = vsel %vm9562_vm14, %v5389_v60, %v5393_v11  ;;  %v5399_v40 = vrot.slane %v5398_v54, 4  ;;  %v7493_v55 = vshrl.u32 %v7192_v46, 16  ;;  %vm12096_vm7 = vcmask 64512   ;;  %v9265_v60 = vld [vmem:[#allocation3 + $0xa8] sm:$0xff]  }
 0x320   : > { %5068 = vst.msk [vmem:[#allocation4 + $0x78] sm:$0xff] %vm12096_vm7, %v9281_v8  ;;  %6616 = vrot.lane.b32.xlu0 %v8842_v29, %s9355_s15  ;;  %v8874_v62 = vcombine.low %v6840_v5, %v6843_v6  ;;  %v11631_v14 = vsel %vm9526_vm13, %v8795_v42, %v5803_v63  ;;  %v5805_v36 = vrot.slane %v5803_v63, 4  ;;  %v7496_v56 = vshll.u32 %v7192_v46, 16  ;;  %v5108_v5 = vld [vmem:[#allocation3 + $0x9c] sm:$0xf]  ;;  %v5566_v49 = vpop.permute.xlu1 %5565 }
 0x321   : > { %v5404_v32 = vsel %vm9562_vm14, %v5399_v40, %v5403_v12  ;;  %v7495_v30 = vrot.slane %v7493_v55, 4  ;;  %v7502_v37 = vshll.u32 %v7193_v35, 16  ;;  %v7506_v3 = vshrl.u32 %v7193_v35, 16  ;;  %5606 = vst.msk [vmem:[#allocation4 + $0x40] sm:$0xff] %vm5597_vm2, %v5566_v49  ;;  %v5109_v40 = vld [vmem:[#allocation3 + $0xa0] sm:$0xf] }
 0x322   : > { %v8777_v44 = vcombine.low %v5394_v18, %v5404_v32  ;;  %v11640_v25 = vsel %vm9526_vm13, %v5805_v36, %v5806_v48  ;;  %v7498_v26 = vrot.slane %v7496_v56, 5  ;;  %v7512_v9 = vshll.u32 %v7194_v33, 16  ;;  %5927 = vst.msk [vmem:[#allocation4 + $0x40] sm:$0xff] %vm5918_vm15, %v11520_v21  ;;  %v5110_v6 = vld [vmem:[#allocation3 + $0xa4] sm:$0x1]  ;;  %v11665_v36 = vpop.permute.xlu0 %7973 }
 0x323   : > { %vm12097_vm11 = vcmask 458112   ;;  %v8811_v31 = vcombine.low %v11631_v14, %v11640_v25  ;;  %v7504_v28 = vrot.slane %v7502_v37, 5  ;;  %v7508_v50 = vrot.slane %v7506_v3, 4  ;;  %6104 = vst.msk [vmem:[#allocation4 + $0x40] sm:$0xff] %vm6095_vm5, %v11611_v10  ;;  %v7740_v14 = vld [vmem:[#allocation3 + $0xb4] sm:$0xe] }
 0x324   : > { %7146 = vst.msk [vmem:[#allocation4 + $0x30] sm:$0xff] %vm12097_vm11, %v11415_v1  ;;  %v7469_v43 = vshrl.u32 %v7189_v61, 16  ;;  %5571 = vrot.lane.b32.xlu1 %v8777_v44, %s9351_s11  ;;  %6937 = vrot.lane.b32.xlu0 %v8874_v62, %s9359_s13  ;;  %v7499_v53 = vor.u32 %v7498_v26, %v7495_v30  ;;  %v7514_v19 = vrot.slane %v7512_v9, 5  ;;  %v7472_v11 = vshll.u32 %v7189_v61, 16  ;;  %v7741_v44 = vld [vmem:[#allocation3 + $0xb8] sm:$0xf]  ;;  %vm12100_vm1 = vmmov %vm12097_vm11 }
 0x325   : > { %7691 = vst.msk [vmem:[#allocation4 + $0x30] sm:$0xff] %vm7684_vm10, %v11601_v15  ;;  %v7478_v2 = vshll.u32 %v7190_v7, 16  ;;  %vm12098_vm6 = vcmask 589312   ;;  %v7509_v1 = vor.u32 %v7508_v50, %v7504_v28  ;;  %v7482_v16 = vshrl.u32 %v7190_v7, 16  ;;  %v7647_v30 = vpop.permute.xlu1 %7646  ;;  %vm12101_vm7 = vmmov %vm12100_vm1 }
 0x326   : > { %8012 = vst.msk [vmem:[#allocation4 + $0x30] sm:$0xff] %vm12098_vm6, %v11488_v52  ;;  %v7471_v46 = vrot.slane %v7469_v43, 4  ;;  %v7488_v12 = vshll.u32 %v7191_v22, 16  ;;  %v7500_v15 = vrot.slane %v7499_v53, 4  ;;  %v7474_v54 = vrot.slane %v7472_v11, 5  ;;  %vm12099_vm9 = vmmov %vm12098_vm6 }
 0x327   : > { %v7480_v0 = vrot.slane %v7478_v2, 5  ;;  %v8922_v8 = vrot.slane %v7737_v39, 9  ;;  %v7510_v29 = vrot.slane %v7509_v1, 4  ;;  %v7484_v42 = vrot.slane %v7482_v16, 4  ;;  %7690 = vst.msk [vmem:[#allocation4 + $0x28] sm:$0xff] %vm7684_vm10, %v7647_v30  ;;  %vm12102_vm11 = vmmov %vm12098_vm6 }
 0x328   : > { %v7490_v63 = vrot.slane %v7488_v12, 5  ;;  %v7883_v48 = vrot.slane %v7738_v47, 5  ;;  %6073 = vrot.lane.b32.xlu1 %v9264_v59, %s9352_s12  ;;  %7115 = vrot.lane.b32.xlu0 %v9265_v60, %s9358_s10  ;;  %v7505_v52 = vsel %vm9562_vm14, %v7500_v15, %v7504_v28  ;;  %v7475_v35 = vor.u32 %v7474_v54, %v7471_v46  ;;  %v7742_v47 = vld [vmem:[#allocation3 + $0xbc] sm:$0x1]  ;;  %v6151_v28 = vld [vmem:[#allocation3 + $0xa8] sm:$0xf]  ;;  %v11678_v59 = vpop.permute.xlu0 %5890 }
 0x329   : > { %v7886_v18 = vrot.slane %v7739_v57, 5  ;;  %v5430_v33 = vshrl.u32 %v5108_v5, 16  ;;  %v7515_v55 = vsel %vm9562_vm14, %v7510_v29, %v7514_v19  ;;  %v7485_v13 = vor.u32 %v7484_v42, %v7480_v0  ;;  %8011 = vst.msk [vmem:[#allocation4 + $0x28] sm:$0xff] %vm12099_vm9, %v11537_v23  ;;  %v6153_v12 = vld [vmem:[#allocation3 + $0xb0] sm:$0x1]  ;;  %vm12107_vm9 = vmmov %vm12100_vm1 }
 0x32a   : > { %v7884_v21 = vsel %vm9526_vm13, %v8922_v8, %v7883_v48  ;;  %v7885_v62 = vrot.slane %v7883_v48, 4  ;;  %v8906_v56 = vcombine.low %v7505_v52, %v7515_v55  ;;  %v7476_v61 = vrot.slane %v7475_v35, 4  ;;  %v5657_v52 = vld [vmem:[#allocation3 + $0xac] sm:$0xf]  ;;  %v6696_v55 = vld [vmem:[#allocation3 + $0xa8] sm:$0xe] }
 0x32b   : > { %v5432_v7 = vrot.slane %v5430_v33, 4  ;;  %v5433_v32 = vshll.u32 %v5108_v5, 16  ;;  %v7486_v37 = vrot.slane %v7485_v13, 4  ;;  %v5439_v3 = vshll.u32 %v5109_v40, 16  ;;  %v5564_v8 = vpop.permute.xlu1 %5563  ;;  %v5658_v33 = vld [vmem:[#allocation3 + $0xb0] sm:$0x1] }
 0x32c   : > { %v7887_v10 = vsel %vm9526_vm13, %v7885_v62, %v7886_v18  ;;  %v5443_v22 = vshrl.u32 %v5109_v40, 16  ;;  %5896 = vrot.lane.b32.xlu1 %v8811_v31, %s9356_s16  ;;  %7660 = vrot.lane.b32.xlu0 %v8906_v56, %s9361_s17  ;;  %v7481_v25 = vsel %vm9562_vm14, %v7476_v61, %v7480_v0  ;;  %v5449_v39 = vshll.u32 %v5110_v6, 16  ;;  %v6152_v31 = vld [vmem:[#allocation3 + $0xac] sm:$0xf]  ;;  %v5656_v0 = vld [vmem:[#allocation3 + $0xa8] sm:$0xe] }
 0x32d   : > { %v8938_v26 = vcombine.low %v7884_v21, %v7887_v10  ;;  %v5435_v9 = vrot.slane %v5433_v32, 5  ;;  %v7491_v50 = vsel %vm9562_vm14, %v7486_v37, %v7490_v63  ;;  %v5441_v43 = vrot.slane %v5439_v3, 5  ;;  %5605 = vst.msk [vmem:[#allocation4 + $0x38] sm:$0xff] %vm5597_vm2, %v5564_v8  ;;  %v6697_v56 = vld [vmem:[#allocation3 + $0xac] sm:$0xf] }
 0x32e   : > { %v5445_v57 = vrot.slane %v5443_v22, 4  ;;  %v8923_v53 = vrot.slane %v7740_v14, 9  ;;  %v8905_v19 = vcombine.low %v7481_v25, %v7491_v50  ;;  %v5451_v2 = vrot.slane %v5449_v39, 5  ;;  %5926 = vst.msk [vmem:[#allocation4 + $0x38] sm:$0xff] %vm5918_vm15, %v11580_v27  ;;  %v6698_v61 = vld [vmem:[#allocation3 + $0xb0] sm:$0x1] }
 0x32f   : > { %v5436_v11 = vor.u32 %v5435_v9, %v5432_v7  ;;  %v7890_v1 = vrot.slane %v7741_v44, 5  ;;  %v7893_v16 = vrot.slane %v7742_v47, 5  ;;  %v6473_v5 = vshrl.u32 %v6151_v28, 16  ;;  %6103 = vst.msk [vmem:[#allocation4 + $0x38] sm:$0xff] %vm6095_vm5, %v11430_v38  ;;  %v6154_v3 = vld [vmem:[#allocation3 + $0xb4] sm:$0xf]  ;;  %v11701_v38 = vpop.permute.xlu0 %7971 }
 0x330   : > { %v5446_v46 = vor.u32 %v5445_v57, %v5441_v43  ;;  %v6476_v49 = vshll.u32 %v6151_v28, 16  ;;  %7658 = vrot.lane.b32.xlu1 %v8905_v19, %s9361_s17  ;;  %7981 = vrot.lane.b32.xlu0 %v8938_v26, %s9360_s14  ;;  %v6482_v54 = vshll.u32 %v6152_v31, 16  ;;  %v6486_v48 = vshrl.u32 %v6152_v31, 16  ;;  %v8027_v7 = vld [vmem:[#allocation4 + $0x28] sm:$0xff]  ;;  %6648 = vst.msk [vmem:[#allocation4 + $0x38] sm:$0xff] %vm6640_vm4, %v11609_v45  ;;  %v8028_v27 = vld [vmem:[#allocation4 + $0x30] sm:$0xff] }
 0x331   : > { %v5437_v23 = vrot.slane %v5436_v11, 4  ;;  %v7891_v60 = vsel %vm9526_vm13, %v8923_v53, %v7890_v1  ;;  %v7892_v15 = vrot.slane %v7890_v1, 4  ;;  %v6475_v42 = vrot.slane %v6473_v5, 4  ;;  %9100 = vmatmul.mubr.msk.bf16.gmra.mrb[8].mxu1 %vm8081_vm8, %v8027_v7  ;;  %v6155_v9 = vld [vmem:[#allocation3 + $0xb8] sm:$0xf]  ;;  %6969 = vst.msk [vmem:[#allocation4 + $0x38] sm:$0xff] %vm6961_vm0, %v11562_v51 }
 0x332   : > { %v5447_v29 = vrot.slane %v5446_v46, 4  ;;  %v6478_v63 = vrot.slane %v6476_v49, 5  ;;  %v6484_v40 = vrot.slane %v6482_v54, 5  ;;  %v6492_v6 = vshll.u32 %v6153_v12, 16  ;;  %9103 = vmatprep.mubr.msk.bf16.mxu1 %vm8081_vm8, %v8028_v27  ;;  %7147 = vst.msk [vmem:[#allocation4 + $0x38] sm:$0xff] %vm12100_vm1, %v11625_v34 }
 0x333   : > { %v5442_v35 = vsel %vm9562_vm14, %v5437_v23, %v5441_v43  ;;  %v7894_v18 = vsel %vm9526_vm13, %v7892_v15, %v7893_v16  ;;  %v6488_v14 = vrot.slane %v6486_v48, 4  ;;  %v8796_v37 = vrot.slane %v5656_v0, 9  ;;  %v6156_v11 = vld [vmem:[#allocation3 + $0xbc] sm:$0x1]  ;;  %v7195_v1 = vld [vmem:[#allocation3 + $0xb4] sm:$0xf]  ;;  %v11719_v0 = vpop.permute.xlu1 %6931 }
 0x334   : > { %v5452_v13 = vsel %vm9562_vm14, %v5447_v29, %v5451_v2  ;;  %v8939_v21 = vcombine.low %v7891_v60, %v7894_v18  ;;  %v6479_v62 = vor.u32 %v6478_v63, %v6475_v42  ;;  %v6494_v30 = vrot.slane %v6492_v6, 5  ;;  %v7196_v5 = vld [vmem:[#allocation3 + $0xb8] sm:$0xf]  ;;  %v7197_v54 = vld [vmem:[#allocation3 + $0xbc] sm:$0x1] }
 0x335   : > { %v8779_v32 = vcombine.low %v5442_v35, %v5452_v13  ;;  %v5810_v10 = vrot.slane %v5657_v52, 5  ;;  %v6489_v44 = vor.u32 %v6488_v14, %v6484_v40  ;;  %v5813_v25 = vrot.slane %v5658_v33, 5  ;;  %v9268_v29 = vld [vmem:[#allocation3 + $0xb4] sm:$0xff]   ;;  %v11722_v35 = vpop.permute.xlu0 %6929 }
 0x336   : > { %7983 = vrot.lane.b32.xlu0 %v8939_v21, %s9360_s14  ;;  %v6480_v22 = vrot.slane %v6479_v62, 4  ;;  %v8859_v26 = vrot.slane %v6696_v55, 9  ;;  %v6846_v47 = vrot.slane %v6697_v56, 5  ;;  %v6849_v28 = vrot.slane %v6698_v61, 5  ;;  %v6699_v52 = vld [vmem:[#allocation3 + $0xb4] sm:$0xe] }
 0x337   : > { %5575 = vrot.lane.b32.xlu1 %v8779_v32, %s9351_s11  ;;  %v5811_v45 = vsel %vm9526_vm13, %v8796_v37, %v5810_v10  ;;  %v5812_v39 = vrot.slane %v5810_v10, 4  ;;  %v6490_v43 = vrot.slane %v6489_v44, 4  ;;  %v6497_v51 = vshrl.u32 %v6154_v3, 16  ;;  %v6700_v55 = vld [vmem:[#allocation3 + $0xb8] sm:$0xf] }
 0x338   : > { %v6485_v50 = vsel %vm9562_vm14, %v6480_v22, %v6484_v40  ;;  %v6500_v57 = vshll.u32 %v6154_v3, 16  ;;  %v6847_v31 = vsel %vm9526_vm13, %v8859_v26, %v6846_v47  ;;  %v6848_v19 = vrot.slane %v6846_v47, 4  ;;  %v6701_v56 = vld [vmem:[#allocation3 + $0xbc] sm:$0x1]  ;;  %v5111_v37 = vld [vmem:[#allocation3 + $0xa8] sm:$0xf] }
 0x339   : > { %v5814_v53 = vsel %vm9526_vm13, %v5812_v39, %v5813_v25  ;;  %v6506_v2 = vshll.u32 %v6155_v9, 16  ;;  %v6495_v46 = vsel %vm9562_vm14, %v6490_v43, %v6494_v30  ;;  %v6499_v16 = vrot.slane %v6497_v51, 4  ;;  %v5112_v22 = vld [vmem:[#allocation3 + $0xac] sm:$0xf]  ;;  %v11731_v43 = vpop.permute.xlu0 %7111  ;;  %v9269_v51 = vld [vmem:[#allocation3 + $0xb4] sm:$0xff]  }
 0x33a   : > { %v8812_v34 = vcombine.low %v5811_v45, %v5814_v53  ;;  %v6502_v12 = vrot.slane %v6500_v57, 5  ;;  %v8843_v49 = vcombine.low %v6485_v50, %v6495_v46  ;;  %v6850_v23 = vsel %vm9526_vm13, %v6848_v19, %v6849_v28  ;;  %v11727_v45 = vpop.permute.xlu1 %5888  ;;  %v5113_v19 = vld [vmem:[#allocation3 + $0xb0] sm:$0x1] }
 0x33b   : > { %v6508_v60 = vrot.slane %v6506_v2, 5  ;;  %v6510_v15 = vshrl.u32 %v6155_v9, 16  ;;  %v8875_v8 = vcombine.low %v6847_v31, %v6850_v23  ;;  %v6516_v63 = vshll.u32 %v6156_v11, 16 }
 0x33c   : > { %5898 = vrot.lane.b32.xlu0 %v8812_v34, %s9356_s16  ;;  %v6503_v42 = vor.u32 %v6502_v12, %v6499_v16  ;;  %v7517_v48 = vshrl.u32 %v7195_v1, 16  ;;  %6618 = vrot.lane.b32.xlu1 %v8843_v49, %s9355_s15  ;;  %v7520_v40 = vshll.u32 %v7195_v1, 16  ;;  %v7526_v6 = vshll.u32 %v7196_v5, 16  ;;  %v5114_v16 = vld [vmem:[#allocation3 + $0xb4] sm:$0xf] }
 0x33d   : > { %v6512_v18 = vrot.slane %v6510_v15, 4  ;;  %v7530_v33 = vshrl.u32 %v7196_v5, 16  ;;  %v6518_v21 = vrot.slane %v6516_v63, 5  ;;  %v7536_v14 = vshll.u32 %v7197_v54, 16  ;;  %v5115_v12 = vld [vmem:[#allocation3 + $0xb8] sm:$0xf] }
 0x33e   : > { %v6504_v13 = vrot.slane %v6503_v42, 4  ;;  %v7519_v62 = vrot.slane %v7517_v48, 4  ;;  %v7522_v7 = vrot.slane %v7520_v40, 5  ;;  %v7528_v32 = vrot.slane %v7526_v6, 5  ;;  %v5116_v15 = vld [vmem:[#allocation3 + $0xbc] sm:$0x1]  ;;  %v11745_v6 = vpop.permute.xlu1 %6069 }
 0x33f   : > { %v6513_v61 = vor.u32 %v6512_v18, %v6508_v60  ;;  %v7532_v30 = vrot.slane %v7530_v33, 4  ;;  %v7538_v10 = vrot.slane %v7536_v14, 5  ;;  %v8860_v3 = vrot.slane %v6699_v52, 9  ;;  %v7198_v40 = vld [vmem:[#allocation3 + $0xc0] sm:$0xf]  ;;  %v11747_v14 = vpop.permute.xlu0 %7652 }
 0x340   : > { %6075 = vrot.lane.b32.xlu0 %v9268_v29, %s9352_s12  ;;  %v6853_v27 = vrot.slane %v6700_v55, 5  ;;  %6939 = vrot.lane.b32.xlu1 %v8875_v8, %s9359_s13  ;;  %v7523_v25 = vor.u32 %v7522_v7, %v7519_v62  ;;  %v6856_v9 = vrot.slane %v6701_v56, 5  ;;  %v6509_v39 = vsel %vm9562_vm14, %v6504_v13, %v6508_v60  ;;  %v7199_v62 = vld [vmem:[#allocation3 + $0xc4] sm:$0xf] }
 0x341   : > { %v6514_v44 = vrot.slane %v6513_v61, 4  ;;  %v7533_v26 = vor.u32 %v7532_v30, %v7528_v32  ;;  %v5454_v28 = vshrl.u32 %v5111_v37, 16  ;;  %v5457_v50 = vshll.u32 %v5111_v37, 16  ;;  %v7200_v30 = vld [vmem:[#allocation3 + $0xc8] sm:$0x1] }
 0x342   : > { %v6855_v47 = vrot.slane %v6853_v27, 4  ;;  %v7524_v53 = vrot.slane %v7523_v25, 4  ;;  %v5463_v11 = vshll.u32 %v5112_v22, 16  ;;  %v6854_v1 = vsel %vm9526_vm13, %v8860_v3, %v6853_v27 }
 0x343   : > { %v6519_v57 = vsel %vm9562_vm14, %v6514_v44, %v6518_v21  ;;  %v7534_v31 = vrot.slane %v7533_v26, 4  ;;  %v5456_v46 = vrot.slane %v5454_v28, 4  ;;  %v5459_v34 = vrot.slane %v5457_v50, 5 }
 0x344   : > { %v8844_v2 = vcombine.low %v6509_v39, %v6519_v57  ;;  %7117 = vrot.lane.b32.xlu1 %v9269_v51, %s9358_s10  ;;  %v7529_v5 = vsel %vm9562_vm14, %v7524_v53, %v7528_v32  ;;  %v6857_v23 = vsel %vm9526_vm13, %v6855_v47, %v6856_v9  ;;  %v5465_v60 = vrot.slane %v5463_v11, 5  ;;  %v5659_v39 = vld [vmem:[#allocation3 + $0xb4] sm:$0xe]  ;;  %v5660_v57 = vld [vmem:[#allocation3 + $0xb8] sm:$0xf] }
 0x345   : > { %v7539_v49 = vsel %vm9562_vm14, %v7534_v31, %v7538_v10  ;;  %v5460_v8 = vor.u32 %v5459_v34, %v5456_v46  ;;  %v5467_v29 = vshrl.u32 %v5112_v22, 16  ;;  %v5473_v42 = vshll.u32 %v5113_v19, 16  ;;  %v9270_v22 = vld [vmem:[#allocation3 + $0xc0] sm:$0xff]  }
 0x346   : > { %6620 = vrot.lane.b32.xlu0 %v8844_v2, %s9355_s15  ;;  %v8907_v54 = vcombine.low %v7529_v5, %v7539_v49  ;;  %v5478_v63 = vshrl.u32 %v5114_v16, 16  ;;  %v5481_v48 = vshll.u32 %v5114_v16, 16  ;;  %v5487_v52 = vshll.u32 %v5115_v12, 16  ;;  %v5661_v2 = vld [vmem:[#allocation3 + $0xbc] sm:$0x1] }
 0x347   : > { %v5491_v18 = vshrl.u32 %v5115_v12, 16  ;;  %v8876_v33 = vcombine.low %v6854_v1, %v6857_v23  ;;  %v5461_v55 = vrot.slane %v5460_v8, 4  ;;  %v5469_v13 = vrot.slane %v5467_v29, 4  ;;  %v11751_v1 = vpop.permute.xlu1 %6610  ;;  %v7743_v5 = vld [vmem:[#allocation3 + $0xc0] sm:$0xe]  ;;  %v11758_v23 = vpop.permute.xlu0 %6067 }
 0x348   : > { %v5497_v21 = vshll.u32 %v5116_v15, 16  ;;  %7662 = vrot.lane.b32.xlu1 %v8907_v54, %s9361_s17  ;;  %v5480_v56 = vrot.slane %v5478_v63, 4  ;;  %v5483_v61 = vrot.slane %v5481_v48, 5  ;;  %v5489_v7 = vrot.slane %v5487_v52, 5  ;;  %v7744_v49 = vld [vmem:[#allocation3 + $0xc4] sm:$0xf] }
 0x349   : > { %v5493_v32 = vrot.slane %v5491_v18, 4  ;;  %v5470_v37 = vor.u32 %v5469_v13, %v5465_v60  ;;  %v5475_v10 = vrot.slane %v5473_v42, 5  ;;  %v7541_v27 = vshrl.u32 %v7198_v40, 16  ;;  %v7745_v42 = vld [vmem:[#allocation3 + $0xc8] sm:$0x1] }
 0x34a   : > { %6941 = vrot.lane.b32.xlu0 %v8876_v33, %s9359_s13  ;;  %v5499_v3 = vrot.slane %v5497_v21, 5  ;;  %v5484_v44 = vor.u32 %v5483_v61, %v5480_v56  ;;  %v7544_v26 = vshll.u32 %v7198_v40, 16  ;;  %v7550_v9 = vshll.u32 %v7199_v62, 16  ;;  %v6157_v63 = vld [vmem:[#allocation3 + $0xc0] sm:$0xf] }
 0x34b   : > { %v5494_v25 = vor.u32 %v5493_v32, %v5489_v7  ;;  %v5471_v47 = vrot.slane %v5470_v37, 4  ;;  %v7543_v28 = vrot.slane %v7541_v27, 4  ;;  %v7554_v50 = vshrl.u32 %v7199_v62, 16  ;;  %v6158_v21 = vld [vmem:[#allocation3 + $0xc4] sm:$0xf]  ;;  %v11769_v27 = vpop.permute.xlu1 %7109 }
 0x34c   : > { %v7560_v51 = vshll.u32 %v7200_v30, 16  ;;  %v5485_v53 = vrot.slane %v5484_v44, 4  ;;  %v7546_v19 = vrot.slane %v7544_v26, 5  ;;  %v7552_v11 = vrot.slane %v7550_v9, 5  ;;  %v409_v9 = vld [vmem:[#allocation3 + $0xcc] sm:$0x1] }
 0x34d   : > { %v5495_v31 = vrot.slane %v5494_v25, 4  ;;  %v5466_v46 = vsel %vm9562_vm14, %v5461_v55, %v5465_v60  ;;  %v5476_v34 = vsel %vm9562_vm14, %v5471_v47, %v5475_v10  ;;  %v7556_v16 = vrot.slane %v7554_v50, 4  ;;  %v6159_v10 = vld [vmem:[#allocation3 + $0xc8] sm:$0x1] }
 0x34e   : > { %7119 = vrot.lane.b32.xlu0 %v9270_v22, %s9358_s10  ;;  %v7562_v12 = vrot.slane %v7560_v51, 5  ;;  %v8780_v15 = vcombine.low %v5466_v46, %v5476_v34  ;;  %v7547_v8 = vor.u32 %v7546_v19, %v7543_v28  ;;  %v8797_v29 = vrot.slane %v5659_v39, 9  ;;  %v6703_v51 = vld [vmem:[#allocation3 + $0xc4] sm:$0xf] }
 0x34f   : > { %v5500_v54 = vsel %vm9562_vm14, %v5495_v31, %v5499_v3  ;;  %v5490_v60 = vsel %vm9562_vm14, %v5485_v53, %v5489_v7  ;;  %v7557_v48 = vor.u32 %v7556_v16, %v7552_v11  ;;  %v5817_v52 = vrot.slane %v5660_v57, 5  ;;  %v464_v57 = vld [vmem:[#allocation3 + $0xd4] sm:$0x1] }
 0x350   : > { %v5820_v18 = vrot.slane %v5661_v2, 5  ;;  %5577 = vrot.lane.b32.xlu1 %v8780_v15, %s9351_s11  ;;  %v8781_v40 = vcombine.low %v5490_v60, %v5500_v54  ;;  %v7548_v33 = vrot.slane %v7547_v8, 4  ;;  %v8924_v55 = vrot.slane %v7743_v5, 9  ;;  %v7202_v2 = vld [vmem:[#allocation3 + $0xd0] sm:$0xf] }
 0x351   : > { %v7897_v13 = vrot.slane %v7744_v49, 5  ;;  %v7558_v62 = vrot.slane %v7557_v48, 4  ;;  %v5819_v56 = vrot.slane %v5817_v52, 4  ;;  %v7900_v61 = vrot.slane %v7745_v42, 5  ;;  %v6609_v39 = vpop.permute.xlu0 %6608  ;;  %v6704_v54 = vld [vmem:[#allocation3 + $0xc8] sm:$0x1] }
 0x352   : > { %v6521_v32 = vshrl.u32 %v6157_v63, 16  ;;  %v7553_v30 = vsel %vm9562_vm14, %v7548_v33, %v7552_v11  ;;  %v5818_v7 = vsel %vm9526_vm13, %v8797_v29, %v5817_v52  ;;  %v6524_v3 = vshll.u32 %v6157_v63, 16  ;;  %6649 = vst.msk [vmem:[#allocation4 + $0x40] sm:$0xff] %vm6640_vm4, %v6609_v39 }
 0x353   : > { %v7899_v37 = vrot.slane %v7897_v13, 4  ;;  %v7563_v22 = vsel %vm9562_vm14, %v7558_v62, %v7562_v12  ;;  %v5821_v44 = vsel %vm9526_vm13, %v5819_v56, %v5820_v18  ;;  %v6530_v26 = vshll.u32 %v6158_v21, 16  ;;  %6970 = vst.msk [vmem:[#allocation4 + $0x40] sm:$0xff] %vm6961_vm0, %v11722_v35  ;;  %v6702_v12 = vld [vmem:[#allocation3 + $0xc0] sm:$0xe] }
 0x354   : > { %v6523_v25 = vrot.slane %v6521_v32, 4  ;;  %5579 = vrot.lane.b32.xlu1 %v8781_v40, %s9351_s11  ;;  %v8908_v47 = vcombine.low %v7553_v30, %v7563_v22  ;;  %v7898_v28 = vsel %vm9526_vm13, %v8924_v55, %v7897_v13  ;;  %v6526_v50 = vrot.slane %v6524_v3, 5  ;;  %7148 = vst.msk [vmem:[#allocation4 + $0x40] sm:$0xff] %vm12101_vm7, %v11582_v17  ;;  %v7747_v62 = vld [vmem:[#allocation3 + $0xd0] sm:$0xf]  ;;  %vm12108_vm7 = vmmov %vm12098_vm6 }
 0x355   : > { %v7901_v53 = vsel %vm9526_vm13, %v7899_v37, %v7900_v61  ;;  %v6532_v31 = vrot.slane %v6530_v26, 5  ;;  %v6534_v19 = vshrl.u32 %v6158_v21, 16  ;;  %v6540_v11 = vshll.u32 %v6159_v10, 16  ;;  %7693 = vst.msk [vmem:[#allocation4 + $0x40] sm:$0xff] %vm7684_vm10, %v11747_v14  ;;  %v7978_v61 = vpop.permute.xlu0 %7977  ;;  %v7746_v10 = vld [vmem:[#allocation3 + $0xcc] sm:$0xe] }
 0x356   : > { %7664 = vrot.lane.b32.xlu0 %v8908_v47, %s9361_s17  ;;  %v8813_v46 = vcombine.low %v5818_v7, %v5821_v44  ;;  %v6527_v34 = vor.u32 %v6526_v50, %v6523_v25  ;;  %v6860_v5 = vrot.slane %v6703_v51, 5  ;;  %v410_v49 = vsel %vm10612_vm12, 0, %v409_v9  ;;  %8014 = vst.msk [vmem:[#allocation4 + $0x40] sm:$0xff] %vm12102_vm11, %v11665_v36  ;;  %v5570_v17 = vpop.permute.xlu1 %5569  ;;  %vm12103_vm12 = vmmov %vm12098_vm6 }
 0x357   : > { %v6536_v16 = vrot.slane %v6534_v19, 4  ;;  %v465_v15 = vsel %vm10641_vm3, 0, %v464_v57  ;;  %v8940_v35 = vcombine.low %v7898_v28, %v7901_v53  ;;  %411 = vst [vmem:[#allocation3 + $0xcc] sm:$0x1] %v410_v49  ;;  %v7574_v8 = vshll.u32 %v7202_v2, 16  ;;  %5608 = vst.msk [vmem:[#allocation4 + $0x50] sm:$0xff] %vm5597_vm2, %v5570_v17 }
 0x358   : > { %5900 = vrot.lane.b32.xlu1 %v8813_v46, %s9356_s16  ;;  %466 = vst [vmem:[#allocation3 + $0xd4] sm:$0x1] %v465_v15  ;;  %v6528_v29 = vrot.slane %v6527_v34, 4  ;;  %v6542_v42 = vrot.slane %v6540_v11, 5  ;;  %v7578_v63 = vshrl.u32 %v7202_v2, 16  ;;  %v8861_v14 = vrot.slane %v6702_v12, 9  ;;  %vm12104_vm3 = vmmov %vm12100_vm1 }
 0x359   : > { %v6537_v24 = vor.u32 %v6536_v16, %v6532_v31  ;;  %v7576_v60 = vrot.slane %v7574_v8, 5  ;;  %5929 = vst.msk [vmem:[#allocation4 + $0x50] sm:$0xff] %vm5918_vm15, %v11678_v59  ;;  %v6862_v52 = vrot.slane %v6860_v5, 4  ;;  %v6863_v18 = vrot.slane %v6704_v54, 5  ;;  %vm12109_vm11 = vmmov %vm12098_vm6 }
 0x35a   : > { %7985 = vrot.lane.b32.xlu0 %v8940_v35, %s9360_s14  ;;  %v7580_v40 = vrot.slane %v7578_v63, 4  ;;  %6106 = vst.msk [vmem:[#allocation4 + $0x50] sm:$0xff] %vm6095_vm5, %v11758_v23  ;;  %v6533_v36 = vsel %vm9562_vm14, %v6528_v29, %v6532_v31  ;;  %v6861_v59 = vsel %vm9526_vm13, %v8861_v14, %v6860_v5  ;;  %v7904_v3 = vrot.slane %v7747_v62, 5  ;;  %v5895_v53 = vpop.permute.xlu0 %5894 }
 0x35b   : > { %v6538_v48 = vrot.slane %v6537_v24, 4  ;;  %v7651_v55 = vpop.permute.xlu1 %7650  ;;  %v6864_v23 = vsel %vm9526_vm13, %v6862_v52, %v6863_v18 }
 0x35c   : > { %6077 = vrot.lane.b32.xlu1 %v9272_v20, %s9352_s12  ;;  %v7581_v21 = vor.u32 %v7580_v40, %v7576_v60  ;;  %7692 = vst.msk [vmem:[#allocation4 + $0x38] sm:$0xff] %vm7684_vm10, %v7651_v55  ;;  %v8877_v22 = vcombine.low %v6861_v59, %v6864_v23  ;;  %v7906_v51 = vrot.slane %v7904_v3, 4  ;;  %s215_s12 = sand.u32 1, %s9339_s19  }
 0x35d   : > { %v6543_v33 = vsel %vm9562_vm14, %v6538_v48, %v6542_v42  ;;  %8013 = vst.msk [vmem:[#allocation4 + $0x38] sm:$0xff] %vm12103_vm12, %v11701_v38  ;;  %v8925_v38 = vrot.slane %v7746_v10, 9  ;;  %v8030_v2 = vld [vmem:[#allocation4 + $0x40] sm:$0xff]  ;;  %vm12110_vm12 = vmmov %vm12100_vm1  ;;  %s11980_s26 = scalar_lea.sflag [#allocation6], %s215_s12 }
 0x35e   : > { %v8845_v13 = vcombine.low %v6533_v36, %v6543_v33  ;;  %v7201_v56 = vld [vmem:[#allocation3 + $0xcc] sm:$0xf]  ;;  %v7582_v26 = vrot.slane %v7581_v21, 4 }
 0x35f   : > { %v7203_v32 = vld [vmem:[#allocation3 + $0xd4] sm:$0x1]  ;;  %v7565_v30 = vshrl.u32 %v7201_v56, 16  ;;  %v7568_v7 = vshll.u32 %v7201_v56, 16  ;;  %v9274_v28 = vld [vmem:[#allocation3 + $0xcc] sm:$0xff]  }
 0x360   : > { %6622 = vrot.lane.b32.xlu1 %v8845_v13, %s9355_s15  ;;  %v7584_v37 = vshll.u32 %v7203_v32, 16  ;;  %v7748_v9 = vld [vmem:[#allocation3 + $0xd4] sm:$0x1]  ;;  %v7976_v34 = vpop.permute.xlu0 %7975 }
 0x361   : > { %v7567_v44 = vrot.slane %v7565_v30, 4  ;;  %v7570_v25 = vrot.slane %v7568_v7, 5  ;;  %v5568_v47 = vpop.permute.xlu1 %5567  ;;  %v7907_v57 = vrot.slane %v7748_v9, 5 }
 0x362   : > { %v7586_v39 = vrot.slane %v7584_v37, 5  ;;  %5607 = vst.msk [vmem:[#allocation4 + $0x48] sm:$0xff] %vm5597_vm2, %v5568_v47 }
 0x363   : > { %v7571_v50 = vor.u32 %v7570_v25, %v7567_v44  ;;  %5928 = vst.msk [vmem:[#allocation4 + $0x48] sm:$0xff] %vm5918_vm15, %v11727_v45 }
 0x364   : > { %6943 = vrot.lane.b32.xlu1 %v8877_v22, %s9359_s13  ;;  %v7587_v19 = vsel %vm9562_vm14, %v7582_v26, %v7586_v39  ;;  %6105 = vst.msk [vmem:[#allocation4 + $0x48] sm:$0xff] %vm6095_vm5, %v11599_v58  ;;  %v8029_v11 = vld [vmem:[#allocation4 + $0x38] sm:$0xff]  ;;  %v7905_v58 = vsel %vm9526_vm13, %v8925_v38, %v7904_v3 }
 0x365   : > { %v7572_v31 = vrot.slane %v7571_v50, 4  ;;  %6650 = vst.msk [vmem:[#allocation4 + $0x48] sm:$0xff] %vm6640_vm4, %v11751_v1  ;;  %9104 = vmatmul.mubr.msk.bf16.gmra.mrb[12].mxu1 %vm8081_vm8, %v8029_v11  ;;  %v7908_v1 = vsel %vm9526_vm13, %v7906_v51, %v7907_v57  ;;  %v6936_v16 = vpop.permute.xlu1 %6935  ;;  %vm12105_vm13 = vmmov %vm12100_vm1 }
 0x366   : > { %6971 = vst.msk [vmem:[#allocation4 + $0x48] sm:$0xff] %vm6961_vm0, %v11719_v0  ;;  %9107 = vmatprep.mubr.msk.bf16.mxu1 %vm8081_vm8, %v8030_v2  ;;  %v8941_v41 = vcombine.low %v7905_v58, %v7908_v1  ;;  %v6934_v0 = vpop.permute.xlu0 %6933 }
 0x367   : > { %v7577_v46 = vsel %vm9562_vm14, %v7572_v31, %v7576_v60  ;;  %7149 = vst.msk [vmem:[#allocation4 + $0x48] sm:$0xff] %vm12104_vm3, %v11769_v27  ;;  %vm12106_vm14 = vmmov %vm12098_vm6 }
 0x368   : > { %7121 = vrot.lane.b32.xlu1 %v9274_v28, %s9358_s10  ;;  %v8909_v45 = vcombine.low %v7577_v46, %v7587_v19  ;;  %vm12111_vm3 = vmmov %vm12098_vm6  ;;  %v11897_v28 = vld [vmem:[%s12026_s4] ss:$0 sm:$0xff]  ;;  %s8503_s10 = sshll.u32 %s215_s12, 8 }
 0x369   : > { %v5893_v12 = vpop.permute.xlu1 %5892  ;;  %s11906_s13 = scalar_lea.vmem [#allocation5], %s8503_s10 }
 0x36c   : > { %7666 = vrot.lane.b32.xlu1 %v8909_v45, %s9361_s17  ;;  %s8437_s17 = sshll.u32 %s11906_s13, 4  ;;  %s11974_s17 = int_to_ptr.vmem [resolvable:$true] %s8437_s17 }
 0x36d   : > { %v7657_v5 = vpop.permute.xlu0 %7656  ;;  %s9285_s30 = scalar_lea.vmem %s11974_s17, 4096  ;;  %p9292_p0 = scmp.lt.s32.totalorder %s11974_s17, %s9290_s7 }
 0x36e   : > { %p9286_p11 = scmp.ne.s32.totalorder %s11974_s17, %s9285_s30  ;;  %p9293_p1 = scmp.lt.s32.totalorder %s9291_s8, %s9285_s30 }
 0x370   : > { %7987 = vrot.lane.b32.xlu1 %v8941_v41, %s9360_s14  ;;  %s9002_s14 = sshll.u32 %s9415_s22, 12  ;;  %p9287_p12 = pnand %p9286_p11, %p9432_p5 }
 0x371   : > { %v6615_v49 = vpop.permute.xlu1 %6614  ;;  %s11971_s22 = scalar_lea.hbm %s12027_s5, %s9002_s14  ;;  %p9294_p2 = por %p9293_p1, %p9292_p0 }
 0x372   : > { %p9288_p13 = pneg %p9287_p12 }
 0x374   : > { %p9295_p3 = pnand %p9294_p2, %p9288_p13 }
 0x375   : > { %v7114_v4 = vpop.permute.xlu1 %7113 }
 0x37c   : > { %v6613_v15 = vpop.permute.xlu0 %6612 }
 0x37d   : > { %6651 = vst.msk [vmem:[#allocation4 + $0x50] sm:$0xff] %vm6640_vm4, %v6613_v15 }
 0x37e   : > { %6972 = vst.msk [vmem:[#allocation4 + $0x50] sm:$0xff] %vm6961_vm0, %v6934_v0 }
 0x37f   : > { %7150 = vst.msk [vmem:[#allocation4 + $0x50] sm:$0xff] %vm12105_vm13, %v11731_v43  ;;  %vm12112_vm13 = vmmov %vm12100_vm1 }
 0x380   : > { %7695 = vst.msk [vmem:[#allocation4 + $0x50] sm:$0xff] %vm7684_vm10, %v7657_v5  ;;  %v7980_v27 = vpop.permute.xlu0 %7979 }
 0x381   : > { %8016 = vst.msk [vmem:[#allocation4 + $0x50] sm:$0xff] %vm12106_vm14, %v7978_v61  ;;  %vm12113_vm14 = vmmov %vm12111_vm3 }
 0x384   : > { %v6072_v54 = vpop.permute.xlu0 %6071 }
 0x388   : > { %v5574_v35 = vpop.permute.xlu1 %5573  ;;  %v8032_v42 = vld [vmem:[#allocation4 + $0x50] sm:$0xff] }
 0x389   : > { %5610 = vst.msk [vmem:[#allocation4 + $0x60] sm:$0xff] %vm5597_vm2, %v5574_v35 }
 0x38a   : > { %5931 = vst.msk [vmem:[#allocation4 + $0x60] sm:$0xff] %vm5918_vm15, %v5895_v53 }
 0x38b   : > { %6108 = vst.msk [vmem:[#allocation4 + $0x60] sm:$0xff] %vm6095_vm5, %v6072_v54 }
 0x38c   : > { %v7655_v8 = vpop.permute.xlu1 %7654 }
 0x38d   : > { %7694 = vst.msk [vmem:[#allocation4 + $0x48] sm:$0xff] %vm7684_vm10, %v7655_v8 }
 0x38e   : > { %8015 = vst.msk [vmem:[#allocation4 + $0x48] sm:$0xff] %vm12098_vm6, %v7976_v34 }
 0x392   : > { %v6617_v43 = vpop.permute.xlu0 %6616 }
 0x393   : > { %6653 = vst.msk [vmem:[#allocation4 + $0x60] sm:$0xff] %vm6640_vm4, %v6617_v43 }
 0x395   : > { %v8031_v17 = vld [vmem:[#allocation4 + $0x48] sm:$0xff] }
 0x396   : > { %v5572_v29 = vpop.permute.xlu1 %5571  ;;  %v6938_v24 = vpop.permute.xlu0 %6937  ;;  %9108 = vmatmul.mubr.msk.bf16.gmra.mrb[16].mxu1 %vm8081_vm8, %v8031_v17 }
 0x397   : > { %5609 = vst.msk [vmem:[#allocation4 + $0x58] sm:$0xff] %vm5597_vm2, %v5572_v29  ;;  %9111 = vmatprep.mubr.msk.bf16.mxu1 %vm8081_vm8, %v8032_v42 }
 0x398   : > { %6974 = vst.msk [vmem:[#allocation4 + $0x60] sm:$0xff] %vm6961_vm0, %v6938_v24 }
 0x399   : > { %5930 = vst.msk [vmem:[#allocation4 + $0x58] sm:$0xff] %vm5918_vm15, %v5893_v12 }
 0x39a   : > { %6107 = vst.msk [vmem:[#allocation4 + $0x58] sm:$0xff] %vm6095_vm5, %v11745_v6  ;;  %v6074_v63 = vpop.permute.xlu1 %6073  ;;  %v7116_v20 = vpop.permute.xlu0 %7115 }
 0x39b   : > { %6652 = vst.msk [vmem:[#allocation4 + $0x58] sm:$0xff] %vm6640_vm4, %v6615_v49 }
 0x39c   : > { %6973 = vst.msk [vmem:[#allocation4 + $0x58] sm:$0xff] %vm6961_vm0, %v6936_v16 }
 0x39d   : > { %7152 = vst.msk [vmem:[#allocation4 + $0x60] sm:$0xff] %vm12107_vm9, %v7116_v20 }
 0x39e   : > { %7151 = vst.msk [vmem:[#allocation4 + $0x58] sm:$0xff] %vm12100_vm1, %v7114_v4  ;;  %v5897_v14 = vpop.permute.xlu1 %5896  ;;  %v7661_v60 = vpop.permute.xlu0 %7660 }
 0x39f   : > { %7697 = vst.msk [vmem:[#allocation4 + $0x60] sm:$0xff] %vm7684_vm10, %v7661_v60 }
 0x3a2   : > { %v7659_v48 = vpop.permute.xlu1 %7658  ;;  %v7982_v52 = vpop.permute.xlu0 %7981 }
 0x3a3   : > { %7696 = vst.msk [vmem:[#allocation4 + $0x58] sm:$0xff] %vm7684_vm10, %v7659_v48 }
 0x3a4   : > { %8018 = vst.msk [vmem:[#allocation4 + $0x60] sm:$0xff] %vm12108_vm7, %v7982_v52 }
 0x3a5   : > { %8017 = vst.msk [vmem:[#allocation4 + $0x58] sm:$0xff] %vm12109_vm11, %v7980_v27 }
 0x3a8   : > { %v7984_v6 = vpop.permute.xlu0 %7983 }
 0x3a9   : > { %v5576_v18 = vpop.permute.xlu1 %5575 }
 0x3aa   : > { %5611 = vst.msk [vmem:[#allocation4 + $0x68] sm:$0xff] %vm5597_vm2, %v5576_v18 }
 0x3ab   : > { %5932 = vst.msk [vmem:[#allocation4 + $0x68] sm:$0xff] %vm5918_vm15, %v5897_v14  ;;  %v8034_v40 = vld [vmem:[#allocation4 + $0x60] sm:$0xff] }
 0x3ac   : > { %6109 = vst.msk [vmem:[#allocation4 + $0x68] sm:$0xff] %vm6095_vm5, %v6074_v63  ;;  %v8033_v36 = vld [vmem:[#allocation4 + $0x58] sm:$0xff] }
 0x3ad   : > { %9112 = vmatmul.mubr.msk.bf16.gmra.mrb[20].mxu1 %vm8081_vm8, %v8033_v36 }
 0x3ae   : > { %v5899_v33 = vpop.permute.xlu0 %5898  ;;  %9115 = vmatprep.mubr.msk.bf16.mxu1 %vm8081_vm8, %v8034_v40  ;;  %v6619_v55 = vpop.permute.xlu1 %6618 }
 0x3af   : > { %6654 = vst.msk [vmem:[#allocation4 + $0x68] sm:$0xff] %vm6640_vm4, %v6619_v55 }
 0x3b2   : > { %v6076_v13 = vpop.permute.xlu0 %6075  ;;  %v6940_v21 = vpop.permute.xlu1 %6939 }
 0x3b3   : > { %6975 = vst.msk [vmem:[#allocation4 + $0x68] sm:$0xff] %vm6961_vm0, %v6940_v21 }
 0x3b6   : > { %v7118_v62 = vpop.permute.xlu1 %7117 }
 0x3b7   : > { %7153 = vst.msk [vmem:[#allocation4 + $0x68] sm:$0xff] %vm12110_vm12, %v7118_v62 }
 0x3b8   : > { %v6621_v59 = vpop.permute.xlu0 %6620 }
 0x3ba   : > { %v7663_v23 = vpop.permute.xlu1 %7662 }
 0x3bb   : > { %7698 = vst.msk [vmem:[#allocation4 + $0x68] sm:$0xff] %vm7684_vm10, %v7663_v23 }
 0x3bc   : > { %8019 = vst.msk [vmem:[#allocation4 + $0x68] sm:$0xff] %vm12111_vm3, %v7984_v6  ;;  %v6942_v56 = vpop.permute.xlu0 %6941 }
 0x3c0   : > { %v7120_v32 = vpop.permute.xlu0 %7119 }
 0x3c2   : > { %v5578_v61 = vpop.permute.xlu1 %5577 }
 0x3c3   : > { %5612 = vst.msk [vmem:[#allocation4 + $0x70] sm:$0xff] %vm5597_vm2, %v5578_v61  ;;  %v8035_v30 = vld [vmem:[#allocation4 + $0x68] sm:$0xff] }
 0x3c4   : > { %5933 = vst.msk [vmem:[#allocation4 + $0x70] sm:$0xff] %vm5918_vm15, %v5899_v33  ;;  %9116 = vmatmul.mubr.msk.bf16.gmra.mrb[24].mxu1 %vm8081_vm8, %v8035_v30 }
 0x3c5   : > { %6110 = vst.msk [vmem:[#allocation4 + $0x70] sm:$0xff] %vm6095_vm5, %v6076_v13 }
 0x3c6   : > { %6655 = vst.msk [vmem:[#allocation4 + $0x70] sm:$0xff] %vm6640_vm4, %v6621_v59  ;;  %v5580_v7 = vpop.permute.xlu1 %5579 }
 0x3c7   : > { %6976 = vst.msk [vmem:[#allocation4 + $0x70] sm:$0xff] %vm6961_vm0, %v6942_v56 }
 0x3c8   : > { %5613 = vst.msk [vmem:[#allocation4 + $0x78] sm:$0xff] %vm5597_vm2, %v5580_v7  ;;  %v7665_v37 = vpop.permute.xlu0 %7664  ;;  %vm12114_vm2 = vmmov %vm12100_vm1 }
 0x3c9   : > { %7154 = vst.msk [vmem:[#allocation4 + $0x70] sm:$0xff] %vm12112_vm13, %v7120_v32 }
 0x3ca   : > { %7699 = vst.msk [vmem:[#allocation4 + $0x70] sm:$0xff] %vm7684_vm10, %v7665_v37  ;;  %v5901_v10 = vpop.permute.xlu1 %5900 }
 0x3cb   : > { %5934 = vst.msk [vmem:[#allocation4 + $0x78] sm:$0xff] %vm5918_vm15, %v5901_v10  ;;  %vm12115_vm15 = vmmov %vm12111_vm3 }
 0x3cc   : > { %v7986_v3 = vpop.permute.xlu0 %7985 }
 0x3cd   : > { %8020 = vst.msk [vmem:[#allocation4 + $0x70] sm:$0xff] %vm12113_vm14, %v7986_v3 }
 0x3ce   : > { %v6078_v22 = vpop.permute.xlu1 %6077 }
 0x3cf   : > { %6111 = vst.msk [vmem:[#allocation4 + $0x78] sm:$0xff] %vm6095_vm5, %v6078_v22 }
 0x3d2   : > { %v6623_v44 = vpop.permute.xlu1 %6622 }
 0x3d3   : > { %6656 = vst.msk [vmem:[#allocation4 + $0x78] sm:$0xff] %vm6640_vm4, %v6623_v44 }
 0x3d4   : > { %v8036_v25 = vld [vmem:[#allocation4 + $0x70] sm:$0xff] }
 0x3d5   : > { %9119 = vmatprep.mubr.msk.bf16.mxu1 %vm8081_vm8, %v8036_v25 }
 0x3d6   : > { %v6944_v26 = vpop.permute.xlu1 %6943 }
 0x3d7   : > { %6977 = vst.msk [vmem:[#allocation4 + $0x78] sm:$0xff] %vm6961_vm0, %v6944_v26 }
 0x3da   : > { %v7122_v9 = vpop.permute.xlu1 %7121 }
 0x3db   : > { %7155 = vst.msk [vmem:[#allocation4 + $0x78] sm:$0xff] %vm12114_vm2, %v7122_v9 }
 0x3de   : > { %v7667_v39 = vpop.permute.xlu1 %7666 }
 0x3df   : > { %7700 = vst.msk [vmem:[#allocation4 + $0x78] sm:$0xff] %vm7684_vm10, %v7667_v39 }
 0x3e2   : > { %v7988_v47 = vpop.permute.xlu1 %7987 }
 0x3e3   : > { %8021 = vst.msk [vmem:[#allocation4 + $0x78] sm:$0xff] %vm12115_vm15, %v7988_v47 }
 0x3e4   : > { %v9093_v50 = vpop.f32.mrb[0].mxu1 }
 0x3e5   : > { %v8177_v38 = vadd.f32 %v9093_v50, %v11897_v28  ;;  %v8168_v51 = vpop.f32.mrb[1].mxu1 }
 0x3e6   : > { %v8169_v57 = vadd.f32 %v11897_v28, %v8168_v51  ;;  %v9094_v53 = vpop.f32.mrb[2].mxu1 }
 0x3e7   : > { %vm8297_vm5 = vcmp.gt.f32.partialorder %v8177_v38, 0.0  ;;  %v8329_v31 = vmul.f32 0.01, %v8177_v38  ;;  %v8180_v19 = vadd.f32 %v9094_v53, %v11897_v28  ;;  %v8171_v11 = vpop.f32.mrb[3].mxu1 }
 0x3e8   : > { %vm8295_vm4 = vcmp.gt.f32.partialorder %v8169_v57, 0.0  ;;  %v8327_v2 = vmul.f32 0.01, %v8169_v57  ;;  %v8172_v46 = vadd.f32 %v11897_v28, %v8171_v11 }
 0x3e9   : > { %v8361_v45 = vsel %vm8297_vm5, %v8177_v38, %v8329_v31  ;;  %vm8298_vm0 = vcmp.gt.f32.partialorder %v8180_v19, 0.0  ;;  %v8330_v58 = vmul.f32 0.01, %v8180_v19 }
 0x3ea   : > { %v8037_v1 = vld [vmem:[#allocation4 + $0x78] sm:$0xff]  ;;  %8393 = vst [vmem:[%s11906_s13 + $0x10] sm:$0xff] %v8361_v45  ;;  %v8359_v34 = vsel %vm8295_vm4, %v8169_v57, %v8327_v2  ;;  %vm8296_vm10 = vcmp.gt.f32.partialorder %v8172_v46, 0.0  ;;  %v8328_v41 = vmul.f32 0.01, %v8172_v46 }
 0x3eb   : > { %9120 = vmatmul.mubr.msk.bf16.gmra.mrb[28].mxu1 %vm8081_vm8, %v8037_v1  ;;  %8391 = vst [vmem:[%s11906_s13] sm:$0xff] %v8359_v34  ;;  %v8362_v16 = vsel %vm8298_vm0, %v8180_v19, %v8330_v58 }
 0x3ec   : > { %8394 = vst [vmem:[%s11906_s13 + $0x18] sm:$0xff] %v8362_v16  ;;  %v8360_v0 = vsel %vm8296_vm10, %v8172_v46, %v8328_v41  ;;  %v9097_v12 = vpop.f32.mrb[4].mxu1 }
 0x3ed   : > { %8392 = vst [vmem:[%s11906_s13 + $0x8] sm:$0xff] %v8360_v0  ;;  %v8193_v5 = vadd.f32 %v9097_v12, %v11897_v28  ;;  %v8184_v49 = vpop.f32.mrb[5].mxu1 }
 0x3ee   : > { %v8185_v15 = vadd.f32 %v11897_v28, %v8184_v49  ;;  %v9098_v4 = vpop.f32.mrb[6].mxu1 }
 0x3ef   : > { %vm8301_vm6 = vcmp.gt.f32.partialorder %v8193_v5, 0.0  ;;  %v8333_v27 = vmul.f32 0.01, %v8193_v5  ;;  %v8196_v35 = vadd.f32 %v9098_v4, %v11897_v28  ;;  %v8187_v54 = vpop.f32.mrb[7].mxu1 }
 0x3f0   : > { %vm8299_vm8 = vcmp.gt.f32.partialorder %v8185_v15, 0.0  ;;  %v8331_v8 = vmul.f32 0.01, %v8185_v15  ;;  %v8188_v43 = vadd.f32 %v11897_v28, %v8187_v54 }
 0x3f1   : > { %v8365_v17 = vsel %vm8301_vm6, %v8193_v5, %v8333_v27  ;;  %vm8302_vm9 = vcmp.gt.f32.partialorder %v8196_v35, 0.0  ;;  %v8334_v29 = vmul.f32 0.01, %v8196_v35 }
 0x3f2   : > { %8397 = vst [vmem:[%s11906_s13 + $0x30] sm:$0xff] %v8365_v17  ;;  %v8363_v24 = vsel %vm8299_vm8, %v8185_v15, %v8331_v8  ;;  %vm8300_vm1 = vcmp.gt.f32.partialorder %v8188_v43, 0.0  ;;  %v8332_v42 = vmul.f32 0.01, %v8188_v43 }
 0x3f3   : > { %8395 = vst [vmem:[%s11906_s13 + $0x20] sm:$0xff] %v8363_v24  ;;  %v8366_v63 = vsel %vm8302_vm9, %v8196_v35, %v8334_v29 }
 0x3f4   : > { %8398 = vst [vmem:[%s11906_s13 + $0x38] sm:$0xff] %v8366_v63  ;;  %v8364_v20 = vsel %vm8300_vm1, %v8188_v43, %v8332_v42 }
 0x3f5   : > { %8396 = vst [vmem:[%s11906_s13 + $0x28] sm:$0xff] %v8364_v20 }
 0x404   : > { %v9101_v14 = vpop.f32.mrb[8].mxu1 }
 0x405   : > { %v8209_v60 = vadd.f32 %v9101_v14, %v11897_v28  ;;  %v8200_v48 = vpop.f32.mrb[9].mxu1 }
 0x406   : > { %v8201_v52 = vadd.f32 %v11897_v28, %v8200_v48  ;;  %v9102_v6 = vpop.f32.mrb[10].mxu1 }
 0x407   : > { %vm8305_vm7 = vcmp.gt.f32.partialorder %v8209_v60, 0.0  ;;  %v8337_v18 = vmul.f32 0.01, %v8209_v60  ;;  %v8212_v40 = vadd.f32 %v9102_v6, %v11897_v28  ;;  %v8203_v36 = vpop.f32.mrb[11].mxu1 }
 0x408   : > { %vm8303_vm11 = vcmp.gt.f32.partialorder %v8201_v52, 0.0  ;;  %v8335_v33 = vmul.f32 0.01, %v8201_v52  ;;  %v8204_v55 = vadd.f32 %v11897_v28, %v8203_v36 }
 0x409   : > { %v8369_v13 = vsel %vm8305_vm7, %v8209_v60, %v8337_v18  ;;  %vm8306_vm12 = vcmp.gt.f32.partialorder %v8212_v40, 0.0  ;;  %v8338_v21 = vmul.f32 0.01, %v8212_v40 }
 0x40a   : > { %8401 = vst [vmem:[%s11906_s13 + $0x50] sm:$0xff] %v8369_v13  ;;  %v8367_v62 = vsel %vm8303_vm11, %v8201_v52, %v8335_v33  ;;  %vm8304_vm3 = vcmp.gt.f32.partialorder %v8204_v55, 0.0  ;;  %v8336_v59 = vmul.f32 0.01, %v8204_v55 }
 0x40b   : > { %8399 = vst [vmem:[%s11906_s13 + $0x40] sm:$0xff] %v8367_v62  ;;  %v8370_v23 = vsel %vm8306_vm12, %v8212_v40, %v8338_v21 }
 0x40c   : > { %8402 = vst [vmem:[%s11906_s13 + $0x58] sm:$0xff] %v8370_v23  ;;  %v8368_v56 = vsel %vm8304_vm3, %v8204_v55, %v8336_v59 }
 0x40d   : > { %8400 = vst [vmem:[%s11906_s13 + $0x48] sm:$0xff] %v8368_v56 }
 0x438   : > { %v9105_v61 = vpop.f32.mrb[12].mxu1 }
 0x439   : > { %v8225_v32 = vadd.f32 %v9105_v61, %v11897_v28  ;;  %v8216_v30 = vpop.f32.mrb[13].mxu1 }
 0x43a   : > { %v8217_v7 = vadd.f32 %v11897_v28, %v8216_v30  ;;  %v9106_v37 = vpop.f32.mrb[14].mxu1 }
 0x43b   : > { %vm8309_vm13 = vcmp.gt.f32.partialorder %v8225_v32, 0.0  ;;  %v8341_v10 = vmul.f32 0.01, %v8225_v32  ;;  %v8228_v3 = vadd.f32 %v9106_v37, %v11897_v28  ;;  %v8219_v22 = vpop.f32.mrb[15].mxu1 }
 0x43c   : > { %vm8307_vm14 = vcmp.gt.f32.partialorder %v8217_v7, 0.0  ;;  %v8339_v44 = vmul.f32 0.01, %v8217_v7  ;;  %v8220_v25 = vadd.f32 %v11897_v28, %v8219_v22 }
 0x43d   : > { %v8373_v26 = vsel %vm8309_vm13, %v8225_v32, %v8341_v10  ;;  %vm8310_vm2 = vcmp.gt.f32.partialorder %v8228_v3, 0.0  ;;  %v8342_v9 = vmul.f32 0.01, %v8228_v3 }
 0x43e   : > { %8405 = vst [vmem:[%s11906_s13 + $0x70] sm:$0xff] %v8373_v26  ;;  %v8371_v39 = vsel %vm8307_vm14, %v8217_v7, %v8339_v44  ;;  %vm8308_vm15 = vcmp.gt.f32.partialorder %v8220_v25, 0.0  ;;  %v8340_v47 = vmul.f32 0.01, %v8220_v25 }
 0x43f   : > { %8403 = vst [vmem:[%s11906_s13 + $0x60] sm:$0xff] %v8371_v39  ;;  %v8374_v50 = vsel %vm8310_vm2, %v8228_v3, %v8342_v9 }
 0x440   : > { %8406 = vst [vmem:[%s11906_s13 + $0x78] sm:$0xff] %v8374_v50  ;;  %v8372_v38 = vsel %vm8308_vm15, %v8220_v25, %v8340_v47 }
 0x441   : > { %8404 = vst [vmem:[%s11906_s13 + $0x68] sm:$0xff] %v8372_v38 }
 0x469   : > { %v9109_v51 = vpop.f32.mrb[16].mxu1 }
 0x46a   : > { %v8241_v57 = vadd.f32 %v9109_v51, %v11897_v28  ;;  %v8232_v53 = vpop.f32.mrb[17].mxu1 }
 0x46b   : > { %v8233_v31 = vadd.f32 %v11897_v28, %v8232_v53  ;;  %v9110_v19 = vpop.f32.mrb[18].mxu1 }
 0x46c   : > { %vm8313_vm5 = vcmp.gt.f32.partialorder %v8241_v57, 0.0  ;;  %v8345_v11 = vmul.f32 0.01, %v8241_v57  ;;  %v8244_v2 = vadd.f32 %v9110_v19, %v11897_v28  ;;  %v8235_v46 = vpop.f32.mrb[19].mxu1 }
 0x46d   : > { %vm8311_vm4 = vcmp.gt.f32.partialorder %v8233_v31, 0.0  ;;  %v8343_v45 = vmul.f32 0.01, %v8233_v31  ;;  %v8236_v58 = vadd.f32 %v11897_v28, %v8235_v46 }
 0x46e   : > { %v8377_v1 = vsel %vm8313_vm5, %v8241_v57, %v8345_v11  ;;  %vm8314_vm0 = vcmp.gt.f32.partialorder %v8244_v2, 0.0  ;;  %v8346_v34 = vmul.f32 0.01, %v8244_v2 }
 0x46f   : > { %8409 = vst [vmem:[%s11906_s13 + $0x90] sm:$0xff] %v8377_v1  ;;  %v8375_v41 = vsel %vm8311_vm4, %v8233_v31, %v8343_v45  ;;  %vm8312_vm10 = vcmp.gt.f32.partialorder %v8236_v58, 0.0  ;;  %v8344_v16 = vmul.f32 0.01, %v8236_v58 }
 0x470   : > { %8407 = vst [vmem:[%s11906_s13 + $0x80] sm:$0xff] %v8375_v41  ;;  %v8378_v0 = vsel %vm8314_vm0, %v8244_v2, %v8346_v34 }
 0x471   : > { %8410 = vst [vmem:[%s11906_s13 + $0x98] sm:$0xff] %v8378_v0  ;;  %v8376_v12 = vsel %vm8312_vm10, %v8236_v58, %v8344_v16 }
 0x472   : > { %8408 = vst [vmem:[%s11906_s13 + $0x88] sm:$0xff] %v8376_v12 }
 0x480   : > { %v9113_v5 = vpop.f32.mrb[20].mxu1 }
 0x481   : > { %v8257_v49 = vadd.f32 %v9113_v5, %v11897_v28  ;;  %v8248_v15 = vpop.f32.mrb[21].mxu1 }
 0x482   : > { %v8249_v4 = vadd.f32 %v11897_v28, %v8248_v15  ;;  %v9114_v27 = vpop.f32.mrb[22].mxu1 }
 0x483   : > { %vm8317_vm6 = vcmp.gt.f32.partialorder %v8257_v49, 0.0  ;;  %v8349_v35 = vmul.f32 0.01, %v8257_v49  ;;  %v8260_v54 = vadd.f32 %v9114_v27, %v11897_v28  ;;  %v8251_v8 = vpop.f32.mrb[23].mxu1 }
 0x484   : > { %vm8315_vm8 = vcmp.gt.f32.partialorder %v8249_v4, 0.0  ;;  %v8347_v43 = vmul.f32 0.01, %v8249_v4  ;;  %v8252_v17 = vadd.f32 %v11897_v28, %v8251_v8 }
 0x485   : > { %v8381_v29 = vsel %vm8317_vm6, %v8257_v49, %v8349_v35  ;;  %vm8318_vm9 = vcmp.gt.f32.partialorder %v8260_v54, 0.0  ;;  %v8350_v24 = vmul.f32 0.01, %v8260_v54 }
 0x486   : > { %8413 = vst [vmem:[%s11906_s13 + $0xb0] sm:$0xff] %v8381_v29  ;;  %v8379_v42 = vsel %vm8315_vm8, %v8249_v4, %v8347_v43  ;;  %vm8316_vm1 = vcmp.gt.f32.partialorder %v8252_v17, 0.0  ;;  %v8348_v63 = vmul.f32 0.01, %v8252_v17 }
 0x487   : > { %8411 = vst [vmem:[%s11906_s13 + $0xa0] sm:$0xff] %v8379_v42  ;;  %v8382_v20 = vsel %vm8318_vm9, %v8260_v54, %v8350_v24 }
 0x488   : > { %8414 = vst [vmem:[%s11906_s13 + $0xb8] sm:$0xff] %v8382_v20  ;;  %v8380_v14 = vsel %vm8316_vm1, %v8252_v17, %v8348_v63 }
 0x489   : > { %8412 = vst [vmem:[%s11906_s13 + $0xa8] sm:$0xff] %v8380_v14 }
 0x497   : > { %v9117_v60 = vpop.f32.mrb[24].mxu1 }
 0x498   : > { %v8273_v48 = vadd.f32 %v9117_v60, %v11897_v28  ;;  %v8264_v52 = vpop.f32.mrb[25].mxu1 }
 0x499   : > { %v8265_v6 = vadd.f32 %v11897_v28, %v8264_v52  ;;  %v9118_v18 = vpop.f32.mrb[26].mxu1 }
 0x49a   : > { %vm8321_vm7 = vcmp.gt.f32.partialorder %v8273_v48, 0.0  ;;  %v8353_v40 = vmul.f32 0.01, %v8273_v48  ;;  %v8276_v36 = vadd.f32 %v9118_v18, %v11897_v28  ;;  %v8267_v33 = vpop.f32.mrb[27].mxu1 }
 0x49b   : > { %vm8319_vm11 = vcmp.gt.f32.partialorder %v8265_v6, 0.0  ;;  %v8351_v55 = vmul.f32 0.01, %v8265_v6  ;;  %v8268_v13 = vadd.f32 %v11897_v28, %v8267_v33 }
 0x49c   : > { %v8385_v21 = vsel %vm8321_vm7, %v8273_v48, %v8353_v40  ;;  %vm8322_vm12 = vcmp.gt.f32.partialorder %v8276_v36, 0.0  ;;  %v8354_v62 = vmul.f32 0.01, %v8276_v36 }
 0x49d   : > { %8417 = vst [vmem:[%s11906_s13 + $0xd0] sm:$0xff] %v8385_v21  ;;  %v8383_v59 = vsel %vm8319_vm11, %v8265_v6, %v8351_v55  ;;  %vm8320_vm3 = vcmp.gt.f32.partialorder %v8268_v13, 0.0  ;;  %v8352_v23 = vmul.f32 0.01, %v8268_v13 }
 0x49e   : > { %8415 = vst [vmem:[%s11906_s13 + $0xc0] sm:$0xff] %v8383_v59  ;;  %v8386_v56 = vsel %vm8322_vm12, %v8276_v36, %v8354_v62 }
 0x49f   : > { %8418 = vst [vmem:[%s11906_s13 + $0xd8] sm:$0xff] %v8386_v56  ;;  %v8384_v61 = vsel %vm8320_vm3, %v8268_v13, %v8352_v23 }
 0x4a0   : > { %8416 = vst [vmem:[%s11906_s13 + $0xc8] sm:$0xff] %v8384_v61 }
 0x4be   : > { %v9121_v32 = vpop.f32.mrb[28].mxu1 }
 0x4bf   : > { %v8289_v30 = vadd.f32 %v9121_v32, %v11897_v28  ;;  %v8280_v7 = vpop.f32.mrb[29].mxu1 }
 0x4c0   : > { %v8281_v37 = vadd.f32 %v11897_v28, %v8280_v7  ;;  %v9122_v10 = vpop.f32.mrb[30].mxu1 }
 0x4c1   : > { %vm8325_vm13 = vcmp.gt.f32.partialorder %v8289_v30, 0.0  ;;  %v8357_v3 = vmul.f32 0.01, %v8289_v30  ;;  %v8292_v22 = vadd.f32 %v9122_v10, %v11897_v28  ;;  %v8283_v44 = vpop.f32.mrb[31].mxu1 }
 0x4c2   : > { %vm8323_vm14 = vcmp.gt.f32.partialorder %v8281_v37, 0.0  ;;  %v8355_v25 = vmul.f32 0.01, %v8281_v37  ;;  %v8284_v26 = vadd.f32 %v11897_v28, %v8283_v44 }
 0x4c3   : > { %v8389_v9 = vsel %vm8325_vm13, %v8289_v30, %v8357_v3  ;;  %vm8326_vm2 = vcmp.gt.f32.partialorder %v8292_v22, 0.0  ;;  %v8358_v39 = vmul.f32 0.01, %v8292_v22 }
 0x4c4   : > { %8421 = vst [vmem:[%s11906_s13 + $0xf0] sm:$0xff] %v8389_v9  ;;  %v8387_v47 = vsel %vm8323_vm14, %v8281_v37, %v8355_v25  ;;  %vm8324_vm15 = vcmp.gt.f32.partialorder %v8284_v26, 0.0  ;;  %v8356_v50 = vmul.f32 0.01, %v8284_v26 }
 0x4c5   : > { %8419 = vst [vmem:[%s11906_s13 + $0xe0] sm:$0xff] %v8387_v47  ;;  %v8390_v38 = vsel %vm8326_vm2, %v8292_v22, %v8358_v39 }
 0x4c6   : > { %8422 = vst [vmem:[%s11906_s13 + $0xf8] sm:$0xff] %v8390_v38  ;;  %v8388_v28 = vsel %vm8324_vm15, %v8284_v26, %v8356_v50 }
 0x4c7   : > { %8420 = vst [vmem:[%s11906_s13 + $0xe8] sm:$0xff] %v8388_v28 }
 0x4c8   : > { %9298 = shalt.err (!%p9295_p3)
}
 0x4c9   : > { %s9299_s9 = scalar_lea.hbm %s11971_s22, 4096  ;;  %s9303_s16 = scalar_lea.hbm %s12027_s5, 8192 }
 0x4ca   : > { %p9300_p4 = scmp.ne.s32.totalorder %s11971_s22, %s9299_s9  ;;  %p9304_p9 = scmp.lt.u32.totalorder %s11971_s22, %s12027_s5 }
 0x4cb   : > { %p9305_p10 = scmp.lt.u32.totalorder %s9303_s16, %s9299_s9  ;;  %p9307_p12 = scmp.lt.u32.totalorder %s9299_s9, %s11971_s22 }
 0x4cc   : > { %p9301_p7 = pnand %p9300_p4, %p9432_p5 }
 0x4cd   : > { %p9306_p11 = por %p9305_p10, %p9304_p9 }
 0x4ce   : > { %p9302_p8 = pneg %p9301_p7 }
 0x4cf   : > { %p9308_p13 = por %p9307_p12, %p9306_p11 }
 0x4d1   : > { %p9309_p0 = pnand %p9308_p13, %p9302_p8 }
 0x4d3   : > { %9312 = shalt.err (!%p9309_p0)
}
 0x4d4   : > { %s9363_s14 = smov 128  }
 0x4d5   : > { %9125 = dma.vmem_to_hbm [thread:$0]  (%p9432_p5), %s11974_s17, 4096, %s11971_s22, %s11980_s26, %s9363_s14, %s9363_s14, %s9351_s11  }
 0x4d6 PF: > { %p9131_p1 = scmp.ge.s32.totalorder %s9347_s21, 2  ;;  %s8452_s23 = sand.u32 1, %s9335_s18  }
 0x4d7   : > { %s8453_s25 = scalar_lea.sflag [#allocation6], %s8452_s23 }
 0x4d8   : > { %p9128_p2 = pnand %p9131_p1, %p9436_p6 }
 0x4da   : > { %9330 = dma.done.wait (!%p9128_p2), %s8453_s25, 4096  }
 0x4db   : > { %9332 = vsyncadd (!%p9128_p2), %s8453_s25, 4294963200  ;;  %p15_p3 = scmp.ge.s32.totalorder %s9419_s24, 4   ;;  %s12116_s18 = smov %s9339_s19 }
 0x4dc   : > { %s12117_s19 = smov %s9343_s20  ;;  %s12118_s20 = smov %s9430_s27 }
 0x4dd   : > { %s12119_s21 = smov %s9419_s24  ;;  %17 = sbr.rel (!%p15_p3) target bundleno = 3 (0x3), region = 81 }
 0x4e4   :  { %8458 = vsyncpa [#allocation6], 1 }
 0x4e5   :  { %8460 = vsyncpa [#allocation6 + $0x1], 1 }

</bundles_post_ra>
